<compile_context>
chip_gen: v7x
topology: tpu7x:2x2x1
jax: 0.10.0
libtpu: 0.0.40
codegen_flags: <defaults>
</compile_context>

<pallas_src>
import jax
import jax.numpy as jnp
from jax.experimental import pallas as pl
from jax.experimental.pallas import tpu as pltpu


def _round_up(x: int, m: int) -> int:
    return (x + m - 1) // m * m


def _choose_tile_h(H: int, W: int, C: int, Cpad: int) -> int:
    """Largest divisor of H whose double-buffered tiles fit a conservative VMEM budget
    (sized for v7x's 64 MiB physical / 32 MiB scoped VMEM; also fine on v5e/v6e)."""
    budget = 12 * 1024 * 1024
    best = 1
    for th in range(1, H + 1):
        if H % th:
            continue
        in_bytes = (th + 2) * (W + 2) * C * 2        # bf16 halo'ed input tile
        y_bytes = th * W * Cpad * 4                  # f32 conv-output tile
        if 2 * in_bytes + 4 * y_bytes <= budget:     # 2x input bufs + in/out y bufs
            best = th
    return best


# ---------------------------------------------------------------------------
# Pass 1: 3x3 conv (9 shifted bf16 matmuls, f32 accum) + per-tile BN partial stats
# ---------------------------------------------------------------------------
def _conv_stats_kernel(x_ref, w_ref, y_ref, stat_ref):
    # x_ref   : (TH+2, W+2, Cin)   bf16   halo'ed input tile
    # w_ref   : (3, 3, Cin, Cpad)  bf16   conv weight (HWIO, lane-padded Cout)
    # y_ref   : (TH*W, Cpad)       f32    conv output tile (pre-BN)
    # stat_ref: (2, Cpad)          f32    row 0 = sum, row 1 = sum of squares
    th = x_ref.shape[0] - 2
    w_out = x_ref.shape[1] - 2
    cin = x_ref.shape[2]
    rows = y_ref.shape[0]          # == th * w_out

    y_ref[...] = jnp.zeros_like(y_ref)
    for kh in range(3):            # static unroll: 9 MXU matmuls
        for kw in range(3):
            patch = x_ref[kh:kh + th, kw:kw + w_out, :].reshape(rows, cin)
            y_ref[...] += jnp.dot(patch, w_ref[kh, kw],
                                  preferred_element_type=jnp.float32)

    y = y_ref[...]
    stat_ref[0:1, :] = jnp.sum(y, axis=0, keepdims=True)
    stat_ref[1:2, :] = jnp.sum(y * y, axis=0, keepdims=True)


# ---------------------------------------------------------------------------
# Pass 2: apply global batch-norm affine + ReLU
# ---------------------------------------------------------------------------
def _bn_relu_kernel(y_ref, scale_ref, shift_ref, o_ref):
    # y_ref: (TH*W, Cpad) f32; scale/shift: (1, Cpad) f32
    o_ref[...] = jnp.maximum(y_ref[...] * scale_ref[...] + shift_ref[...], 0.0)


def conv_block_nhwc(x, weight_oihw, gamma, beta, *, eps=1e-5):
    """One ConvBlock on an NHWC activation.

    x may carry lane-padded (zero) channels; the conv weight's input-channel dim is
    zero-padded up to match.  Returns an NHWC activation with Cout padded to 128.
    """
    N, H, W, C = x.shape
    Cout, Cin_w, KH, KW = weight_oihw.shape
    assert KH == 3 and KW == 3, "kernel specialized for 3x3 'same' convolution"
    assert Cin_w <= C
    Cpad = _round_up(Cout, 128)

    # Weight: OIHW -> zero-pad Cin up to C and Cout up to Cpad -> HWIO, bf16.
    w = weight_oihw.astype(jnp.float32)
    w = jnp.pad(w, ((0, Cpad - Cout), (0, C - Cin_w), (0, 0), (0, 0)))
    w_hwio = jnp.transpose(w, (2, 3, 1, 0)).astype(jnp.bfloat16)      # (3,3,C,Cpad)

    g = jnp.pad(gamma.astype(jnp.float32), (0, Cpad - Cout))
    b = jnp.pad(beta.astype(jnp.float32), (0, Cpad - Cout))

    TH = _choose_tile_h(H, W, C, Cpad)
    nH = H // TH

    # 'same' zero padding + bf16 cast, then cut into row tiles with a 1-row halo so
    # each grid step gets a non-overlapping (auto-pipelined) block.
    xp = jnp.pad(x.astype(jnp.bfloat16), ((0, 0), (1, 1), (1, 1), (0, 0)))
    x_tiles = jnp.stack([xp[:, i * TH:i * TH + TH + 2] for i in range(nH)], axis=1)
    # x_tiles: (N, nH, TH+2, W+2, C)

    grid = (N, nH)
    cparams = pltpu.CompilerParams(
        dimension_semantics=("parallel", "parallel"),
        vmem_limit_bytes=32 * 1024 * 1024,
    )

    y, stats = pl.pallas_call(
        _conv_stats_kernel,
        out_shape=(
            jax.ShapeDtypeStruct((N, nH, TH * W, Cpad), jnp.float32),   # pre-BN conv out
            jax.ShapeDtypeStruct((N, nH, 2, Cpad), jnp.float32),        # per-tile partials
        ),
        grid=grid,
        in_specs=[
            pl.BlockSpec((None, None, TH + 2, W + 2, C), lambda n, i: (n, i, 0, 0, 0)),
            pl.BlockSpec((3, 3, C, Cpad), lambda n, i: (0, 0, 0, 0)),   # resident weight
        ],
        out_specs=(
            pl.BlockSpec((None, None, TH * W, Cpad), lambda n, i: (n, i, 0, 0)),
            pl.BlockSpec((None, None, 2, Cpad), lambda n, i: (n, i, 0, 0)),
        ),
        compiler_params=cparams,
        cost_estimate=pl.CostEstimate(
            flops=2 * N * H * W * 9 * C * Cpad,
            transcendentals=0,
            bytes_accessed=int(x_tiles.size) * 2 + int(w_hwio.size) * 2
                           + N * H * W * Cpad * 4,
        ),
    )(x_tiles, w_hwio)

    # Combine per-tile partials into global (N,H,W) batch statistics (tiny XLA op).
    tot = jnp.sum(stats, axis=(0, 1))                       # (2, Cpad)
    m = jnp.float32(N * H * W)
    mean = tot[0] / m
    var = jnp.maximum(tot[1] / m - mean * mean, 0.0)        # biased var, guard >= 0
    inv = jax.lax.rsqrt(var + eps)
    scale = (g * inv).reshape(1, Cpad)
    shift = (b - mean * g * inv).reshape(1, Cpad)

    out = pl.pallas_call(
        _bn_relu_kernel,
        out_shape=jax.ShapeDtypeStruct((N, nH, TH * W, Cpad), jnp.float32),
        grid=grid,
        in_specs=[
            pl.BlockSpec((None, None, TH * W, Cpad), lambda n, i: (n, i, 0, 0)),
            pl.BlockSpec((1, Cpad), lambda n, i: (0, 0)),
            pl.BlockSpec((1, Cpad), lambda n, i: (0, 0)),
        ],
        out_specs=pl.BlockSpec((None, None, TH * W, Cpad), lambda n, i: (n, i, 0, 0)),
        compiler_params=cparams,
    )(y, scale, shift)

    # (N, nH, TH*W, Cpad) -> (N, H, W, Cpad): memory-order-preserving, free reshape.
    return out.reshape(N, H, W, Cpad)


def unet_conv_block_forward(x_nchw, params1, params2, *, eps=1e-5):
    """UNETConvBlock forward: two chained ConvBlocks. NCHW in / NCHW out (PyTorch)."""
    w1, g1, b1 = params1
    w2, g2, b2 = params2
    Cout = w2.shape[0]

    x = jnp.transpose(x_nchw, (0, 2, 3, 1))          # NCHW -> NHWC (once)
    h = conv_block_nhwc(x, w1, g1, b1, eps=eps)      # stays NHWC, lane-padded channels
    h = conv_block_nhwc(h, w2, g2, b2, eps=eps)
    return jnp.transpose(h[..., :Cout], (0, 3, 1, 2))  # drop channel padding, -> NCHW


if __name__ == "__main__":
    key = jax.random.PRNGKey(0)
    N, Cin, Cout, H, W = 2, 4, 8, 16, 16

    k1, k2, k3 = jax.random.split(key, 3)
    x = jax.random.normal(k1, (N, Cin, H, W), dtype=jnp.float32)
    # PyTorch-shaped conv weights [Cout, Cin, KH, KW], no bias.
    w1 = jax.random.normal(k2, (Cout, Cin, 3, 3), dtype=jnp.float32) * 0.1
    w2 = jax.random.normal(k3, (Cout, Cout, 3, 3), dtype=jnp.float32) * 0.1
    # BatchNorm2d default affine params.
    g1 = jnp.ones((Cout,), jnp.float32)
    b1 = jnp.zeros((Cout,), jnp.float32)
    g2 = jnp.ones((Cout,), jnp.float32)
    b2 = jnp.zeros((Cout,), jnp.float32)

    fwd = jax.jit(unet_conv_block_forward)
    out = fwd(x, (w1, g1, b1), (w2, g2, b2))
    jax.block_until_ready(out)
    assert out.shape == (N, Cout, H, W)
    print("KERNEL_OK")
</pallas_src>

<mosaic_0001>
module attributes {stable_mosaic.version = 11 : i64} {
  func.func @_conv_stats_kernel(%arg0: i32, %arg1: i32, %arg2: memref<1x1x18x18x4xbf16, #tpu.memory_space<vmem>>, %arg3: memref<3x3x4x128xbf16, #tpu.memory_space<vmem>>, %arg4: memref<1x1x256x128xf32, #tpu.memory_space<vmem>>, %arg5: memref<1x1x2x128xf32, #tpu.memory_space<vmem>>) attributes {dimension_semantics = [#tpu.dimension_semantics<parallel>, #tpu.dimension_semantics<parallel>], iteration_bounds = array<i64: 2, 1>, scalar_prefetch = 0 : i64, scratch_operands = 0 : i64, tpu.core_type = #tpu.core_type<tc>, window_params = [{transform_indices = @transform_0, window_bounds = array<i64: 1, 1, 18, 18, 4>}, {pipeline_mode = #tpu.pipeline_mode<synchronous>, transform_indices = @transform_1, window_bounds = array<i64: 3, 3, 4, 128>}, {transform_indices = @transform_2, window_bounds = array<i64: 1, 1, 256, 128>}, {transform_indices = @transform_3, window_bounds = array<i64: 1, 1, 2, 128>}]} {
    %cst = arith.constant 0.000000e+00 : f32
    %0 = vector.broadcast %cst : f32 to vector<256x128xf32>
    %c0 = arith.constant 0 : index
    %c0_0 = arith.constant 0 : index
    %c0_1 = arith.constant 0 : index
    %c0_2 = arith.constant 0 : index
    %1 = vector.load %arg4[%c0, %c0_0, %c0_1, %c0_2] : memref<1x1x256x128xf32, #tpu.memory_space<vmem>>, vector<1x1x256x128xf32>
    %2 = vector.shape_cast %1 : vector<1x1x256x128xf32> to vector<256x128xf32>
    %3 = vector.shape_cast %0 : vector<256x128xf32> to vector<1x1x256x128xf32>
    tpu.vector_store %arg4[%c0, %c0_0, %c0_1, %c0_2], %3 {strides = array<i32>} : memref<1x1x256x128xf32, #tpu.memory_space<vmem>>, vector<1x1x256x128xf32>,
    %c0_3 = arith.constant 0 : index
    %c0_4 = arith.constant 0 : index
    %c0_5 = arith.constant 0 : index
    %c0_6 = arith.constant 0 : index
    %c0_7 = arith.constant 0 : index
    %4 = vector.load %arg2[%c0_3, %c0_4, %c0_5, %c0_6, %c0_7] : memref<1x1x18x18x4xbf16, #tpu.memory_space<vmem>>, vector<1x1x16x16x4xbf16>
    %5 = vector.shape_cast %4 : vector<1x1x16x16x4xbf16> to vector<16x16x4xbf16>
    %6 = vector.shape_cast %5 : vector<16x16x4xbf16> to vector<256x4xbf16>
    %c0_8 = arith.constant 0 : index
    %c0_9 = arith.constant 0 : index
    %c0_10 = arith.constant 0 : index
    %c0_11 = arith.constant 0 : index
    %7 = vector.load %arg4[%c0_8, %c0_9, %c0_10, %c0_11] : memref<1x1x256x128xf32, #tpu.memory_space<vmem>>, vector<1x1x256x128xf32>
    %8 = vector.shape_cast %7 : vector<1x1x256x128xf32> to vector<256x128xf32>
    %c0_12 = arith.constant 0 : index
    %c0_13 = arith.constant 0 : index
    %c0_14 = arith.constant 0 : index
    %c0_15 = arith.constant 0 : index
    %9 = vector.load %arg3[%c0_12, %c0_13, %c0_14, %c0_15] : memref<3x3x4x128xbf16, #tpu.memory_space<vmem>>, vector<1x1x4x128xbf16>
    %10 = vector.shape_cast %9 : vector<1x1x4x128xbf16> to vector<4x128xbf16>
    %cst_16 = arith.constant dense<0.000000e+00> : vector<256x128xf32>
    %11 = tpu.matmul %6, %10, %cst_16 {dimension_numbers = #tpu.dot_dimension_numbers<[1], [0], [0], [1], [0, 0, 1, 1], [], []>} : vector<256x4xbf16>, vector<4x128xbf16>, vector<256x128xf32> -> vector<256x128xf32>
    %12 = arith.addf %8, %11 : vector<256x128xf32>
    %c0_17 = arith.constant 0 : index
    %c0_18 = arith.constant 0 : index
    %c0_19 = arith.constant 0 : index
    %c0_20 = arith.constant 0 : index
    %13 = vector.load %arg4[%c0_17, %c0_18, %c0_19, %c0_20] : memref<1x1x256x128xf32, #tpu.memory_space<vmem>>, vector<1x1x256x128xf32>
    %14 = vector.shape_cast %13 : vector<1x1x256x128xf32> to vector<256x128xf32>
    %15 = vector.shape_cast %12 : vector<256x128xf32> to vector<1x1x256x128xf32>
    tpu.vector_store %arg4[%c0_17, %c0_18, %c0_19, %c0_20], %15 {strides = array<i32>} : memref<1x1x256x128xf32, #tpu.memory_space<vmem>>, vector<1x1x256x128xf32>,
    %c0_21 = arith.constant 0 : index
    %c0_22 = arith.constant 0 : index
    %c0_23 = arith.constant 0 : index
    %c1 = arith.constant 1 : index
    %c0_24 = arith.constant 0 : index
    %16 = vector.load %arg2[%c0_21, %c0_22, %c0_23, %c1, %c0_24] : memref<1x1x18x18x4xbf16, #tpu.memory_space<vmem>>, vector<1x1x16x16x4xbf16>
    %17 = vector.shape_cast %16 : vector<1x1x16x16x4xbf16> to vector<16x16x4xbf16>
    %18 = vector.shape_cast %17 : vector<16x16x4xbf16> to vector<256x4xbf16>
    %c0_25 = arith.constant 0 : index
    %c0_26 = arith.constant 0 : index
    %c0_27 = arith.constant 0 : index
    %c0_28 = arith.constant 0 : index
    %19 = vector.load %arg4[%c0_25, %c0_26, %c0_27, %c0_28] : memref<1x1x256x128xf32, #tpu.memory_space<vmem>>, vector<1x1x256x128xf32>
    %20 = vector.shape_cast %19 : vector<1x1x256x128xf32> to vector<256x128xf32>
    %c0_29 = arith.constant 0 : index
    %c1_30 = arith.constant 1 : index
    %c0_31 = arith.constant 0 : index
    %c0_32 = arith.constant 0 : index
    %21 = vector.load %arg3[%c0_29, %c1_30, %c0_31, %c0_32] : memref<3x3x4x128xbf16, #tpu.memory_space<vmem>>, vector<1x1x4x128xbf16>
    %22 = vector.shape_cast %21 : vector<1x1x4x128xbf16> to vector<4x128xbf16>
    %cst_33 = arith.constant dense<0.000000e+00> : vector<256x128xf32>
    %23 = tpu.matmul %18, %22, %cst_33 {dimension_numbers = #tpu.dot_dimension_numbers<[1], [0], [0], [1], [0, 0, 1, 1], [], []>} : vector<256x4xbf16>, vector<4x128xbf16>, vector<256x128xf32> -> vector<256x128xf32>
    %24 = arith.addf %20, %23 : vector<256x128xf32>
    %c0_34 = arith.constant 0 : index
    %c0_35 = arith.constant 0 : index
    %c0_36 = arith.constant 0 : index
    %c0_37 = arith.constant 0 : index
    %25 = vector.load %arg4[%c0_34, %c0_35, %c0_36, %c0_37] : memref<1x1x256x128xf32, #tpu.memory_space<vmem>>, vector<1x1x256x128xf32>
    %26 = vector.shape_cast %25 : vector<1x1x256x128xf32> to vector<256x128xf32>
    %27 = vector.shape_cast %24 : vector<256x128xf32> to vector<1x1x256x128xf32>
    tpu.vector_store %arg4[%c0_34, %c0_35, %c0_36, %c0_37], %27 {strides = array<i32>} : memref<1x1x256x128xf32, #tpu.memory_space<vmem>>, vector<1x1x256x128xf32>,
    %c0_38 = arith.constant 0 : index
    %c0_39 = arith.constant 0 : index
    %c0_40 = arith.constant 0 : index
    %c2 = arith.constant 2 : index
    %c0_41 = arith.constant 0 : index
    %28 = vector.load %arg2[%c0_38, %c0_39, %c0_40, %c2, %c0_41] : memref<1x1x18x18x4xbf16, #tpu.memory_space<vmem>>, vector<1x1x16x16x4xbf16>
    %29 = vector.shape_cast %28 : vector<1x1x16x16x4xbf16> to vector<16x16x4xbf16>
    %30 = vector.shape_cast %29 : vector<16x16x4xbf16> to vector<256x4xbf16>
    %c0_42 = arith.constant 0 : index
    %c0_43 = arith.constant 0 : index
    %c0_44 = arith.constant 0 : index
    %c0_45 = arith.constant 0 : index
    %31 = vector.load %arg4[%c0_42, %c0_43, %c0_44, %c0_45] : memref<1x1x256x128xf32, #tpu.memory_space<vmem>>, vector<1x1x256x128xf32>
    %32 = vector.shape_cast %31 : vector<1x1x256x128xf32> to vector<256x128xf32>
    %c0_46 = arith.constant 0 : index
    %c2_47 = arith.constant 2 : index
    %c0_48 = arith.constant 0 : index
    %c0_49 = arith.constant 0 : index
    %33 = vector.load %arg3[%c0_46, %c2_47, %c0_48, %c0_49] : memref<3x3x4x128xbf16, #tpu.memory_space<vmem>>, vector<1x1x4x128xbf16>
    %34 = vector.shape_cast %33 : vector<1x1x4x128xbf16> to vector<4x128xbf16>
    %cst_50 = arith.constant dense<0.000000e+00> : vector<256x128xf32>
    %35 = tpu.matmul %30, %34, %cst_50 {dimension_numbers = #tpu.dot_dimension_numbers<[1], [0], [0], [1], [0, 0, 1, 1], [], []>} : vector<256x4xbf16>, vector<4x128xbf16>, vector<256x128xf32> -> vector<256x128xf32>
    %36 = arith.addf %32, %35 : vector<256x128xf32>
    %c0_51 = arith.constant 0 : index
    %c0_52 = arith.constant 0 : index
    %c0_53 = arith.constant 0 : index
    %c0_54 = arith.constant 0 : index
    %37 = vector.load %arg4[%c0_51, %c0_52, %c0_53, %c0_54] : memref<1x1x256x128xf32, #tpu.memory_space<vmem>>, vector<1x1x256x128xf32>
    %38 = vector.shape_cast %37 : vector<1x1x256x128xf32> to vector<256x128xf32>
    %39 = vector.shape_cast %36 : vector<256x128xf32> to vector<1x1x256x128xf32>
    tpu.vector_store %arg4[%c0_51, %c0_52, %c0_53, %c0_54], %39 {strides = array<i32>} : memref<1x1x256x128xf32, #tpu.memory_space<vmem>>, vector<1x1x256x128xf32>,
    %c0_55 = arith.constant 0 : index
    %c0_56 = arith.constant 0 : index
    %c1_57 = arith.constant 1 : index
    %c0_58 = arith.constant 0 : index
    %c0_59 = arith.constant 0 : index
    %40 = vector.load %arg2[%c0_55, %c0_56, %c1_57, %c0_58, %c0_59] : memref<1x1x18x18x4xbf16, #tpu.memory_space<vmem>>, vector<1x1x16x16x4xbf16>
    %41 = vector.shape_cast %40 : vector<1x1x16x16x4xbf16> to vector<16x16x4xbf16>
    %42 = vector.shape_cast %41 : vector<16x16x4xbf16> to vector<256x4xbf16>
    %c0_60 = arith.constant 0 : index
    %c0_61 = arith.constant 0 : index
    %c0_62 = arith.constant 0 : index
    %c0_63 = arith.constant 0 : index
    %43 = vector.load %arg4[%c0_60, %c0_61, %c0_62, %c0_63] : memref<1x1x256x128xf32, #tpu.memory_space<vmem>>, vector<1x1x256x128xf32>
    %44 = vector.shape_cast %43 : vector<1x1x256x128xf32> to vector<256x128xf32>
    %c1_64 = arith.constant 1 : index
    %c0_65 = arith.constant 0 : index
    %c0_66 = arith.constant 0 : index
    %c0_67 = arith.constant 0 : index
    %45 = vector.load %arg3[%c1_64, %c0_65, %c0_66, %c0_67] : memref<3x3x4x128xbf16, #tpu.memory_space<vmem>>, vector<1x1x4x128xbf16>
    %46 = vector.shape_cast %45 : vector<1x1x4x128xbf16> to vector<4x128xbf16>
    %cst_68 = arith.constant dense<0.000000e+00> : vector<256x128xf32>
    %47 = tpu.matmul %42, %46, %cst_68 {dimension_numbers = #tpu.dot_dimension_numbers<[1], [0], [0], [1], [0, 0, 1, 1], [], []>} : vector<256x4xbf16>, vector<4x128xbf16>, vector<256x128xf32> -> vector<256x128xf32>
    %48 = arith.addf %44, %47 : vector<256x128xf32>
    %c0_69 = arith.constant 0 : index
    %c0_70 = arith.constant 0 : index
    %c0_71 = arith.constant 0 : index
    %c0_72 = arith.constant 0 : index
    %49 = vector.load %arg4[%c0_69, %c0_70, %c0_71, %c0_72] : memref<1x1x256x128xf32, #tpu.memory_space<vmem>>, vector<1x1x256x128xf32>
    %50 = vector.shape_cast %49 : vector<1x1x256x128xf32> to vector<256x128xf32>
    %51 = vector.shape_cast %48 : vector<256x128xf32> to vector<1x1x256x128xf32>
    tpu.vector_store %arg4[%c0_69, %c0_70, %c0_71, %c0_72], %51 {strides = array<i32>} : memref<1x1x256x128xf32, #tpu.memory_space<vmem>>, vector<1x1x256x128xf32>,
    %c0_73 = arith.constant 0 : index
    %c0_74 = arith.constant 0 : index
    %c1_75 = arith.constant 1 : index
    %c1_76 = arith.constant 1 : index
    %c0_77 = arith.constant 0 : index
    %52 = vector.load %arg2[%c0_73, %c0_74, %c1_75, %c1_76, %c0_77] : memref<1x1x18x18x4xbf16, #tpu.memory_space<vmem>>, vector<1x1x16x16x4xbf16>
    %53 = vector.shape_cast %52 : vector<1x1x16x16x4xbf16> to vector<16x16x4xbf16>
    %54 = vector.shape_cast %53 : vector<16x16x4xbf16> to vector<256x4xbf16>
    %c0_78 = arith.constant 0 : index
    %c0_79 = arith.constant 0 : index
    %c0_80 = arith.constant 0 : index
    %c0_81 = arith.constant 0 : index
    %55 = vector.load %arg4[%c0_78, %c0_79, %c0_80, %c0_81] : memref<1x1x256x128xf32, #tpu.memory_space<vmem>>, vector<1x1x256x128xf32>
    %56 = vector.shape_cast %55 : vector<1x1x256x128xf32> to vector<256x128xf32>
    %c1_82 = arith.constant 1 : index
    %c1_83 = arith.constant 1 : index
    %c0_84 = arith.constant 0 : index
    %c0_85 = arith.constant 0 : index
    %57 = vector.load %arg3[%c1_82, %c1_83, %c0_84, %c0_85] : memref<3x3x4x128xbf16, #tpu.memory_space<vmem>>, vector<1x1x4x128xbf16>
    %58 = vector.shape_cast %57 : vector<1x1x4x128xbf16> to vector<4x128xbf16>
    %cst_86 = arith.constant dense<0.000000e+00> : vector<256x128xf32>
    %59 = tpu.matmul %54, %58, %cst_86 {dimension_numbers = #tpu.dot_dimension_numbers<[1], [0], [0], [1], [0, 0, 1, 1], [], []>} : vector<256x4xbf16>, vector<4x128xbf16>, vector<256x128xf32> -> vector<256x128xf32>
    %60 = arith.addf %56, %59 : vector<256x128xf32>
    %c0_87 = arith.constant 0 : index
    %c0_88 = arith.constant 0 : index
    %c0_89 = arith.constant 0 : index
    %c0_90 = arith.constant 0 : index
    %61 = vector.load %arg4[%c0_87, %c0_88, %c0_89, %c0_90] : memref<1x1x256x128xf32, #tpu.memory_space<vmem>>, vector<1x1x256x128xf32>
    %62 = vector.shape_cast %61 : vector<1x1x256x128xf32> to vector<256x128xf32>
    %63 = vector.shape_cast %60 : vector<256x128xf32> to vector<1x1x256x128xf32>
    tpu.vector_store %arg4[%c0_87, %c0_88, %c0_89, %c0_90], %63 {strides = array<i32>} : memref<1x1x256x128xf32, #tpu.memory_space<vmem>>, vector<1x1x256x128xf32>,
    %c0_91 = arith.constant 0 : index
    %c0_92 = arith.constant 0 : index
    %c1_93 = arith.constant 1 : index
    %c2_94 = arith.constant 2 : index
    %c0_95 = arith.constant 0 : index
    %64 = vector.load %arg2[%c0_91, %c0_92, %c1_93, %c2_94, %c0_95] : memref<1x1x18x18x4xbf16, #tpu.memory_space<vmem>>, vector<1x1x16x16x4xbf16>
    %65 = vector.shape_cast %64 : vector<1x1x16x16x4xbf16> to vector<16x16x4xbf16>
    %66 = vector.shape_cast %65 : vector<16x16x4xbf16> to vector<256x4xbf16>
    %c0_96 = arith.constant 0 : index
    %c0_97 = arith.constant 0 : index
    %c0_98 = arith.constant 0 : index
    %c0_99 = arith.constant 0 : index
    %67 = vector.load %arg4[%c0_96, %c0_97, %c0_98, %c0_99] : memref<1x1x256x128xf32, #tpu.memory_space<vmem>>, vector<1x1x256x128xf32>
    %68 = vector.shape_cast %67 : vector<1x1x256x128xf32> to vector<256x128xf32>
    %c1_100 = arith.constant 1 : index
    %c2_101 = arith.constant 2 : index
    %c0_102 = arith.constant 0 : index
    %c0_103 = arith.constant 0 : index
    %69 = vector.load %arg3[%c1_100, %c2_101, %c0_102, %c0_103] : memref<3x3x4x128xbf16, #tpu.memory_space<vmem>>, vector<1x1x4x128xbf16>
    %70 = vector.shape_cast %69 : vector<1x1x4x128xbf16> to vector<4x128xbf16>
    %cst_104 = arith.constant dense<0.000000e+00> : vector<256x128xf32>
    %71 = tpu.matmul %66, %70, %cst_104 {dimension_numbers = #tpu.dot_dimension_numbers<[1], [0], [0], [1], [0, 0, 1, 1], [], []>} : vector<256x4xbf16>, vector<4x128xbf16>, vector<256x128xf32> -> vector<256x128xf32>
    %72 = arith.addf %68, %71 : vector<256x128xf32>
    %c0_105 = arith.constant 0 : index
    %c0_106 = arith.constant 0 : index
    %c0_107 = arith.constant 0 : index
    %c0_108 = arith.constant 0 : index
    %73 = vector.load %arg4[%c0_105, %c0_106, %c0_107, %c0_108] : memref<1x1x256x128xf32, #tpu.memory_space<vmem>>, vector<1x1x256x128xf32>
    %74 = vector.shape_cast %73 : vector<1x1x256x128xf32> to vector<256x128xf32>
    %75 = vector.shape_cast %72 : vector<256x128xf32> to vector<1x1x256x128xf32>
    tpu.vector_store %arg4[%c0_105, %c0_106, %c0_107, %c0_108], %75 {strides = array<i32>} : memref<1x1x256x128xf32, #tpu.memory_space<vmem>>, vector<1x1x256x128xf32>,
    %c0_109 = arith.constant 0 : index
    %c0_110 = arith.constant 0 : index
    %c2_111 = arith.constant 2 : index
    %c0_112 = arith.constant 0 : index
    %c0_113 = arith.constant 0 : index
    %76 = vector.load %arg2[%c0_109, %c0_110, %c2_111, %c0_112, %c0_113] : memref<1x1x18x18x4xbf16, #tpu.memory_space<vmem>>, vector<1x1x16x16x4xbf16>
    %77 = vector.shape_cast %76 : vector<1x1x16x16x4xbf16> to vector<16x16x4xbf16>
    %78 = vector.shape_cast %77 : vector<16x16x4xbf16> to vector<256x4xbf16>
    %c0_114 = arith.constant 0 : index
    %c0_115 = arith.constant 0 : index
    %c0_116 = arith.constant 0 : index
    %c0_117 = arith.constant 0 : index
    %79 = vector.load %arg4[%c0_114, %c0_115, %c0_116, %c0_117] : memref<1x1x256x128xf32, #tpu.memory_space<vmem>>, vector<1x1x256x128xf32>
    %80 = vector.shape_cast %79 : vector<1x1x256x128xf32> to vector<256x128xf32>
    %c2_118 = arith.constant 2 : index
    %c0_119 = arith.constant 0 : index
    %c0_120 = arith.constant 0 : index
    %c0_121 = arith.constant 0 : index
    %81 = vector.load %arg3[%c2_118, %c0_119, %c0_120, %c0_121] : memref<3x3x4x128xbf16, #tpu.memory_space<vmem>>, vector<1x1x4x128xbf16>
    %82 = vector.shape_cast %81 : vector<1x1x4x128xbf16> to vector<4x128xbf16>
    %cst_122 = arith.constant dense<0.000000e+00> : vector<256x128xf32>
    %83 = tpu.matmul %78, %82, %cst_122 {dimension_numbers = #tpu.dot_dimension_numbers<[1], [0], [0], [1], [0, 0, 1, 1], [], []>} : vector<256x4xbf16>, vector<4x128xbf16>, vector<256x128xf32> -> vector<256x128xf32>
    %84 = arith.addf %80, %83 : vector<256x128xf32>
    %c0_123 = arith.constant 0 : index
    %c0_124 = arith.constant 0 : index
    %c0_125 = arith.constant 0 : index
    %c0_126 = arith.constant 0 : index
    %85 = vector.load %arg4[%c0_123, %c0_124, %c0_125, %c0_126] : memref<1x1x256x128xf32, #tpu.memory_space<vmem>>, vector<1x1x256x128xf32>
    %86 = vector.shape_cast %85 : vector<1x1x256x128xf32> to vector<256x128xf32>
    %87 = vector.shape_cast %84 : vector<256x128xf32> to vector<1x1x256x128xf32>
    tpu.vector_store %arg4[%c0_123, %c0_124, %c0_125, %c0_126], %87 {strides = array<i32>} : memref<1x1x256x128xf32, #tpu.memory_space<vmem>>, vector<1x1x256x128xf32>,
    %c0_127 = arith.constant 0 : index
    %c0_128 = arith.constant 0 : index
    %c2_129 = arith.constant 2 : index
    %c1_130 = arith.constant 1 : index
    %c0_131 = arith.constant 0 : index
    %88 = vector.load %arg2[%c0_127, %c0_128, %c2_129, %c1_130, %c0_131] : memref<1x1x18x18x4xbf16, #tpu.memory_space<vmem>>, vector<1x1x16x16x4xbf16>
    %89 = vector.shape_cast %88 : vector<1x1x16x16x4xbf16> to vector<16x16x4xbf16>
    %90 = vector.shape_cast %89 : vector<16x16x4xbf16> to vector<256x4xbf16>
    %c0_132 = arith.constant 0 : index
    %c0_133 = arith.constant 0 : index
    %c0_134 = arith.constant 0 : index
    %c0_135 = arith.constant 0 : index
    %91 = vector.load %arg4[%c0_132, %c0_133, %c0_134, %c0_135] : memref<1x1x256x128xf32, #tpu.memory_space<vmem>>, vector<1x1x256x128xf32>
    %92 = vector.shape_cast %91 : vector<1x1x256x128xf32> to vector<256x128xf32>
    %c2_136 = arith.constant 2 : index
    %c1_137 = arith.constant 1 : index
    %c0_138 = arith.constant 0 : index
    %c0_139 = arith.constant 0 : index
    %93 = vector.load %arg3[%c2_136, %c1_137, %c0_138, %c0_139] : memref<3x3x4x128xbf16, #tpu.memory_space<vmem>>, vector<1x1x4x128xbf16>
    %94 = vector.shape_cast %93 : vector<1x1x4x128xbf16> to vector<4x128xbf16>
    %cst_140 = arith.constant dense<0.000000e+00> : vector<256x128xf32>
    %95 = tpu.matmul %90, %94, %cst_140 {dimension_numbers = #tpu.dot_dimension_numbers<[1], [0], [0], [1], [0, 0, 1, 1], [], []>} : vector<256x4xbf16>, vector<4x128xbf16>, vector<256x128xf32> -> vector<256x128xf32>
    %96 = arith.addf %92, %95 : vector<256x128xf32>
    %c0_141 = arith.constant 0 : index
    %c0_142 = arith.constant 0 : index
    %c0_143 = arith.constant 0 : index
    %c0_144 = arith.constant 0 : index
    %97 = vector.load %arg4[%c0_141, %c0_142, %c0_143, %c0_144] : memref<1x1x256x128xf32, #tpu.memory_space<vmem>>, vector<1x1x256x128xf32>
    %98 = vector.shape_cast %97 : vector<1x1x256x128xf32> to vector<256x128xf32>
    %99 = vector.shape_cast %96 : vector<256x128xf32> to vector<1x1x256x128xf32>
    tpu.vector_store %arg4[%c0_141, %c0_142, %c0_143, %c0_144], %99 {strides = array<i32>} : memref<1x1x256x128xf32, #tpu.memory_space<vmem>>, vector<1x1x256x128xf32>,
    %c0_145 = arith.constant 0 : index
    %c0_146 = arith.constant 0 : index
    %c2_147 = arith.constant 2 : index
    %c2_148 = arith.constant 2 : index
    %c0_149 = arith.constant 0 : index
    %100 = vector.load %arg2[%c0_145, %c0_146, %c2_147, %c2_148, %c0_149] : memref<1x1x18x18x4xbf16, #tpu.memory_space<vmem>>, vector<1x1x16x16x4xbf16>
    %101 = vector.shape_cast %100 : vector<1x1x16x16x4xbf16> to vector<16x16x4xbf16>
    %102 = vector.shape_cast %101 : vector<16x16x4xbf16> to vector<256x4xbf16>
    %c0_150 = arith.constant 0 : index
    %c0_151 = arith.constant 0 : index
    %c0_152 = arith.constant 0 : index
    %c0_153 = arith.constant 0 : index
    %103 = vector.load %arg4[%c0_150, %c0_151, %c0_152, %c0_153] : memref<1x1x256x128xf32, #tpu.memory_space<vmem>>, vector<1x1x256x128xf32>
    %104 = vector.shape_cast %103 : vector<1x1x256x128xf32> to vector<256x128xf32>
    %c2_154 = arith.constant 2 : index
    %c2_155 = arith.constant 2 : index
    %c0_156 = arith.constant 0 : index
    %c0_157 = arith.constant 0 : index
    %105 = vector.load %arg3[%c2_154, %c2_155, %c0_156, %c0_157] : memref<3x3x4x128xbf16, #tpu.memory_space<vmem>>, vector<1x1x4x128xbf16>
    %106 = vector.shape_cast %105 : vector<1x1x4x128xbf16> to vector<4x128xbf16>
    %cst_158 = arith.constant dense<0.000000e+00> : vector<256x128xf32>
    %107 = tpu.matmul %102, %106, %cst_158 {dimension_numbers = #tpu.dot_dimension_numbers<[1], [0], [0], [1], [0, 0, 1, 1], [], []>} : vector<256x4xbf16>, vector<4x128xbf16>, vector<256x128xf32> -> vector<256x128xf32>
    %108 = arith.addf %104, %107 : vector<256x128xf32>
    %c0_159 = arith.constant 0 : index
    %c0_160 = arith.constant 0 : index
    %c0_161 = arith.constant 0 : index
    %c0_162 = arith.constant 0 : index
    %109 = vector.load %arg4[%c0_159, %c0_160, %c0_161, %c0_162] : memref<1x1x256x128xf32, #tpu.memory_space<vmem>>, vector<1x1x256x128xf32>
    %110 = vector.shape_cast %109 : vector<1x1x256x128xf32> to vector<256x128xf32>
    %111 = vector.shape_cast %108 : vector<256x128xf32> to vector<1x1x256x128xf32>
    tpu.vector_store %arg4[%c0_159, %c0_160, %c0_161, %c0_162], %111 {strides = array<i32>} : memref<1x1x256x128xf32, #tpu.memory_space<vmem>>, vector<1x1x256x128xf32>,
    %c0_163 = arith.constant 0 : index
    %c0_164 = arith.constant 0 : index
    %c0_165 = arith.constant 0 : index
    %c0_166 = arith.constant 0 : index
    %112 = vector.load %arg4[%c0_163, %c0_164, %c0_165, %c0_166] : memref<1x1x256x128xf32, #tpu.memory_space<vmem>>, vector<1x1x256x128xf32>
    %113 = vector.shape_cast %112 : vector<1x1x256x128xf32> to vector<256x128xf32>
    %cst_167 = arith.constant dense<0.000000e+00> : vector<128xf32>
    %114 = vector.multi_reduction <add>, %113, %cst_167 [0] : vector<256x128xf32> to vector<128xf32>
    %115 = vector.shape_cast %114 : vector<128xf32> to vector<1x128xf32>
    %c0_168 = arith.constant 0 : index
    %c0_169 = arith.constant 0 : index
    %c0_170 = arith.constant 0 : index
    %c0_171 = arith.constant 0 : index
    %116 = vector.load %arg5[%c0_168, %c0_169, %c0_170, %c0_171] : memref<1x1x2x128xf32, #tpu.memory_space<vmem>>, vector<1x1x1x128xf32>
    %117 = vector.shape_cast %116 : vector<1x1x1x128xf32> to vector<1x128xf32>
    %118 = vector.shape_cast %115 : vector<1x128xf32> to vector<1x1x1x128xf32>
    tpu.vector_store %arg5[%c0_168, %c0_169, %c0_170, %c0_171], %118 {strides = array<i32>} : memref<1x1x2x128xf32, #tpu.memory_space<vmem>>, vector<1x1x1x128xf32>,
    %119 = arith.mulf %113, %113 : vector<256x128xf32>
    %cst_172 = arith.constant dense<0.000000e+00> : vector<128xf32>
    %120 = vector.multi_reduction <add>, %119, %cst_172 [0] : vector<256x128xf32> to vector<128xf32>
    %121 = vector.shape_cast %120 : vector<128xf32> to vector<1x128xf32>
    %c0_173 = arith.constant 0 : index
    %c0_174 = arith.constant 0 : index
    %c1_175 = arith.constant 1 : index
    %c0_176 = arith.constant 0 : index
    %122 = vector.load %arg5[%c0_173, %c0_174, %c1_175, %c0_176] : memref<1x1x2x128xf32, #tpu.memory_space<vmem>>, vector<1x1x1x128xf32>
    %123 = vector.shape_cast %122 : vector<1x1x1x128xf32> to vector<1x128xf32>
    %124 = vector.shape_cast %121 : vector<1x128xf32> to vector<1x1x1x128xf32>
    tpu.vector_store %arg5[%c0_173, %c0_174, %c1_175, %c0_176], %124 {strides = array<i32>} : memref<1x1x2x128xf32, #tpu.memory_space<vmem>>, vector<1x1x1x128xf32>,
    return
  }
  func.func @transform_0(%arg0: i32, %arg1: i32) -> (i32, i32, i32, i32, i32) {
    %c0_i32 = arith.constant 0 : i32
    %c0_i32_0 = arith.constant 0 : i32
    %c0_i32_1 = arith.constant 0 : i32
    %c0_i32_2 = arith.constant 0 : i32
    return %arg0, %arg1, %c0_i32, %c0_i32_0, %c0_i32_1 : i32, i32, i32, i32, i32
  }
  func.func @transform_1(%arg0: i32, %arg1: i32) -> (i32, i32, i32, i32) {
    %c0_i32 = arith.constant 0 : i32
    %c0_i32_0 = arith.constant 0 : i32
    %c0_i32_1 = arith.constant 0 : i32
    %c0_i32_2 = arith.constant 0 : i32
    %c0_i32_3 = arith.constant 0 : i32
    return %c0_i32, %c0_i32_0, %c0_i32_1, %c0_i32_2 : i32, i32, i32, i32
  }
  func.func @transform_2(%arg0: i32, %arg1: i32) -> (i32, i32, i32, i32) {
    %c0_i32 = arith.constant 0 : i32
    %c0_i32_0 = arith.constant 0 : i32
    %c0_i32_1 = arith.constant 0 : i32
    return %arg0, %arg1, %c0_i32, %c0_i32_0 : i32, i32, i32, i32
  }
  func.func @transform_3(%arg0: i32, %arg1: i32) -> (i32, i32, i32, i32) {
    %c0_i32 = arith.constant 0 : i32
    %c0_i32_0 = arith.constant 0 : i32
    %c0_i32_1 = arith.constant 0 : i32
    return %arg0, %arg1, %c0_i32, %c0_i32_0 : i32, i32, i32, i32
  }
}

module attributes {stable_mosaic.version = 11 : i64} {
  func.func @_bn_relu_kernel(%arg0: i32, %arg1: i32, %arg2: memref<1x1x256x128xf32, #tpu.memory_space<vmem>>, %arg3: memref<1x128xf32, #tpu.memory_space<vmem>>, %arg4: memref<1x128xf32, #tpu.memory_space<vmem>>, %arg5: memref<1x1x256x128xf32, #tpu.memory_space<vmem>>) attributes {dimension_semantics = [#tpu.dimension_semantics<parallel>, #tpu.dimension_semantics<parallel>], iteration_bounds = array<i64: 2, 1>, scalar_prefetch = 0 : i64, scratch_operands = 0 : i64, tpu.core_type = #tpu.core_type<tc>, window_params = [{transform_indices = @transform_0, window_bounds = array<i64: 1, 1, 256, 128>}, {pipeline_mode = #tpu.pipeline_mode<synchronous>, transform_indices = @transform_1, window_bounds = array<i64: 1, 128>}, {pipeline_mode = #tpu.pipeline_mode<synchronous>, transform_indices = @transform_2, window_bounds = array<i64: 1, 128>}, {transform_indices = @transform_3, window_bounds = array<i64: 1, 1, 256, 128>}]} {
    %c0 = arith.constant 0 : index
    %c0_0 = arith.constant 0 : index
    %c0_1 = arith.constant 0 : index
    %c0_2 = arith.constant 0 : index
    %0 = vector.load %arg2[%c0, %c0_0, %c0_1, %c0_2] : memref<1x1x256x128xf32, #tpu.memory_space<vmem>>, vector<1x1x256x128xf32>
    %1 = vector.shape_cast %0 : vector<1x1x256x128xf32> to vector<256x128xf32>
    %c0_3 = arith.constant 0 : index
    %c0_4 = arith.constant 0 : index
    %2 = vector.load %arg3[%c0_3, %c0_4] : memref<1x128xf32, #tpu.memory_space<vmem>>, vector<1x128xf32>
    %3 = vector.broadcast %2 : vector<1x128xf32> to vector<256x128xf32>
    %4 = arith.mulf %1, %3 : vector<256x128xf32>
    %c0_5 = arith.constant 0 : index
    %c0_6 = arith.constant 0 : index
    %5 = vector.load %arg4[%c0_5, %c0_6] : memref<1x128xf32, #tpu.memory_space<vmem>>, vector<1x128xf32>
    %6 = vector.broadcast %5 : vector<1x128xf32> to vector<256x128xf32>
    %7 = arith.addf %4, %6 : vector<256x128xf32>
    %cst = arith.constant 0.000000e+00 : f32
    %8 = vector.broadcast %cst : f32 to vector<256x128xf32>
    %9 = arith.maximumf %7, %8 : vector<256x128xf32>
    %c0_7 = arith.constant 0 : index
    %c0_8 = arith.constant 0 : index
    %c0_9 = arith.constant 0 : index
    %c0_10 = arith.constant 0 : index
    %10 = vector.load %arg5[%c0_7, %c0_8, %c0_9, %c0_10] : memref<1x1x256x128xf32, #tpu.memory_space<vmem>>, vector<1x1x256x128xf32>
    %11 = vector.shape_cast %10 : vector<1x1x256x128xf32> to vector<256x128xf32>
    %12 = vector.shape_cast %9 : vector<256x128xf32> to vector<1x1x256x128xf32>
    tpu.vector_store %arg5[%c0_7, %c0_8, %c0_9, %c0_10], %12 {strides = array<i32>} : memref<1x1x256x128xf32, #tpu.memory_space<vmem>>, vector<1x1x256x128xf32>,
    return
  }
  func.func @transform_0(%arg0: i32, %arg1: i32) -> (i32, i32, i32, i32) {
    %c0_i32 = arith.constant 0 : i32
    %c0_i32_0 = arith.constant 0 : i32
    %c0_i32_1 = arith.constant 0 : i32
    return %arg0, %arg1, %c0_i32, %c0_i32_0 : i32, i32, i32, i32
  }
  func.func @transform_1(%arg0: i32, %arg1: i32) -> (i32, i32) {
    %c0_i32 = arith.constant 0 : i32
    %c0_i32_0 = arith.constant 0 : i32
    %c0_i32_1 = arith.constant 0 : i32
    return %c0_i32, %c0_i32_0 : i32, i32
  }
  func.func @transform_2(%arg0: i32, %arg1: i32) -> (i32, i32) {
    %c0_i32 = arith.constant 0 : i32
    %c0_i32_0 = arith.constant 0 : i32
    %c0_i32_1 = arith.constant 0 : i32
    return %c0_i32, %c0_i32_0 : i32, i32
  }
  func.func @transform_3(%arg0: i32, %arg1: i32) -> (i32, i32, i32, i32) {
    %c0_i32 = arith.constant 0 : i32
    %c0_i32_0 = arith.constant 0 : i32
    %c0_i32_1 = arith.constant 0 : i32
    return %arg0, %arg1, %c0_i32, %c0_i32_0 : i32, i32, i32, i32
  }
}

module attributes {stable_mosaic.version = 11 : i64} {
  func.func @_conv_stats_kernel(%arg0: i32, %arg1: i32, %arg2: memref<1x1x18x18x128xbf16, #tpu.memory_space<vmem>>, %arg3: memref<3x3x128x128xbf16, #tpu.memory_space<vmem>>, %arg4: memref<1x1x256x128xf32, #tpu.memory_space<vmem>>, %arg5: memref<1x1x2x128xf32, #tpu.memory_space<vmem>>) attributes {dimension_semantics = [#tpu.dimension_semantics<parallel>, #tpu.dimension_semantics<parallel>], iteration_bounds = array<i64: 2, 1>, scalar_prefetch = 0 : i64, scratch_operands = 0 : i64, tpu.core_type = #tpu.core_type<tc>, window_params = [{transform_indices = @transform_0, window_bounds = array<i64: 1, 1, 18, 18, 128>}, {pipeline_mode = #tpu.pipeline_mode<synchronous>, transform_indices = @transform_1, window_bounds = array<i64: 3, 3, 128, 128>}, {transform_indices = @transform_2, window_bounds = array<i64: 1, 1, 256, 128>}, {transform_indices = @transform_3, window_bounds = array<i64: 1, 1, 2, 128>}]} {
    %cst = arith.constant 0.000000e+00 : f32
    %0 = vector.broadcast %cst : f32 to vector<256x128xf32>
    %c0 = arith.constant 0 : index
    %c0_0 = arith.constant 0 : index
    %c0_1 = arith.constant 0 : index
    %c0_2 = arith.constant 0 : index
    %1 = vector.load %arg4[%c0, %c0_0, %c0_1, %c0_2] : memref<1x1x256x128xf32, #tpu.memory_space<vmem>>, vector<1x1x256x128xf32>
    %2 = vector.shape_cast %1 : vector<1x1x256x128xf32> to vector<256x128xf32>
    %3 = vector.shape_cast %0 : vector<256x128xf32> to vector<1x1x256x128xf32>
    tpu.vector_store %arg4[%c0, %c0_0, %c0_1, %c0_2], %3 {strides = array<i32>} : memref<1x1x256x128xf32, #tpu.memory_space<vmem>>, vector<1x1x256x128xf32>,
    %c0_3 = arith.constant 0 : index
    %c0_4 = arith.constant 0 : index
    %c0_5 = arith.constant 0 : index
    %c0_6 = arith.constant 0 : index
    %c0_7 = arith.constant 0 : index
    %4 = vector.load %arg2[%c0_3, %c0_4, %c0_5, %c0_6, %c0_7] : memref<1x1x18x18x128xbf16, #tpu.memory_space<vmem>>, vector<1x1x16x16x128xbf16>
    %5 = vector.shape_cast %4 : vector<1x1x16x16x128xbf16> to vector<16x16x128xbf16>
    %6 = vector.shape_cast %5 : vector<16x16x128xbf16> to vector<256x128xbf16>
    %c0_8 = arith.constant 0 : index
    %c0_9 = arith.constant 0 : index
    %c0_10 = arith.constant 0 : index
    %c0_11 = arith.constant 0 : index
    %7 = vector.load %arg4[%c0_8, %c0_9, %c0_10, %c0_11] : memref<1x1x256x128xf32, #tpu.memory_space<vmem>>, vector<1x1x256x128xf32>
    %8 = vector.shape_cast %7 : vector<1x1x256x128xf32> to vector<256x128xf32>
    %c0_12 = arith.constant 0 : index
    %c0_13 = arith.constant 0 : index
    %c0_14 = arith.constant 0 : index
    %c0_15 = arith.constant 0 : index
    %9 = vector.load %arg3[%c0_12, %c0_13, %c0_14, %c0_15] : memref<3x3x128x128xbf16, #tpu.memory_space<vmem>>, vector<1x1x128x128xbf16>
    %10 = vector.shape_cast %9 : vector<1x1x128x128xbf16> to vector<128x128xbf16>
    %cst_16 = arith.constant dense<0.000000e+00> : vector<256x128xf32>
    %11 = tpu.matmul %6, %10, %cst_16 {dimension_numbers = #tpu.dot_dimension_numbers<[1], [0], [0], [1], [0, 0, 1, 1], [], []>} : vector<256x128xbf16>, vector<128x128xbf16>, vector<256x128xf32> -> vector<256x128xf32>
    %12 = arith.addf %8, %11 : vector<256x128xf32>
    %c0_17 = arith.constant 0 : index
    %c0_18 = arith.constant 0 : index
    %c0_19 = arith.constant 0 : index
    %c0_20 = arith.constant 0 : index
    %13 = vector.load %arg4[%c0_17, %c0_18, %c0_19, %c0_20] : memref<1x1x256x128xf32, #tpu.memory_space<vmem>>, vector<1x1x256x128xf32>
    %14 = vector.shape_cast %13 : vector<1x1x256x128xf32> to vector<256x128xf32>
    %15 = vector.shape_cast %12 : vector<256x128xf32> to vector<1x1x256x128xf32>
    tpu.vector_store %arg4[%c0_17, %c0_18, %c0_19, %c0_20], %15 {strides = array<i32>} : memref<1x1x256x128xf32, #tpu.memory_space<vmem>>, vector<1x1x256x128xf32>,
    %c0_21 = arith.constant 0 : index
    %c0_22 = arith.constant 0 : index
    %c0_23 = arith.constant 0 : index
    %c1 = arith.constant 1 : index
    %c0_24 = arith.constant 0 : index
    %16 = vector.load %arg2[%c0_21, %c0_22, %c0_23, %c1, %c0_24] : memref<1x1x18x18x128xbf16, #tpu.memory_space<vmem>>, vector<1x1x16x16x128xbf16>
    %17 = vector.shape_cast %16 : vector<1x1x16x16x128xbf16> to vector<16x16x128xbf16>
    %18 = vector.shape_cast %17 : vector<16x16x128xbf16> to vector<256x128xbf16>
    %c0_25 = arith.constant 0 : index
    %c0_26 = arith.constant 0 : index
    %c0_27 = arith.constant 0 : index
    %c0_28 = arith.constant 0 : index
    %19 = vector.load %arg4[%c0_25, %c0_26, %c0_27, %c0_28] : memref<1x1x256x128xf32, #tpu.memory_space<vmem>>, vector<1x1x256x128xf32>
    %20 = vector.shape_cast %19 : vector<1x1x256x128xf32> to vector<256x128xf32>
    %c0_29 = arith.constant 0 : index
    %c1_30 = arith.constant 1 : index
    %c0_31 = arith.constant 0 : index
    %c0_32 = arith.constant 0 : index
    %21 = vector.load %arg3[%c0_29, %c1_30, %c0_31, %c0_32] : memref<3x3x128x128xbf16, #tpu.memory_space<vmem>>, vector<1x1x128x128xbf16>
    %22 = vector.shape_cast %21 : vector<1x1x128x128xbf16> to vector<128x128xbf16>
    %cst_33 = arith.constant dense<0.000000e+00> : vector<256x128xf32>
    %23 = tpu.matmul %18, %22, %cst_33 {dimension_numbers = #tpu.dot_dimension_numbers<[1], [0], [0], [1], [0, 0, 1, 1], [], []>} : vector<256x128xbf16>, vector<128x128xbf16>, vector<256x128xf32> -> vector<256x128xf32>
    %24 = arith.addf %20, %23 : vector<256x128xf32>
    %c0_34 = arith.constant 0 : index
    %c0_35 = arith.constant 0 : index
    %c0_36 = arith.constant 0 : index
    %c0_37 = arith.constant 0 : index
    %25 = vector.load %arg4[%c0_34, %c0_35, %c0_36, %c0_37] : memref<1x1x256x128xf32, #tpu.memory_space<vmem>>, vector<1x1x256x128xf32>
    %26 = vector.shape_cast %25 : vector<1x1x256x128xf32> to vector<256x128xf32>
    %27 = vector.shape_cast %24 : vector<256x128xf32> to vector<1x1x256x128xf32>
    tpu.vector_store %arg4[%c0_34, %c0_35, %c0_36, %c0_37], %27 {strides = array<i32>} : memref<1x1x256x128xf32, #tpu.memory_space<vmem>>, vector<1x1x256x128xf32>,
    %c0_38 = arith.constant 0 : index
    %c0_39 = arith.constant 0 : index
    %c0_40 = arith.constant 0 : index
    %c2 = arith.constant 2 : index
    %c0_41 = arith.constant 0 : index
    %28 = vector.load %arg2[%c0_38, %c0_39, %c0_40, %c2, %c0_41] : memref<1x1x18x18x128xbf16, #tpu.memory_space<vmem>>, vector<1x1x16x16x128xbf16>
    %29 = vector.shape_cast %28 : vector<1x1x16x16x128xbf16> to vector<16x16x128xbf16>
    %30 = vector.shape_cast %29 : vector<16x16x128xbf16> to vector<256x128xbf16>
    %c0_42 = arith.constant 0 : index
    %c0_43 = arith.constant 0 : index
    %c0_44 = arith.constant 0 : index
    %c0_45 = arith.constant 0 : index
    %31 = vector.load %arg4[%c0_42, %c0_43, %c0_44, %c0_45] : memref<1x1x256x128xf32, #tpu.memory_space<vmem>>, vector<1x1x256x128xf32>
    %32 = vector.shape_cast %31 : vector<1x1x256x128xf32> to vector<256x128xf32>
    %c0_46 = arith.constant 0 : index
    %c2_47 = arith.constant 2 : index
    %c0_48 = arith.constant 0 : index
    %c0_49 = arith.constant 0 : index
    %33 = vector.load %arg3[%c0_46, %c2_47, %c0_48, %c0_49] : memref<3x3x128x128xbf16, #tpu.memory_space<vmem>>, vector<1x1x128x128xbf16>
    %34 = vector.shape_cast %33 : vector<1x1x128x128xbf16> to vector<128x128xbf16>
    %cst_50 = arith.constant dense<0.000000e+00> : vector<256x128xf32>
    %35 = tpu.matmul %30, %34, %cst_50 {dimension_numbers = #tpu.dot_dimension_numbers<[1], [0], [0], [1], [0, 0, 1, 1], [], []>} : vector<256x128xbf16>, vector<128x128xbf16>, vector<256x128xf32> -> vector<256x128xf32>
    %36 = arith.addf %32, %35 : vector<256x128xf32>
    %c0_51 = arith.constant 0 : index
    %c0_52 = arith.constant 0 : index
    %c0_53 = arith.constant 0 : index
    %c0_54 = arith.constant 0 : index
    %37 = vector.load %arg4[%c0_51, %c0_52, %c0_53, %c0_54] : memref<1x1x256x128xf32, #tpu.memory_space<vmem>>, vector<1x1x256x128xf32>
    %38 = vector.shape_cast %37 : vector<1x1x256x128xf32> to vector<256x128xf32>
    %39 = vector.shape_cast %36 : vector<256x128xf32> to vector<1x1x256x128xf32>
    tpu.vector_store %arg4[%c0_51, %c0_52, %c0_53, %c0_54], %39 {strides = array<i32>} : memref<1x1x256x128xf32, #tpu.memory_space<vmem>>, vector<1x1x256x128xf32>,
    %c0_55 = arith.constant 0 : index
    %c0_56 = arith.constant 0 : index
    %c1_57 = arith.constant 1 : index
    %c0_58 = arith.constant 0 : index
    %c0_59 = arith.constant 0 : index
    %40 = vector.load %arg2[%c0_55, %c0_56, %c1_57, %c0_58, %c0_59] : memref<1x1x18x18x128xbf16, #tpu.memory_space<vmem>>, vector<1x1x16x16x128xbf16>
    %41 = vector.shape_cast %40 : vector<1x1x16x16x128xbf16> to vector<16x16x128xbf16>
    %42 = vector.shape_cast %41 : vector<16x16x128xbf16> to vector<256x128xbf16>
    %c0_60 = arith.constant 0 : index
    %c0_61 = arith.constant 0 : index
    %c0_62 = arith.constant 0 : index
    %c0_63 = arith.constant 0 : index
    %43 = vector.load %arg4[%c0_60, %c0_61, %c0_62, %c0_63] : memref<1x1x256x128xf32, #tpu.memory_space<vmem>>, vector<1x1x256x128xf32>
    %44 = vector.shape_cast %43 : vector<1x1x256x128xf32> to vector<256x128xf32>
    %c1_64 = arith.constant 1 : index
    %c0_65 = arith.constant 0 : index
    %c0_66 = arith.constant 0 : index
    %c0_67 = arith.constant 0 : index
    %45 = vector.load %arg3[%c1_64, %c0_65, %c0_66, %c0_67] : memref<3x3x128x128xbf16, #tpu.memory_space<vmem>>, vector<1x1x128x128xbf16>
    %46 = vector.shape_cast %45 : vector<1x1x128x128xbf16> to vector<128x128xbf16>
    %cst_68 = arith.constant dense<0.000000e+00> : vector<256x128xf32>
    %47 = tpu.matmul %42, %46, %cst_68 {dimension_numbers = #tpu.dot_dimension_numbers<[1], [0], [0], [1], [0, 0, 1, 1], [], []>} : vector<256x128xbf16>, vector<128x128xbf16>, vector<256x128xf32> -> vector<256x128xf32>
    %48 = arith.addf %44, %47 : vector<256x128xf32>
    %c0_69 = arith.constant 0 : index
    %c0_70 = arith.constant 0 : index
    %c0_71 = arith.constant 0 : index
    %c0_72 = arith.constant 0 : index
    %49 = vector.load %arg4[%c0_69, %c0_70, %c0_71, %c0_72] : memref<1x1x256x128xf32, #tpu.memory_space<vmem>>, vector<1x1x256x128xf32>
    %50 = vector.shape_cast %49 : vector<1x1x256x128xf32> to vector<256x128xf32>
    %51 = vector.shape_cast %48 : vector<256x128xf32> to vector<1x1x256x128xf32>
    tpu.vector_store %arg4[%c0_69, %c0_70, %c0_71, %c0_72], %51 {strides = array<i32>} : memref<1x1x256x128xf32, #tpu.memory_space<vmem>>, vector<1x1x256x128xf32>,
    %c0_73 = arith.constant 0 : index
    %c0_74 = arith.constant 0 : index
    %c1_75 = arith.constant 1 : index
    %c1_76 = arith.constant 1 : index
    %c0_77 = arith.constant 0 : index
    %52 = vector.load %arg2[%c0_73, %c0_74, %c1_75, %c1_76, %c0_77] : memref<1x1x18x18x128xbf16, #tpu.memory_space<vmem>>, vector<1x1x16x16x128xbf16>
    %53 = vector.shape_cast %52 : vector<1x1x16x16x128xbf16> to vector<16x16x128xbf16>
    %54 = vector.shape_cast %53 : vector<16x16x128xbf16> to vector<256x128xbf16>
    %c0_78 = arith.constant 0 : index
    %c0_79 = arith.constant 0 : index
    %c0_80 = arith.constant 0 : index
    %c0_81 = arith.constant 0 : index
    %55 = vector.load %arg4[%c0_78, %c0_79, %c0_80, %c0_81] : memref<1x1x256x128xf32, #tpu.memory_space<vmem>>, vector<1x1x256x128xf32>
    %56 = vector.shape_cast %55 : vector<1x1x256x128xf32> to vector<256x128xf32>
    %c1_82 = arith.constant 1 : index
    %c1_83 = arith.constant 1 : index
    %c0_84 = arith.constant 0 : index
    %c0_85 = arith.constant 0 : index
    %57 = vector.load %arg3[%c1_82, %c1_83, %c0_84, %c0_85] : memref<3x3x128x128xbf16, #tpu.memory_space<vmem>>, vector<1x1x128x128xbf16>
    %58 = vector.shape_cast %57 : vector<1x1x128x128xbf16> to vector<128x128xbf16>
    %cst_86 = arith.constant dense<0.000000e+00> : vector<256x128xf32>
    %59 = tpu.matmul %54, %58, %cst_86 {dimension_numbers = #tpu.dot_dimension_numbers<[1], [0], [0], [1], [0, 0, 1, 1], [], []>} : vector<256x128xbf16>, vector<128x128xbf16>, vector<256x128xf32> -> vector<256x128xf32>
    %60 = arith.addf %56, %59 : vector<256x128xf32>
    %c0_87 = arith.constant 0 : index
    %c0_88 = arith.constant 0 : index
    %c0_89 = arith.constant 0 : index
    %c0_90 = arith.constant 0 : index
    %61 = vector.load %arg4[%c0_87, %c0_88, %c0_89, %c0_90] : memref<1x1x256x128xf32, #tpu.memory_space<vmem>>, vector<1x1x256x128xf32>
    %62 = vector.shape_cast %61 : vector<1x1x256x128xf32> to vector<256x128xf32>
    %63 = vector.shape_cast %60 : vector<256x128xf32> to vector<1x1x256x128xf32>
    tpu.vector_store %arg4[%c0_87, %c0_88, %c0_89, %c0_90], %63 {strides = array<i32>} : memref<1x1x256x128xf32, #tpu.memory_space<vmem>>, vector<1x1x256x128xf32>,
    %c0_91 = arith.constant 0 : index
    %c0_92 = arith.constant 0 : index
    %c1_93 = arith.constant 1 : index
    %c2_94 = arith.constant 2 : index
    %c0_95 = arith.constant 0 : index
    %64 = vector.load %arg2[%c0_91, %c0_92, %c1_93, %c2_94, %c0_95] : memref<1x1x18x18x128xbf16, #tpu.memory_space<vmem>>, vector<1x1x16x16x128xbf16>
    %65 = vector.shape_cast %64 : vector<1x1x16x16x128xbf16> to vector<16x16x128xbf16>
    %66 = vector.shape_cast %65 : vector<16x16x128xbf16> to vector<256x128xbf16>
    %c0_96 = arith.constant 0 : index
    %c0_97 = arith.constant 0 : index
    %c0_98 = arith.constant 0 : index
    %c0_99 = arith.constant 0 : index
    %67 = vector.load %arg4[%c0_96, %c0_97, %c0_98, %c0_99] : memref<1x1x256x128xf32, #tpu.memory_space<vmem>>, vector<1x1x256x128xf32>
    %68 = vector.shape_cast %67 : vector<1x1x256x128xf32> to vector<256x128xf32>
    %c1_100 = arith.constant 1 : index
    %c2_101 = arith.constant 2 : index
    %c0_102 = arith.constant 0 : index
    %c0_103 = arith.constant 0 : index
    %69 = vector.load %arg3[%c1_100, %c2_101, %c0_102, %c0_103] : memref<3x3x128x128xbf16, #tpu.memory_space<vmem>>, vector<1x1x128x128xbf16>
    %70 = vector.shape_cast %69 : vector<1x1x128x128xbf16> to vector<128x128xbf16>
    %cst_104 = arith.constant dense<0.000000e+00> : vector<256x128xf32>
    %71 = tpu.matmul %66, %70, %cst_104 {dimension_numbers = #tpu.dot_dimension_numbers<[1], [0], [0], [1], [0, 0, 1, 1], [], []>} : vector<256x128xbf16>, vector<128x128xbf16>, vector<256x128xf32> -> vector<256x128xf32>
    %72 = arith.addf %68, %71 : vector<256x128xf32>
    %c0_105 = arith.constant 0 : index
    %c0_106 = arith.constant 0 : index
    %c0_107 = arith.constant 0 : index
    %c0_108 = arith.constant 0 : index
    %73 = vector.load %arg4[%c0_105, %c0_106, %c0_107, %c0_108] : memref<1x1x256x128xf32, #tpu.memory_space<vmem>>, vector<1x1x256x128xf32>
    %74 = vector.shape_cast %73 : vector<1x1x256x128xf32> to vector<256x128xf32>
    %75 = vector.shape_cast %72 : vector<256x128xf32> to vector<1x1x256x128xf32>
    tpu.vector_store %arg4[%c0_105, %c0_106, %c0_107, %c0_108], %75 {strides = array<i32>} : memref<1x1x256x128xf32, #tpu.memory_space<vmem>>, vector<1x1x256x128xf32>,
    %c0_109 = arith.constant 0 : index
    %c0_110 = arith.constant 0 : index
    %c2_111 = arith.constant 2 : index
    %c0_112 = arith.constant 0 : index
    %c0_113 = arith.constant 0 : index
    %76 = vector.load %arg2[%c0_109, %c0_110, %c2_111, %c0_112, %c0_113] : memref<1x1x18x18x128xbf16, #tpu.memory_space<vmem>>, vector<1x1x16x16x128xbf16>
    %77 = vector.shape_cast %76 : vector<1x1x16x16x128xbf16> to vector<16x16x128xbf16>
    %78 = vector.shape_cast %77 : vector<16x16x128xbf16> to vector<256x128xbf16>
    %c0_114 = arith.constant 0 : index
    %c0_115 = arith.constant 0 : index
    %c0_116 = arith.constant 0 : index
    %c0_117 = arith.constant 0 : index
    %79 = vector.load %arg4[%c0_114, %c0_115, %c0_116, %c0_117] : memref<1x1x256x128xf32, #tpu.memory_space<vmem>>, vector<1x1x256x128xf32>
    %80 = vector.shape_cast %79 : vector<1x1x256x128xf32> to vector<256x128xf32>
    %c2_118 = arith.constant 2 : index
    %c0_119 = arith.constant 0 : index
    %c0_120 = arith.constant 0 : index
    %c0_121 = arith.constant 0 : index
    %81 = vector.load %arg3[%c2_118, %c0_119, %c0_120, %c0_121] : memref<3x3x128x128xbf16, #tpu.memory_space<vmem>>, vector<1x1x128x128xbf16>
    %82 = vector.shape_cast %81 : vector<1x1x128x128xbf16> to vector<128x128xbf16>
    %cst_122 = arith.constant dense<0.000000e+00> : vector<256x128xf32>
    %83 = tpu.matmul %78, %82, %cst_122 {dimension_numbers = #tpu.dot_dimension_numbers<[1], [0], [0], [1], [0, 0, 1, 1], [], []>} : vector<256x128xbf16>, vector<128x128xbf16>, vector<256x128xf32> -> vector<256x128xf32>
    %84 = arith.addf %80, %83 : vector<256x128xf32>
    %c0_123 = arith.constant 0 : index
    %c0_124 = arith.constant 0 : index
    %c0_125 = arith.constant 0 : index
    %c0_126 = arith.constant 0 : index
    %85 = vector.load %arg4[%c0_123, %c0_124, %c0_125, %c0_126] : memref<1x1x256x128xf32, #tpu.memory_space<vmem>>, vector<1x1x256x128xf32>
    %86 = vector.shape_cast %85 : vector<1x1x256x128xf32> to vector<256x128xf32>
    %87 = vector.shape_cast %84 : vector<256x128xf32> to vector<1x1x256x128xf32>
    tpu.vector_store %arg4[%c0_123, %c0_124, %c0_125, %c0_126], %87 {strides = array<i32>} : memref<1x1x256x128xf32, #tpu.memory_space<vmem>>, vector<1x1x256x128xf32>,
    %c0_127 = arith.constant 0 : index
    %c0_128 = arith.constant 0 : index
    %c2_129 = arith.constant 2 : index
    %c1_130 = arith.constant 1 : index
    %c0_131 = arith.constant 0 : index
    %88 = vector.load %arg2[%c0_127, %c0_128, %c2_129, %c1_130, %c0_131] : memref<1x1x18x18x128xbf16, #tpu.memory_space<vmem>>, vector<1x1x16x16x128xbf16>
    %89 = vector.shape_cast %88 : vector<1x1x16x16x128xbf16> to vector<16x16x128xbf16>
    %90 = vector.shape_cast %89 : vector<16x16x128xbf16> to vector<256x128xbf16>
    %c0_132 = arith.constant 0 : index
    %c0_133 = arith.constant 0 : index
    %c0_134 = arith.constant 0 : index
    %c0_135 = arith.constant 0 : index
    %91 = vector.load %arg4[%c0_132, %c0_133, %c0_134, %c0_135] : memref<1x1x256x128xf32, #tpu.memory_space<vmem>>, vector<1x1x256x128xf32>
    %92 = vector.shape_cast %91 : vector<1x1x256x128xf32> to vector<256x128xf32>
    %c2_136 = arith.constant 2 : index
    %c1_137 = arith.constant 1 : index
    %c0_138 = arith.constant 0 : index
    %c0_139 = arith.constant 0 : index
    %93 = vector.load %arg3[%c2_136, %c1_137, %c0_138, %c0_139] : memref<3x3x128x128xbf16, #tpu.memory_space<vmem>>, vector<1x1x128x128xbf16>
    %94 = vector.shape_cast %93 : vector<1x1x128x128xbf16> to vector<128x128xbf16>
    %cst_140 = arith.constant dense<0.000000e+00> : vector<256x128xf32>
    %95 = tpu.matmul %90, %94, %cst_140 {dimension_numbers = #tpu.dot_dimension_numbers<[1], [0], [0], [1], [0, 0, 1, 1], [], []>} : vector<256x128xbf16>, vector<128x128xbf16>, vector<256x128xf32> -> vector<256x128xf32>
    %96 = arith.addf %92, %95 : vector<256x128xf32>
    %c0_141 = arith.constant 0 : index
    %c0_142 = arith.constant 0 : index
    %c0_143 = arith.constant 0 : index
    %c0_144 = arith.constant 0 : index
    %97 = vector.load %arg4[%c0_141, %c0_142, %c0_143, %c0_144] : memref<1x1x256x128xf32, #tpu.memory_space<vmem>>, vector<1x1x256x128xf32>
    %98 = vector.shape_cast %97 : vector<1x1x256x128xf32> to vector<256x128xf32>
    %99 = vector.shape_cast %96 : vector<256x128xf32> to vector<1x1x256x128xf32>
    tpu.vector_store %arg4[%c0_141, %c0_142, %c0_143, %c0_144], %99 {strides = array<i32>} : memref<1x1x256x128xf32, #tpu.memory_space<vmem>>, vector<1x1x256x128xf32>,
    %c0_145 = arith.constant 0 : index
    %c0_146 = arith.constant 0 : index
    %c2_147 = arith.constant 2 : index
    %c2_148 = arith.constant 2 : index
    %c0_149 = arith.constant 0 : index
    %100 = vector.load %arg2[%c0_145, %c0_146, %c2_147, %c2_148, %c0_149] : memref<1x1x18x18x128xbf16, #tpu.memory_space<vmem>>, vector<1x1x16x16x128xbf16>
    %101 = vector.shape_cast %100 : vector<1x1x16x16x128xbf16> to vector<16x16x128xbf16>
    %102 = vector.shape_cast %101 : vector<16x16x128xbf16> to vector<256x128xbf16>
    %c0_150 = arith.constant 0 : index
    %c0_151 = arith.constant 0 : index
    %c0_152 = arith.constant 0 : index
    %c0_153 = arith.constant 0 : index
    %103 = vector.load %arg4[%c0_150, %c0_151, %c0_152, %c0_153] : memref<1x1x256x128xf32, #tpu.memory_space<vmem>>, vector<1x1x256x128xf32>
    %104 = vector.shape_cast %103 : vector<1x1x256x128xf32> to vector<256x128xf32>
    %c2_154 = arith.constant 2 : index
    %c2_155 = arith.constant 2 : index
    %c0_156 = arith.constant 0 : index
    %c0_157 = arith.constant 0 : index
    %105 = vector.load %arg3[%c2_154, %c2_155, %c0_156, %c0_157] : memref<3x3x128x128xbf16, #tpu.memory_space<vmem>>, vector<1x1x128x128xbf16>
    %106 = vector.shape_cast %105 : vector<1x1x128x128xbf16> to vector<128x128xbf16>
    %cst_158 = arith.constant dense<0.000000e+00> : vector<256x128xf32>
    %107 = tpu.matmul %102, %106, %cst_158 {dimension_numbers = #tpu.dot_dimension_numbers<[1], [0], [0], [1], [0, 0, 1, 1], [], []>} : vector<256x128xbf16>, vector<128x128xbf16>, vector<256x128xf32> -> vector<256x128xf32>
    %108 = arith.addf %104, %107 : vector<256x128xf32>
    %c0_159 = arith.constant 0 : index
    %c0_160 = arith.constant 0 : index
    %c0_161 = arith.constant 0 : index
    %c0_162 = arith.constant 0 : index
    %109 = vector.load %arg4[%c0_159, %c0_160, %c0_161, %c0_162] : memref<1x1x256x128xf32, #tpu.memory_space<vmem>>, vector<1x1x256x128xf32>
    %110 = vector.shape_cast %109 : vector<1x1x256x128xf32> to vector<256x128xf32>
    %111 = vector.shape_cast %108 : vector<256x128xf32> to vector<1x1x256x128xf32>
    tpu.vector_store %arg4[%c0_159, %c0_160, %c0_161, %c0_162], %111 {strides = array<i32>} : memref<1x1x256x128xf32, #tpu.memory_space<vmem>>, vector<1x1x256x128xf32>,
    %c0_163 = arith.constant 0 : index
    %c0_164 = arith.constant 0 : index
    %c0_165 = arith.constant 0 : index
    %c0_166 = arith.constant 0 : index
    %112 = vector.load %arg4[%c0_163, %c0_164, %c0_165, %c0_166] : memref<1x1x256x128xf32, #tpu.memory_space<vmem>>, vector<1x1x256x128xf32>
    %113 = vector.shape_cast %112 : vector<1x1x256x128xf32> to vector<256x128xf32>
    %cst_167 = arith.constant dense<0.000000e+00> : vector<128xf32>
    %114 = vector.multi_reduction <add>, %113, %cst_167 [0] : vector<256x128xf32> to vector<128xf32>
    %115 = vector.shape_cast %114 : vector<128xf32> to vector<1x128xf32>
    %c0_168 = arith.constant 0 : index
    %c0_169 = arith.constant 0 : index
    %c0_170 = arith.constant 0 : index
    %c0_171 = arith.constant 0 : index
    %116 = vector.load %arg5[%c0_168, %c0_169, %c0_170, %c0_171] : memref<1x1x2x128xf32, #tpu.memory_space<vmem>>, vector<1x1x1x128xf32>
    %117 = vector.shape_cast %116 : vector<1x1x1x128xf32> to vector<1x128xf32>
    %118 = vector.shape_cast %115 : vector<1x128xf32> to vector<1x1x1x128xf32>
    tpu.vector_store %arg5[%c0_168, %c0_169, %c0_170, %c0_171], %118 {strides = array<i32>} : memref<1x1x2x128xf32, #tpu.memory_space<vmem>>, vector<1x1x1x128xf32>,
    %119 = arith.mulf %113, %113 : vector<256x128xf32>
    %cst_172 = arith.constant dense<0.000000e+00> : vector<128xf32>
    %120 = vector.multi_reduction <add>, %119, %cst_172 [0] : vector<256x128xf32> to vector<128xf32>
    %121 = vector.shape_cast %120 : vector<128xf32> to vector<1x128xf32>
    %c0_173 = arith.constant 0 : index
    %c0_174 = arith.constant 0 : index
    %c1_175 = arith.constant 1 : index
    %c0_176 = arith.constant 0 : index
    %122 = vector.load %arg5[%c0_173, %c0_174, %c1_175, %c0_176] : memref<1x1x2x128xf32, #tpu.memory_space<vmem>>, vector<1x1x1x128xf32>
    %123 = vector.shape_cast %122 : vector<1x1x1x128xf32> to vector<1x128xf32>
    %124 = vector.shape_cast %121 : vector<1x128xf32> to vector<1x1x1x128xf32>
    tpu.vector_store %arg5[%c0_173, %c0_174, %c1_175, %c0_176], %124 {strides = array<i32>} : memref<1x1x2x128xf32, #tpu.memory_space<vmem>>, vector<1x1x1x128xf32>,
    return
  }
  func.func @transform_0(%arg0: i32, %arg1: i32) -> (i32, i32, i32, i32, i32) {
    %c0_i32 = arith.constant 0 : i32
    %c0_i32_0 = arith.constant 0 : i32
    %c0_i32_1 = arith.constant 0 : i32
    %c0_i32_2 = arith.constant 0 : i32
    return %arg0, %arg1, %c0_i32, %c0_i32_0, %c0_i32_1 : i32, i32, i32, i32, i32
  }
  func.func @transform_1(%arg0: i32, %arg1: i32) -> (i32, i32, i32, i32) {
    %c0_i32 = arith.constant 0 : i32
    %c0_i32_0 = arith.constant 0 : i32
    %c0_i32_1 = arith.constant 0 : i32
    %c0_i32_2 = arith.constant 0 : i32
    %c0_i32_3 = arith.constant 0 : i32
    return %c0_i32, %c0_i32_0, %c0_i32_1, %c0_i32_2 : i32, i32, i32, i32
  }
  func.func @transform_2(%arg0: i32, %arg1: i32) -> (i32, i32, i32, i32) {
    %c0_i32 = arith.constant 0 : i32
    %c0_i32_0 = arith.constant 0 : i32
    %c0_i32_1 = arith.constant 0 : i32
    return %arg0, %arg1, %c0_i32, %c0_i32_0 : i32, i32, i32, i32
  }
  func.func @transform_3(%arg0: i32, %arg1: i32) -> (i32, i32, i32, i32) {
    %c0_i32 = arith.constant 0 : i32
    %c0_i32_0 = arith.constant 0 : i32
    %c0_i32_1 = arith.constant 0 : i32
    return %arg0, %arg1, %c0_i32, %c0_i32_0 : i32, i32, i32, i32
  }
}

</mosaic_0001>

<bundles_post_ra>
// kernel: unet_conv_block_forward.5
= control target key start
LH: loop header
LB: loop body
LE: loop exit
PB: predicated region body
PF: predicated region fallthrough
CT: control target
= control target key end

     0   :  { %s556_s12 = smov 0   ;;  %s558_s13 = smov 0   ;;  %s731_s0 = inlined_call_operand.vmem [shape: f32[2,1,256,128], index: 0, kind: input, shape index: {}]   ;;  %s732_s1 = inlined_call_operand.vmem [shape: f32[1,128], index: 1, kind: input, shape index: {}]   ;;  %s733_s2 = inlined_call_operand.vmem [shape: f32[1,128], index: 2, kind: input, shape index: {}]   ;;  %s734_s3 = inlined_call_operand.vmem [shape: f32[2,1,256,128], index: 3, kind: output, shape index: {}]  }
   0x1   :  { %s560_s14 = smov 0  }
   0x2 LB: > { %s25_s15 = sadd.s32 1, %s530_s13  ;;  %p477_p0 = scmp.ge.s32.totalorder %s534_s14, 1  ;;  %s534_s14 = sphi %s560_s14, %s13_s14   ;;  %s530_s13 = sphi %s558_s13, %s736_s13   ;;  %s526_s12 = sphi %s556_s12, %s735_s12  }
   0x3   : > { %p27_p1 = scmp.ge.s32.totalorder %s25_s15, 2  ;;  %p157_p2 = scmp.lt.s32.totalorder %s534_s14, 3 }
   0x5   : > { %s738_s15 = smov (%p27_p1, %s25_s15), 0  ;;  %p158_p3 = pnand %p477_p0, %p157_p2 }
   0x6   : > { %p189_p4 = scmp.lt.s32.totalorder (!%p158_p3), %s526_s12, 1  ;;  %v577_v0 = vld [vmem:[%s732_s1] ss:$0 sm:$0xff] (!%p158_p3) }
   0x7   : > { %161 = sbr.rel (%p158_p3) target bundleno = 47 (0x2f), region = 32  ;;  %v587_v1 = vld [vmem:[%s733_s2] ss:$0 sm:$0xff] (!%p158_p3) }
   0xe   : > { %s740_s12 = smov (!%p189_p4, %s526_s12), 1 }
   0xf   : > { %s486_s16 = sshll.u32 %s740_s12, 8 }
  0x10   : > { %s582_s21 = scalar_lea.vmem %s731_s0, %s486_s16  ;;  %s610_s26 = scalar_lea.vmem %s734_s3, %s486_s16 }
  0x11   : > { %v207_v2 = vld [vmem:[%s582_s21] sm:$0xff]  ;;  %v208_v3 = vld [vmem:[%s582_s21 + $0x8] sm:$0xff]  ;;  %v209_v4 = vld [vmem:[%s582_s21 + $0x10] sm:$0xff] }
  0x12   : > { %v246_v5 = vmul.f32 %v577_v0, %v207_v2  ;;  %v247_v6 = vmul.f32 %v577_v0, %v208_v3  ;;  %v248_v7 = vmul.f32 %v577_v0, %v209_v4  ;;  %v210_v8 = vld [vmem:[%s582_s21 + $0x18] sm:$0xff]  ;;  %v211_v9 = vld [vmem:[%s582_s21 + $0x20] sm:$0xff]  ;;  %v212_v10 = vld [vmem:[%s582_s21 + $0x28] sm:$0xff] }
  0x13   : > { %v249_v11 = vmul.f32 %v577_v0, %v210_v8  ;;  %v250_v12 = vmul.f32 %v577_v0, %v211_v9  ;;  %v251_v13 = vmul.f32 %v577_v0, %v212_v10  ;;  %v213_v14 = vld [vmem:[%s582_s21 + $0x30] sm:$0xff]  ;;  %v214_v15 = vld [vmem:[%s582_s21 + $0x38] sm:$0xff]  ;;  %v215_v24 = vld [vmem:[%s582_s21 + $0x40] sm:$0xff] }
  0x14   : > { %v285_v16 = vadd.f32 %v587_v1, %v246_v5  ;;  %v286_v17 = vadd.f32 %v587_v1, %v247_v6  ;;  %v287_v18 = vadd.f32 %v587_v1, %v248_v7  ;;  %v252_v19 = vmul.f32 %v577_v0, %v213_v14  ;;  %v216_v25 = vld [vmem:[%s582_s21 + $0x48] sm:$0xff]  ;;  %v217_v26 = vld [vmem:[%s582_s21 + $0x50] sm:$0xff]  ;;  %v218_v31 = vld [vmem:[%s582_s21 + $0x58] sm:$0xff] }
  0x15   : > { %v288_v20 = vadd.f32 %v587_v1, %v249_v11  ;;  %v289_v21 = vadd.f32 %v587_v1, %v250_v12  ;;  %v290_v22 = vadd.f32 %v587_v1, %v251_v13  ;;  %v253_v23 = vmul.f32 %v577_v0, %v214_v15  ;;  %v219_v32 = vld [vmem:[%s582_s21 + $0x60] sm:$0xff]  ;;  %v220_v33 = vld [vmem:[%s582_s21 + $0x68] sm:$0xff]  ;;  %v221_v38 = vld [vmem:[%s582_s21 + $0x70] sm:$0xff] }
  0x16   : > { %v317_v27 = vmax.f32 %v285_v16, 0.0  ;;  %v318_v28 = vmax.f32 %v286_v17, 0.0  ;;  %v319_v29 = vmax.f32 %v287_v18, 0.0  ;;  %v291_v30 = vadd.f32 %v587_v1, %v252_v19  ;;  %v222_v43 = vld [vmem:[%s582_s21 + $0x78] sm:$0xff]  ;;  %v223_v56 = vld [vmem:[%s582_s21 + $0x80] sm:$0xff]  ;;  %v224_v57 = vld [vmem:[%s582_s21 + $0x88] sm:$0xff] }
  0x17   : > { %v320_v34 = vmax.f32 %v288_v20, 0.0  ;;  %v321_v35 = vmax.f32 %v289_v21, 0.0  ;;  %v322_v36 = vmax.f32 %v290_v22, 0.0  ;;  %v292_v37 = vadd.f32 %v587_v1, %v253_v23  ;;  %v225_v58 = vld [vmem:[%s582_s21 + $0x90] sm:$0xff]  ;;  %v226_v63 = vld [vmem:[%s582_s21 + $0x98] sm:$0xff]  ;;  %v227_v2 = vld [vmem:[%s582_s21 + $0xa0] sm:$0xff] }
  0x18   : > { %349 = vst [vmem:[%s610_s26] sm:$0xff] %v317_v27  ;;  %350 = vst [vmem:[%s610_s26 + $0x8] sm:$0xff] %v318_v28  ;;  %v323_v39 = vmax.f32 %v291_v30, 0.0  ;;  %v254_v40 = vmul.f32 %v577_v0, %v215_v24  ;;  %v255_v41 = vmul.f32 %v577_v0, %v216_v25  ;;  %v256_v42 = vmul.f32 %v577_v0, %v217_v26  ;;  %v228_v3 = vld [vmem:[%s582_s21 + $0xa8] sm:$0xff]  ;;  %v229_v8 = vld [vmem:[%s582_s21 + $0xb0] sm:$0xff] }
  0x19   : > { %351 = vst [vmem:[%s610_s26 + $0x10] sm:$0xff] %v319_v29  ;;  %352 = vst [vmem:[%s610_s26 + $0x18] sm:$0xff] %v320_v34  ;;  %v324_v44 = vmax.f32 %v292_v37, 0.0  ;;  %v257_v45 = vmul.f32 %v577_v0, %v218_v31  ;;  %v258_v46 = vmul.f32 %v577_v0, %v219_v32  ;;  %v259_v47 = vmul.f32 %v577_v0, %v220_v33  ;;  %v230_v13 = vld [vmem:[%s582_s21 + $0xb8] sm:$0xff]  ;;  %v231_v26 = vld [vmem:[%s582_s21 + $0xc0] sm:$0xff] }
  0x1a   : > { %353 = vst [vmem:[%s610_s26 + $0x20] sm:$0xff] %v321_v35  ;;  %354 = vst [vmem:[%s610_s26 + $0x28] sm:$0xff] %v322_v36  ;;  %v293_v48 = vadd.f32 %v587_v1, %v254_v40  ;;  %v294_v49 = vadd.f32 %v587_v1, %v255_v41  ;;  %v295_v50 = vadd.f32 %v587_v1, %v256_v42  ;;  %v232_v27 = vld [vmem:[%s582_s21 + $0xc8] sm:$0xff]  ;;  %v233_v28 = vld [vmem:[%s582_s21 + $0xd0] sm:$0xff] }
  0x1b   : > { %355 = vst [vmem:[%s610_s26 + $0x30] sm:$0xff] %v323_v39  ;;  %v260_v51 = vmul.f32 %v577_v0, %v221_v38  ;;  %356 = vst [vmem:[%s610_s26 + $0x38] sm:$0xff] %v324_v44  ;;  %v296_v52 = vadd.f32 %v587_v1, %v257_v45  ;;  %v297_v53 = vadd.f32 %v587_v1, %v258_v46  ;;  %v234_v33 = vld [vmem:[%s582_s21 + $0xd8] sm:$0xff]  ;;  %v235_v34 = vld [vmem:[%s582_s21 + $0xe0] sm:$0xff] }
  0x1c   : > { %v298_v54 = vadd.f32 %v587_v1, %v259_v47  ;;  %v261_v55 = vmul.f32 %v577_v0, %v222_v43  ;;  %v325_v59 = vmax.f32 %v293_v48, 0.0  ;;  %v326_v60 = vmax.f32 %v294_v49, 0.0  ;;  %v236_v35 = vld [vmem:[%s582_s21 + $0xe8] sm:$0xff]  ;;  %v237_v40 = vld [vmem:[%s582_s21 + $0xf0] sm:$0xff]  ;;  %v238_v45 = vld [vmem:[%s582_s21 + $0xf8] sm:$0xff] }
  0x1d   : > { %v327_v61 = vmax.f32 %v295_v50, 0.0  ;;  %v299_v62 = vadd.f32 %v587_v1, %v260_v51  ;;  %v328_v4 = vmax.f32 %v296_v52, 0.0  ;;  %v329_v5 = vmax.f32 %v297_v53, 0.0 }
  0x1e   : > { %v330_v6 = vmax.f32 %v298_v54, 0.0  ;;  %v300_v7 = vadd.f32 %v587_v1, %v261_v55  ;;  %357 = vst [vmem:[%s610_s26 + $0x40] sm:$0xff] %v325_v59  ;;  %358 = vst [vmem:[%s610_s26 + $0x48] sm:$0xff] %v326_v60  ;;  %v262_v10 = vmul.f32 %v577_v0, %v223_v56  ;;  %v263_v11 = vmul.f32 %v577_v0, %v224_v57 }
  0x1f   : > { %359 = vst [vmem:[%s610_s26 + $0x50] sm:$0xff] %v327_v61  ;;  %v331_v9 = vmax.f32 %v299_v62, 0.0  ;;  %v264_v12 = vmul.f32 %v577_v0, %v225_v58  ;;  %360 = vst [vmem:[%s610_s26 + $0x58] sm:$0xff] %v328_v4  ;;  %v265_v15 = vmul.f32 %v577_v0, %v226_v63  ;;  %v266_v16 = vmul.f32 %v577_v0, %v227_v2 }
  0x20   : > { %361 = vst [vmem:[%s610_s26 + $0x60] sm:$0xff] %v329_v5  ;;  %362 = vst [vmem:[%s610_s26 + $0x68] sm:$0xff] %v330_v6  ;;  %v332_v14 = vmax.f32 %v300_v7, 0.0  ;;  %v267_v17 = vmul.f32 %v577_v0, %v228_v3  ;;  %v301_v18 = vadd.f32 %v587_v1, %v262_v10  ;;  %v302_v19 = vadd.f32 %v587_v1, %v263_v11 }
  0x21   : > { %363 = vst [vmem:[%s610_s26 + $0x70] sm:$0xff] %v331_v9  ;;  %v303_v20 = vadd.f32 %v587_v1, %v264_v12  ;;  %v268_v21 = vmul.f32 %v577_v0, %v229_v8  ;;  %v304_v22 = vadd.f32 %v587_v1, %v265_v15  ;;  %v305_v23 = vadd.f32 %v587_v1, %v266_v16 }
  0x22   : > { %364 = vst [vmem:[%s610_s26 + $0x78] sm:$0xff] %v332_v14  ;;  %v306_v24 = vadd.f32 %v587_v1, %v267_v17  ;;  %v269_v25 = vmul.f32 %v577_v0, %v230_v13  ;;  %v333_v29 = vmax.f32 %v301_v18, 0.0  ;;  %v334_v30 = vmax.f32 %v302_v19, 0.0 }
  0x23   : > { %v335_v31 = vmax.f32 %v303_v20, 0.0  ;;  %v307_v32 = vadd.f32 %v587_v1, %v268_v21  ;;  %v336_v36 = vmax.f32 %v304_v22, 0.0  ;;  %v337_v37 = vmax.f32 %v305_v23, 0.0 }
  0x24   : > { %v338_v38 = vmax.f32 %v306_v24, 0.0  ;;  %v308_v39 = vadd.f32 %v587_v1, %v269_v25  ;;  %365 = vst [vmem:[%s610_s26 + $0x80] sm:$0xff] %v333_v29  ;;  %366 = vst [vmem:[%s610_s26 + $0x88] sm:$0xff] %v334_v30  ;;  %v270_v42 = vmul.f32 %v577_v0, %v231_v26  ;;  %v271_v43 = vmul.f32 %v577_v0, %v232_v27 }
  0x25   : > { %367 = vst [vmem:[%s610_s26 + $0x90] sm:$0xff] %v335_v31  ;;  %v339_v41 = vmax.f32 %v307_v32, 0.0  ;;  %v272_v44 = vmul.f32 %v577_v0, %v233_v28  ;;  %368 = vst [vmem:[%s610_s26 + $0x98] sm:$0xff] %v336_v36  ;;  %v273_v47 = vmul.f32 %v577_v0, %v234_v33  ;;  %v274_v48 = vmul.f32 %v577_v0, %v235_v34 }
  0x26   : > { %369 = vst [vmem:[%s610_s26 + $0xa0] sm:$0xff] %v337_v37  ;;  %370 = vst [vmem:[%s610_s26 + $0xa8] sm:$0xff] %v338_v38  ;;  %v340_v46 = vmax.f32 %v308_v39, 0.0  ;;  %v275_v49 = vmul.f32 %v577_v0, %v236_v35  ;;  %v309_v50 = vadd.f32 %v587_v1, %v270_v42  ;;  %v310_v51 = vadd.f32 %v587_v1, %v271_v43 }
  0x27   : > { %371 = vst [vmem:[%s610_s26 + $0xb0] sm:$0xff] %v339_v41  ;;  %v311_v52 = vadd.f32 %v587_v1, %v272_v44  ;;  %v276_v53 = vmul.f32 %v577_v0, %v237_v40  ;;  %v312_v54 = vadd.f32 %v587_v1, %v273_v47  ;;  %v313_v55 = vadd.f32 %v587_v1, %v274_v48 }
  0x28   : > { %372 = vst [vmem:[%s610_s26 + $0xb8] sm:$0xff] %v340_v46  ;;  %v314_v56 = vadd.f32 %v587_v1, %v275_v49  ;;  %v277_v57 = vmul.f32 %v577_v0, %v238_v45  ;;  %v341_v58 = vmax.f32 %v309_v50, 0.0  ;;  %v342_v59 = vmax.f32 %v310_v51, 0.0 }
  0x29   : > { %v343_v60 = vmax.f32 %v311_v52, 0.0  ;;  %v315_v61 = vadd.f32 %v587_v1, %v276_v53  ;;  %v344_v62 = vmax.f32 %v312_v54, 0.0  ;;  %v345_v63 = vmax.f32 %v313_v55, 0.0 }
  0x2a   : > { %v346_v2 = vmax.f32 %v314_v56, 0.0  ;;  %v316_v3 = vadd.f32 %v587_v1, %v277_v57  ;;  %373 = vst [vmem:[%s610_s26 + $0xc0] sm:$0xff] %v341_v58  ;;  %374 = vst [vmem:[%s610_s26 + $0xc8] sm:$0xff] %v342_v59 }
  0x2b   : > { %375 = vst [vmem:[%s610_s26 + $0xd0] sm:$0xff] %v343_v60  ;;  %v347_v4 = vmax.f32 %v315_v61, 0.0  ;;  %376 = vst [vmem:[%s610_s26 + $0xd8] sm:$0xff] %v344_v62 }
  0x2c   : > { %377 = vst [vmem:[%s610_s26 + $0xe0] sm:$0xff] %v345_v63  ;;  %378 = vst [vmem:[%s610_s26 + $0xe8] sm:$0xff] %v346_v2  ;;  %v348_v0 = vmax.f32 %v316_v3, 0.0 }
  0x2d   : > { %379 = vst [vmem:[%s610_s26 + $0xf0] sm:$0xff] %v347_v4 }
  0x2e   : > { %380 = vst [vmem:[%s610_s26 + $0xf8] sm:$0xff] %v348_v0 }
  0x2f PF: > { %s13_s14 = sadd.s32 1, %s534_s14   ;;  %s735_s12 = smov %s530_s13 }
  0x30   : > { %p10_p5 = scmp.ge.s32.totalorder %s13_s14, 4   ;;  %s736_s13 = smov %s738_s15 }
  0x32   :  { %12 = sbr.rel (!%p10_p5) target bundleno = 2 (0x2), region = 62 }

// kernel: unet_conv_block_forward.4
= control target key start
LH: loop header
LB: loop body
LE: loop exit
PB: predicated region body
PF: predicated region fallthrough
CT: control target
= control target key end

     0   :  { %s7493_s12 = smov 0   ;;  %s7495_s13 = smov 0   ;;  %s8834_s0 = inlined_call_operand.vmem [shape: bf16[2,1,18,18,4], index: 0, kind: input, shape index: {}]   ;;  %s8835_s1 = inlined_call_operand.vmem [shape: bf16[3,3,4,128], index: 1, kind: input, shape index: {}]   ;;  %s8836_s2 = inlined_call_operand.vmem [shape: f32[2,1,256,128], index: 2, kind: output, shape index: {0}]   ;;  %s8837_s3 = inlined_call_operand.vmem [shape: f32[2,1,2,128], index: 3, kind: output, shape index: {1}]  }
   0x1   :  { %s7497_s14 = smov 0  }
   0x2 LB: > { %s26_s15 = sadd.s32 1, %s7467_s13  ;;  %p5879_p0 = scmp.ge.s32.totalorder %s7471_s14, 1  ;;  %s7471_s14 = sphi %s7497_s14, %s14_s14   ;;  %s7467_s13 = sphi %s7495_s13, %s8843_s13   ;;  %s7463_s12 = sphi %s7493_s12, %s8842_s12  }
   0x3   : > { %p28_p1 = scmp.ge.s32.totalorder %s26_s15, 2  ;;  %p162_p2 = scmp.lt.s32.totalorder %s7471_s14, 3 }
   0x5   : > { %s8845_s15 = smov (%p28_p1, %s26_s15), 0  ;;  %p163_p3 = pnand %p5879_p0, %p162_p2 }
   0x6   : > { %v323_v0 = vld [vmem:[%s8835_s1] sm:$0x3] (!%p163_p3)  ;;  %vm453_vm0 = vcmask (!%p163_p3), 1041408   ;;  %p201_p4 = scmp.lt.s32.totalorder (!%p163_p3), %s7463_s12, 1  ;;  %v5916_v2 = vld [vmem:[%s8835_s1 + $0x2] sm:$0x3] (!%p163_p3) }
   0x7   : > { %166 = sbr.rel (%p163_p3) target bundleno = 559 (0x22f), region = 28  ;;  %7364 = vmatprep.subr.msk.bf16.mxu1 (!%p163_p3), %vm453_vm0, %v323_v0  ;;  %v455_v1 = vsel (!%p163_p3), %vm453_vm0, %v323_v0, 0  ;;  %v6111_v3 = vld [vmem:[%s8835_s1 + $0x8] sm:$0x3] (!%p163_p3)  ;;  %v6208_v5 = vld [vmem:[%s8835_s1 + $0xa] sm:$0x3] (!%p163_p3) }
   0x8   : > { %6641 = vmatpush3.bf16.msra.mxu1 (!%p163_p3), %v455_v1  ;;  %7368 = vmatprep.subr.msk.bf16.mxu0 (!%p163_p3), %vm453_vm0, %v6111_v3  ;;  %v7526_v4 = vsel (!%p163_p3), %vm453_vm0, %v6111_v3, 0  ;;  %vm404_vm1 = vcmask (!%p163_p3), 31744   ;;  %vm730_vm2 = vsmask.f32 (!%p163_p3), 3328  ;;  %vm731_vm3 = vsmask.f32 (!%p163_p3), 7440 }
   0x9   : > { %7365 = vmatprep.subr.msk.bf16.mxu1 (!%p163_p3), %vm453_vm0, %v5916_v2  ;;  %6777 = vmatpush3.bf16.msra.mxu0 (!%p163_p3), %v7526_v4  ;;  %v7543_v6 = vld [vmem:[%s8835_s1 + $0xc] sm:$0x3] (!%p163_p3)  ;;  %v5965_v7 = vld [vmem:[%s8835_s1 + $0x4] sm:$0x3] (!%p163_p3)  ;;  %v7551_v8 = vld [vmem:[%s8835_s1 + $0xe] sm:$0x3] (!%p163_p3) }
   0xa   : > { %7370 = vmatprep.subr.msk.bf16.mxu0 (!%p163_p3), %vm453_vm0, %v6208_v5  ;;  %v1248_v10 = vsel (!%p163_p3), %vm453_vm0, %v5916_v2, 0  ;;  %v7557_v12 = vsel (!%p163_p3), %vm453_vm0, %v6208_v5, 0  ;;  %v7563_v14 = vsel (!%p163_p3), %vm453_vm0, %v7543_v6, 0  ;;  %v7567_v15 = vsel (!%p163_p3), %vm453_vm0, %v5965_v7, 0  ;;  %vm7585_vm4 = vmor (!%p163_p3), %vm730_vm2, %vm731_vm3 }
   0xb   : > { %v7571_v16 = vsel (!%p163_p3), %vm453_vm0, %v7551_v8, 0  ;;  %vm1571_vm5 = vcmask (!%p163_p3), 1042432   ;;  %vm1572_vm6 = vcmask (!%p163_p3), 1046532  }
   0xc   : > { %vm7660_vm7 = vmor (!%p163_p3), %vm1571_vm5, %vm1572_vm6 }
   0xe   : > { %s8847_s12 = smov (!%p201_p4, %s7463_s12), 1 }
   0xf   : > { %s7374_s24 = smul.u32 216, %s8847_s12  ;;  %s6486_s17 = sshll.u32 %s8847_s12, 8 }
  0x10   : > { %s8782_s20 = scalar_lea.vmem %s8836_s2, %s6486_s17  ;;  %s5883_s21 = sshll.u32 %s8847_s12, 1 }
  0x11   : > { %s7538_s27 = scalar_lea.vmem %s8834_s0, %s7374_s24  ;;  %s225_s24 = scalar_lea.vmem %s8837_s3, %s5883_s21 }
  0x12   : > { %v7400_v9 = vld [vmem:[%s7538_s27] sm:$0xff]   ;;  %v7401_v11 = vld [vmem:[%s7538_s27 + $0xc] sm:$0xff]   ;;  %v7402_v13 = vld [vmem:[%s7538_s27 + $0x18] sm:$0xff]  }
  0x13   : > { %6642 = vmatprep.mubr.msk.bf16.mxu1 %vm404_vm1, %v7400_v9  ;;  %v6063_v17 = vld [vmem:[%s7538_s27 + $0xc] sm:$0xf]  ;;  %v6064_v18 = vld [vmem:[%s7538_s27 + $0x10] sm:$0xf]  ;;  %v6065_v19 = vld [vmem:[%s7538_s27 + $0x14] sm:$0x1] }
  0x14   : > { %6643 = vmatmul.mubr.msk.bf16.vlgmr.msra.gmra.mrb[0].mxu1 %vm404_vm1, %v7401_v11  ;;  %v7403_v20 = vld [vmem:[%s7538_s27 + $0x24] sm:$0xff]   ;;  %v2516_v21 = vshrl.u32 %v6063_v17, 16  ;;  %v2519_v22 = vshll.u32 %v6063_v17, 16  ;;  %v2525_v23 = vshll.u32 %v6064_v18, 16  ;;  %v2529_v24 = vshrl.u32 %v6064_v18, 16  ;;  %v7404_v42 = vld [vmem:[%s7538_s27 + $0x30] sm:$0xff]  }
  0x15   : > { %6675 = vmatpush3.bf16.msra.mxu1 %v1248_v10  ;;  %6646 = vmatprep.mubr.msk.bf16.mxu1 %vm404_vm1, %v7402_v13  ;;  %v6066_v25 = vld [vmem:[%s7538_s27 + $0x18] sm:$0xf]  ;;  %v2535_v26 = vshll.u32 %v6065_v19, 16  ;;  %v6067_v27 = vld [vmem:[%s7538_s27 + $0x1c] sm:$0xf] }
  0x16   : > { %7366 = vmatprep.subr.msk.bf16.mxu1 %vm453_vm0, %v5965_v7  ;;  %v6068_v28 = vld [vmem:[%s7538_s27 + $0x20] sm:$0x1]  ;;  %v2540_v29 = vshrl.u32 %v6066_v25, 16  ;;  %v2518_v30 = vrot.slane %v2516_v21, 4  ;;  %v2521_v31 = vrot.slane %v2519_v22, 5  ;;  %v2527_v32 = vrot.slane %v2525_v23, 5 }
  0x17   : > { %v2531_v33 = vrot.slane %v2529_v24, 4  ;;  %v2537_v34 = vrot.slane %v2535_v26, 5  ;;  %v2543_v36 = vshll.u32 %v6066_v25, 16  ;;  %v2549_v37 = vshll.u32 %v6067_v27, 16  ;;  %v6069_v46 = vld [vmem:[%s7538_s27 + $0x24] sm:$0xf] }
  0x18   : > { %v2542_v35 = vrot.slane %v2540_v29, 4  ;;  %v2522_v38 = vor.u32 %v2521_v31, %v2518_v30  ;;  %v2553_v40 = vshrl.u32 %v6067_v27, 16  ;;  %v2559_v41 = vshll.u32 %v6068_v28, 16  ;;  %v6070_v51 = vld [vmem:[%s7538_s27 + $0x28] sm:$0xf]  ;;  %v7405_v60 = vld [vmem:[%s7538_s27 + $0x3c] sm:$0xff]  }
  0x19   : > { %v2532_v39 = vor.u32 %v2531_v33, %v2527_v32  ;;  %v2545_v44 = vrot.slane %v2543_v36, 5  ;;  %v2551_v45 = vrot.slane %v2549_v37, 5  ;;  %v6071_v53 = vld [vmem:[%s7538_s27 + $0x2c] sm:$0x1]  ;;  %v2564_v54 = vshrl.u32 %v6069_v46, 16 }
  0x1a   : > { %v2523_v47 = vrot.slane %v2522_v38, 4  ;;  %v2555_v49 = vrot.slane %v2553_v40, 4  ;;  %v2561_v50 = vrot.slane %v2559_v41, 5  ;;  %v2567_v55 = vshll.u32 %v6069_v46, 16  ;;  %v6072_v62 = vld [vmem:[%s7538_s27 + $0x30] sm:$0xf] }
  0x1b   : > { %v2533_v48 = vrot.slane %v2532_v39, 4  ;;  %v2546_v52 = vor.u32 %v2545_v44, %v2542_v35  ;;  %v2573_v56 = vshll.u32 %v6070_v51, 16  ;;  %v2577_v61 = vshrl.u32 %v6070_v51, 16  ;;  %v6073_v63 = vld [vmem:[%s7538_s27 + $0x34] sm:$0xf]  ;;  %v7406_v7 = vld [vmem:[%s7538_s27 + $0x48] sm:$0xff]  }
  0x1c   : > { %6647 = vmatmul.mubr.msk.bf16.gmra.mrb[4].mxu1 %vm404_vm1, %v7403_v20  ;;  %v2528_v57 = vsel %vm7585_vm4, %v2523_v47, %v2527_v32  ;;  %v2556_v59 = vor.u32 %v2555_v49, %v2551_v45  ;;  %v2566_v2 = vrot.slane %v2564_v54, 4  ;;  %v2569_v3 = vrot.slane %v2567_v55, 5  ;;  %v6074_v5 = vld [vmem:[%s7538_s27 + $0x38] sm:$0x1]  ;;  %v6075_v25 = vld [vmem:[%s7538_s27 + $0x3c] sm:$0xf] }
  0x1d   : > { %6650 = vmatprep.mubr.msk.bf16.mxu1 %vm404_vm1, %v7404_v42  ;;  %v2538_v58 = vsel %vm7585_vm4, %v2533_v48, %v2537_v34  ;;  %v2547_v1 = vrot.slane %v2546_v52, 4  ;;  %v2575_v10 = vrot.slane %v2573_v56, 5  ;;  %v2579_v11 = vrot.slane %v2577_v61, 4  ;;  %v6076_v30 = vld [vmem:[%s7538_s27 + $0x40] sm:$0xf]  ;;  %v7407_v49 = vld [vmem:[%s7538_s27 + $0x54] sm:$0xff]  }
  0x1e   : > { %v6112_v0 = vcombine.low %v2528_v57, %v2538_v58  ;;  %v2557_v9 = vrot.slane %v2556_v59, 4  ;;  %v2583_v13 = vshll.u32 %v6071_v53, 16  ;;  %v2570_v18 = vor.u32 %v2569_v3, %v2566_v2  ;;  %v6077_v37 = vld [vmem:[%s7538_s27 + $0x44] sm:$0x1]  ;;  %v6078_v40 = vld [vmem:[%s7538_s27 + $0x48] sm:$0xf] }
  0x1f   : > { %v2552_v17 = vsel %vm7585_vm4, %v2547_v1, %v2551_v45  ;;  %v2588_v19 = vshrl.u32 %v6072_v62, 16  ;;  %v2591_v20 = vshll.u32 %v6072_v62, 16  ;;  %v2580_v22 = vor.u32 %v2579_v11, %v2575_v10  ;;  %v6079_v46 = vld [vmem:[%s7538_s27 + $0x4c] sm:$0xf]  ;;  %v6080_v52 = vld [vmem:[%s7538_s27 + $0x50] sm:$0x1] }
  0x20   : > { %6778 = vmatprep.mubr.msk.bf16.mxu0 %vm404_vm1, %v6112_v0  ;;  %v2562_v21 = vsel %vm7585_vm4, %v2557_v9, %v2561_v50  ;;  %v2585_v23 = vrot.slane %v2583_v13, 5  ;;  %v2597_v24 = vshll.u32 %v6073_v63, 16  ;;  %v2571_v27 = vrot.slane %v2570_v18, 4  ;;  %v7408_v56 = vld [vmem:[%s7538_s27 + $0x60] sm:$0xff]   ;;  %v6082_v13 = vld [vmem:[%s7538_s27 + $0x58] sm:$0xf] }
  0x21   : > { %v6113_v26 = vcombine.low %v2552_v17, %v2562_v21  ;;  %v2590_v28 = vrot.slane %v2588_v19, 4  ;;  %v2593_v29 = vrot.slane %v2591_v20, 5  ;;  %v2581_v31 = vrot.slane %v2580_v22, 4  ;;  %v6083_v21 = vld [vmem:[%s7538_s27 + $0x5c] sm:$0x1] }
  0x22   : > { %v2599_v32 = vrot.slane %v2597_v24, 5  ;;  %v2601_v33 = vshrl.u32 %v6073_v63, 16  ;;  %v2607_v34 = vshll.u32 %v6074_v5, 16  ;;  %v2576_v35 = vsel %vm7585_vm4, %v2571_v27, %v2575_v10  ;;  %v6081_v5 = vld [vmem:[%s7538_s27 + $0x54] sm:$0xf] }
  0x23   : > { %6779 = vmatmul.mubr.msk.bf16.vlgmr.msra.gmra.mrb[0].mxu0 %vm404_vm1, %v6113_v26  ;;  %v2594_v36 = vor.u32 %v2593_v29, %v2590_v28  ;;  %v2612_v38 = vshrl.u32 %v6075_v25, 16  ;;  %v2615_v39 = vshll.u32 %v6075_v25, 16  ;;  %v2586_v41 = vsel %vm7585_vm4, %v2581_v31, %v2585_v23  ;;  %v6084_v22 = vld [vmem:[%s7538_s27 + $0x60] sm:$0xf]  ;;  %v6085_v27 = vld [vmem:[%s7538_s27 + $0x64] sm:$0xf] }
  0x24   : > { %6651 = vmatmul.mubr.msk.bf16.gmra.mrb[8].mxu1 %vm404_vm1, %v7405_v60  ;;  %6811 = vmatpush3.bf16.msra.mxu0 %v7557_v12  ;;  %v2603_v42 = vrot.slane %v2601_v33, 4  ;;  %v2609_v44 = vrot.slane %v2607_v34, 5  ;;  %v2621_v45 = vshll.u32 %v6076_v30, 16  ;;  %v6114_v47 = vcombine.low %v2576_v35, %v2586_v41 }
  0x25   : > { %6654 = vmatprep.mubr.msk.bf16.mxu1 %vm404_vm1, %v7406_v7  ;;  %v2595_v48 = vrot.slane %v2594_v36, 4  ;;  %v2614_v50 = vrot.slane %v2612_v38, 4  ;;  %v2617_v51 = vrot.slane %v2615_v39, 5  ;;  %7371 = vmatprep.subr.msk.bf16.mxu0 %vm453_vm0, %v7543_v6  ;;  %v2625_v12 = vshrl.u32 %v6076_v30, 16  ;;  %v7409_v30 = vld [vmem:[%s7538_s27 + $0x6c] sm:$0xff]   ;;  %v7410_v38 = vld [vmem:[%s7538_s27 + $0x78] sm:$0xff]  }
  0x26   : > { %v2604_v53 = vor.u32 %v2603_v42, %v2599_v32  ;;  %v2623_v54 = vrot.slane %v2621_v45, 5  ;;  %v2631_v55 = vshll.u32 %v6077_v37, 16  ;;  %6782 = vmatprep.mubr.msk.bf16.mxu0 %vm404_vm1, %v6114_v47  ;;  %v2636_v59 = vshrl.u32 %v6078_v40, 16  ;;  %v6086_v37 = vld [vmem:[%s7538_s27 + $0x68] sm:$0x1] }
  0x27   : > { %v2600_v57 = vsel %vm7585_vm4, %v2595_v48, %v2599_v32  ;;  %v2618_v58 = vor.u32 %v2617_v51, %v2614_v50  ;;  %v2639_v60 = vshll.u32 %v6078_v40, 16  ;;  %v2627_v62 = vrot.slane %v2625_v12, 4 }
  0x28   : > { %v2605_v61 = vrot.slane %v2604_v53, 4  ;;  %v2633_v63 = vrot.slane %v2631_v55, 5  ;;  %v2645_v0 = vshll.u32 %v6079_v46, 16  ;;  %v2638_v1 = vrot.slane %v2636_v59, 4  ;;  %v6148_v59 = vld [vmem:[%s7538_s27 + $0x1c] sm:$0xf] }
  0x29   : > { %v2619_v6 = vrot.slane %v2618_v58, 4  ;;  %v2641_v2 = vrot.slane %v2639_v60, 5  ;;  %v2649_v3 = vshrl.u32 %v6079_v46, 16  ;;  %v2628_v9 = vor.u32 %v2627_v62, %v2623_v54  ;;  %v6147_v58 = vld [vmem:[%s7538_s27 + $0x18] sm:$0xe] }
  0x2a   : > { %v2610_v7 = vsel %vm7585_vm4, %v2605_v61, %v2609_v44  ;;  %v2647_v10 = vrot.slane %v2645_v0, 5  ;;  %v2655_v11 = vshll.u32 %v6080_v52, 16  ;;  %v2660_v25 = vshrl.u32 %v6081_v5, 16  ;;  %v6144_v44 = vld [vmem:[%s7538_s27 + $0xc] sm:$0xe] }
  0x2b   : > { %v6115_v17 = vcombine.low %v2600_v57, %v2610_v7  ;;  %v2624_v18 = vsel %vm7585_vm4, %v2619_v6, %v2623_v54  ;;  %v2642_v19 = vor.u32 %v2641_v2, %v2638_v1  ;;  %v2651_v20 = vrot.slane %v2649_v3, 4  ;;  %v6146_v54 = vld [vmem:[%s7538_s27 + $0x14] sm:$0x1]  ;;  %v6149_v6 = vld [vmem:[%s7538_s27 + $0x20] sm:$0x1]  ;;  %v7411_v3 = vld [vmem:[%s7538_s27 + $0x84] sm:$0xff]  }
  0x2c   : > { %6655 = vmatmul.mubr.msk.bf16.gmra.mrb[12].mxu1 %vm404_vm1, %v7407_v49  ;;  %v2629_v23 = vrot.slane %v2628_v9, 4  ;;  %v2657_v24 = vrot.slane %v2655_v11, 5  ;;  %v2663_v26 = vshll.u32 %v6081_v5, 16  ;;  %v2669_v31 = vshll.u32 %v6082_v13, 16  ;;  %v6145_v49 = vld [vmem:[%s7538_s27 + $0x10] sm:$0xf] }
  0x2d   : > { %6658 = vmatprep.mubr.msk.bf16.mxu1 %vm404_vm1, %v7408_v56  ;;  %6783 = vmatmul.mubr.msk.bf16.gmra.mrb[4].mxu0 %vm404_vm1, %v6115_v17  ;;  %v2643_v28 = vrot.slane %v2642_v19, 4  ;;  %v2652_v29 = vor.u32 %v2651_v20, %v2647_v10  ;;  %v2673_v32 = vshrl.u32 %v6082_v13, 16  ;;  %v2662_v34 = vrot.slane %v2660_v25, 4 }
  0x2e   : > { %v2634_v33 = vsel %vm7585_vm4, %v2629_v23, %v2633_v63  ;;  %v2665_v35 = vrot.slane %v2663_v26, 5  ;;  %v2679_v36 = vshll.u32 %v6083_v21, 16  ;;  %v2671_v42 = vrot.slane %v2669_v31, 5  ;;  %v6150_v21 = vld [vmem:[%s7538_s27 + $0x24] sm:$0xe]  ;;  %v7412_v26 = vld [vmem:[%s7538_s27 + $0x90] sm:$0xff]  }
  0x2f   : > { %v6116_v39 = vcombine.low %v2624_v18, %v2634_v33  ;;  %v2648_v40 = vsel %vm7585_vm4, %v2643_v28, %v2647_v10  ;;  %v2653_v41 = vrot.slane %v2652_v29, 4  ;;  %v2675_v46 = vrot.slane %v2673_v32, 4 }
  0x30   : > { %v2666_v45 = vor.u32 %v2665_v35, %v2662_v34  ;;  %v2681_v47 = vrot.slane %v2679_v36, 5  ;;  %v2684_v48 = vshrl.u32 %v6084_v22, 16  ;;  %v2687_v51 = vshll.u32 %v6084_v22, 16  ;;  %v6153_v36 = vld [vmem:[%s7538_s27 + $0x30] sm:$0xe] }
  0x31   : > { %6786 = vmatprep.mubr.msk.bf16.mxu0 %vm404_vm1, %v6116_v39  ;;  %v2658_v50 = vsel %vm7585_vm4, %v2653_v41, %v2657_v24  ;;  %v2693_v52 = vshll.u32 %v6085_v27, 16  ;;  %v2697_v53 = vshrl.u32 %v6085_v27, 16  ;;  %v2676_v56 = vor.u32 %v2675_v46, %v2671_v42  ;;  %v6151_v27 = vld [vmem:[%s7538_s27 + $0x28] sm:$0xf] }
  0x32   : > { %v6117_v12 = vcombine.low %v2648_v40, %v2658_v50  ;;  %v2667_v55 = vrot.slane %v2666_v45, 4  ;;  %v2686_v57 = vrot.slane %v2684_v48, 4  ;;  %v2689_v60 = vrot.slane %v2687_v51, 5  ;;  %v6156_v50 = vld [vmem:[%s7538_s27 + $0x3c] sm:$0xe] }
  0x33   : > { %v2695_v61 = vrot.slane %v2693_v52, 5  ;;  %v2699_v62 = vrot.slane %v2697_v53, 4  ;;  %v2703_v63 = vshll.u32 %v6086_v37, 16  ;;  %v2677_v2 = vrot.slane %v2676_v56, 4  ;;  %v6154_v37 = vld [vmem:[%s7538_s27 + $0x34] sm:$0xf] }
  0x34   : > { %6659 = vmatmul.mubr.msk.bf16.gmra.mrb[16].mxu1 %vm404_vm1, %v7409_v30  ;;  %v2672_v1 = vsel %vm7585_vm4, %v2667_v55, %v2671_v42  ;;  %v6192_v5 = vrot.slane %v6144_v44, 9  ;;  %v3355_v7 = vrot.slane %v6145_v49, 5  ;;  %v2690_v9 = vor.u32 %v2689_v60, %v2686_v57  ;;  %v6152_v30 = vld [vmem:[%s7538_s27 + $0x2c] sm:$0x1]  ;;  %v6157_v51 = vld [vmem:[%s7538_s27 + $0x40] sm:$0xf] }
  0x35   : > { %6662 = vmatprep.mubr.msk.bf16.mxu1 %vm404_vm1, %v7410_v38  ;;  %6787 = vmatmul.mubr.msk.bf16.gmra.mrb[8].mxu0 %vm404_vm1, %v6117_v12  ;;  %v2700_v10 = vor.u32 %v2699_v62, %v2695_v61  ;;  %v2705_v11 = vrot.slane %v2703_v63, 5  ;;  %v3358_v13 = vrot.slane %v6146_v54, 5  ;;  %v2682_v17 = vsel %vm7585_vm4, %v2677_v2, %v2681_v47  ;;  %v6155_v38 = vld [vmem:[%s7538_s27 + $0x38] sm:$0x1]  ;;  %v7413_v52 = vld [vmem:[%s7538_s27 + $0x9c] sm:$0xff]  }
  0x36   : > { %v3356_v18 = vsel %vm7660_vm7, %v6192_v5, %v3355_v7  ;;  %v3357_v19 = vrot.slane %v3355_v7, 4  ;;  %v6193_v20 = vrot.slane %v6147_v58, 9  ;;  %v6118_v22 = vcombine.low %v2672_v1, %v2682_v17  ;;  %v6158_v55 = vld [vmem:[%s7538_s27 + $0x44] sm:$0x1]  ;;  %v6159_v56 = vld [vmem:[%s7538_s27 + $0x48] sm:$0xe] }
  0x37   : > { %v2691_v23 = vrot.slane %v2690_v9, 4  ;;  %v2701_v24 = vrot.slane %v2700_v10, 4  ;;  %v3362_v25 = vrot.slane %v6148_v59, 5  ;;  %v3365_v29 = vrot.slane %v6149_v6, 5  ;;  %v7414_v58 = vld [vmem:[%s7538_s27 + $0xa8] sm:$0xff]  }
  0x38   : > { %v3359_v28 = vsel %vm7660_vm7, %v3357_v19, %v3358_v13  ;;  %v6194_v31 = vrot.slane %v6150_v21, 9  ;;  %v3369_v32 = vrot.slane %v6151_v27, 5  ;;  %6790 = vmatprep.mubr.msk.bf16.mxu0 %vm404_vm1, %v6118_v22  ;;  %v3372_v44 = vrot.slane %v6152_v30, 5  ;;  %v6160_v62 = vld [vmem:[%s7538_s27 + $0x4c] sm:$0xf] }
  0x39   : > { %v2696_v33 = vsel %vm7585_vm4, %v2691_v23, %v2695_v61  ;;  %v2706_v34 = vsel %vm7585_vm4, %v2701_v24, %v2705_v11  ;;  %v6209_v35 = vcombine.low %v3356_v18, %v3359_v28  ;;  %v3363_v40 = vsel %vm7660_vm7, %v6193_v20, %v3362_v25  ;;  %v6161_v1 = vld [vmem:[%s7538_s27 + $0x50] sm:$0x1]  ;;  %v682_v5 = vld [vmem:[%s7538_s27] sm:$0xf]  ;;  %v683_v13 = vld [vmem:[%s7538_s27 + $0x4] sm:$0xf] }
  0x3a   : > { %v6119_v39 = vcombine.low %v2696_v33, %v2706_v34  ;;  %v3364_v41 = vrot.slane %v3362_v25, 4  ;;  %v3371_v42 = vrot.slane %v3369_v32, 4  ;;  %v6195_v45 = vrot.slane %v6153_v36, 9  ;;  %v684_v17 = vld [vmem:[%s7538_s27 + $0x8] sm:$0x1] }
  0x3b   : > { %v3376_v46 = vrot.slane %v6154_v37, 5  ;;  %v3379_v47 = vrot.slane %v6155_v38, 5  ;;  %v3370_v49 = vsel %vm7660_vm7, %v6194_v31, %v3369_v32  ;;  %v6196_v59 = vrot.slane %v6156_v50, 9  ;;  %v685_v22 = vld [vmem:[%s7538_s27 + $0xc] sm:$0xf] }
  0x3c   : > { %6663 = vmatmul.mubr.msk.bf16.gmra.mrb[20].mxu1 %vm404_vm1, %v7411_v3  ;;  %v3366_v48 = vsel %vm7660_vm7, %v3364_v41, %v3365_v29  ;;  %v3373_v53 = vsel %vm7660_vm7, %v3371_v42, %v3372_v44  ;;  %v3383_v60 = vrot.slane %v6157_v51, 5  ;;  %v3386_v61 = vrot.slane %v6158_v55, 5  ;;  %v686_v27 = vld [vmem:[%s7538_s27 + $0x10] sm:$0xf]  ;;  %v687_v32 = vld [vmem:[%s7538_s27 + $0x14] sm:$0x1] }
  0x3d   : > { %6666 = vmatprep.mubr.msk.bf16.mxu1 %vm404_vm1, %v7412_v26  ;;  %6791 = vmatmul.mubr.msk.bf16.gmra.mrb[12].mxu0 %vm404_vm1, %v6119_v39  ;;  %v7703_v54 = vsel %vm7660_vm7, %v6195_v45, %v3376_v46  ;;  %v3378_v12 = vrot.slane %v3376_v46, 4  ;;  %v6210_v57 = vcombine.low %v3363_v40, %v3366_v48  ;;  %v6211_v63 = vcombine.low %v3370_v49, %v3373_v53  ;;  %v6162_v33 = vld [vmem:[%s7538_s27 + $0x54] sm:$0xe]  ;;  %v6163_v38 = vld [vmem:[%s7538_s27 + $0x58] sm:$0xf] }
  0x3e   : > { %6812 = vmatprep.mubr.msk.bf16.mxu0 %vm404_vm1, %v6209_v35  ;;  %v6197_v2 = vrot.slane %v6159_v56, 9  ;;  %v3390_v3 = vrot.slane %v6160_v62, 5  ;;  %v7720_v9 = vsel %vm7660_vm7, %v6196_v59, %v3383_v60  ;;  %v3385_v10 = vrot.slane %v3383_v60, 4  ;;  %v6164_v44 = vld [vmem:[%s7538_s27 + $0x5c] sm:$0x1]  ;;  %v7415_v45 = vld [vmem:[%s7538_s27 + $0xb4] sm:$0xff]  }
  0x3f   : > { %v7712_v6 = vsel %vm7660_vm7, %v3378_v12, %v3379_v47  ;;  %v3393_v11 = vrot.slane %v6161_v1, 5  ;;  %v734_v20 = vshrl.u32 %v682_v5, 16  ;;  %v737_v21 = vshll.u32 %v682_v5, 16  ;;  %v6165_v50 = vld [vmem:[%s7538_s27 + $0x60] sm:$0xe] }
  0x40   : > { %v6212_v7 = vcombine.low %v7703_v54, %v7712_v6  ;;  %v7726_v18 = vsel %vm7660_vm7, %v6197_v2, %v3390_v3  ;;  %v3392_v19 = vrot.slane %v3390_v3, 4  ;;  %v7732_v23 = vsel %vm7660_vm7, %v3385_v10, %v3386_v61  ;;  %v6166_v55 = vld [vmem:[%s7538_s27 + $0x64] sm:$0xf]  ;;  %v6167_v59 = vld [vmem:[%s7538_s27 + $0x68] sm:$0x1] }
  0x41   : > { %v743_v24 = vshll.u32 %v683_v13, 16  ;;  %v747_v25 = vshrl.u32 %v683_v13, 16  ;;  %v753_v26 = vshll.u32 %v684_v17, 16  ;;  %v6213_v28 = vcombine.low %v7720_v9, %v7732_v23  ;;  %v688_v1 = vld [vmem:[%s7538_s27 + $0x18] sm:$0xf] }
  0x42   : > { %v7740_v29 = vsel %vm7660_vm7, %v3392_v19, %v3393_v11  ;;  %v736_v30 = vrot.slane %v734_v20, 4  ;;  %v739_v31 = vrot.slane %v737_v21, 5  ;;  %v758_v40 = vshrl.u32 %v685_v22, 16  ;;  %v689_v19 = vld [vmem:[%s7538_s27 + $0x1c] sm:$0xf] }
  0x43   : > { %v6214_v34 = vcombine.low %v7726_v18, %v7740_v29  ;;  %v745_v35 = vrot.slane %v743_v24, 5  ;;  %v749_v36 = vrot.slane %v747_v25, 4  ;;  %v755_v37 = vrot.slane %v753_v26, 5  ;;  %v693_v9 = vld [vmem:[%s7538_s27 + $0x2c] sm:$0x1] }
  0x44   : > { %6667 = vmatmul.mubr.msk.bf16.gmra.mrb[24].mxu1 %vm404_vm1, %v7413_v52  ;;  %v740_v39 = vor.u32 %v739_v31, %v736_v30  ;;  %v761_v41 = vshll.u32 %v685_v22, 16  ;;  %v767_v42 = vshll.u32 %v686_v27, 16  ;;  %v771_v47 = vshrl.u32 %v686_v27, 16  ;;  %v690_v22 = vld [vmem:[%s7538_s27 + $0x20] sm:$0x1] }
  0x45   : > { %6670 = vmatprep.mubr.msk.bf16.mxu1 %vm404_vm1, %v7414_v58  ;;  %6813 = vmatmul.mubr.msk.bf16.vlgmr.msra.gmra.mrb[0].mxu0 %vm404_vm1, %v6210_v57  ;;  %v750_v46 = vor.u32 %v749_v36, %v745_v35  ;;  %v777_v48 = vshll.u32 %v687_v32, 16  ;;  %v6198_v49 = vrot.slane %v6162_v33, 9  ;;  %v760_v52 = vrot.slane %v758_v40, 4  ;;  %v691_v32 = vld [vmem:[%s7538_s27 + $0x24] sm:$0xf] }
  0x46   : > { %6845 = vmatpush3.bf16.msra.mxu0 %v7563_v14  ;;  %6816 = vmatprep.mubr.msk.bf16.mxu0 %vm404_vm1, %v6211_v63  ;;  %v741_v51 = vrot.slane %v740_v39, 4  ;;  %v763_v53 = vrot.slane %v761_v41, 5  ;;  %v769_v12 = vrot.slane %v767_v42, 5  ;;  %v773_v14 = vrot.slane %v771_v47, 4  ;;  %v6168_v23 = vld [vmem:[%s7538_s27 + $0x6c] sm:$0xe] }
  0x47   : > { %7372 = vmatprep.subr.msk.bf16.mxu0 %vm453_vm0, %v7551_v8  ;;  %v751_v56 = vrot.slane %v750_v46, 4  ;;  %v779_v57 = vrot.slane %v777_v48, 5  ;;  %v3397_v58 = vrot.slane %v6163_v38, 5  ;;  %v3400_v62 = vrot.slane %v6164_v44, 5  ;;  %v6169_v44 = vld [vmem:[%s7538_s27 + $0x70] sm:$0xf] }
  0x48   : > { %v746_v60 = vsel %vm7585_vm4, %v741_v51, %v745_v35  ;;  %v764_v61 = vor.u32 %v763_v53, %v760_v52  ;;  %v6199_v63 = vrot.slane %v6165_v50, 9  ;;  %v774_v8 = vor.u32 %v773_v14, %v769_v12  ;;  %v692_v35 = vld [vmem:[%s7538_s27 + $0x28] sm:$0xf]  ;;  %v6171_v50 = vld [vmem:[%s7538_s27 + $0x78] sm:$0xe] }
  0x49   : > { %v756_v2 = vsel %vm7585_vm4, %v751_v56, %v755_v37  ;;  %v7765_v3 = vsel %vm7660_vm7, %v6198_v49, %v3397_v58  ;;  %v3399_v5 = vrot.slane %v3397_v58, 4  ;;  %v3404_v13 = vrot.slane %v6166_v55, 5  ;;  %v6172_v55 = vld [vmem:[%s7538_s27 + $0x7c] sm:$0xf] }
  0x4a   : > { %v5917_v10 = vcombine.low %v746_v60, %v756_v2  ;;  %v765_v11 = vrot.slane %v764_v61, 4  ;;  %v3407_v17 = vrot.slane %v6167_v59, 5  ;;  %v775_v20 = vrot.slane %v774_v8, 4  ;;  %v6173_v59 = vld [vmem:[%s7538_s27 + $0x80] sm:$0x1] }
  0x4b   : > { %v3401_v21 = vsel %vm7660_vm7, %v3399_v5, %v3400_v62  ;;  %v782_v24 = vshrl.u32 %v688_v1, 16  ;;  %v785_v25 = vshll.u32 %v688_v1, 16  ;;  %v7781_v30 = vsel %vm7660_vm7, %v6199_v63, %v3404_v13  ;;  %v694_v1 = vld [vmem:[%s7538_s27 + $0x30] sm:$0xf] }
  0x4c   : > { %6671 = vmatmul.mubr.msk.bf16.gmra.mrb[28].mxu1 %vm404_vm1, %v7415_v45  ;;  %v770_v26 = vsel %vm7585_vm4, %v765_v11, %v769_v12  ;;  %v6215_v27 = vcombine.low %v7765_v3, %v3401_v21  ;;  %v3406_v31 = vrot.slane %v3404_v13, 4  ;;  %v780_v54 = vsel %vm7585_vm4, %v775_v20, %v779_v57  ;;  %v6170_v45 = vld [vmem:[%s7538_s27 + $0x74] sm:$0x1] }
  0x4d   : > { %6817 = vmatmul.mubr.msk.bf16.gmra.mrb[4].mxu0 %vm404_vm1, %v6212_v7  ;;  %6676 = vmatprep.mubr.msk.bf16.mxu1 %vm404_vm1, %v5917_v10  ;;  %v784_v6 = vrot.slane %v782_v24, 4  ;;  %v787_v7 = vrot.slane %v785_v25, 5  ;;  %v791_v33 = vshll.u32 %v689_v19, 16  ;;  %v5918_v36 = vcombine.low %v770_v26, %v780_v54  ;;  %v696_v25 = vld [vmem:[%s7538_s27 + $0x38] sm:$0x1] }
  0x4e   : > { %6820 = vmatprep.mubr.msk.bf16.mxu0 %vm404_vm1, %v6213_v28  ;;  %v7793_v37 = vsel %vm7660_vm7, %v3406_v31, %v3407_v17  ;;  %v795_v38 = vshrl.u32 %v689_v19, 16  ;;  %v801_v39 = vshll.u32 %v690_v22, 16  ;;  %v806_v42 = vshrl.u32 %v691_v32, 16  ;;  %v697_v26 = vld [vmem:[%s7538_s27 + $0x3c] sm:$0xf] }
  0x4f   : > { %v6216_v28 = vcombine.low %v7781_v30, %v7793_v37  ;;  %v788_v40 = vor.u32 %v787_v7, %v784_v6  ;;  %v793_v41 = vrot.slane %v791_v33, 5  ;;  %v809_v48 = vshll.u32 %v691_v32, 16 }
  0x50   : > { %v797_v46 = vrot.slane %v795_v38, 4  ;;  %v803_v47 = vrot.slane %v801_v39, 5  ;;  %v815_v49 = vshll.u32 %v692_v35, 16  ;;  %v808_v52 = vrot.slane %v806_v42, 4 }
  0x51   : > { %v789_v51 = vrot.slane %v788_v40, 4  ;;  %v819_v53 = vshrl.u32 %v692_v35, 16  ;;  %v825_v12 = vshll.u32 %v693_v9, 16  ;;  %v811_v14 = vrot.slane %v809_v48, 5 }
  0x52   : > { %v798_v56 = vor.u32 %v797_v46, %v793_v41  ;;  %v817_v57 = vrot.slane %v815_v49, 5  ;;  %v6200_v58 = vrot.slane %v6168_v23, 9  ;;  %v3411_v63 = vrot.slane %v6169_v44, 5  ;;  %v699_v23 = vld [vmem:[%s7538_s27 + $0x44] sm:$0x1] }
  0x53   : > { %v794_v60 = vsel %vm7585_vm4, %v789_v51, %v793_v41  ;;  %v821_v61 = vrot.slane %v819_v53, 4  ;;  %v827_v62 = vrot.slane %v825_v12, 5  ;;  %v3414_v8 = vrot.slane %v6170_v45, 5  ;;  %v6174_v41 = vld [vmem:[%s7538_s27 + $0x84] sm:$0xe] }
  0x54   : > { %6677 = vmatmul.mubr.msk.bf16.vlgmr.msra.gmra.mrb[0].mxu1 %vm404_vm1, %v5918_v36  ;;  %v799_v2 = vrot.slane %v798_v56, 4  ;;  %v6201_v3 = vrot.slane %v6171_v50, 9  ;;  %v3412_v10 = vsel %vm7660_vm7, %v6200_v58, %v3411_v63  ;;  %v3413_v11 = vrot.slane %v3411_v63, 4  ;;  %v698_v36 = vld [vmem:[%s7538_s27 + $0x40] sm:$0xf] }
  0x55   : > { %6709 = vmatpush3.bf16.msra.mxu1 %v7567_v15  ;;  %6821 = vmatmul.mubr.msk.bf16.gmra.mrb[8].mxu0 %vm404_vm1, %v6214_v34  ;;  %v812_v15 = vor.u32 %v811_v14, %v808_v52  ;;  %v822_v5 = vor.u32 %v821_v61, %v817_v57  ;;  %v3418_v13 = vrot.slane %v6172_v55, 5  ;;  %v3421_v29 = vrot.slane %v6173_v59, 5  ;;  %v695_v34 = vld [vmem:[%s7538_s27 + $0x34] sm:$0xf]  ;;  %v6176_v56 = vld [vmem:[%s7538_s27 + $0x8c] sm:$0x1] }
  0x56   : > { %6824 = vmatprep.mubr.msk.bf16.mxu0 %vm404_vm1, %v6215_v27  ;;  %v804_v17 = vsel %vm7585_vm4, %v799_v2, %v803_v47  ;;  %v830_v19 = vshrl.u32 %v694_v1, 16  ;;  %v3415_v22 = vsel %vm7660_vm7, %v3413_v11, %v3414_v8  ;;  %v833_v7 = vshll.u32 %v694_v1, 16  ;;  %v6175_v47 = vld [vmem:[%s7538_s27 + $0x88] sm:$0xf]  ;;  %v6179_v8 = vld [vmem:[%s7538_s27 + $0x98] sm:$0x1] }
  0x57   : > { %v813_v18 = vrot.slane %v812_v15, 4  ;;  %v5919_v20 = vcombine.low %v794_v60, %v804_v17  ;;  %v823_v21 = vrot.slane %v822_v5, 4  ;;  %v7823_v24 = vsel %vm7660_vm7, %v6201_v3, %v3418_v13  ;;  %v700_v3 = vld [vmem:[%s7538_s27 + $0x48] sm:$0xf] }
  0x58   : > { %v6217_v31 = vcombine.low %v3412_v10, %v3415_v22  ;;  %v3420_v32 = vrot.slane %v3418_v13, 4  ;;  %v832_v54 = vrot.slane %v830_v19, 4  ;;  %v839_v33 = vshll.u32 %v695_v34, 16  ;;  %v701_v19 = vld [vmem:[%s7538_s27 + $0x4c] sm:$0xf] }
  0x59   : > { %v818_v27 = vsel %vm7585_vm4, %v813_v18, %v817_v57  ;;  %6680 = vmatprep.mubr.msk.bf16.mxu1 %vm404_vm1, %v5919_v20  ;;  %v828_v6 = vsel %vm7585_vm4, %v823_v21, %v827_v62  ;;  %v843_v35 = vshrl.u32 %v695_v34, 16  ;;  %v849_v9 = vshll.u32 %v696_v25, 16  ;;  %v6177_v57 = vld [vmem:[%s7538_s27 + $0x90] sm:$0xe]  ;;  %v6178_v62 = vld [vmem:[%s7538_s27 + $0x94] sm:$0xf] }
  0x5a   : > { %v5920_v38 = vcombine.low %v818_v27, %v828_v6  ;;  %v3422_v39 = vsel %vm7660_vm7, %v3420_v32, %v3421_v29  ;;  %v854_v40 = vshrl.u32 %v697_v26, 16  ;;  %v835_v44 = vrot.slane %v833_v7, 5 }
  0x5b   : > { %v6218_v42 = vcombine.low %v7823_v24, %v3422_v39  ;;  %v841_v45 = vrot.slane %v839_v33, 5  ;;  %v845_v46 = vrot.slane %v843_v35, 4  ;;  %v851_v48 = vrot.slane %v849_v9, 5  ;;  %v702_v24 = vld [vmem:[%s7538_s27 + $0x50] sm:$0x1] }
  0x5c   : > { %6681 = vmatmul.mubr.msk.bf16.gmra.mrb[4].mxu1 %vm404_vm1, %v5920_v38  ;;  %v856_v49 = vrot.slane %v854_v40, 4  ;;  %v857_v50 = vshll.u32 %v697_v26, 16  ;;  %v863_v51 = vshll.u32 %v698_v36, 16  ;;  %v836_v52 = vor.u32 %v835_v44, %v832_v54  ;;  %v703_v54 = vld [vmem:[%s7538_s27 + $0x54] sm:$0xf] }
  0x5d   : > { %6825 = vmatmul.mubr.msk.bf16.gmra.mrb[12].mxu0 %vm404_vm1, %v6216_v28  ;;  %v846_v53 = vor.u32 %v845_v46, %v841_v45  ;;  %v867_v12 = vshrl.u32 %v698_v36, 16  ;;  %v873_v55 = vshll.u32 %v699_v23, 16  ;;  %v6202_v28 = vrot.slane %v6174_v41, 9  ;;  %v704_v36 = vld [vmem:[%s7538_s27 + $0x58] sm:$0xf] }
  0x5e   : > { %6828 = vmatprep.mubr.msk.bf16.mxu0 %vm404_vm1, %v6217_v31  ;;  %v859_v30 = vrot.slane %v857_v50, 5  ;;  %v865_v37 = vrot.slane %v863_v51, 5  ;;  %v3425_v14 = vrot.slane %v6175_v47, 5  ;;  %v837_v58 = vrot.slane %v836_v52, 4  ;;  %v705_v40 = vld [vmem:[%s7538_s27 + $0x5c] sm:$0x1] }
  0x5f   : > { %v847_v59 = vrot.slane %v846_v53, 4  ;;  %v869_v60 = vrot.slane %v867_v12, 4  ;;  %v875_v61 = vrot.slane %v873_v55, 5  ;;  %v3428_v15 = vrot.slane %v6176_v56, 5  ;;  %v6180_v41 = vld [vmem:[%s7538_s27 + $0x9c] sm:$0xe] }
  0x60   : > { %v860_v63 = vor.u32 %v859_v30, %v856_v49  ;;  %v3426_v1 = vsel %vm7660_vm7, %v6202_v28, %v3425_v14  ;;  %v3427_v2 = vrot.slane %v3425_v14, 4  ;;  %v842_v5 = vsel %vm7585_vm4, %v837_v58, %v841_v45  ;;  %v6181_v47 = vld [vmem:[%s7538_s27 + $0xa0] sm:$0xf]  ;;  %v6182_v52 = vld [vmem:[%s7538_s27 + $0xa4] sm:$0x1] }
  0x61   : > { %v852_v10 = vsel %vm7585_vm4, %v847_v59, %v851_v48  ;;  %v870_v11 = vor.u32 %v869_v60, %v865_v37  ;;  %v6203_v13 = vrot.slane %v6177_v57, 9  ;;  %v3432_v34 = vrot.slane %v6178_v62, 5  ;;  %v6183_v30 = vld [vmem:[%s7538_s27 + $0xa8] sm:$0xe]  ;;  %v6184_v58 = vld [vmem:[%s7538_s27 + $0xac] sm:$0xf] }
  0x62   : > { %v5921_v17 = vcombine.low %v842_v5, %v852_v10  ;;  %v861_v18 = vrot.slane %v860_v63, 4  ;;  %v3429_v29 = vsel %vm7660_vm7, %v3427_v2, %v3428_v15  ;;  %v3435_v22 = vrot.slane %v6179_v8, 5  ;;  %v6185_v63 = vld [vmem:[%s7538_s27 + $0xb0] sm:$0x1]  ;;  %v707_v5 = vld [vmem:[%s7538_s27 + $0x64] sm:$0xf] }
  0x63   : > { %v871_v20 = vrot.slane %v870_v11, 4  ;;  %v6219_v21 = vcombine.low %v3426_v1, %v3429_v29  ;;  %v878_v25 = vshrl.u32 %v700_v3, 16  ;;  %v3433_v27 = vsel %vm7660_vm7, %v6203_v13, %v3432_v34 }
  0x64   : > { %6684 = vmatprep.mubr.msk.bf16.mxu1 %vm404_vm1, %v5921_v17  ;;  %v866_v26 = vsel %vm7585_vm4, %v861_v18, %v865_v37  ;;  %v3434_v31 = vrot.slane %v3432_v34, 4  ;;  %v881_v32 = vshll.u32 %v700_v3, 16  ;;  %v887_v33 = vshll.u32 %v701_v19, 16  ;;  %v706_v3 = vld [vmem:[%s7538_s27 + $0x60] sm:$0xf] }
  0x65   : > { %6829 = vmatmul.mubr.msk.bf16.gmra.mrb[16].mxu0 %vm404_vm1, %v6218_v42  ;;  %v876_v6 = vsel %vm7585_vm4, %v871_v20, %v875_v61  ;;  %v880_v7 = vrot.slane %v878_v25, 4  ;;  %v891_v35 = vshrl.u32 %v701_v19, 16  ;;  %v897_v23 = vshll.u32 %v702_v24, 16  ;;  %v708_v18 = vld [vmem:[%s7538_s27 + $0x68] sm:$0x1] }
  0x66   : > { %6832 = vmatprep.mubr.msk.bf16.mxu0 %vm404_vm1, %v6219_v21  ;;  %v5922_v38 = vcombine.low %v866_v26, %v876_v6  ;;  %v3436_v39 = vsel %vm7660_vm7, %v3434_v31, %v3435_v22  ;;  %v883_v9 = vrot.slane %v881_v32, 5  ;;  %v889_v44 = vrot.slane %v887_v33, 5  ;;  %v709_v21 = vld [vmem:[%s7538_s27 + $0x6c] sm:$0xf]  ;;  %v710_v6 = vld [vmem:[%s7538_s27 + $0x70] sm:$0xf] }
  0x67   : > { %v6220_v42 = vcombine.low %v3433_v27, %v3436_v39  ;;  %v893_v45 = vrot.slane %v891_v35, 4  ;;  %v902_v46 = vshrl.u32 %v703_v54, 16  ;;  %v899_v49 = vrot.slane %v897_v23, 5 }
  0x68   : > { %6685 = vmatmul.mubr.msk.bf16.gmra.mrb[8].mxu1 %vm404_vm1, %v5922_v38  ;;  %v884_v48 = vor.u32 %v883_v9, %v880_v7  ;;  %v905_v50 = vshll.u32 %v703_v54, 16  ;;  %v911_v51 = vshll.u32 %v704_v36, 16  ;;  %v915_v55 = vshrl.u32 %v704_v36, 16  ;;  %v711_v38 = vld [vmem:[%s7538_s27 + $0x74] sm:$0x1] }
  0x69   : > { %v894_v53 = vor.u32 %v893_v45, %v889_v44  ;;  %v904_v12 = vrot.slane %v902_v46, 4  ;;  %v921_v56 = vshll.u32 %v705_v40, 16  ;;  %v6204_v57 = vrot.slane %v6180_v41, 9  ;;  %v6186_v41 = vld [vmem:[%s7538_s27 + $0xb4] sm:$0xe] }
  0x6a   : > { %v885_v37 = vrot.slane %v884_v48, 4  ;;  %v907_v28 = vrot.slane %v905_v50, 5  ;;  %v913_v14 = vrot.slane %v911_v51, 5  ;;  %v917_v60 = vrot.slane %v915_v55, 4  ;;  %v6188_v48 = vld [vmem:[%s7538_s27 + $0xbc] sm:$0x1] }
  0x6b   : > { %v895_v59 = vrot.slane %v894_v53, 4  ;;  %v923_v61 = vrot.slane %v921_v56, 5  ;;  %v3439_v62 = vrot.slane %v6181_v47, 5  ;;  %v3442_v15 = vrot.slane %v6182_v52, 5 }
  0x6c   : > { %v890_v1 = vsel %vm7585_vm4, %v885_v37, %v889_v44  ;;  %v908_v2 = vor.u32 %v907_v28, %v904_v12  ;;  %v6205_v8 = vrot.slane %v6183_v30, 9  ;;  %v918_v11 = vor.u32 %v917_v60, %v913_v14  ;;  %v6190_v12 = vld [vmem:[%s7538_s27 + $0xc4] sm:$0xf]  ;;  %v6191_v28 = vld [vmem:[%s7538_s27 + $0xc8] sm:$0x1] }
  0x6d   : > { %6833 = vmatmul.mubr.msk.bf16.gmra.mrb[20].mxu0 %vm404_vm1, %v6220_v42  ;;  %v900_v10 = vsel %vm7585_vm4, %v895_v59, %v899_v49  ;;  %v3440_v13 = vsel %vm7660_vm7, %v6204_v57, %v3439_v62  ;;  %v3441_v17 = vrot.slane %v3439_v62, 4  ;;  %v3446_v19 = vrot.slane %v6184_v58, 5  ;;  %v6187_v42 = vld [vmem:[%s7538_s27 + $0xb8] sm:$0xf]  ;;  %v6189_v49 = vld [vmem:[%s7538_s27 + $0xc0] sm:$0xe] }
  0x6e   : > { %v5923_v29 = vcombine.low %v890_v1, %v900_v10  ;;  %v909_v34 = vrot.slane %v908_v2, 4  ;;  %v3449_v20 = vrot.slane %v6185_v63, 5  ;;  %v919_v22 = vrot.slane %v918_v11, 4 }
  0x6f   : > { %v3443_v24 = vsel %vm7660_vm7, %v3441_v17, %v3442_v15  ;;  %v926_v25 = vshrl.u32 %v706_v3, 16  ;;  %v929_v26 = vshll.u32 %v706_v3, 16  ;;  %v3447_v32 = vsel %vm7660_vm7, %v6205_v8, %v3446_v19  ;;  %v713_v17 = vld [vmem:[%s7538_s27 + $0x7c] sm:$0xf] }
  0x70   : > { %6688 = vmatprep.mubr.msk.bf16.mxu1 %vm404_vm1, %v5923_v29  ;;  %v914_v27 = vsel %vm7585_vm4, %v909_v34, %v913_v14  ;;  %v6221_v31 = vcombine.low %v3440_v13, %v3443_v24  ;;  %v3448_v54 = vrot.slane %v3446_v19, 4  ;;  %v924_v7 = vsel %vm7585_vm4, %v919_v22, %v923_v61  ;;  %v712_v14 = vld [vmem:[%s7538_s27 + $0x78] sm:$0xf]  ;;  %v714_v19 = vld [vmem:[%s7538_s27 + $0x80] sm:$0x1] }
  0x71   : > { %v928_v33 = vrot.slane %v926_v25, 4  ;;  %v931_v35 = vrot.slane %v929_v26, 5  ;;  %v935_v36 = vshll.u32 %v707_v5, 16  ;;  %v5924_v39 = vcombine.low %v914_v27, %v924_v7  ;;  %v715_v26 = vld [vmem:[%s7538_s27 + $0x84] sm:$0xf] }
  0x72   : > { %6836 = vmatprep.mubr.msk.bf16.mxu0 %vm404_vm1, %v6221_v31  ;;  %v3450_v9 = vsel %vm7660_vm7, %v3448_v54, %v3449_v20  ;;  %v939_v23 = vshrl.u32 %v707_v5, 16  ;;  %v945_v40 = vshll.u32 %v708_v18, 16  ;;  %v950_v47 = vshrl.u32 %v709_v21, 16  ;;  %v716_v27 = vld [vmem:[%s7538_s27 + $0x88] sm:$0xf] }
  0x73   : > { %v6222_v44 = vcombine.low %v3447_v32, %v3450_v9  ;;  %v932_v45 = vor.u32 %v931_v35, %v928_v33  ;;  %v937_v46 = vrot.slane %v935_v36, 5  ;;  %6689 = vmatmul.mubr.msk.bf16.gmra.mrb[12].mxu1 %vm404_vm1, %v5924_v39  ;;  %v953_v52 = vshll.u32 %v709_v21, 16 }
  0x74   : > { %v941_v50 = vrot.slane %v939_v23, 4  ;;  %v947_v51 = vrot.slane %v945_v40, 5  ;;  %v959_v53 = vshll.u32 %v710_v6, 16  ;;  %v952_v56 = vrot.slane %v950_v47, 4  ;;  %v717_v40 = vld [vmem:[%s7538_s27 + $0x8c] sm:$0x1] }
  0x75   : > { %6837 = vmatmul.mubr.msk.bf16.gmra.mrb[24].mxu0 %vm404_vm1, %v6222_v44  ;;  %v933_v55 = vrot.slane %v932_v45, 4  ;;  %v963_v30 = vshrl.u32 %v710_v6, 16  ;;  %v969_v37 = vshll.u32 %v711_v38, 16  ;;  %v955_v58 = vrot.slane %v953_v52, 5  ;;  %v7416_v38 = vld [vmem:[%s7538_s27 + $0x18] sm:$0xff]  }
  0x76   : > { %v942_v57 = vor.u32 %v941_v50, %v937_v46  ;;  %v961_v59 = vrot.slane %v959_v53, 5  ;;  %v6206_v60 = vrot.slane %v6186_v41, 9  ;;  %v3453_v1 = vrot.slane %v6187_v42, 5  ;;  %v718_v47 = vld [vmem:[%s7538_s27 + $0x90] sm:$0xf] }
  0x77   : > { %v938_v61 = vsel %vm7585_vm4, %v933_v55, %v937_v46  ;;  %v965_v62 = vrot.slane %v963_v30, 4  ;;  %v971_v63 = vrot.slane %v969_v37, 5  ;;  %v956_v15 = vor.u32 %v955_v58, %v952_v56  ;;  %v719_v56 = vld [vmem:[%s7538_s27 + $0x94] sm:$0xf]  ;;  %v7946_v30 = vld [vmem:[%s8835_s1 + $0x6] sm:$0x3] }
  0x78   : > { %v943_v2 = vrot.slane %v942_v57, 4  ;;  %v3456_v8 = vrot.slane %v6188_v48, 5  ;;  %v6207_v3 = vrot.slane %v6189_v49, 9  ;;  %v3454_v10 = vsel %vm7660_vm7, %v6206_v60, %v3453_v1  ;;  %7367 = vmatprep.subr.msk.bf16.mxu1 %vm453_vm0, %v7946_v30 }
  0x79   : > { %v966_v5 = vor.u32 %v965_v62, %v961_v59  ;;  %v3455_v11 = vrot.slane %v3453_v1, 4  ;;  %v3460_v13 = vrot.slane %v6190_v12, 5  ;;  %v957_v29 = vrot.slane %v956_v15, 4  ;;  %v722_v1 = vld [vmem:[%s7538_s27 + $0xa0] sm:$0xf] }
  0x7a   : > { %v948_v18 = vsel %vm7585_vm4, %v943_v2, %v947_v51  ;;  %v3463_v34 = vrot.slane %v6191_v28, 5  ;;  %v974_v20 = vshrl.u32 %v712_v14, 16  ;;  %v977_v33 = vshll.u32 %v712_v14, 16  ;;  %v720_v14 = vld [vmem:[%s7538_s27 + $0x98] sm:$0x1] }
  0x7b   : > { %v5925_v21 = vcombine.low %v938_v61, %v948_v18  ;;  %v967_v22 = vrot.slane %v966_v5, 4  ;;  %v3457_v24 = vsel %vm7660_vm7, %v3455_v11, %v3456_v8  ;;  %v3461_v25 = vsel %vm7660_vm7, %v6207_v3, %v3460_v13 }
  0x7c   : > { %v962_v31 = vsel %vm7585_vm4, %v957_v29, %v961_v59  ;;  %v6223_v32 = vcombine.low %v3454_v10, %v3457_v24  ;;  %v3462_v54 = vrot.slane %v3460_v13, 4  ;;  %v976_v6 = vrot.slane %v974_v20, 4  ;;  %v721_v59 = vld [vmem:[%s7538_s27 + $0x9c] sm:$0xf]  ;;  %v7417_v13 = vld [vmem:[%s7538_s27 + $0x24] sm:$0xff]   ;;  %v7418_v20 = vld [vmem:[%s7538_s27 + $0x30] sm:$0xff]  }
  0x7d   : > { %6692 = vmatprep.mubr.msk.bf16.mxu1 %vm404_vm1, %v5925_v21  ;;  %v972_v7 = vsel %vm7585_vm4, %v967_v22, %v971_v63  ;;  %v983_v35 = vshll.u32 %v713_v17, 16  ;;  %v987_v36 = vshrl.u32 %v713_v17, 16  ;;  %v993_v23 = vshll.u32 %v714_v19, 16 }
  0x7e   : > { %v5926_v39 = vcombine.low %v962_v31, %v972_v7  ;;  %6840 = vmatprep.mubr.msk.bf16.mxu0 %vm404_vm1, %v6223_v32  ;;  %v3464_v9 = vsel %vm7660_vm7, %v3462_v54, %v3463_v34  ;;  %v998_v41 = vshrl.u32 %v715_v26, 16  ;;  %v979_v44 = vrot.slane %v977_v33, 5 }
  0x7f   : > { %v6224_v42 = vcombine.low %v3461_v25, %v3464_v9  ;;  %v985_v45 = vrot.slane %v983_v35, 5  ;;  %v989_v46 = vrot.slane %v987_v36, 4  ;;  %v995_v48 = vrot.slane %v993_v23, 5  ;;  %v723_v25 = vld [vmem:[%s7538_s27 + $0xa4] sm:$0x1] }
  0x80   : > { %6693 = vmatmul.mubr.msk.bf16.gmra.mrb[16].mxu1 %vm404_vm1, %v5926_v39  ;;  %v1000_v49 = vrot.slane %v998_v41, 4  ;;  %v1001_v50 = vshll.u32 %v715_v26, 16  ;;  %v1007_v51 = vshll.u32 %v716_v27, 16  ;;  %v980_v52 = vor.u32 %v979_v44, %v976_v6  ;;  %v724_v6 = vld [vmem:[%s7538_s27 + $0xa8] sm:$0xf] }
  0x81   : > { %6841 = vmatmul.mubr.msk.bf16.gmra.mrb[28].mxu0 %vm404_vm1, %v6224_v42  ;;  %v990_v53 = vor.u32 %v989_v46, %v985_v45  ;;  %v1011_v12 = vshrl.u32 %v716_v27, 16  ;;  %v1017_v55 = vshll.u32 %v717_v40, 16  ;;  %v1022_v57 = vshrl.u32 %v718_v47, 16  ;;  %v726_v41 = vld [vmem:[%s7538_s27 + $0xb0] sm:$0x1] }
  0x82   : > { %v1003_v37 = vrot.slane %v1001_v50, 5  ;;  %v1009_v28 = vrot.slane %v1007_v51, 5  ;;  %6846 = vmatprep.mubr.msk.bf16.mxu0 %vm404_vm1, %v7416_v38  ;;  %v1025_v58 = vshll.u32 %v718_v47, 16  ;;  %v981_v60 = vrot.slane %v980_v52, 4  ;;  %v725_v38 = vld [vmem:[%s7538_s27 + $0xac] sm:$0xf] }
  0x83   : > { %v991_v61 = vrot.slane %v990_v53, 4  ;;  %v1013_v62 = vrot.slane %v1011_v12, 4  ;;  %v1019_v63 = vrot.slane %v1017_v55, 5  ;;  %v1024_v15 = vrot.slane %v1022_v57, 4  ;;  %v727_v42 = vld [vmem:[%s7538_s27 + $0xb4] sm:$0xf] }
  0x84   : > { %v1004_v2 = vor.u32 %v1003_v37, %v1000_v49  ;;  %v1027_v8 = vrot.slane %v1025_v58, 5  ;;  %v1031_v3 = vshll.u32 %v719_v56, 16  ;;  %v986_v5 = vsel %vm7585_vm4, %v981_v60, %v985_v45  ;;  %v7419_v55 = vld [vmem:[%s7538_s27 + $0x3c] sm:$0xff]  }
  0x85   : > { %v996_v10 = vsel %vm7585_vm4, %v991_v61, %v995_v48  ;;  %v1014_v11 = vor.u32 %v1013_v62, %v1009_v28  ;;  %v1035_v17 = vshrl.u32 %v719_v56, 16  ;;  %v1041_v24 = vshll.u32 %v720_v14, 16  ;;  %v728_v48 = vld [vmem:[%s7538_s27 + $0xb8] sm:$0xf]  ;;  %v729_v58 = vld [vmem:[%s7538_s27 + $0xbc] sm:$0x1] }
  0x86   : > { %v5927_v18 = vcombine.low %v986_v5, %v996_v10  ;;  %v1005_v29 = vrot.slane %v1004_v2, 4  ;;  %v1028_v34 = vor.u32 %v1027_v8, %v1024_v15  ;;  %v1033_v19 = vrot.slane %v1031_v3, 5  ;;  %v1476_v5 = vld [vmem:[%s7538_s27 + $0x4] sm:$0xf]  ;;  %v1477_v10 = vld [vmem:[%s7538_s27 + $0x8] sm:$0x1] }
  0x87   : > { %v1015_v21 = vrot.slane %v1014_v11, 4  ;;  %v1037_v22 = vrot.slane %v1035_v17, 4  ;;  %v1046_v26 = vshrl.u32 %v721_v59, 16  ;;  %v1049_v32 = vshll.u32 %v721_v59, 16  ;;  %v7420_v59 = vld [vmem:[%s7538_s27 + $0x48] sm:$0xff]  }
  0x88   : > { %6696 = vmatprep.mubr.msk.bf16.mxu1 %vm404_vm1, %v5927_v18  ;;  %v1010_v27 = vsel %vm7585_vm4, %v1005_v29, %v1009_v28  ;;  %v1029_v31 = vrot.slane %v1028_v34, 4  ;;  %v1055_v54 = vshll.u32 %v722_v1, 16  ;;  %v1043_v35 = vrot.slane %v1041_v24, 5  ;;  %v1478_v29 = vld [vmem:[%s7538_s27 + $0xc] sm:$0xe] }
  0x89   : > { %v1020_v7 = vsel %vm7585_vm4, %v1015_v21, %v1019_v63  ;;  %6847 = vmatmul.mubr.msk.bf16.vlgmr.msra.gmra.mrb[0].mxu0 %vm404_vm1, %v7417_v13  ;;  %v1038_v33 = vor.u32 %v1037_v22, %v1033_v19  ;;  %v1048_v36 = vrot.slane %v1046_v26, 4  ;;  %v1051_v23 = vrot.slane %v1049_v32, 5  ;;  %v1479_v22 = vld [vmem:[%s7538_s27 + $0x10] sm:$0xf]  ;;  %v1480_v24 = vld [vmem:[%s7538_s27 + $0x14] sm:$0x1] }
  0x8a   : > { %v5928_v39 = vcombine.low %v1010_v27, %v1020_v7  ;;  %6879 = vmatpush3.bf16.msra.mxu0 %v7571_v16  ;;  %v1034_v9 = vsel %vm7585_vm4, %v1029_v31, %v1033_v19  ;;  %v1057_v40 = vrot.slane %v1055_v54, 5  ;;  %6850 = vmatprep.mubr.msk.bf16.mxu0 %vm404_vm1, %v7418_v20  ;;  %v1059_v45 = vshrl.u32 %v722_v1, 16  ;;  %v1475_v1 = vld [vmem:[%s7538_s27] sm:$0xe]  ;;  %v1481_v32 = vld [vmem:[%s7538_s27 + $0x18] sm:$0xe] }
  0x8b   : > { %v1039_v44 = vrot.slane %v1038_v33, 4  ;;  %v1065_v46 = vshll.u32 %v723_v25, 16  ;;  %v1070_v47 = vshrl.u32 %v724_v6, 16  ;;  %v1052_v16 = vor.u32 %v1051_v23, %v1048_v36  ;;  %v1482_v36 = vld [vmem:[%s7538_s27 + $0x1c] sm:$0xf] }
  0x8c   : > { %6697 = vmatmul.mubr.msk.bf16.gmra.mrb[20].mxu1 %vm404_vm1, %v5928_v39  ;;  %v1073_v49 = vshll.u32 %v724_v6, 16  ;;  %v1079_v50 = vshll.u32 %v725_v38, 16  ;;  %v1083_v51 = vshrl.u32 %v725_v38, 16  ;;  %v1061_v53 = vrot.slane %v1059_v45, 4 }
  0x8d   : > { %v1044_v52 = vsel %vm7585_vm4, %v1039_v44, %v1043_v35  ;;  %v1067_v12 = vrot.slane %v1065_v46, 5  ;;  %v1072_v56 = vrot.slane %v1070_v47, 4  ;;  %v1053_v28 = vrot.slane %v1052_v16, 4  ;;  %v7421_v35 = vld [vmem:[%s7538_s27 + $0x54] sm:$0xff]   ;;  %v1483_v46 = vld [vmem:[%s7538_s27 + $0x20] sm:$0x1] }
  0x8e   : > { %v5929_v37 = vcombine.low %v1034_v9, %v1044_v52  ;;  %v1075_v14 = vrot.slane %v1073_v49, 5  ;;  %v1081_v57 = vrot.slane %v1079_v50, 5  ;;  %v1062_v60 = vor.u32 %v1061_v53, %v1057_v40  ;;  %v1484_v47 = vld [vmem:[%s7538_s27 + $0x24] sm:$0xe]  ;;  %v1486_v52 = vld [vmem:[%s7538_s27 + $0x2c] sm:$0x1] }
  0x8f   : > { %v1085_v61 = vrot.slane %v1083_v51, 4  ;;  %v1089_v62 = vshll.u32 %v726_v41, 16  ;;  %v1094_v63 = vshrl.u32 %v727_v42, 16  ;;  %v1058_v2 = vsel %vm7585_vm4, %v1053_v28, %v1057_v40  ;;  %v7422_v40 = vld [vmem:[%s7538_s27 + $0x60] sm:$0xff]   ;;  %v1485_v51 = vld [vmem:[%s7538_s27 + $0x28] sm:$0xf] }
  0x90   : > { %6700 = vmatprep.mubr.msk.bf16.mxu1 %vm404_vm1, %v5929_v37  ;;  %v1076_v15 = vor.u32 %v1075_v14, %v1072_v56  ;;  %v1097_v8 = vshll.u32 %v727_v42, 16  ;;  %v1103_v3 = vshll.u32 %v728_v48, 16  ;;  %v1063_v11 = vrot.slane %v1062_v60, 4  ;;  %v1487_v53 = vld [vmem:[%s7538_s27 + $0x30] sm:$0xe] }
  0x91   : > { %6851 = vmatmul.mubr.msk.bf16.gmra.mrb[4].mxu0 %vm404_vm1, %v7419_v55  ;;  %v1086_v13 = vor.u32 %v1085_v61, %v1081_v57  ;;  %v1091_v17 = vrot.slane %v1089_v62, 5  ;;  %v1096_v18 = vrot.slane %v1094_v63, 4  ;;  %v1107_v21 = vshrl.u32 %v728_v48, 16  ;;  %v1488_v28 = vld [vmem:[%s7538_s27 + $0x34] sm:$0xf] }
  0x92   : > { %v1077_v34 = vrot.slane %v1076_v15, 4  ;;  %v1099_v19 = vrot.slane %v1097_v8, 5  ;;  %v1105_v20 = vrot.slane %v1103_v3, 5  ;;  %6854 = vmatprep.mubr.msk.bf16.mxu0 %vm404_vm1, %v7420_v59  ;;  %v1068_v25 = vsel %vm7585_vm4, %v1063_v11, %v1067_v12  ;;  %v1489_v14 = vld [vmem:[%s7538_s27 + $0x38] sm:$0x1] }
  0x93   : > { %v1087_v26 = vrot.slane %v1086_v13, 4  ;;  %v1113_v27 = vshll.u32 %v729_v58, 16  ;;  %v5949_v31 = vrot.slane %v1475_v1, 9  ;;  %v5930_v54 = vcombine.low %v1058_v2, %v1068_v25  ;;  %v1491_v61 = vld [vmem:[%s7538_s27 + $0x40] sm:$0xf] }
  0x94   : > { %v1082_v6 = vsel %vm7585_vm4, %v1077_v34, %v1081_v57  ;;  %v1100_v7 = vor.u32 %v1099_v19, %v1096_v18  ;;  %v1109_v33 = vrot.slane %v1107_v21, 4  ;;  %v1576_v9 = vrot.slane %v1476_v5, 5  ;;  %v1492_v15 = vld [vmem:[%s7538_s27 + $0x44] sm:$0x1]  ;;  %v1493_v8 = vld [vmem:[%s7538_s27 + $0x48] sm:$0xe] }
  0x95   : > { %v1092_v38 = vsel %vm7585_vm4, %v1087_v26, %v1091_v17  ;;  %v1115_v39 = vrot.slane %v1113_v27, 5  ;;  %v1579_v23 = vrot.slane %v1477_v10, 5  ;;  %6701 = vmatmul.mubr.msk.bf16.gmra.mrb[24].mxu1 %vm404_vm1, %v5930_v54  ;;  %v5950_v45 = vrot.slane %v1478_v29, 9  ;;  %v1494_v13 = vld [vmem:[%s7538_s27 + $0x4c] sm:$0xf] }
  0x96   : > { %v5931_v41 = vcombine.low %v1082_v6, %v1092_v38  ;;  %v1101_v42 = vrot.slane %v1100_v7, 4  ;;  %v1110_v44 = vor.u32 %v1109_v33, %v1105_v20  ;;  %v1577_v48 = vsel %vm7660_vm7, %v5949_v31, %v1576_v9  ;;  %v7423_v18 = vld [vmem:[%s7538_s27 + $0x6c] sm:$0xff]   ;;  %v1496_v27 = vld [vmem:[%s7538_s27 + $0x54] sm:$0xe]  ;;  %v1497_v7 = vld [vmem:[%s7538_s27 + $0x58] sm:$0xf] }
  0x97   : > { %v1578_v16 = vrot.slane %v1576_v9, 4  ;;  %v1583_v49 = vrot.slane %v1479_v22, 5  ;;  %v1586_v50 = vrot.slane %v1480_v24, 5  ;;  %v8016_v56 = vsel %vm453_vm0, %v7946_v30, 0  ;;  %v1490_v30 = vld [vmem:[%s7538_s27 + $0x3c] sm:$0xe] }
  0x98   : > { %6704 = vmatprep.mubr.msk.bf16.mxu1 %vm404_vm1, %v5931_v41  ;;  %v1106_v12 = vsel %vm7585_vm4, %v1101_v42, %v1105_v20  ;;  %v1111_v55 = vrot.slane %v1110_v44, 4  ;;  %v5951_v37 = vrot.slane %v1481_v32, 9  ;;  %v1590_v60 = vrot.slane %v1482_v36, 5  ;;  %v1495_v20 = vld [vmem:[%s7538_s27 + $0x50] sm:$0x1]  ;;  %v7424_v22 = vld [vmem:[%s7538_s27 + $0x78] sm:$0xff]  }
  0x99   : > { %6855 = vmatmul.mubr.msk.bf16.gmra.mrb[8].mxu0 %vm404_vm1, %v7421_v35  ;;  %v1580_v57 = vsel %vm7660_vm7, %v1578_v16, %v1579_v23  ;;  %v8025_v58 = vsel %vm7660_vm7, %v5950_v45, %v1583_v49  ;;  %v1585_v59 = vrot.slane %v1583_v49, 4  ;;  %v1593_v1 = vrot.slane %v1483_v46, 5  ;;  %v1498_v33 = vld [vmem:[%s7538_s27 + $0x5c] sm:$0x1]  ;;  %v1499_v35 = vld [vmem:[%s7538_s27 + $0x60] sm:$0xe] }
  0x9a   : > { %v1116_v62 = vsel %vm7585_vm4, %v1111_v55, %v1115_v39  ;;  %v5966_v63 = vcombine.low %v1577_v48, %v1580_v57  ;;  %6858 = vmatprep.mubr.msk.bf16.mxu0 %vm404_vm1, %v7422_v40  ;;  %v5952_v2 = vrot.slane %v1484_v47, 9  ;;  %v8040_v10 = vsel %vm7660_vm7, %v5951_v37, %v1590_v60  ;;  %v1500_v23 = vld [vmem:[%s7538_s27 + $0x64] sm:$0xf]  ;;  %v1501_v40 = vld [vmem:[%s7538_s27 + $0x68] sm:$0x1] }
  0x9b   : > { %v5932_v3 = vcombine.low %v1106_v12, %v1116_v62  ;;  %v8036_v5 = vsel %vm7660_vm7, %v1585_v59, %v1586_v50  ;;  %v1592_v11 = vrot.slane %v1590_v60, 4  ;;  %v1597_v29 = vrot.slane %v1485_v51, 5  ;;  %v1502_v41 = vld [vmem:[%s7538_s27 + $0x6c] sm:$0xe]  ;;  %v1503_v47 = vld [vmem:[%s7538_s27 + $0x70] sm:$0xf] }
  0x9c   : > { %v5967_v17 = vcombine.low %v8025_v58, %v8036_v5  ;;  %v1600_v34 = vrot.slane %v1486_v52, 5  ;;  %v5953_v19 = vrot.slane %v1487_v53, 9  ;;  %v1604_v24 = vrot.slane %v1488_v28, 5  ;;  %v1504_v55 = vld [vmem:[%s7538_s27 + $0x74] sm:$0x1]  ;;  %v7425_v59 = vld [vmem:[%s7538_s27 + $0x84] sm:$0xff]  }
  0x9d   : > { %v8049_v21 = vsel %vm7660_vm7, %v1592_v11, %v1593_v1  ;;  %v1607_v25 = vrot.slane %v1489_v14, 5  ;;  %v5954_v26 = vrot.slane %v1490_v30, 9  ;;  %6705 = vmatmul.mubr.msk.bf16.gmra.mrb[28].mxu1 %vm404_vm1, %v5932_v3  ;;  %v8058_v32 = vsel %vm7660_vm7, %v5952_v2, %v1597_v29  ;;  %v1505_v58 = vld [vmem:[%s7538_s27 + $0x78] sm:$0xe]  ;;  %v1507_v3 = vld [vmem:[%s7538_s27 + $0x80] sm:$0x1] }
  0x9e   : > { %v5968_v31 = vcombine.low %v8040_v10, %v8049_v21  ;;  %v1599_v54 = vrot.slane %v1597_v29, 4  ;;  %v1611_v6 = vrot.slane %v1491_v61, 5  ;;  %6710 = vmatprep.mubr.msk.bf16.mxu1 %vm404_vm1, %v5966_v63  ;;  %v8066_v36 = vsel %vm7660_vm7, %v5953_v19, %v1604_v24  ;;  %v1506_v63 = vld [vmem:[%s7538_s27 + $0x7c] sm:$0xf]  ;;  %v1508_v5 = vld [vmem:[%s7538_s27 + $0x84] sm:$0xe] }
  0x9f   : > { %v1606_v38 = vrot.slane %v1604_v24, 4  ;;  %v1614_v39 = vrot.slane %v1492_v15, 5  ;;  %v5955_v9 = vrot.slane %v1493_v8, 9  ;;  %v1618_v46 = vrot.slane %v1494_v13, 5  ;;  %v7426_v10 = vld [vmem:[%s7538_s27 + $0x90] sm:$0xff]  }
  0xa0   : > { %v8073_v42 = vsel %vm7660_vm7, %v1599_v54, %v1600_v34  ;;  %v8077_v44 = vsel %vm7660_vm7, %v5954_v26, %v1611_v6  ;;  %v1613_v45 = vrot.slane %v1611_v6, 4  ;;  %v1621_v49 = vrot.slane %v1495_v20, 5  ;;  %v1509_v34 = vld [vmem:[%s7538_s27 + $0x88] sm:$0xf]  ;;  %v6306_v24 = vld [vmem:[%s7538_s27 + $0x18] sm:$0xf] }
  0xa1   : > { %6859 = vmatmul.mubr.msk.bf16.gmra.mrb[12].mxu0 %vm404_vm1, %v7423_v18  ;;  %v5969_v48 = vcombine.low %v8058_v32, %v8073_v42  ;;  %v8085_v16 = vsel %vm7660_vm7, %v1606_v38, %v1607_v25  ;;  %v5956_v50 = vrot.slane %v1496_v27, 9  ;;  %v8096_v53 = vsel %vm7660_vm7, %v5955_v9, %v1618_v46  ;;  %v7448_v54 = vld [vmem:[%s8835_s1 + $0x8] sm:$0x3]  ;;  %v6308_v38 = vld [vmem:[%s7538_s27 + $0x20] sm:$0x1] }
  0xa2   : > { %6862 = vmatprep.mubr.msk.bf16.mxu0 %vm404_vm1, %v7424_v22  ;;  %v5970_v51 = vcombine.low %v8066_v36, %v8085_v16  ;;  %v8092_v52 = vsel %vm7660_vm7, %v1613_v45, %v1614_v39  ;;  %v1620_v12 = vrot.slane %v1618_v46, 4  ;;  %v1625_v28 = vrot.slane %v1497_v7, 5  ;;  %v1510_v22 = vld [vmem:[%s7538_s27 + $0x8c] sm:$0x1]  ;;  %v6309_v39 = vld [vmem:[%s7538_s27 + $0x24] sm:$0xf] }
  0xa3   : > { %v5971_v37 = vcombine.low %v8077_v44, %v8092_v52  ;;  %v1628_v14 = vrot.slane %v1498_v33, 5  ;;  %v5957_v57 = vrot.slane %v1499_v35, 9  ;;  %v1632_v30 = vrot.slane %v1500_v23, 5  ;;  %v6451_v45 = vld [vmem:[%s8835_s1 + $0x10] sm:$0x3] }
  0xa4   : > { %v8105_v60 = vsel %vm7660_vm7, %v1620_v12, %v1621_v49  ;;  %v1635_v61 = vrot.slane %v1501_v40, 5  ;;  %v5958_v62 = vrot.slane %v1502_v41, 9  ;;  %v8112_v2 = vsel %vm7660_vm7, %v5956_v50, %v1625_v28  ;;  %v6310_v12 = vld [vmem:[%s7538_s27 + $0x28] sm:$0xf]  ;;  %7373 = vmatprep.subr.msk.bf16.mxu0 %vm453_vm0, %v6451_v45 }
  0xa5   : > { %v5972_v1 = vcombine.low %v8096_v53, %v8105_v60  ;;  %v1627_v15 = vrot.slane %v1625_v28, 4  ;;  %v1639_v8 = vrot.slane %v1503_v47, 5  ;;  %6711 = vmatmul.mubr.msk.bf16.vlgmr.msra.gmra.mrb[0].mxu1 %vm404_vm1, %v5967_v17  ;;  %v8120_v11 = vsel %vm7660_vm7, %v5957_v57, %v1632_v30 }
  0xa6   : > { %v1634_v13 = vrot.slane %v1632_v30, 4  ;;  %v1642_v18 = vrot.slane %v1504_v55, 5  ;;  %v5959_v29 = vrot.slane %v1505_v58, 9  ;;  %6743 = vmatpush3.bf16.msra.mxu1 %v8016_v56  ;;  %6714 = vmatprep.mubr.msk.bf16.mxu1 %vm404_vm1, %v5968_v31  ;;  %v1646_v21 = vrot.slane %v1506_v63, 5  ;;  %v6307_v31 = vld [vmem:[%s7538_s27 + $0x1c] sm:$0xf] }
  0xa7   : > { %v8127_v19 = vsel %vm7660_vm7, %v1627_v15, %v1628_v14  ;;  %v8131_v17 = vsel %vm7660_vm7, %v5958_v62, %v1639_v8  ;;  %v1641_v20 = vrot.slane %v1639_v8, 4  ;;  %v1649_v26 = vrot.slane %v1507_v3, 5  ;;  %7369 = vmatprep.subr.msk.bf16.mxu1 %vm453_vm0, %v7448_v54  ;;  %v7427_v55 = vld [vmem:[%s7538_s27 + $0x9c] sm:$0xff]   ;;  %v6311_v63 = vld [vmem:[%s7538_s27 + $0x2c] sm:$0x1] }
  0xa8   : > { %v5973_v25 = vcombine.low %v8112_v2, %v8127_v19  ;;  %v8139_v56 = vsel %vm7660_vm7, %v1634_v13, %v1635_v61  ;;  %v5960_v27 = vrot.slane %v1508_v5, 9  ;;  %v8155_v33 = vsel %vm7660_vm7, %v5959_v29, %v1646_v21  ;;  %v7428_v15 = vld [vmem:[%s7538_s27 + $0xa8] sm:$0xff]   ;;  %v1511_v13 = vld [vmem:[%s7538_s27 + $0x90] sm:$0xe]  ;;  %v1512_v29 = vld [vmem:[%s7538_s27 + $0x94] sm:$0xf] }
  0xa9   : > { %6863 = vmatmul.mubr.msk.bf16.gmra.mrb[16].mxu0 %vm404_vm1, %v7425_v59  ;;  %v5974_v6 = vcombine.low %v8120_v11, %v8139_v56  ;;  %v8151_v7 = vsel %vm7660_vm7, %v1641_v20, %v1642_v18  ;;  %v1648_v35 = vrot.slane %v1646_v21, 4  ;;  %v1653_v23 = vrot.slane %v1509_v34, 5  ;;  %v1513_v34 = vld [vmem:[%s7538_s27 + $0x98] sm:$0x1]  ;;  %v6318_v2 = vld [vmem:[%s7538_s27 + $0x48] sm:$0xf] }
  0xaa   : > { %6866 = vmatprep.mubr.msk.bf16.mxu0 %vm404_vm1, %v7426_v10  ;;  %v5975_v9 = vcombine.low %v8131_v17, %v8151_v7  ;;  %v1656_v40 = vrot.slane %v1510_v22, 5  ;;  %v4295_v41 = vshrl.u32 %v6306_v24, 16  ;;  %v4298_v47 = vshll.u32 %v6306_v24, 16 }
  0xab   : > { %v8167_v46 = vsel %vm7660_vm7, %v1648_v35, %v1649_v26  ;;  %v4304_v49 = vshll.u32 %v6307_v31, 16  ;;  %v4308_v50 = vshrl.u32 %v6307_v31, 16  ;;  %v8176_v14 = vsel %vm7660_vm7, %v5960_v27, %v1653_v23  ;;  %v1514_v26 = vld [vmem:[%s7538_s27 + $0x9c] sm:$0xe]  ;;  %v1515_v31 = vld [vmem:[%s7538_s27 + $0xa0] sm:$0xf] }
  0xac   : > { %v5976_v28 = vcombine.low %v8155_v33, %v8167_v46  ;;  %v1655_v57 = vrot.slane %v1653_v23, 4  ;;  %v4297_v58 = vrot.slane %v4295_v41, 4  ;;  %v4300_v59 = vrot.slane %v4298_v47, 5  ;;  %v1516_v23 = vld [vmem:[%s7538_s27 + $0xa4] sm:$0x1] }
  0xad   : > { %v4306_v30 = vrot.slane %v4304_v49, 5  ;;  %v4310_v61 = vrot.slane %v4308_v50, 4  ;;  %v4314_v62 = vshll.u32 %v6308_v38, 16  ;;  %6715 = vmatmul.mubr.msk.bf16.gmra.mrb[4].mxu1 %vm404_vm1, %v5969_v48  ;;  %v4319_v3 = vshrl.u32 %v6309_v39, 16  ;;  %v6312_v49 = vld [vmem:[%s7538_s27 + $0x30] sm:$0xf] }
  0xae   : > { %v8186_v8 = vsel %vm7660_vm7, %v1655_v57, %v1656_v40  ;;  %v4322_v5 = vshll.u32 %v6309_v39, 16  ;;  %v4328_v10 = vshll.u32 %v6310_v12, 16  ;;  %6718 = vmatprep.mubr.msk.bf16.mxu1 %vm404_vm1, %v5970_v51  ;;  %v4301_v42 = vor.u32 %v4300_v59, %v4297_v58  ;;  %v6313_v58 = vld [vmem:[%s7538_s27 + $0x34] sm:$0xf]  ;;  %v6326_v33 = vld [vmem:[%s7538_s27 + $0x68] sm:$0x1] }
  0xaf   : > { %v5977_v32 = vcombine.low %v8176_v14, %v8186_v8  ;;  %v4311_v48 = vor.u32 %v4310_v61, %v4306_v30  ;;  %v4316_v18 = vrot.slane %v4314_v62, 5  ;;  %v4321_v20 = vrot.slane %v4319_v3, 4  ;;  %v7429_v59 = vld [vmem:[%s7538_s27 + $0xb4] sm:$0xff]  }
  0xb0   : > { %v4324_v21 = vrot.slane %v4322_v5, 5  ;;  %v4330_v22 = vrot.slane %v4328_v10, 5  ;;  %v4332_v24 = vshrl.u32 %v6310_v12, 16  ;;  %v4302_v36 = vrot.slane %v4301_v42, 4 }
  0xb1   : > { %6867 = vmatmul.mubr.msk.bf16.gmra.mrb[20].mxu0 %vm404_vm1, %v7427_v55  ;;  %v4312_v16 = vrot.slane %v4311_v48, 4  ;;  %v4338_v51 = vshll.u32 %v6311_v63, 16  ;;  %v8200_v27 = vsel %vm453_vm0, %v6451_v45, 0  ;;  %v5961_v38 = vrot.slane %v1511_v13, 9 }
  0xb2   : > { %6870 = vmatprep.mubr.msk.bf16.mxu0 %vm404_vm1, %v7428_v15  ;;  %v4325_v54 = vor.u32 %v4324_v21, %v4321_v20  ;;  %v4334_v35 = vrot.slane %v4332_v24, 4  ;;  %v1660_v39 = vrot.slane %v1512_v29, 5  ;;  %v4307_v40 = vsel %vm7585_vm4, %v4302_v36, %v4306_v30  ;;  %v7430_v15 = vld [vmem:[%s7538_s27 + $0xc0] sm:$0xff]   ;;  %v1517_v36 = vld [vmem:[%s7538_s27 + $0xa8] sm:$0xe] }
  0xb3   : > { %v4317_v41 = vsel %vm7585_vm4, %v4312_v16, %v4316_v18  ;;  %v4340_v47 = vrot.slane %v4338_v51, 5  ;;  %v1663_v45 = vrot.slane %v1513_v34, 5  ;;  %v5962_v30 = vrot.slane %v1514_v26, 9  ;;  %v6315_v18 = vld [vmem:[%s7538_s27 + $0x3c] sm:$0xf] }
  0xb4   : > { %v8210_v50 = vcombine.low %v4307_v40, %v4317_v41  ;;  %v4326_v12 = vrot.slane %v4325_v54, 4  ;;  %v4335_v55 = vor.u32 %v4334_v35, %v4330_v22  ;;  %v8214_v57 = vsel %vm7660_vm7, %v5961_v38, %v1660_v39  ;;  %v6316_v34 = vld [vmem:[%s7538_s27 + $0x40] sm:$0xf]  ;;  %v6317_v26 = vld [vmem:[%s7538_s27 + $0x44] sm:$0x1] }
  0xb5   : > { %v1662_v61 = vrot.slane %v1660_v39, 4  ;;  %v1667_v62 = vrot.slane %v1515_v31, 5  ;;  %v1670_v63 = vrot.slane %v1516_v23, 5  ;;  %6719 = vmatmul.mubr.msk.bf16.gmra.mrb[8].mxu1 %vm404_vm1, %v5971_v37  ;;  %v4343_v10 = vshrl.u32 %v6312_v49, 16  ;;  %v6314_v37 = vld [vmem:[%s7538_s27 + $0x38] sm:$0x1] }
  0xb6   : > { %v4331_v3 = vsel %vm7585_vm4, %v4326_v12, %v4330_v22  ;;  %v4336_v5 = vrot.slane %v4335_v55, 4  ;;  %v4346_v13 = vshll.u32 %v6312_v49, 16  ;;  %6722 = vmatprep.mubr.msk.bf16.mxu1 %vm404_vm1, %v5972_v1  ;;  %v4352_v48 = vshll.u32 %v6313_v58, 16  ;;  %v1518_v35 = vld [vmem:[%s7538_s27 + $0xac] sm:$0xf] }
  0xb7   : > { %v8231_v42 = vsel %vm7660_vm7, %v1662_v61, %v1663_v45  ;;  %v8235_v44 = vsel %vm7660_vm7, %v5962_v30, %v1667_v62  ;;  %v1669_v52 = vrot.slane %v1667_v62, 4  ;;  %v4345_v60 = vrot.slane %v4343_v10, 4  ;;  %v1519_v38 = vld [vmem:[%s7538_s27 + $0xb0] sm:$0x1]  ;;  %v1521_v45 = vld [vmem:[%s7538_s27 + $0xb8] sm:$0xf] }
  0xb8   : > { %v4341_v29 = vsel %vm7585_vm4, %v4336_v5, %v4340_v47  ;;  %v5978_v53 = vcombine.low %v8214_v57, %v8231_v42  ;;  %v4348_v1 = vrot.slane %v4346_v13, 5  ;;  %v4354_v22 = vrot.slane %v4352_v48, 5  ;;  %v1520_v47 = vld [vmem:[%s7538_s27 + $0xb4] sm:$0xe]  ;;  %v7431_v61 = vld [vmem:[%s7538_s27 + $0xcc] sm:$0xff]  }
  0xb9   : > { %6871 = vmatmul.mubr.msk.bf16.gmra.mrb[24].mxu0 %vm404_vm1, %v7429_v59  ;;  %v8245_v20 = vcombine.low %v4331_v3, %v4341_v29  ;;  %v8249_v21 = vsel %vm7660_vm7, %v1669_v52, %v1670_v63  ;;  %v4356_v24 = vshrl.u32 %v6313_v58, 16  ;;  %v4362_v31 = vshll.u32 %v6314_v37, 16  ;;  %v1522_v59 = vld [vmem:[%s7538_s27 + $0xbc] sm:$0x1] }
  0xba   : > { %6874 = vmatprep.mubr.msk.bf16.mxu0 %vm404_vm1, %v7430_v15  ;;  %v5979_v16 = vcombine.low %v8235_v44, %v8249_v21  ;;  %v4349_v51 = vor.u32 %v4348_v1, %v4345_v60  ;;  %v4367_v54 = vshrl.u32 %v6315_v18, 16  ;;  %v4370_v23 = vshll.u32 %v6315_v18, 16  ;;  %v6319_v1 = vld [vmem:[%s7538_s27 + $0x4c] sm:$0xf] }
  0xbb   : > { %v4358_v39 = vrot.slane %v4356_v24, 4  ;;  %v4376_v40 = vshll.u32 %v6316_v34, 16  ;;  %v4380_v41 = vshrl.u32 %v6316_v34, 16  ;;  %v4364_v12 = vrot.slane %v4362_v31, 5  ;;  %v6321_v31 = vld [vmem:[%s7538_s27 + $0x54] sm:$0xf] }
  0xbc   : > { %v4350_v49 = vrot.slane %v4349_v51, 4  ;;  %v4369_v55 = vrot.slane %v4367_v54, 4  ;;  %v4386_v58 = vshll.u32 %v6317_v26, 16  ;;  %v4372_v62 = vrot.slane %v4370_v23, 5  ;;  %v6322_v54 = vld [vmem:[%s7538_s27 + $0x58] sm:$0xf] }
  0xbd   : > { %v4359_v30 = vor.u32 %v4358_v39, %v4354_v22  ;;  %v4378_v63 = vrot.slane %v4376_v40, 5  ;;  %v4382_v15 = vrot.slane %v4380_v41, 4  ;;  %6723 = vmatmul.mubr.msk.bf16.gmra.mrb[12].mxu1 %vm404_vm1, %v5973_v25  ;;  %v5963_v10 = vrot.slane %v1517_v36, 9  ;;  %v6335_v44 = vld [vmem:[%s7538_s27 + $0x8c] sm:$0x1] }
  0xbe   : > { %v4355_v3 = vsel %vm7585_vm4, %v4350_v49, %v4354_v22  ;;  %v4388_v5 = vrot.slane %v4386_v58, 5  ;;  %v1674_v13 = vrot.slane %v1518_v35, 5  ;;  %6726 = vmatprep.mubr.msk.bf16.mxu1 %vm404_vm1, %v5974_v6  ;;  %v4373_v37 = vor.u32 %v4372_v62, %v4369_v55  ;;  %v6320_v22 = vld [vmem:[%s7538_s27 + $0x50] sm:$0x1]  ;;  %v6323_v58 = vld [vmem:[%s7538_s27 + $0x5c] sm:$0x1] }
  0xbf   : > { %v4360_v52 = vrot.slane %v4359_v30, 4  ;;  %v4383_v48 = vor.u32 %v4382_v15, %v4378_v63  ;;  %v1677_v18 = vrot.slane %v1519_v38, 5  ;;  %v5964_v29 = vrot.slane %v1520_v47, 9 }
  0xc0   : > { %v8275_v19 = vsel %vm7660_vm7, %v5963_v10, %v1674_v13  ;;  %v1676_v25 = vrot.slane %v1674_v13, 4  ;;  %v1681_v60 = vrot.slane %v1521_v45, 5  ;;  %v4374_v56 = vrot.slane %v4373_v37, 4 }
  0xc1   : > { %6875 = vmatmul.mubr.msk.bf16.gmra.mrb[28].mxu0 %vm404_vm1, %v7431_v61  ;;  %v4365_v11 = vsel %vm7585_vm4, %v4360_v52, %v4364_v12  ;;  %v4384_v6 = vrot.slane %v4383_v48, 4  ;;  %v1684_v34 = vrot.slane %v1522_v59, 5  ;;  %v4391_v39 = vshrl.u32 %v6318_v2, 16  ;;  %v6325_v52 = vld [vmem:[%s7538_s27 + $0x64] sm:$0xf] }
  0xc2   : > { %6880 = vmatprep.mubr.msk.bf16.mxu0 %vm404_vm1, %v8210_v50  ;;  %v6357_v24 = vcombine.low %v4355_v3, %v4365_v11  ;;  %v8286_v26 = vsel %vm7660_vm7, %v1676_v25, %v1677_v18  ;;  %v8290_v36 = vsel %vm7660_vm7, %v5964_v29, %v1681_v60  ;;  %v1683_v51 = vrot.slane %v1681_v60, 4  ;;  %v6327_v60 = vld [vmem:[%s7538_s27 + $0x6c] sm:$0xf] }
  0xc3   : > { %v4379_v35 = vsel %vm7585_vm4, %v4374_v56, %v4378_v63  ;;  %v4389_v38 = vsel %vm7585_vm4, %v4384_v6, %v4388_v5  ;;  %v5980_v50 = vcombine.low %v8275_v19, %v8286_v26  ;;  %v4394_v41 = vshll.u32 %v6318_v2, 16  ;;  %v6324_v63 = vld [vmem:[%s7538_s27 + $0x60] sm:$0xf]  ;;  %v6328_v6 = vld [vmem:[%s7538_s27 + $0x70] sm:$0xf] }
  0xc4   : > { %v8300_v23 = vcombine.low %v4379_v35, %v4389_v38  ;;  %v8304_v40 = vsel %vm7660_vm7, %v1683_v51, %v1684_v34  ;;  %v4400_v47 = vshll.u32 %v6319_v1, 16  ;;  %v4393_v49 = vrot.slane %v4391_v39, 4 }
  0xc5   : > { %v5981_v45 = vcombine.low %v8290_v36, %v8304_v40  ;;  %v4404_v12 = vshrl.u32 %v6319_v1, 16  ;;  %v4410_v55 = vshll.u32 %v6320_v22, 16  ;;  %6727 = vmatmul.mubr.msk.bf16.gmra.mrb[16].mxu1 %vm404_vm1, %v5975_v9  ;;  %v4396_v59 = vrot.slane %v4394_v41, 5 }
  0xc6   : > { %v4402_v61 = vrot.slane %v4400_v47, 5  ;;  %v4415_v30 = vshrl.u32 %v6321_v31, 16  ;;  %v4418_v62 = vshll.u32 %v6321_v31, 16  ;;  %6730 = vmatprep.mubr.msk.bf16.mxu1 %vm404_vm1, %v5976_v28  ;;  %v4424_v5 = vshll.u32 %v6322_v54, 16 }
  0xc7   : > { %v4406_v15 = vrot.slane %v4404_v12, 4  ;;  %v4412_v3 = vrot.slane %v4410_v55, 5  ;;  %v4428_v10 = vshrl.u32 %v6322_v54, 16  ;;  %v4397_v13 = vor.u32 %v4396_v59, %v4393_v49  ;;  %v6329_v49 = vld [vmem:[%s7538_s27 + $0x74] sm:$0x1] }
  0xc8   : > { %v4417_v17 = vrot.slane %v4415_v30, 4  ;;  %v4420_v7 = vrot.slane %v4418_v62, 5  ;;  %v4434_v9 = vshll.u32 %v6323_v58, 16  ;;  %v4426_v48 = vrot.slane %v4424_v5, 5  ;;  %v6330_v55 = vld [vmem:[%s7538_s27 + $0x78] sm:$0xf] }
  0xc9   : > { %6881 = vmatmul.mubr.msk.bf16.vlgmr.msra.gmra.mrb[0].mxu0 %vm404_vm1, %v8245_v20  ;;  %v4407_v37 = vor.u32 %v4406_v15, %v4402_v61  ;;  %v4430_v18 = vrot.slane %v4428_v10, 4  ;;  %v4439_v46 = vshrl.u32 %v6324_v63, 16  ;;  %v4398_v28 = vrot.slane %v4397_v13, 4  ;;  %v6331_v62 = vld [vmem:[%s7538_s27 + $0x7c] sm:$0xf] }
  0xca   : > { %6913 = vmatpush3.bf16.msra.mxu0 %v8200_v27  ;;  %6884 = vmatprep.mubr.msk.bf16.mxu0 %vm404_vm1, %v6357_v24  ;;  %v4421_v2 = vor.u32 %v4420_v7, %v4417_v17  ;;  %v4436_v25 = vrot.slane %v4434_v9, 5  ;;  %v4442_v29 = vshll.u32 %v6324_v63, 16  ;;  %v4448_v20 = vshll.u32 %v6325_v52, 16  ;;  %v6332_v15 = vld [vmem:[%s7538_s27 + $0x80] sm:$0x1] }
  0xcb   : > { %v4408_v1 = vrot.slane %v4407_v37, 4  ;;  %v4431_v11 = vor.u32 %v4430_v18, %v4426_v48  ;;  %v4441_v56 = vrot.slane %v4439_v46, 4  ;;  %v4403_v34 = vsel %vm7585_vm4, %v4398_v28, %v4402_v61  ;;  %v6333_v17 = vld [vmem:[%s7538_s27 + $0x84] sm:$0xf] }
  0xcc   : > { %v4422_v22 = vrot.slane %v4421_v2, 4  ;;  %v4444_v51 = vrot.slane %v4442_v29, 5  ;;  %v4452_v31 = vshrl.u32 %v6325_v52, 16  ;;  %v4450_v54 = vrot.slane %v4448_v20, 5 }
  0xcd   : > { %v4413_v27 = vsel %vm7585_vm4, %v4408_v1, %v4412_v3  ;;  %v4432_v24 = vrot.slane %v4431_v11, 4  ;;  %v4458_v35 = vshll.u32 %v6326_v33, 16  ;;  %6731 = vmatmul.mubr.msk.bf16.gmra.mrb[20].mxu1 %vm404_vm1, %v5977_v32  ;;  %v4463_v8 = vshrl.u32 %v6327_v60, 16 }
  0xce   : > { %v6359_v38 = vcombine.low %v4403_v34, %v4413_v27  ;;  %v4427_v39 = vsel %vm7585_vm4, %v4422_v22, %v4426_v48  ;;  %v4445_v41 = vor.u32 %v4444_v51, %v4441_v56  ;;  %v4454_v47 = vrot.slane %v4452_v31, 4  ;;  %6734 = vmatprep.mubr.msk.bf16.mxu1 %vm404_vm1, %v5978_v53 }
  0xcf   : > { %v4437_v12 = vsel %vm7585_vm4, %v4432_v24, %v4436_v25  ;;  %v4460_v14 = vrot.slane %v4458_v35, 5  ;;  %v4466_v32 = vshll.u32 %v6327_v60, 16  ;;  %v4472_v30 = vshll.u32 %v6328_v6, 16  ;;  %v6337_v24 = vld [vmem:[%s7538_s27 + $0x94] sm:$0xf] }
  0xd0   : > { %v6360_v58 = vcombine.low %v4427_v39, %v4437_v12  ;;  %v4446_v59 = vrot.slane %v4445_v41, 4  ;;  %v4455_v61 = vor.u32 %v4454_v47, %v4450_v54  ;;  %v4465_v57 = vrot.slane %v4463_v8, 4  ;;  %v6338_v35 = vld [vmem:[%s7538_s27 + $0x98] sm:$0x1]  ;;  %v6339_v12 = vld [vmem:[%s7538_s27 + $0x9c] sm:$0xf] }
  0xd1   : > { %6885 = vmatmul.mubr.msk.bf16.gmra.mrb[4].mxu0 %vm404_vm1, %v8300_v23  ;;  %v4468_v42 = vrot.slane %v4466_v32, 5  ;;  %v4476_v53 = vshrl.u32 %v6328_v6, 16  ;;  %v4482_v63 = vshll.u32 %v6329_v49, 16  ;;  %v4474_v10 = vrot.slane %v4472_v30, 5  ;;  %v6334_v23 = vld [vmem:[%s7538_s27 + $0x88] sm:$0xf] }
  0xd2   : > { %6888 = vmatprep.mubr.msk.bf16.mxu0 %vm404_vm1, %v6359_v38  ;;  %v4451_v3 = vsel %vm7585_vm4, %v4446_v59, %v4450_v54  ;;  %v4456_v5 = vrot.slane %v4455_v61, 4  ;;  %v4487_v13 = vshrl.u32 %v6330_v55, 16  ;;  %v4490_v37 = vshll.u32 %v6330_v55, 16  ;;  %v7432_v38 = vld [vmem:[%s7538_s27 + $0xc] sm:$0xff]  }
  0xd3   : > { %v4469_v7 = vor.u32 %v4468_v42, %v4465_v57  ;;  %v4478_v9 = vrot.slane %v4476_v53, 4  ;;  %v4484_v52 = vrot.slane %v4482_v63, 5  ;;  %v4496_v33 = vshll.u32 %v6331_v62, 16  ;;  %v6340_v63 = vld [vmem:[%s7538_s27 + $0xa0] sm:$0xf] }
  0xd4   : > { %v4461_v48 = vsel %vm7585_vm4, %v4456_v5, %v4460_v14  ;;  %v4489_v18 = vrot.slane %v4487_v13, 4  ;;  %v4500_v46 = vshrl.u32 %v6331_v62, 16  ;;  %v4492_v29 = vrot.slane %v4490_v37, 5 }
  0xd5   : > { %v6361_v28 = vcombine.low %v4451_v3, %v4461_v48  ;;  %v4470_v2 = vrot.slane %v4469_v7, 4  ;;  %v4479_v25 = vor.u32 %v4478_v9, %v4474_v10  ;;  %6735 = vmatmul.mubr.msk.bf16.gmra.mrb[24].mxu1 %vm404_vm1, %v5979_v16  ;;  %v4498_v60 = vrot.slane %v4496_v33, 5  ;;  %v6336_v16 = vld [vmem:[%s7538_s27 + $0x90] sm:$0xf]  ;;  %v6341_v7 = vld [vmem:[%s7538_s27 + $0xa4] sm:$0x1] }
  0xd6   : > { %v4502_v1 = vrot.slane %v4500_v46, 4  ;;  %v4506_v11 = vshll.u32 %v6332_v15, 16  ;;  %v4511_v56 = vshrl.u32 %v6333_v17, 16  ;;  %6738 = vmatprep.mubr.msk.bf16.mxu1 %vm404_vm1, %v5980_v50  ;;  %v4493_v34 = vor.u32 %v4492_v29, %v4489_v18  ;;  %v7433_v48 = vld [vmem:[%s7538_s27 + $0x18] sm:$0xff]  }
  0xd7   : > { %v4475_v20 = vsel %vm7585_vm4, %v4470_v2, %v4474_v10  ;;  %v4480_v6 = vrot.slane %v4479_v25, 4  ;;  %v4514_v21 = vshll.u32 %v6333_v17, 16  ;;  %v4520_v27 = vshll.u32 %v6334_v23, 16  ;;  %v6343_v2 = vld [vmem:[%s7538_s27 + $0xac] sm:$0xf] }
  0xd8   : > { %v4503_v22 = vor.u32 %v4502_v1, %v4498_v60  ;;  %v4508_v51 = vrot.slane %v4506_v11, 5  ;;  %v4513_v31 = vrot.slane %v4511_v56, 4  ;;  %v4494_v26 = vrot.slane %v4493_v34, 4  ;;  %v6344_v11 = vld [vmem:[%s7538_s27 + $0xb0] sm:$0x1]  ;;  %v7434_v56 = vld [vmem:[%s7538_s27 + $0x24] sm:$0xff]  }
  0xd9   : > { %6889 = vmatmul.mubr.msk.bf16.gmra.mrb[8].mxu0 %vm404_vm1, %v6360_v58  ;;  %v4485_v19 = vsel %vm7585_vm4, %v4480_v6, %v4484_v52  ;;  %v4516_v50 = vrot.slane %v4514_v21, 5  ;;  %v4524_v54 = vshrl.u32 %v6334_v23, 16  ;;  %v4522_v47 = vrot.slane %v4520_v27, 5  ;;  %v6342_v23 = vld [vmem:[%s7538_s27 + $0xa8] sm:$0xf] }
  0xda   : > { %6892 = vmatprep.mubr.msk.bf16.mxu0 %vm404_vm1, %v6361_v28  ;;  %v6362_v39 = vcombine.low %v4475_v20, %v4485_v19  ;;  %v4504_v41 = vrot.slane %v4503_v22, 4  ;;  %v4530_v49 = vshll.u32 %v6335_v44, 16  ;;  %v4499_v14 = vsel %vm7585_vm4, %v4494_v26, %v4498_v60  ;;  %v6345_v21 = vld [vmem:[%s7538_s27 + $0xb4] sm:$0xf] }
  0xdb   : > { %v4517_v8 = vor.u32 %v4516_v50, %v4513_v31  ;;  %v4526_v32 = vrot.slane %v4524_v54, 4  ;;  %v4535_v55 = vshrl.u32 %v6336_v16, 16  ;;  %v4538_v61 = vshll.u32 %v6336_v16, 16 }
  0xdc   : > { %v4509_v58 = vsel %vm7585_vm4, %v4504_v41, %v4508_v51  ;;  %v4532_v59 = vrot.slane %v4530_v49, 5  ;;  %v4544_v30 = vshll.u32 %v6337_v24, 16  ;;  %v4548_v5 = vshrl.u32 %v6337_v24, 16 }
  0xdd   : > { %v6363_v62 = vcombine.low %v4499_v14, %v4509_v58  ;;  %v4518_v57 = vrot.slane %v4517_v8, 4  ;;  %v4527_v42 = vor.u32 %v4526_v32, %v4522_v47  ;;  %v4537_v53 = vrot.slane %v4535_v55, 4  ;;  %6739 = vmatmul.mubr.msk.bf16.gmra.mrb[28].mxu1 %vm404_vm1, %v5981_v45  ;;  %v7435_v14 = vld [vmem:[%s7538_s27 + $0x30] sm:$0xff]   ;;  %v6347_v55 = vld [vmem:[%s7538_s27 + $0xbc] sm:$0x1] }
  0xde   : > { %v4540_v15 = vrot.slane %v4538_v61, 5  ;;  %v4546_v3 = vrot.slane %v4544_v30, 5  ;;  %v4554_v10 = vshll.u32 %v6338_v35, 16  ;;  %6744 = vmatprep.mubr.msk.bf16.mxu1 %vm404_vm1, %v7432_v38  ;;  %v4559_v9 = vshrl.u32 %v6339_v12, 16  ;;  %v7436_v61 = vld [vmem:[%s7538_s27 + $0x3c] sm:$0xff]  }
  0xdf   : > { %v4523_v13 = vsel %vm7585_vm4, %v4518_v57, %v4522_v47  ;;  %v4528_v17 = vrot.slane %v4527_v42, 4  ;;  %v4562_v52 = vshll.u32 %v6339_v12, 16  ;;  %v4550_v36 = vrot.slane %v4548_v5, 4  ;;  %v6348_v42 = vld [vmem:[%s7538_s27 + $0xc0] sm:$0xf] }
  0xe0   : > { %v4541_v37 = vor.u32 %v4540_v15, %v4537_v53  ;;  %v4556_v40 = vrot.slane %v4554_v10, 5  ;;  %v4568_v45 = vshll.u32 %v6340_v63, 16  ;;  %v4561_v33 = vrot.slane %v4559_v9, 4  ;;  %v6349_v5 = vld [vmem:[%s7538_s27 + $0xc4] sm:$0xf] }
  0xe1   : > { %6893 = vmatmul.mubr.msk.bf16.gmra.mrb[12].mxu0 %vm404_vm1, %v6362_v39  ;;  %v4533_v18 = vsel %vm7585_vm4, %v4528_v17, %v4532_v59  ;;  %v4564_v46 = vrot.slane %v4562_v52, 5  ;;  %v4572_v28 = vshrl.u32 %v6340_v63, 16  ;;  %v4551_v60 = vor.u32 %v4550_v36, %v4546_v3  ;;  %v6346_v39 = vld [vmem:[%s7538_s27 + $0xb8] sm:$0xf]  ;;  %v6350_v9 = vld [vmem:[%s7538_s27 + $0xc8] sm:$0x1] }
  0xe2   : > { %6896 = vmatprep.mubr.msk.bf16.mxu0 %vm404_vm1, %v6363_v62  ;;  %v6364_v25 = vcombine.low %v4523_v13, %v4533_v18  ;;  %v4542_v29 = vrot.slane %v4541_v37, 4  ;;  %v4570_v1 = vrot.slane %v4568_v45, 5  ;;  %v4578_v34 = vshll.u32 %v6341_v7, 16 }
  0xe3   : > { %v4565_v20 = vor.u32 %v4564_v46, %v4561_v33  ;;  %v4574_v6 = vrot.slane %v4572_v28, 4  ;;  %v4583_v44 = vshrl.u32 %v6342_v23, 16  ;;  %v4552_v22 = vrot.slane %v4551_v60, 4  ;;  %v6351_v33 = vld [vmem:[%s7538_s27 + $0xcc] sm:$0xf] }
  0xe4   : > { %v4547_v16 = vsel %vm7585_vm4, %v4542_v29, %v4546_v3  ;;  %v4586_v51 = vshll.u32 %v6342_v23, 16  ;;  %v4592_v31 = vshll.u32 %v6343_v2, 16  ;;  %v4580_v19 = vrot.slane %v4578_v34, 5  ;;  %v6352_v29 = vld [vmem:[%s7538_s27 + $0xd0] sm:$0xf] }
  0xe5   : > { %v4566_v27 = vrot.slane %v4565_v20, 4  ;;  %v4575_v24 = vor.u32 %v4574_v6, %v4570_v1  ;;  %v4585_v26 = vrot.slane %v4583_v44, 4  ;;  %6745 = vmatmul.mubr.msk.bf16.vlgmr.msra.gmra.mrb[0].mxu1 %vm404_vm1, %v7433_v48  ;;  %v4557_v50 = vsel %vm7585_vm4, %v4552_v22, %v4556_v40  ;;  %v6353_v20 = vld [vmem:[%s7538_s27 + $0xd4] sm:$0x1]  ;;  %v7437_v6 = vld [vmem:[%s7538_s27 + $0x48] sm:$0xff]  }
  0xe6   : > { %v4588_v54 = vrot.slane %v4586_v51, 5  ;;  %v4594_v35 = vrot.slane %v4592_v31, 5  ;;  %v4596_v38 = vshrl.u32 %v6343_v2, 16  ;;  %6947 = vmatpush3.bf16.msra.mxu1 %v7526_v4  ;;  %6748 = vmatprep.mubr.msk.bf16.mxu1 %vm404_vm1, %v7434_v56  ;;  %v6365_v41 = vcombine.low %v4547_v16, %v4557_v50  ;;  %v6387_v22 = vld [vmem:[%s7538_s27 + $0x18] sm:$0xe] }
  0xe7   : > { %v4571_v47 = vsel %vm7585_vm4, %v4566_v27, %v4570_v1  ;;  %v4576_v49 = vrot.slane %v4575_v24, 4  ;;  %v4602_v12 = vshll.u32 %v6344_v11, 16  ;;  %v4607_v58 = vshrl.u32 %v6345_v21, 16  ;;  %v6388_v51 = vld [vmem:[%s7538_s27 + $0x1c] sm:$0xf]  ;;  %v7438_v31 = vld [vmem:[%s7538_s27 + $0x54] sm:$0xff]  }
  0xe8   : > { %v4589_v8 = vor.u32 %v4588_v54, %v4585_v26  ;;  %v4598_v32 = vrot.slane %v4596_v38, 4  ;;  %v4610_v59 = vshll.u32 %v6345_v21, 16  ;;  %v4616_v62 = vshll.u32 %v6346_v39, 16  ;;  %v6389_v50 = vld [vmem:[%s7538_s27 + $0x20] sm:$0x1] }
  0xe9   : > { %6897 = vmatmul.mubr.msk.bf16.gmra.mrb[16].mxu0 %vm404_vm1, %v6364_v25  ;;  %v4581_v4 = vsel %vm7585_vm4, %v4576_v49, %v4580_v19  ;;  %v4604_v30 = vrot.slane %v4602_v12, 5  ;;  %v4620_v57 = vshrl.u32 %v6346_v39, 16  ;;  %v4609_v3 = vrot.slane %v4607_v58, 4  ;;  %v6391_v54 = vld [vmem:[%s7538_s27 + $0x28] sm:$0xf] }
  0xea   : > { %6900 = vmatprep.mubr.msk.bf16.mxu0 %vm404_vm1, %v6365_v41  ;;  %v6366_v53 = vcombine.low %v4571_v47, %v4581_v4  ;;  %v4590_v63 = vrot.slane %v4589_v8, 4  ;;  %v4599_v15 = vor.u32 %v4598_v32, %v4594_v35  ;;  %v4612_v10 = vrot.slane %v4610_v59, 5  ;;  %v6390_v41 = vld [vmem:[%s7538_s27 + $0x24] sm:$0xe]  ;;  %v6392_v59 = vld [vmem:[%s7538_s27 + $0x2c] sm:$0x1] }
  0xeb   : > { %v4618_v13 = vrot.slane %v4616_v62, 5  ;;  %v4622_v17 = vrot.slane %v4620_v57, 4  ;;  %v4626_v7 = vshll.u32 %v6347_v55, 16  ;;  %v4631_v36 = vshrl.u32 %v6348_v42, 16  ;;  %v6393_v57 = vld [vmem:[%s7538_s27 + $0x30] sm:$0xe] }
  0xec   : > { %v4595_v52 = vsel %vm7585_vm4, %v4590_v63, %v4594_v35  ;;  %v4600_v37 = vrot.slane %v4599_v15, 4  ;;  %v4634_v40 = vshll.u32 %v6348_v42, 16  ;;  %v4613_v45 = vor.u32 %v4612_v10, %v4609_v3  ;;  %v6394_v3 = vld [vmem:[%s7538_s27 + $0x34] sm:$0xf] }
  0xed   : > { %v4623_v23 = vor.u32 %v4622_v17, %v4618_v13  ;;  %v4628_v48 = vrot.slane %v4626_v7, 5  ;;  %v4640_v18 = vshll.u32 %v6349_v5, 16  ;;  %6749 = vmatmul.mubr.msk.bf16.gmra.mrb[4].mxu1 %vm404_vm1, %v7435_v14  ;;  %v4633_v28 = vrot.slane %v4631_v36, 4  ;;  %v6395_v7 = vld [vmem:[%s7538_s27 + $0x38] sm:$0x1] }
  0xee   : > { %v4605_v46 = vsel %vm7585_vm4, %v4600_v37, %v4604_v30  ;;  %v4636_v2 = vrot.slane %v4634_v40, 5  ;;  %v4644_v25 = vshrl.u32 %v6349_v5, 16  ;;  %6752 = vmatprep.mubr.msk.bf16.mxu1 %vm404_vm1, %v7436_v61  ;;  %v4614_v1 = vrot.slane %v4613_v45, 4  ;;  %v6396_v36 = vld [vmem:[%s7538_s27 + $0x3c] sm:$0xe]  ;;  %v7439_v40 = vld [vmem:[%s7538_s27 + $0x60] sm:$0xff]  }
  0xef   : > { %v6367_v60 = vcombine.low %v4595_v52, %v4605_v46  ;;  %v4624_v11 = vrot.slane %v4623_v23, 4  ;;  %v4642_v56 = vrot.slane %v4640_v18, 5  ;;  %v4650_v21 = vshll.u32 %v6350_v9, 16  ;;  %v7440_v46 = vld [vmem:[%s7538_s27 + $0x6c] sm:$0xff]  }
  0xf0   : > { %v4637_v34 = vor.u32 %v4636_v2, %v4633_v28  ;;  %v4646_v44 = vrot.slane %v4644_v25, 4  ;;  %v4655_v16 = vshrl.u32 %v6351_v33, 16  ;;  %v4619_v27 = vsel %vm7585_vm4, %v4614_v1, %v4618_v13 }
  0xf1   : > { %6901 = vmatmul.mubr.msk.bf16.gmra.mrb[20].mxu0 %vm404_vm1, %v6366_v53  ;;  %v4629_v24 = vsel %vm7585_vm4, %v4624_v11, %v4628_v48  ;;  %v4658_v19 = vshll.u32 %v6351_v33, 16  ;;  %v4664_v26 = vshll.u32 %v6352_v29, 16  ;;  %v4652_v39 = vrot.slane %v4650_v21, 5  ;;  %v6397_v33 = vld [vmem:[%s7538_s27 + $0x40] sm:$0xf] }
  0xf2   : > { %6904 = vmatprep.mubr.msk.bf16.mxu0 %vm404_vm1, %v6367_v60  ;;  %v4638_v35 = vrot.slane %v4637_v34, 4  ;;  %v4647_v38 = vor.u32 %v4646_v44, %v4642_v56  ;;  %v4657_v47 = vrot.slane %v4655_v16, 4  ;;  %v4668_v14 = vshrl.u32 %v6352_v29, 16  ;;  %v6399_v29 = vld [vmem:[%s7538_s27 + $0x48] sm:$0xe] }
  0xf3   : > { %v4660_v49 = vrot.slane %v4658_v19, 5  ;;  %v4666_v12 = vrot.slane %v4664_v26, 5  ;;  %v6368_v8 = vcombine.low %v4619_v27, %v4629_v24  ;;  %v4674_v58 = vshll.u32 %v6353_v20, 16  ;;  %v6400_v60 = vld [vmem:[%s7538_s27 + $0x4c] sm:$0xf] }
  0xf4   : > { %v4643_v32 = vsel %vm7585_vm4, %v4638_v35, %v4642_v56  ;;  %v4648_v55 = vrot.slane %v4647_v38, 4  ;;  %v4670_v4 = vrot.slane %v4668_v14, 4  ;;  %v6435_v30 = vrot.slane %v6387_v22, 9  ;;  %v6398_v20 = vld [vmem:[%s7538_s27 + $0x44] sm:$0x1] }
  0xf5   : > { %v4661_v61 = vor.u32 %v4660_v49, %v4657_v47  ;;  %v5134_v62 = vrot.slane %v6388_v51, 5  ;;  %6753 = vmatmul.mubr.msk.bf16.gmra.mrb[8].mxu1 %vm404_vm1, %v7437_v6  ;;  %v4676_v53 = vrot.slane %v4674_v58, 5  ;;  %v5137_v63 = vrot.slane %v6389_v50, 5  ;;  %v6401_v6 = vld [vmem:[%s7538_s27 + $0x50] sm:$0x1] }
  0xf6   : > { %v4653_v42 = vsel %vm7585_vm4, %v4648_v55, %v4652_v39  ;;  %v5141_v15 = vrot.slane %v6391_v54, 5  ;;  %6756 = vmatprep.mubr.msk.bf16.mxu1 %vm404_vm1, %v7438_v31  ;;  %v4671_v13 = vor.u32 %v4670_v4, %v4666_v12  ;;  %v6436_v17 = vrot.slane %v6390_v41, 9  ;;  %v6402_v34 = vld [vmem:[%s7538_s27 + $0x54] sm:$0xe]  ;;  %v6403_v51 = vld [vmem:[%s7538_s27 + $0x58] sm:$0xf] }
  0xf7   : > { %v6369_v5 = vcombine.low %v4643_v32, %v4653_v42  ;;  %v4662_v10 = vrot.slane %v4661_v61, 4  ;;  %v5136_v9 = vrot.slane %v5134_v62, 4  ;;  %v5144_v37 = vrot.slane %v6392_v59, 5  ;;  %v6404_v26 = vld [vmem:[%s7538_s27 + $0x5c] sm:$0x1] }
  0xf8   : > { %v5143_v52 = vrot.slane %v5141_v15, 4  ;;  %v4672_v45 = vrot.slane %v4671_v13, 4  ;;  %v5135_v23 = vsel %vm7660_vm7, %v6435_v30, %v5134_v62  ;;  %v6437_v48 = vrot.slane %v6393_v57, 9  ;;  %v6087_v50 = vld [vmem:[%s7538_s27 + $0x6c] sm:$0xf]  ;;  %v7441_v42 = vld [vmem:[%s7538_s27 + $0x78] sm:$0xff]  }
  0xf9   : > { %6905 = vmatmul.mubr.msk.bf16.gmra.mrb[24].mxu0 %vm404_vm1, %v6368_v8  ;;  %v5148_v18 = vrot.slane %v6394_v3, 5  ;;  %v4667_v28 = vsel %vm7585_vm4, %v4662_v10, %v4666_v12  ;;  %v5138_v2 = vsel %vm7660_vm7, %v5136_v9, %v5137_v63  ;;  %v5151_v25 = vrot.slane %v6395_v7, 5  ;;  %v6088_v41 = vld [vmem:[%s7538_s27 + $0x70] sm:$0xf]  ;;  %v6089_v55 = vld [vmem:[%s7538_s27 + $0x74] sm:$0x1] }
  0xfa   : > { %6908 = vmatprep.mubr.msk.bf16.mxu0 %vm404_vm1, %v6369_v5  ;;  %v4677_v1 = vsel %vm7585_vm4, %v4672_v45, %v4676_v53  ;;  %v8468_v11 = vsel %vm7660_vm7, %v6436_v17, %v5141_v15  ;;  %v8472_v56 = vsel %vm7660_vm7, %v5143_v52, %v5144_v37  ;;  %v6452_v44 = vcombine.low %v5135_v23, %v5138_v2  ;;  %v6090_v59 = vld [vmem:[%s7538_s27 + $0x78] sm:$0xf]  ;;  %v6091_v57 = vld [vmem:[%s7538_s27 + $0x7c] sm:$0xf]  ;;  %v7442_v5 = vld [vmem:[%s7538_s27 + $0x84] sm:$0xff]  }
  0xfb   : > { %v5150_v21 = vrot.slane %v5148_v18, 4  ;;  %v6438_v16 = vrot.slane %v6396_v36, 9  ;;  %v5155_v22 = vrot.slane %v6397_v33, 5  ;;  %v6370_v31 = vcombine.low %v4667_v28, %v4677_v1  ;;  %v6092_v52 = vld [vmem:[%s7538_s27 + $0x80] sm:$0x1] }
  0xfc   : > { %v8480_v27 = vsel %vm7660_vm7, %v6437_v48, %v5148_v18  ;;  %v6439_v24 = vrot.slane %v6399_v29, 9  ;;  %v5162_v19 = vrot.slane %v6400_v60, 5  ;;  %v5158_v38 = vrot.slane %v6398_v20, 5  ;;  %v6405_v33 = vld [vmem:[%s7538_s27 + $0x60] sm:$0xe] }
  0xfd   : > { %6757 = vmatmul.mubr.msk.bf16.gmra.mrb[12].mxu1 %vm404_vm1, %v7439_v40  ;;  %v8487_v54 = vsel %vm7660_vm7, %v5150_v21, %v5151_v25  ;;  %v5157_v35 = vrot.slane %v5155_v22, 4  ;;  %v6440_v39 = vrot.slane %v6402_v34, 9  ;;  %v6453_v47 = vcombine.low %v8468_v11, %v8472_v56  ;;  %v6409_v60 = vld [vmem:[%s7538_s27 + $0x70] sm:$0xf]  ;;  %v6407_v21 = vld [vmem:[%s7538_s27 + $0x68] sm:$0x1] }
  0xfe   : > { %6760 = vmatprep.mubr.msk.bf16.mxu1 %vm404_vm1, %v7440_v46  ;;  %v5165_v49 = vrot.slane %v6401_v6, 5  ;;  %v5169_v12 = vrot.slane %v6403_v51, 5  ;;  %v6454_v14 = vcombine.low %v8480_v27, %v8487_v54  ;;  %v8497_v8 = vsel %vm7660_vm7, %v6438_v16, %v5155_v22  ;;  %v6406_v46 = vld [vmem:[%s7538_s27 + $0x64] sm:$0xf]  ;;  %v6408_v6 = vld [vmem:[%s7538_s27 + $0x6c] sm:$0xe] }
  0xff   : > { %v8501_v32 = vsel %vm7660_vm7, %v6439_v24, %v5162_v19  ;;  %v2708_v58 = vshrl.u32 %v6087_v50, 16  ;;  %v5164_v61 = vrot.slane %v5162_v19, 4  ;;  %v5172_v4 = vrot.slane %v6404_v26, 5  ;;  %v7443_v51 = vld [vmem:[%s7538_s27 + $0x90] sm:$0xff]   ;;  %v6093_v26 = vld [vmem:[%s7538_s27 + $0x84] sm:$0xf] }
 0x100   : > { %v2711_v30 = vshll.u32 %v6087_v50, 16  ;;  %v2717_v62 = vshll.u32 %v6088_v41, 16  ;;  %v8511_v53 = vsel %vm7660_vm7, %v5157_v35, %v5158_v38  ;;  %v8515_v63 = vsel %vm7660_vm7, %v6440_v39, %v5169_v12  ;;  %v6410_v38 = vld [vmem:[%s7538_s27 + $0x74] sm:$0x1] }
 0x101   : > { %6909 = vmatmul.mubr.msk.bf16.gmra.mrb[28].mxu0 %vm404_vm1, %v6370_v31  ;;  %v2710_v15 = vrot.slane %v2708_v58, 4  ;;  %v2721_v3 = vshrl.u32 %v6088_v41, 16  ;;  %v5171_v10 = vrot.slane %v5169_v12, 4  ;;  %v2727_v7 = vshll.u32 %v6089_v55, 16  ;;  %v6094_v41 = vld [vmem:[%s7538_s27 + $0x88] sm:$0xf] }
 0x102   : > { %6914 = vmatprep.mubr.msk.bf16.mxu0 %vm404_vm1, %v6452_v44  ;;  %v2713_v13 = vrot.slane %v2711_v30, 5  ;;  %v2719_v17 = vrot.slane %v2717_v62, 5  ;;  %v2732_v37 = vshrl.u32 %v6090_v59, 16  ;;  %v2735_v36 = vshll.u32 %v6090_v59, 16  ;;  %v6095_v59 = vld [vmem:[%s7538_s27 + $0x8c] sm:$0x1] }
 0x103   : > { %v2723_v9 = vrot.slane %v2721_v3, 4  ;;  %v2741_v40 = vshll.u32 %v6091_v57, 16  ;;  %v8521_v45 = vsel %vm7660_vm7, %v5164_v61, %v5165_v49  ;;  %v2729_v48 = vrot.slane %v2727_v7, 5 }
 0x104   : > { %v2714_v23 = vor.u32 %v2713_v13, %v2710_v15  ;;  %v2745_v18 = vshrl.u32 %v6091_v57, 16  ;;  %v2734_v2 = vrot.slane %v2732_v37, 4  ;;  %v2737_v25 = vrot.slane %v2735_v36, 5  ;;  %v6098_v13 = vld [vmem:[%s7538_s27 + $0x98] sm:$0x1] }
 0x105   : > { %6761 = vmatmul.mubr.msk.bf16.gmra.mrb[16].mxu1 %vm404_vm1, %v7441_v42  ;;  %v2724_v28 = vor.u32 %v2723_v9, %v2719_v17  ;;  %v8526_v29 = vrot.slane %v2741_v40, 5  ;;  %v8532_v1 = vsel %vm7660_vm7, %v5171_v10, %v5172_v4  ;;  %v2751_v20 = vshll.u32 %v6092_v52, 16  ;;  %v6096_v4 = vld [vmem:[%s7538_s27 + $0x90] sm:$0xf]  ;;  %v6411_v37 = vld [vmem:[%s7538_s27 + $0x78] sm:$0xe] }
 0x106   : > { %6764 = vmatprep.mubr.msk.bf16.mxu1 %vm404_vm1, %v7442_v5  ;;  %v2715_v11 = vrot.slane %v2714_v23, 4  ;;  %v2747_v56 = vrot.slane %v2745_v18, 4  ;;  %v2738_v44 = vor.u32 %v2737_v25, %v2734_v2  ;;  %v6441_v16 = vrot.slane %v6405_v33, 9  ;;  %v6413_v2 = vld [vmem:[%s7538_s27 + $0x80] sm:$0x1] }
 0x107   : > { %v2725_v34 = vrot.slane %v2724_v28, 4  ;;  %v5176_v22 = vrot.slane %v6406_v46, 5  ;;  %v6455_v31 = vcombine.low %v8497_v8, %v8511_v53  ;;  %v5183_v19 = vrot.slane %v6409_v60, 5  ;;  %v6097_v53 = vld [vmem:[%s7538_s27 + $0x94] sm:$0xf]  ;;  %v7445_v60 = vld [vmem:[%s7538_s27 + $0xa8] sm:$0xff]  }
 0x108   : > { %v2720_v27 = vsel %vm7585_vm4, %v2715_v11, %v2719_v17  ;;  %v2748_v24 = vor.u32 %v2747_v56, %v8526_v29  ;;  %v6456_v50 = vcombine.low %v8501_v32, %v8521_v45  ;;  %v8549_v35 = vrot.slane %v2738_v44, 4  ;;  %v6414_v25 = vld [vmem:[%s7538_s27 + $0x84] sm:$0xe]  ;;  %v7446_v44 = vld [vmem:[%s7538_s27 + $0xb4] sm:$0xff]  }
 0x109   : > { %6915 = vmatmul.mubr.msk.bf16.vlgmr.msra.gmra.mrb[0].mxu0 %vm404_vm1, %v6453_v47  ;;  %v2730_v54 = vsel %vm7585_vm4, %v2725_v34, %v2729_v48  ;;  %v6442_v39 = vrot.slane %v6408_v6, 9  ;;  %v7444_v47 = vld [vmem:[%s7538_s27 + $0x9c] sm:$0xff]   ;;  %v6457_v49 = vcombine.low %v8515_v63, %v8532_v1  ;;  %v8556_v12 = vrot.slane %v2751_v20, 5  ;;  %v6415_v34 = vld [vmem:[%s7538_s27 + $0x88] sm:$0xf] }
 0x10a   : > { %6918 = vmatprep.mubr.msk.bf16.mxu0 %vm404_vm1, %v6454_v14  ;;  %v5178_v14 = vrot.slane %v5176_v22, 4  ;;  %v5179_v8 = vrot.slane %v6407_v21, 5  ;;  %v8558_v55 = vcombine.low %v2720_v27, %v2730_v54  ;;  %v8560_v32 = vrot.slane %v2748_v24, 4  ;;  %v6412_v48 = vld [vmem:[%s7538_s27 + $0x7c] sm:$0xf] }
 0x10b   : > { %v8564_v58 = vsel %vm7660_vm7, %v6441_v16, %v5176_v22  ;;  %v2756_v61 = vshrl.u32 %v6093_v26, 16  ;;  %v5185_v30 = vrot.slane %v5183_v19, 4  ;;  %v5186_v62 = vrot.slane %v6410_v38, 5  ;;  %v6416_v54 = vld [vmem:[%s7538_s27 + $0x8c] sm:$0x1] }
 0x10c   : > { %v2759_v57 = vshll.u32 %v6093_v26, 16  ;;  %v2765_v42 = vshll.u32 %v6094_v41, 16  ;;  %v2744_v15 = vsel %vm7585_vm4, %v8549_v35, %v8526_v29  ;;  %v8576_v3 = vsel %vm7660_vm7, %v6442_v39, %v5183_v19 }
 0x10d   : > { %6765 = vmatmul.mubr.msk.bf16.gmra.mrb[20].mxu1 %vm404_vm1, %v7443_v51  ;;  %v2758_v5 = vrot.slane %v2756_v61, 4  ;;  %v2769_v10 = vshrl.u32 %v6094_v41, 16  ;;  %v8582_v17 = vsel %vm7660_vm7, %v5178_v14, %v5179_v8  ;;  %v2775_v52 = vshll.u32 %v6095_v59, 16  ;;  %v6099_v41 = vld [vmem:[%s7538_s27 + $0x9c] sm:$0xf] }
 0x10e   : > { %6768 = vmatprep.mubr.msk.bf16.mxu1 %vm404_vm1, %v7444_v47  ;;  %v2761_v7 = vrot.slane %v2759_v57, 5  ;;  %v8584_v9 = vrot.slane %v2765_v42, 5  ;;  %v2780_v40 = vshrl.u32 %v6096_v4, 16  ;;  %v2783_v45 = vshll.u32 %v6096_v4, 16  ;;  %v6100_v61 = vld [vmem:[%s7538_s27 + $0xa0] sm:$0xf] }
 0x10f   : > { %v2771_v36 = vrot.slane %v2769_v10, 4  ;;  %v2789_v23 = vshll.u32 %v6097_v53, 16  ;;  %v8591_v18 = vsel %vm7660_vm7, %v5185_v30, %v5186_v62  ;;  %v2793_v46 = vshrl.u32 %v6097_v53, 16  ;;  %v6102_v10 = vld [vmem:[%s7538_s27 + $0xa8] sm:$0xf] }
 0x110   : > { %v2762_v33 = vor.u32 %v2761_v7, %v2758_v5  ;;  %v2799_v28 = vshll.u32 %v6098_v13, 16  ;;  %v2782_v56 = vrot.slane %v2780_v40, 4  ;;  %v2785_v20 = vrot.slane %v2783_v45, 5 }
 0x111   : > { %6919 = vmatmul.mubr.msk.bf16.gmra.mrb[4].mxu0 %vm404_vm1, %v6455_v31  ;;  %v2772_v11 = vor.u32 %v2771_v36, %v8584_v9  ;;  %v8598_v6 = vrot.slane %v2789_v23, 5  ;;  %v8604_v16 = vrot.slane %v2775_v52, 5  ;;  %v2795_v22 = vrot.slane %v2793_v46, 4  ;;  %v6103_v52 = vld [vmem:[%s7538_s27 + $0xac] sm:$0xf] }
 0x112   : > { %6922 = vmatprep.mubr.msk.bf16.mxu0 %vm404_vm1, %v6456_v50  ;;  %v8602_v21 = vrot.slane %v2762_v33, 4  ;;  %v6443_v51 = vrot.slane %v6411_v37, 9  ;;  %v2786_v27 = vor.u32 %v2785_v20, %v2782_v56  ;;  %v5190_v24 = vrot.slane %v6412_v48, 5  ;;  %v7447_v37 = vld [vmem:[%s7538_s27 + $0xc0] sm:$0xff]  }
 0x113   : > { %v8606_v31 = vrot.slane %v2772_v11, 4  ;;  %v5193_v19 = vrot.slane %v6413_v2, 5  ;;  %v2754_v26 = vsel %vm7585_vm4, %v8560_v32, %v8556_v12  ;;  %v2796_v50 = vor.u32 %v2795_v22, %v8598_v6  ;;  %v6106_v32 = vld [vmem:[%s7538_s27 + $0xb8] sm:$0xf] }
 0x114   : > { %v6444_v38 = vrot.slane %v6414_v25, 9  ;;  %v5197_v39 = vrot.slane %v6415_v34, 5  ;;  %v6458_v47 = vcombine.low %v8564_v58, %v8582_v17  ;;  %v8618_v14 = vrot.slane %v2786_v27, 4  ;;  %v6417_v25 = vld [vmem:[%s7538_s27 + $0x90] sm:$0xe] }
 0x115   : > { %6769 = vmatmul.mubr.msk.bf16.gmra.mrb[24].mxu1 %vm404_vm1, %v7445_v60  ;;  %v8620_v8 = vrot.slane %v2799_v28, 5  ;;  %v5192_v59 = vrot.slane %v5190_v24, 4  ;;  %v6459_v4 = vcombine.low %v8576_v3, %v8591_v18  ;;  %v2768_v30 = vsel %vm7585_vm4, %v8602_v21, %v8584_v9  ;;  %v6101_v3 = vld [vmem:[%s7538_s27 + $0xa4] sm:$0x1]  ;;  %v6104_v18 = vld [vmem:[%s7538_s27 + $0xb0] sm:$0x1] }
 0x116   : > { %6772 = vmatprep.mubr.msk.bf16.mxu1 %vm404_vm1, %v7446_v44  ;;  %v2778_v58 = vsel %vm7585_vm4, %v8606_v31, %v8604_v16  ;;  %v2797_v62 = vrot.slane %v2796_v50, 4  ;;  %v5191_v57 = vsel %vm7660_vm7, %v6443_v51, %v5190_v24  ;;  %v8640_v53 = vsel %vm7660_vm7, %v6444_v38, %v5197_v39  ;;  %v6419_v34 = vld [vmem:[%s7538_s27 + $0x98] sm:$0x1]  ;;  %v6421_v51 = vld [vmem:[%s7538_s27 + $0xa0] sm:$0xf] }
 0x117   : > { %v5194_v42 = vsel %vm7660_vm7, %v5192_v59, %v5193_v19  ;;  %v2804_v5 = vshrl.u32 %v6099_v41, 16  ;;  %v5199_v13 = vrot.slane %v5197_v39, 4  ;;  %v5200_v17 = vrot.slane %v6416_v54, 5  ;;  %v6105_v59 = vld [vmem:[%s7538_s27 + $0xb4] sm:$0xf] }
 0x118   : > { %v2807_v7 = vshll.u32 %v6099_v41, 16  ;;  %v2813_v9 = vshll.u32 %v6100_v61, 16  ;;  %v2792_v36 = vsel %vm7585_vm4, %v8618_v14, %v8598_v6  ;;  %v2802_v63 = vsel %vm7585_vm4, %v2797_v62, %v8620_v8  ;;  %v6418_v6 = vld [vmem:[%s7538_s27 + $0x94] sm:$0xf]  ;;  %v6420_v41 = vld [vmem:[%s7538_s27 + $0x9c] sm:$0xe] }
 0x119   : > { %6923 = vmatmul.mubr.msk.bf16.gmra.mrb[8].mxu0 %vm404_vm1, %v6457_v49  ;;  %v2806_v1 = vrot.slane %v2804_v5, 4  ;;  %v2817_v49 = vshrl.u32 %v6100_v61, 16  ;;  %v6460_v40 = vcombine.low %v5191_v57, %v5194_v42  ;;  %v2823_v48 = vshll.u32 %v6101_v3, 16  ;;  %v6107_v3 = vld [vmem:[%s7538_s27 + $0xbc] sm:$0x1] }
 0x11a   : > { %6926 = vmatprep.mubr.msk.bf16.mxu0 %vm404_vm1, %v6458_v47  ;;  %v2809_v45 = vrot.slane %v2807_v7, 5  ;;  %v2815_v23 = vrot.slane %v2813_v9, 5  ;;  %v2828_v46 = vshrl.u32 %v6102_v10, 16  ;;  %v2831_v28 = vshll.u32 %v6102_v10, 16  ;;  %v6108_v10 = vld [vmem:[%s7538_s27 + $0xc0] sm:$0xf] }
 0x11b   : > { %v2819_v33 = vrot.slane %v2817_v49, 4  ;;  %v2837_v2 = vshll.u32 %v6103_v52, 16  ;;  %v8662_v60 = vsel %vm7660_vm7, %v5199_v13, %v5200_v17  ;;  %v2825_v56 = vrot.slane %v2823_v48, 5 }
 0x11c   : > { %v2810_v11 = vor.u32 %v2809_v45, %v2806_v1  ;;  %v2841_v20 = vshrl.u32 %v6103_v52, 16  ;;  %v2830_v21 = vrot.slane %v2828_v46, 4  ;;  %v2833_v16 = vrot.slane %v2831_v28, 5  ;;  %v6423_v46 = vld [vmem:[%s7538_s27 + $0xa8] sm:$0xe] }
 0x11d   : > { %6773 = vmatmul.mubr.msk.bf16.gmra.mrb[28].mxu1 %vm404_vm1, %v7447_v37  ;;  %v2820_v44 = vor.u32 %v2819_v33, %v2815_v23  ;;  %v8667_v22 = vrot.slane %v2837_v2, 5  ;;  %v2847_v24 = vshll.u32 %v6104_v18, 16  ;;  %v6445_v19 = vrot.slane %v6417_v25, 9 }
 0x11e   : > { %6794 = vmatprep.mubr.msk.bf16.mxu1 %vm404_vm1, %v8558_v55  ;;  %v2811_v31 = vrot.slane %v2810_v11, 4  ;;  %v2843_v27 = vrot.slane %v2841_v20, 4  ;;  %v2834_v54 = vor.u32 %v2833_v16, %v2830_v21  ;;  %v5204_v38 = vrot.slane %v6418_v6, 5  ;;  %v6424_v11 = vld [vmem:[%s7538_s27 + $0xac] sm:$0xf] }
 0x11f   : > { %v2821_v50 = vrot.slane %v2820_v44, 4  ;;  %v5207_v39 = vrot.slane %v6419_v34, 5  ;;  %v6121_v55 = vcombine.low %v2744_v15, %v2754_v26  ;;  %v5211_v8 = vrot.slane %v6421_v51, 5  ;;  %v6110_v34 = vld [vmem:[%s7538_s27 + $0xc8] sm:$0x1] }
 0x120   : > { %v2816_v47 = vsel %vm7585_vm4, %v2811_v31, %v2815_v23  ;;  %v2844_v14 = vor.u32 %v2843_v27, %v8667_v22  ;;  %v6122_v61 = vcombine.low %v2768_v30, %v2778_v58  ;;  %v8688_v12 = vcombine.low %v2792_v36, %v2802_v63  ;;  %v6422_v30 = vld [vmem:[%s7538_s27 + $0xa4] sm:$0x1]  ;;  %v6427_v16 = vld [vmem:[%s7538_s27 + $0xb8] sm:$0xf] }
 0x121   : > { %6927 = vmatmul.mubr.msk.bf16.gmra.mrb[12].mxu0 %vm404_vm1, %v6459_v4  ;;  %v2826_v29 = vsel %vm7585_vm4, %v2821_v50, %v2825_v56  ;;  %v5206_v35 = vrot.slane %v5204_v38, 4  ;;  %v6461_v15 = vcombine.low %v8640_v53, %v8662_v60  ;;  %v8696_v26 = vrot.slane %v2847_v24, 5  ;;  %v6109_v53 = vld [vmem:[%s7538_s27 + $0xc4] sm:$0xf]  ;;  %v6425_v56 = vld [vmem:[%s7538_s27 + $0xb0] sm:$0x1] }
 0x122   : > { %6930 = vmatprep.mubr.msk.bf16.mxu0 %vm404_vm1, %v6460_v40  ;;  %v5205_v4 = vsel %vm7660_vm7, %v6445_v19, %v5204_v38  ;;  %v6446_v58 = vrot.slane %v6420_v41, 9  ;;  %v6124_v62 = vcombine.low %v2816_v47, %v2826_v29  ;;  %v2835_v57 = vrot.slane %v2834_v54, 4  ;;  %v6426_v24 = vld [vmem:[%s7538_s27 + $0xb4] sm:$0xe] }
 0x123   : > { %v5208_v42 = vsel %vm7660_vm7, %v5206_v35, %v5207_v39  ;;  %v2852_v5 = vshrl.u32 %v6105_v59, 16  ;;  %v2845_v13 = vrot.slane %v2844_v14, 4  ;;  %v5213_v17 = vrot.slane %v5211_v8, 4  ;;  %v6429_v14 = vld [vmem:[%s7538_s27 + $0xc0] sm:$0xe] }
 0x124   : > { %v2855_v7 = vshll.u32 %v6105_v59, 16  ;;  %v2861_v9 = vshll.u32 %v6106_v32, 16  ;;  %v6462_v52 = vcombine.low %v5205_v4, %v5208_v42  ;;  %v5214_v37 = vrot.slane %v6422_v30, 5  ;;  %v6430_v35 = vld [vmem:[%s7538_s27 + $0xc4] sm:$0xf] }
 0x125   : > { %6795 = vmatmul.mubr.msk.bf16.vlgmr.msra.gmra.mrb[16].mxu1 %vm404_vm1, %v6121_v55  ;;  %v2854_v36 = vrot.slane %v2852_v5, 4  ;;  %v2865_v63 = vshrl.u32 %v6106_v32, 16  ;;  %v5212_v1 = vsel %vm7660_vm7, %v6446_v58, %v5211_v8  ;;  %v2871_v45 = vshll.u32 %v6107_v3, 16  ;;  %v6428_v55 = vld [vmem:[%s7538_s27 + $0xbc] sm:$0x1] }
 0x126   : > { %6798 = vmatprep.mubr.msk.bf16.mxu1 %vm404_vm1, %v6122_v61  ;;  %v2857_v49 = vrot.slane %v2855_v7, 5  ;;  %v2863_v40 = vrot.slane %v2861_v9, 5  ;;  %v2876_v48 = vshrl.u32 %v6108_v10, 16  ;;  %v2879_v18 = vshll.u32 %v6108_v10, 16  ;;  %v6431_v32 = vld [vmem:[%s7538_s27 + $0xc8] sm:$0x1] }
 0x127   : > { %v2867_v23 = vrot.slane %v2865_v63, 4  ;;  %v2885_v33 = vshll.u32 %v6109_v53, 16  ;;  %v2840_v28 = vsel %vm7585_vm4, %v2835_v57, %v8667_v22  ;;  %v2850_v2 = vsel %vm7585_vm4, %v2845_v13, %v8696_v26  ;;  %v6433_v58 = vld [vmem:[%s7538_s27 + $0xd0] sm:$0xf] }
 0x128   : > { %v2858_v25 = vor.u32 %v2857_v49, %v2854_v36  ;;  %v2889_v60 = vshrl.u32 %v6109_v53, 16  ;;  %v5215_v20 = vsel %vm7660_vm7, %v5213_v17, %v5214_v37  ;;  %v2878_v44 = vrot.slane %v2876_v48, 4  ;;  %v6434_v49 = vld [vmem:[%s7538_s27 + $0xd4] sm:$0x1] }
 0x129   : > { %6931 = vmatmul.mubr.msk.bf16.gmra.mrb[16].mxu0 %vm404_vm1, %v6461_v15  ;;  %v2868_v6 = vor.u32 %v2867_v23, %v2863_v40  ;;  %v2881_v21 = vrot.slane %v2879_v18, 5  ;;  %v2887_v51 = vrot.slane %v2885_v33, 5  ;;  %v6447_v27 = vrot.slane %v6423_v46, 9 }
 0x12a   : > { %6934 = vmatprep.mubr.msk.bf16.mxu0 %vm404_vm1, %v6462_v52  ;;  %v2859_v22 = vrot.slane %v2858_v25, 4  ;;  %v2891_v31 = vrot.slane %v2889_v60, 4  ;;  %v2873_v50 = vrot.slane %v2871_v45, 5  ;;  %v5218_v54 = vrot.slane %v6424_v11, 5 }
 0x12b   : > { %v2869_v19 = vrot.slane %v2868_v6, 4  ;;  %v5221_v38 = vrot.slane %v6425_v56, 5  ;;  %v6463_v39 = vcombine.low %v5212_v1, %v5215_v20  ;;  %v2895_v41 = vshll.u32 %v6110_v34, 16  ;;  %v6432_v1 = vld [vmem:[%s7538_s27 + $0xcc] sm:$0xe] }
 0x12c   : > { %v5225_v47 = vrot.slane %v6427_v16, 5  ;;  %v2882_v8 = vor.u32 %v2881_v21, %v2878_v44  ;;  %v5219_v59 = vsel %vm7660_vm7, %v6447_v27, %v5218_v54  ;;  %v5220_v61 = vrot.slane %v5218_v54, 4 }
 0x12d   : > { %6799 = vmatmul.mubr.msk.bf16.gmra.mrb[20].mxu1 %vm404_vm1, %v8688_v12  ;;  %v6448_v29 = vrot.slane %v6426_v24, 9  ;;  %v6125_v15 = vcombine.low %v2840_v28, %v2850_v2  ;;  %v2864_v26 = vsel %vm7585_vm4, %v2859_v22, %v2863_v40  ;;  %v2892_v4 = vor.u32 %v2891_v31, %v2887_v51 }
 0x12e   : > { %6802 = vmatprep.mubr.msk.bf16.mxu1 %vm404_vm1, %v6124_v62  ;;  %v5227_v30 = vrot.slane %v5225_v47, 4  ;;  %v2874_v12 = vsel %vm7585_vm4, %v2869_v19, %v2873_v50  ;;  %v5222_v57 = vsel %vm7660_vm7, %v5220_v61, %v5221_v38  ;;  %v5228_v42 = vrot.slane %v6428_v55, 5 }
 0x12f   : > { %v6449_v3 = vrot.slane %v6429_v14, 9  ;;  %v2897_v62 = vrot.slane %v2895_v41, 5  ;;  %v6464_v5 = vcombine.low %v5219_v59, %v5222_v57  ;;  %v5232_v10 = vrot.slane %v6430_v35, 5 }
 0x130   : > { %v5235_v13 = vrot.slane %v6431_v32, 5  ;;  %v2883_v17 = vrot.slane %v2882_v8, 4  ;;  %v5226_v7 = vsel %vm7660_vm7, %v6448_v29, %v5225_v47  ;;  %v5229_v9 = vsel %vm7660_vm7, %v5227_v30, %v5228_v42 }
 0x131   : > { %6935 = vmatmul.mubr.msk.bf16.gmra.mrb[20].mxu0 %vm404_vm1, %v6463_v39  ;;  %v5239_v53 = vrot.slane %v6433_v58, 5  ;;  %v6126_v52 = vcombine.low %v2864_v26, %v2874_v12  ;;  %v2893_v37 = vrot.slane %v2892_v4, 4  ;;  %v5233_v36 = vsel %vm7660_vm7, %v6449_v3, %v5232_v10 }
 0x132   : > { %6938 = vmatprep.mubr.msk.bf16.mxu0 %vm404_vm1, %v6464_v5  ;;  %v5234_v63 = vrot.slane %v5232_v10, 4  ;;  %v6465_v40 = vcombine.low %v5226_v7, %v5229_v9  ;;  %v6450_v48 = vrot.slane %v6432_v1, 9  ;;  %v5242_v33 = vrot.slane %v6434_v49, 5 }
 0x133   : > { %v5241_v18 = vrot.slane %v5239_v53, 4  ;;  %v2888_v46 = vsel %vm7585_vm4, %v2883_v17, %v2887_v51  ;;  %v2898_v28 = vsel %vm7585_vm4, %v2893_v37, %v2897_v62 }
 0x134   : > { %v5236_v45 = vsel %vm7660_vm7, %v5234_v63, %v5235_v13  ;;  %v6127_v2 = vcombine.low %v2888_v46, %v2898_v28  ;;  %v5240_v25 = vsel %vm7660_vm7, %v6450_v48, %v5239_v53 }
 0x135   : > { %6803 = vmatmul.mubr.msk.bf16.gmra.mrb[24].mxu1 %vm404_vm1, %v6125_v15  ;;  %v6466_v23 = vcombine.low %v5233_v36, %v5236_v45  ;;  %v5243_v60 = vsel %vm7660_vm7, %v5241_v18, %v5242_v33 }
 0x136   : > { %6806 = vmatprep.mubr.msk.bf16.mxu1 %vm404_vm1, %v6126_v52  ;;  %v6467_v11 = vcombine.low %v5240_v25, %v5243_v60 }
 0x139   : > { %6939 = vmatmul.mubr.msk.bf16.gmra.mrb[24].mxu0 %vm404_vm1, %v6465_v40 }
 0x13a   : > { %6942 = vmatprep.mubr.msk.bf16.mxu0 %vm404_vm1, %v6466_v23 }
 0x13d   : > { %6807 = vmatmul.mubr.msk.bf16.gmra.mrb[28].mxu1 %vm404_vm1, %v6127_v2 }
 0x141   : > { %6943 = vmatmul.mubr.msk.bf16.gmra.mrb[28].mxu0 %vm404_vm1, %v6467_v11 }
 0x1b8   : > { %v6746_v56 = vpop.f32.mrb[0].mxu1 }
 0x1b9   : > { %v2276_v43 = vpop.f32.mrb[1].mxu1 }
 0x1ba   : > { %v6747_v20 = vpop.f32.mrb[2].mxu1 }
 0x1bb   : > { %v2279_v6 = vpop.f32.mrb[3].mxu1 }
 0x1c0   : > { %v6750_v34 = vpop.f32.mrb[4].mxu1 }
 0x1c1   : > { %v2292_v44 = vpop.f32.mrb[5].mxu1 }
 0x1c2   : > { %v6751_v21 = vpop.f32.mrb[6].mxu1 }
 0x1c3   : > { %v2295_v16 = vpop.f32.mrb[7].mxu1 }
 0x1c8   : > { %v6754_v22 = vpop.f32.mrb[8].mxu1 }
 0x1c9   : > { %v2308_v51 = vpop.f32.mrb[9].mxu1 }
 0x1ca   : > { %v6755_v31 = vpop.f32.mrb[10].mxu1 }
 0x1cb   : > { %v8768_v27 = vpop.f32.mrb[11].mxu1 }
 0x1d0   : > { %v8770_v0 = vpop.f32.mrb[12].mxu1 }
 0x1d1   : > { %v8772_v24 = vpop.f32.mrb[13].mxu1 }
 0x1d2   : > { %v8774_v19 = vpop.f32.mrb[14].mxu1 }
 0x1d3   : > { %v8776_v50 = vpop.f32.mrb[15].mxu1 }
 0x1dc   : > { %v6916_v54 = vpop.f32.mrb[0].mxu0 }
 0x1dd   : > { %v6953_v38 = vadd.f32 %v6916_v54, %v6746_v56  ;;  %v5411_v39 = vpop.f32.mrb[1].mxu0 }
 0x1de   : > { %v6959_v41 = vadd.f32 %v5411_v39, %v2276_v43  ;;  %v6917_v55 = vpop.f32.mrb[2].mxu0 }
 0x1df   : > { %5572 = vst [vmem:[%s8782_s20 + $0x10] sm:$0xff] %v6953_v38  ;;  %v6965_v47 = vadd.f32 %v6917_v55, %v6747_v20  ;;  %v5414_v14 = vpop.f32.mrb[3].mxu0  ;;  %v5674_v35 = vmul.f32 %v6953_v38, %v6953_v38 }
 0x1e0   : > { %5570 = vst [vmem:[%s8782_s20] sm:$0xff] %v6959_v41  ;;  %v6971_v8 = vadd.f32 %v5414_v14, %v2279_v6  ;;  %v5672_v59 = vmul.f32 %v6959_v41, %v6959_v41 }
 0x1e1   : > { %5573 = vst [vmem:[%s8782_s20 + $0x18] sm:$0xff] %v6965_v47  ;;  %v5675_v58 = vmul.f32 %v6965_v47, %v6965_v47 }
 0x1e2   : > { %5571 = vst [vmem:[%s8782_s20 + $0x8] sm:$0xff] %v6971_v8  ;;  %v5634_v61 = vadd.f32 %v6971_v8, %v6959_v41  ;;  %v5673_v29 = vmul.f32 %v6971_v8, %v6971_v8 }
 0x1e4   : > { %v5635_v32 = vadd.f32 %v6953_v38, %v5634_v61  ;;  %v5704_v15 = vadd.f32 %v5673_v29, %v5672_v59  ;;  %v6920_v26 = vpop.f32.mrb[4].mxu0 }
 0x1e5   : > { %v6977_v4 = vadd.f32 %v6920_v26, %v6750_v34  ;;  %v5427_v30 = vpop.f32.mrb[5].mxu0 }
 0x1e6   : > { %v5705_v12 = vadd.f32 %v5704_v15, %v5674_v35  ;;  %v6983_v57 = vadd.f32 %v5427_v30, %v2292_v44  ;;  %v5636_v42 = vadd.f32 %v6965_v47, %v5635_v32  ;;  %v6921_v3 = vpop.f32.mrb[6].mxu0 }
 0x1e7   : > { %5576 = vst [vmem:[%s8782_s20 + $0x30] sm:$0xff] %v6977_v4  ;;  %v6989_v62 = vadd.f32 %v6921_v3, %v6751_v21  ;;  %v5430_v5 = vpop.f32.mrb[7].mxu0  ;;  %v5678_v37 = vmul.f32 %v6977_v4, %v6977_v4 }
 0x1e8   : > { %5574 = vst [vmem:[%s8782_s20 + $0x20] sm:$0xff] %v6983_v57  ;;  %v5637_v10 = vadd.f32 %v6983_v57, %v5636_v42  ;;  %v5676_v13 = vmul.f32 %v6983_v57, %v6983_v57  ;;  %v5706_v17 = vadd.f32 %v5705_v12, %v5675_v58  ;;  %v6995_v7 = vadd.f32 %v5430_v5, %v2295_v16 }
 0x1e9   : > { %5577 = vst [vmem:[%s8782_s20 + $0x38] sm:$0xff] %v6989_v62  ;;  %v5679_v45 = vmul.f32 %v6989_v62, %v6989_v62 }
 0x1ea   : > { %v5707_v9 = vadd.f32 %v5706_v17, %v5676_v13  ;;  %5575 = vst [vmem:[%s8782_s20 + $0x28] sm:$0xff] %v6995_v7  ;;  %v5638_v53 = vadd.f32 %v6995_v7, %v5637_v10  ;;  %v5677_v52 = vmul.f32 %v6995_v7, %v6995_v7 }
 0x1ec   : > { %v5639_v36 = vadd.f32 %v6977_v4, %v5638_v53  ;;  %v5708_v63 = vadd.f32 %v5707_v9, %v5677_v52  ;;  %v6924_v1 = vpop.f32.mrb[8].mxu0 }
 0x1ed   : > { %v7001_v49 = vadd.f32 %v6924_v1, %v6754_v22  ;;  %v5443_v40 = vpop.f32.mrb[9].mxu0 }
 0x1ee   : > { %v5709_v23 = vadd.f32 %v5708_v63, %v5678_v37  ;;  %v7007_v48 = vadd.f32 %v5443_v40, %v2308_v51  ;;  %v5640_v18 = vadd.f32 %v6989_v62, %v5639_v36  ;;  %v6925_v33 = vpop.f32.mrb[10].mxu0 }
 0x1ef   : > { %5580 = vst [vmem:[%s8782_s20 + $0x50] sm:$0xff] %v7001_v49  ;;  %v7013_v46 = vadd.f32 %v6925_v33, %v6755_v31  ;;  %v5446_v28 = vpop.f32.mrb[11].mxu0  ;;  %v5682_v6 = vmul.f32 %v7001_v49, %v7001_v49 }
 0x1f0   : > { %5578 = vst [vmem:[%s8782_s20 + $0x40] sm:$0xff] %v7007_v48  ;;  %v5641_v2 = vadd.f32 %v7007_v48, %v5640_v18  ;;  %v5680_v25 = vmul.f32 %v7007_v48, %v7007_v48  ;;  %v5710_v60 = vadd.f32 %v5709_v23, %v5679_v45  ;;  %v7019_v11 = vadd.f32 %v5446_v28, %v8768_v27 }
 0x1f1   : > { %5581 = vst [vmem:[%s8782_s20 + $0x58] sm:$0xff] %v7013_v46  ;;  %v5683_v51 = vmul.f32 %v7013_v46, %v7013_v46 }
 0x1f2   : > { %v5711_v56 = vadd.f32 %v5710_v60, %v5680_v25  ;;  %5579 = vst [vmem:[%s8782_s20 + $0x48] sm:$0xff] %v7019_v11  ;;  %v5642_v43 = vadd.f32 %v7019_v11, %v5641_v2  ;;  %v5681_v20 = vmul.f32 %v7019_v11, %v7019_v11 }
 0x1f4   : > { %v5643_v34 = vadd.f32 %v7001_v49, %v5642_v43  ;;  %v5712_v44 = vadd.f32 %v5711_v56, %v5681_v20  ;;  %v6928_v21 = vpop.f32.mrb[12].mxu0 }
 0x1f5   : > { %v7025_v16 = vadd.f32 %v6928_v21, %v8770_v0  ;;  %v5459_v22 = vpop.f32.mrb[13].mxu0 }
 0x1f6   : > { %v5713_v31 = vadd.f32 %v5712_v44, %v5682_v6  ;;  %v7031_v27 = vadd.f32 %v5459_v22, %v8772_v24  ;;  %v5644_v54 = vadd.f32 %v7013_v46, %v5643_v34  ;;  %v6929_v38 = vpop.f32.mrb[14].mxu0 }
 0x1f7   : > { %5584 = vst [vmem:[%s8782_s20 + $0x70] sm:$0xff] %v7025_v16  ;;  %v7037_v39 = vadd.f32 %v6929_v38, %v8774_v19  ;;  %v5462_v41 = vpop.f32.mrb[15].mxu0  ;;  %v5686_v32 = vmul.f32 %v7025_v16, %v7025_v16 }
 0x1f8   : > { %5582 = vst [vmem:[%s8782_s20 + $0x60] sm:$0xff] %v7031_v27  ;;  %v5645_v55 = vadd.f32 %v7031_v27, %v5644_v54  ;;  %v5684_v47 = vmul.f32 %v7031_v27, %v7031_v27  ;;  %v5714_v14 = vadd.f32 %v5713_v31, %v5683_v51  ;;  %v7043_v8 = vadd.f32 %v5462_v41, %v8776_v50  ;;  %v6796_v0 = vpop.f32.mrb[16].mxu1 }
 0x1f9   : > { %5585 = vst [vmem:[%s8782_s20 + $0x78] sm:$0xff] %v7037_v39  ;;  %v3130_v59 = vpop.f32.mrb[17].mxu1  ;;  %v5687_v30 = vmul.f32 %v7037_v39, %v7037_v39 }
 0x1fa   : > { %v5715_v61 = vadd.f32 %v5714_v14, %v5684_v47  ;;  %5583 = vst [vmem:[%s8782_s20 + $0x68] sm:$0xff] %v7043_v8  ;;  %v5646_v29 = vadd.f32 %v7043_v8, %v5645_v55  ;;  %v5685_v24 = vmul.f32 %v7043_v8, %v7043_v8  ;;  %v6797_v35 = vpop.f32.mrb[18].mxu1 }
 0x1fb   : > { %v3133_v15 = vpop.f32.mrb[19].mxu1 }
 0x1fc   : > { %v5647_v19 = vadd.f32 %v7025_v16, %v5646_v29  ;;  %v5716_v26 = vadd.f32 %v5715_v61, %v5685_v24  ;;  %v6932_v4 = vpop.f32.mrb[16].mxu0 }
 0x1fd   : > { %v7049_v58 = vadd.f32 %v6932_v4, %v6796_v0  ;;  %v5475_v12 = vpop.f32.mrb[17].mxu0 }
 0x1fe   : > { %v5717_v50 = vadd.f32 %v5716_v26, %v5686_v32  ;;  %v7055_v57 = vadd.f32 %v5475_v12, %v3130_v59  ;;  %v5648_v42 = vadd.f32 %v7037_v39, %v5647_v19  ;;  %v6933_v3 = vpop.f32.mrb[18].mxu0 }
 0x1ff   : > { %5588 = vst [vmem:[%s8782_s20 + $0x90] sm:$0xff] %v7049_v58  ;;  %v7061_v62 = vadd.f32 %v6933_v3, %v6797_v35  ;;  %v5478_v5 = vpop.f32.mrb[19].mxu0  ;;  %v5690_v1 = vmul.f32 %v7049_v58, %v7049_v58 }
 0x200   : > { %5586 = vst [vmem:[%s8782_s20 + $0x80] sm:$0xff] %v7055_v57  ;;  %v5649_v10 = vadd.f32 %v7055_v57, %v5648_v42  ;;  %v5688_v13 = vmul.f32 %v7055_v57, %v7055_v57  ;;  %v5718_v17 = vadd.f32 %v5717_v50, %v5687_v30  ;;  %v7067_v7 = vadd.f32 %v5478_v5, %v3133_v15  ;;  %v6800_v9 = vpop.f32.mrb[20].mxu1 }
 0x201   : > { %5589 = vst [vmem:[%s8782_s20 + $0x98] sm:$0xff] %v7061_v62  ;;  %v3146_v53 = vpop.f32.mrb[21].mxu1  ;;  %v5691_v48 = vmul.f32 %v7061_v62, %v7061_v62 }
 0x202   : > { %v5719_v52 = vadd.f32 %v5718_v17, %v5688_v13  ;;  %5587 = vst [vmem:[%s8782_s20 + $0x88] sm:$0xff] %v7067_v7  ;;  %v5650_v37 = vadd.f32 %v7067_v7, %v5649_v10  ;;  %v5689_v36 = vmul.f32 %v7067_v7, %v7067_v7  ;;  %v6801_v63 = vpop.f32.mrb[22].mxu1 }
 0x203   : > { %v3149_v49 = vpop.f32.mrb[23].mxu1 }
 0x204   : > { %v5651_v40 = vadd.f32 %v7049_v58, %v5650_v37  ;;  %v5720_v45 = vadd.f32 %v5719_v52, %v5689_v36  ;;  %v6936_v23 = vpop.f32.mrb[20].mxu0 }
 0x205   : > { %v7073_v18 = vadd.f32 %v6936_v23, %v6800_v9  ;;  %v5491_v33 = vpop.f32.mrb[21].mxu0 }
 0x206   : > { %v5721_v46 = vadd.f32 %v5720_v45, %v5690_v1  ;;  %v7079_v28 = vadd.f32 %v5491_v33, %v3146_v53  ;;  %v5652_v2 = vadd.f32 %v7061_v62, %v5651_v40  ;;  %v6937_v25 = vpop.f32.mrb[22].mxu0 }
 0x207   : > { %5592 = vst [vmem:[%s8782_s20 + $0xb0] sm:$0xff] %v7073_v18  ;;  %v7085_v60 = vadd.f32 %v6937_v25, %v6801_v63  ;;  %v5494_v11 = vpop.f32.mrb[23].mxu0  ;;  %v5694_v31 = vmul.f32 %v7073_v18, %v7073_v18 }
 0x208   : > { %5590 = vst [vmem:[%s8782_s20 + $0xa0] sm:$0xff] %v7079_v28  ;;  %v5653_v56 = vadd.f32 %v7079_v28, %v5652_v2  ;;  %v5692_v43 = vmul.f32 %v7079_v28, %v7079_v28  ;;  %v5722_v20 = vadd.f32 %v5721_v46, %v5691_v48  ;;  %v7091_v6 = vadd.f32 %v5494_v11, %v3149_v49  ;;  %v6804_v34 = vpop.f32.mrb[24].mxu1 }
 0x209   : > { %5593 = vst [vmem:[%s8782_s20 + $0xb8] sm:$0xff] %v7085_v60  ;;  %v3162_v44 = vpop.f32.mrb[25].mxu1  ;;  %v5695_v41 = vmul.f32 %v7085_v60, %v7085_v60 }
 0x20a   : > { %v5723_v21 = vadd.f32 %v5722_v20, %v5692_v43  ;;  %5591 = vst [vmem:[%s8782_s20 + $0xa8] sm:$0xff] %v7091_v6  ;;  %v5654_v16 = vadd.f32 %v7091_v6, %v5653_v56  ;;  %v5693_v22 = vmul.f32 %v7091_v6, %v7091_v6  ;;  %v6805_v51 = vpop.f32.mrb[26].mxu1 }
 0x20b   : > { %v3165_v27 = vpop.f32.mrb[27].mxu1 }
 0x20c   : > { %v5655_v54 = vadd.f32 %v7073_v18, %v5654_v16  ;;  %v5724_v38 = vadd.f32 %v5723_v21, %v5693_v22  ;;  %v6940_v39 = vpop.f32.mrb[24].mxu0 }
 0x20d   : > { %v7097_v55 = vadd.f32 %v6940_v39, %v6804_v34  ;;  %v5507_v47 = vpop.f32.mrb[25].mxu0 }
 0x20e   : > { %v5725_v14 = vadd.f32 %v5724_v38, %v5694_v31  ;;  %v7103_v8 = vadd.f32 %v5507_v47, %v3162_v44  ;;  %v5656_v0 = vadd.f32 %v7085_v60, %v5655_v54  ;;  %v6941_v59 = vpop.f32.mrb[26].mxu0 }
 0x20f   : > { %5596 = vst [vmem:[%s8782_s20 + $0xd0] sm:$0xff] %v7097_v55  ;;  %v7109_v61 = vadd.f32 %v6941_v59, %v6805_v51  ;;  %v5510_v29 = vpop.f32.mrb[27].mxu0  ;;  %v5698_v50 = vmul.f32 %v7097_v55, %v7097_v55 }
 0x210   : > { %5594 = vst [vmem:[%s8782_s20 + $0xc0] sm:$0xff] %v7103_v8  ;;  %v5657_v24 = vadd.f32 %v7103_v8, %v5656_v0  ;;  %v5696_v35 = vmul.f32 %v7103_v8, %v7103_v8  ;;  %v5726_v32 = vadd.f32 %v5725_v14, %v5695_v41  ;;  %v7115_v15 = vadd.f32 %v5510_v29, %v3165_v27  ;;  %v6808_v19 = vpop.f32.mrb[28].mxu1 }
 0x211   : > { %5597 = vst [vmem:[%s8782_s20 + $0xd8] sm:$0xff] %v7109_v61  ;;  %v3178_v26 = vpop.f32.mrb[29].mxu1  ;;  %v5699_v5 = vmul.f32 %v7109_v61, %v7109_v61 }
 0x212   : > { %v5727_v4 = vadd.f32 %v5726_v32, %v5696_v35  ;;  %5595 = vst [vmem:[%s8782_s20 + $0xc8] sm:$0xff] %v7115_v15  ;;  %v5658_v30 = vadd.f32 %v7115_v15, %v5657_v24  ;;  %v5697_v58 = vmul.f32 %v7115_v15, %v7115_v15  ;;  %v6809_v12 = vpop.f32.mrb[30].mxu1 }
 0x213   : > { %v3181_v57 = vpop.f32.mrb[31].mxu1 }
 0x214   : > { %v5659_v42 = vadd.f32 %v7097_v55, %v5658_v30  ;;  %v5728_v3 = vadd.f32 %v5727_v4, %v5697_v58  ;;  %v6944_v62 = vpop.f32.mrb[28].mxu0 }
 0x215   : > { %v7121_v10 = vadd.f32 %v6944_v62, %v6808_v19  ;;  %v5523_v13 = vpop.f32.mrb[29].mxu0 }
 0x216   : > { %v5729_v17 = vadd.f32 %v5728_v3, %v5698_v50  ;;  %v7127_v7 = vadd.f32 %v5523_v13, %v3178_v26  ;;  %v5660_v9 = vadd.f32 %v7109_v61, %v5659_v42  ;;  %v6945_v53 = vpop.f32.mrb[30].mxu0 }
 0x217   : > { %5600 = vst [vmem:[%s8782_s20 + $0xf0] sm:$0xff] %v7121_v10  ;;  %v7133_v52 = vadd.f32 %v6945_v53, %v6809_v12  ;;  %v5526_v37 = vpop.f32.mrb[31].mxu0  ;;  %v5702_v48 = vmul.f32 %v7121_v10, %v7121_v10 }
 0x218   : > { %5598 = vst [vmem:[%s8782_s20 + $0xe0] sm:$0xff] %v7127_v7  ;;  %v5661_v36 = vadd.f32 %v7127_v7, %v5660_v9  ;;  %v5700_v63 = vmul.f32 %v7127_v7, %v7127_v7  ;;  %v5730_v1 = vadd.f32 %v5729_v17, %v5699_v5  ;;  %v7139_v49 = vadd.f32 %v5526_v37, %v3181_v57 }
 0x219   : > { %5601 = vst [vmem:[%s8782_s20 + $0xf8] sm:$0xff] %v7133_v52  ;;  %v5703_v46 = vmul.f32 %v7133_v52, %v7133_v52 }
 0x21a   : > { %v5731_v40 = vadd.f32 %v5730_v1, %v5700_v63  ;;  %5599 = vst [vmem:[%s8782_s20 + $0xe8] sm:$0xff] %v7139_v49  ;;  %v5662_v45 = vadd.f32 %v7139_v49, %v5661_v36  ;;  %v5701_v23 = vmul.f32 %v7139_v49, %v7139_v49 }
 0x21c   : > { %v5663_v18 = vadd.f32 %v7121_v10, %v5662_v45  ;;  %v5732_v33 = vadd.f32 %v5731_v40, %v5701_v23 }
 0x21e   : > { %v5664_v28 = vadd.f32 %v7133_v52, %v5663_v18  ;;  %v5733_v2 = vadd.f32 %v5732_v33, %v5702_v48 }
 0x220   : > { %v5665_v25 = vrot.slane %v5664_v28, 4  ;;  %v5734_v60 = vadd.f32 %v5733_v2, %v5703_v46 }
 0x222   : > { %v5666_v11 = vadd.f32 %v5665_v25, %v5664_v28  ;;  %v5735_v56 = vrot.slane %v5734_v60, 4 }
 0x224   : > { %v5667_v43 = vrot.slane %v5666_v11, 2  ;;  %v5736_v20 = vadd.f32 %v5735_v56, %v5734_v60 }
 0x226   : > { %v5668_v6 = vadd.f32 %v5667_v43, %v5666_v11  ;;  %v5737_v34 = vrot.slane %v5736_v20, 2 }
 0x228   : > { %v5669_v44 = vrot.slane %v5668_v6, 1  ;;  %v5738_v21 = vadd.f32 %v5737_v34, %v5736_v20 }
 0x22a   : > { %v5670_v16 = vadd.f32 %v5669_v44, %v5668_v6  ;;  %v5739_v22 = vrot.slane %v5738_v21, 1 }
 0x22c   : > { %5671 = vst [vmem:[%s225_s24] sm:$0x1] %v5670_v16  ;;  %v5740_v51 = vadd.f32 %v5739_v22, %v5738_v21 }
 0x22e   : > { %5741 = vst [vmem:[%s225_s24 + $0x1] sm:$0x1] %v5740_v51 }
 0x22f PF: > { %s14_s14 = sadd.s32 1, %s7471_s14   ;;  %s8842_s12 = smov %s7467_s13 }
 0x230   : > { %p11_p5 = scmp.ge.s32.totalorder %s14_s14, 4   ;;  %s8843_s13 = smov %s8845_s15 }
 0x232   :  { %13 = sbr.rel (!%p11_p5) target bundleno = 2 (0x2), region = 80 }

// kernel: unet_conv_block_forward.6
= control target key start
LH: loop header
LB: loop body
LE: loop exit
PB: predicated region body
PF: predicated region fallthrough
CT: control target
= control target key end

     0   :  { %s8063_s12 = smov 0   ;;  %s8065_s13 = smov 0   ;;  %s9225_s0 = inlined_call_operand.vmem [shape: bf16[2,1,18,18,128], index: 0, kind: input, shape index: {}]   ;;  %s9226_s1 = inlined_call_operand.vmem [shape: bf16[3,3,128,128], index: 1, kind: input, shape index: {}]   ;;  %s9227_s2 = inlined_call_operand.vmem [shape: f32[2,1,256,128], index: 2, kind: output, shape index: {0}]   ;;  %s9228_s3 = inlined_call_operand.vmem [shape: f32[2,1,2,128], index: 3, kind: output, shape index: {1}]  }
   0x1   :  { %s8067_s14 = smov 0  }
   0x2 LB: > { %s26_s15 = sadd.s32 1, %s8037_s13  ;;  %p6129_p0 = scmp.ge.s32.totalorder %s8041_s14, 1  ;;  %s8041_s14 = sphi %s8067_s14, %s14_s14   ;;  %s8037_s13 = sphi %s8065_s13, %s9234_s13   ;;  %s8033_s12 = sphi %s8063_s12, %s9233_s12  }
   0x3   : > { %p28_p1 = scmp.ge.s32.totalorder %s26_s15, 2  ;;  %p162_p2 = scmp.lt.s32.totalorder %s8041_s14, 3 }
   0x5   : > { %s9236_s15 = smov (%p28_p1, %s26_s15), 0  ;;  %p163_p3 = pnand %p6129_p0, %p162_p2 }
   0x6   : > { %v7891_v0 = vld [vmem:[%s9226_s1] sm:$0xff] (!%p163_p3)   ;;  %v7893_v2 = vld [vmem:[%s9226_s1 + $0x8] sm:$0xff] (!%p163_p3)   ;;  %p201_p4 = scmp.lt.s32.totalorder (!%p163_p3), %s8033_s12, 1  ;;  %v7895_v4 = vld [vmem:[%s9226_s1 + $0x10] sm:$0xff] (!%p163_p3)   ;;  %vm756_vm0 = vsmask.f32 (!%p163_p3), 3328 }
   0x7   : > { %166 = sbr.rel (%p163_p3) target bundleno = 572 (0x23c), region = 28  ;;  %v7892_v1 = vld [vmem:[%s9226_s1 + $0x100] sm:$0xff] (!%p163_p3)   ;;  %7001 = vmatprep.subr.bf16.mxu1 (!%p163_p3), %v7891_v0  ;;  %v7894_v3 = vld [vmem:[%s9226_s1 + $0x108] sm:$0xff] (!%p163_p3)   ;;  %v7896_v5 = vld [vmem:[%s9226_s1 + $0x110] sm:$0xff] (!%p163_p3)   ;;  %vm757_vm1 = vsmask.f32 (!%p163_p3), 7440 }
   0x8   : > { %7193 = vmatprep.subr.bf16.mxu0 (!%p163_p3), %v7892_v1  ;;  %7002 = vmatpush3.bf16.msra.mxu1 (!%p163_p3), %v7891_v0  ;;  %v7897_v6 = vld [vmem:[%s9226_s1 + $0x18] sm:$0xff] (!%p163_p3)   ;;  %v7899_v8 = vld [vmem:[%s9226_s1 + $0x20] sm:$0xff] (!%p163_p3)   ;;  %v7901_v10 = vld [vmem:[%s9226_s1 + $0x28] sm:$0xff] (!%p163_p3)   ;;  %vm1625_vm3 = vcmask (!%p163_p3), 1042432   ;;  %vm1626_vm4 = vcmask (!%p163_p3), 1046532  }
   0x9   : > { %7194 = vmatpush3.bf16.msra.mxu0 (!%p163_p3), %v7892_v1  ;;  %7003 = vmatprep.subr.bf16.mxu1 (!%p163_p3), %v7893_v2  ;;  %v7898_v7 = vld [vmem:[%s9226_s1 + $0x118] sm:$0xff] (!%p163_p3)   ;;  %v7900_v9 = vld [vmem:[%s9226_s1 + $0x120] sm:$0xff] (!%p163_p3)   ;;  %v7902_v11 = vld [vmem:[%s9226_s1 + $0x128] sm:$0xff] (!%p163_p3)  }
   0xa   : > { %7195 = vmatprep.subr.bf16.mxu0 (!%p163_p3), %v7894_v3  ;;  %v7903_v18 = vld [vmem:[%s9226_s1 + $0x30] sm:$0xff] (!%p163_p3)   ;;  %v7905_v32 = vld [vmem:[%s9226_s1 + $0x38] sm:$0xff] (!%p163_p3)   ;;  %vm8143_vm2 = vmor (!%p163_p3), %vm756_vm0, %vm757_vm1 }
   0xb   : > { %v7904_v24 = vld [vmem:[%s9226_s1 + $0x130] sm:$0xff] (!%p163_p3)   ;;  %v7906_v38 = vld [vmem:[%s9226_s1 + $0x138] sm:$0xff] (!%p163_p3)   ;;  %v7909_v47 = vld [vmem:[%s9226_s1 + $0x40] sm:$0xff] (!%p163_p3)  }
   0xc   : > { %7004 = vmatpush3.bf16.msra.mxu1 (!%p163_p3), %v7893_v2  ;;  %v7910_v52 = vld [vmem:[%s9226_s1 + $0x140] sm:$0xff] (!%p163_p3)   ;;  %vm8243_vm5 = vmor (!%p163_p3), %vm1625_vm3, %vm1626_vm4 }
   0xd   : > { %7196 = vmatpush3.bf16.msra.mxu0 (!%p163_p3), %v7894_v3  ;;  %7005 = vmatprep.subr.bf16.mxu1 (!%p163_p3), %v7895_v4 }
   0xe   : > { %s9238_s12 = smov (!%p201_p4, %s8033_s12), 1  ;;  %7197 = vmatprep.subr.bf16.mxu0 %v7896_v5 }
   0xf   : > { %s7865_s5 = smul.u32 216, %s9238_s12  ;;  %s6133_s28 = sshll.u32 %s9238_s12, 1 }
  0x10   : > { %7006 = vmatpush3.bf16.msra.mxu1 %v7895_v4  ;;  %s225_s4 = scalar_lea.vmem %s9228_s3, %s6133_s28 }
  0x11   : > { %7198 = vmatpush3.bf16.msra.mxu0 %v7896_v5  ;;  %7007 = vmatprep.subr.bf16.mxu1 %v7897_v6  ;;  %s8120_s18 = scalar_lea.vmem %s9225_s0, %s7865_s5 }
  0x12   : > { %7199 = vmatprep.subr.bf16.mxu0 %v7898_v7  ;;  %v7907_v12 = vld [vmem:[%s8120_s18] sm:$0xff]   ;;  %v6326_v13 = vld [vmem:[%s8120_s18 + $0xc] sm:$0xf]  ;;  %v6327_v14 = vld [vmem:[%s8120_s18 + $0x10] sm:$0xf] }
  0x13   : > { %7017 = vmatprep.mubr.bf16.mxu1 %v7907_v12  ;;  %v6328_v15 = vld [vmem:[%s8120_s18 + $0x14] sm:$0x1]  ;;  %v2626_v16 = vshrl.u32 %v6326_v13, 16  ;;  %v2629_v17 = vshll.u32 %v6326_v13, 16  ;;  %v2635_v19 = vshll.u32 %v6327_v14, 16  ;;  %v2639_v20 = vshrl.u32 %v6327_v14, 16 }
  0x14   : > { %7008 = vmatpush3.bf16.msra.mxu1 %v7897_v6  ;;  %v2645_v21 = vshll.u32 %v6328_v15, 16  ;;  %v6329_v29 = vld [vmem:[%s8120_s18 + $0x18] sm:$0xf]  ;;  %v6330_v30 = vld [vmem:[%s8120_s18 + $0x1c] sm:$0xf]  ;;  %v7908_v55 = vld [vmem:[%s8120_s18 + $0xc] sm:$0xff]  }
  0x15   : > { %7200 = vmatpush3.bf16.msra.mxu0 %v7898_v7  ;;  %7009 = vmatprep.subr.bf16.mxu1 %v7899_v8  ;;  %v2628_v22 = vrot.slane %v2626_v16, 4  ;;  %v2631_v23 = vrot.slane %v2629_v17, 5  ;;  %v2637_v25 = vrot.slane %v2635_v19, 5  ;;  %v2641_v26 = vrot.slane %v2639_v20, 4  ;;  %v6331_v31 = vld [vmem:[%s8120_s18 + $0x20] sm:$0x1] }
  0x16   : > { %7201 = vmatprep.subr.bf16.mxu0 %v7900_v9  ;;  %v2647_v27 = vrot.slane %v2645_v21, 5  ;;  %v2650_v35 = vshrl.u32 %v6329_v29, 16  ;;  %v2653_v36 = vshll.u32 %v6329_v29, 16  ;;  %v2659_v37 = vshll.u32 %v6330_v30, 16  ;;  %v6332_v53 = vld [vmem:[%s8120_s18 + $0x24] sm:$0xf] }
  0x17   : > { %v2632_v28 = vor.u32 %v2631_v23, %v2628_v22  ;;  %v2642_v34 = vor.u32 %v2641_v26, %v2637_v25  ;;  %v2663_v40 = vshrl.u32 %v6330_v30, 16  ;;  %v2669_v41 = vshll.u32 %v6331_v31, 16  ;;  %v6333_v57 = vld [vmem:[%s8120_s18 + $0x28] sm:$0xf]  ;;  %v6334_v58 = vld [vmem:[%s8120_s18 + $0x2c] sm:$0x1] }
  0x18   : > { %7010 = vmatpush3.bf16.msra.mxu1 %v7899_v8  ;;  %v2652_v43 = vrot.slane %v2650_v35, 4  ;;  %v2655_v44 = vrot.slane %v2653_v36, 5  ;;  %v2661_v45 = vrot.slane %v2659_v37, 5  ;;  %v2674_v59 = vshrl.u32 %v6332_v53, 16  ;;  %v7912_v2 = vld [vmem:[%s8120_s18 + $0x18] sm:$0xff]   ;;  %v7911_v6 = vld [vmem:[%s9226_s1 + $0x148] sm:$0xff]  }
  0x19   : > { %7202 = vmatpush3.bf16.msra.mxu0 %v7900_v9  ;;  %7011 = vmatprep.subr.bf16.mxu1 %v7901_v10  ;;  %v2633_v39 = vrot.slane %v2632_v28, 4  ;;  %v2643_v42 = vrot.slane %v2642_v34, 4  ;;  %v2665_v48 = vrot.slane %v2663_v40, 4  ;;  %v2671_v51 = vrot.slane %v2669_v41, 5  ;;  %v6335_v13 = vld [vmem:[%s8120_s18 + $0x30] sm:$0xf] }
  0x1a   : > { %7203 = vmatprep.subr.bf16.mxu0 %v7902_v11  ;;  %v2656_v50 = vor.u32 %v2655_v44, %v2652_v43  ;;  %v2677_v60 = vshll.u32 %v6332_v53, 16  ;;  %v2683_v62 = vshll.u32 %v6333_v57, 16  ;;  %v2687_v63 = vshrl.u32 %v6333_v57, 16  ;;  %v6336_v14 = vld [vmem:[%s8120_s18 + $0x34] sm:$0xf]  ;;  %v7913_v28 = vld [vmem:[%s8120_s18 + $0x24] sm:$0xff]  }
  0x1b   : > { %v2638_v46 = vsel %vm8143_vm2, %v2633_v39, %v2637_v25  ;;  %v2648_v49 = vsel %vm8143_vm2, %v2643_v42, %v2647_v27  ;;  %v2666_v56 = vor.u32 %v2665_v48, %v2661_v45  ;;  %v2693_v0 = vshll.u32 %v6334_v58, 16  ;;  %v6337_v17 = vld [vmem:[%s8120_s18 + $0x38] sm:$0x1]  ;;  %v7915_v31 = vld [vmem:[%s9226_s1 + $0x150] sm:$0xff]   ;;  %v6338_v39 = vld [vmem:[%s8120_s18 + $0x3c] sm:$0xf] }
  0x1c   : > { %7012 = vmatpush3.bf16.msra.mxu1 %v7901_v10  ;;  %v6390_v54 = vcombine.low %v2638_v46, %v2648_v49  ;;  %v2657_v61 = vrot.slane %v2656_v50, 4  ;;  %v2676_v3 = vrot.slane %v2674_v59, 4  ;;  %v2679_v4 = vrot.slane %v2677_v60, 5  ;;  %v7914_v10 = vld [vmem:[%s9226_s1 + $0x48] sm:$0xff]   ;;  %v7917_v36 = vld [vmem:[%s8120_s18 + $0x30] sm:$0xff]  }
  0x1d   : > { %7204 = vmatpush3.bf16.msra.mxu0 %v7902_v11  ;;  %7013 = vmatprep.subr.bf16.mxu1 %v7903_v18  ;;  %v2667_v1 = vrot.slane %v2666_v56, 4  ;;  %v2685_v7 = vrot.slane %v2683_v62, 5  ;;  %v2689_v8 = vrot.slane %v2687_v63, 4  ;;  %v2695_v9 = vrot.slane %v2693_v0, 5  ;;  %v6339_v40 = vld [vmem:[%s8120_s18 + $0x40] sm:$0xf] }
  0x1e   : > { %7205 = vmatprep.subr.bf16.mxu0 %v7904_v24  ;;  %7209 = vmatprep.mubr.bf16.mxu0 %v6390_v54  ;;  %v2662_v5 = vsel %vm8143_vm2, %v2657_v61, %v2661_v45  ;;  %v2680_v12 = vor.u32 %v2679_v4, %v2676_v3  ;;  %v2701_v19 = vshll.u32 %v6335_v13, 16  ;;  %v2707_v21 = vshll.u32 %v6336_v14, 16  ;;  %v6340_v41 = vld [vmem:[%s8120_s18 + $0x44] sm:$0x1]  ;;  %v7919_v54 = vld [vmem:[%s9226_s1 + $0x50] sm:$0xff]  }
  0x1f   : > { %v2672_v11 = vsel %vm8143_vm2, %v2667_v1, %v2671_v51  ;;  %v2690_v16 = vor.u32 %v2689_v8, %v2685_v7  ;;  %v2711_v22 = vshrl.u32 %v6336_v14, 16  ;;  %v2717_v23 = vshll.u32 %v6337_v17, 16  ;;  %v6341_v58 = vld [vmem:[%s8120_s18 + $0x48] sm:$0xf]  ;;  %v6342_v61 = vld [vmem:[%s8120_s18 + $0x4c] sm:$0xf] }
  0x20   : > { %7014 = vmatpush3.bf16.msra.mxu1 %v7903_v18  ;;  %v6391_v15 = vcombine.low %v2662_v5, %v2672_v11  ;;  %v2698_v18 = vshrl.u32 %v6335_v13, 16  ;;  %v2681_v20 = vrot.slane %v2680_v12, 4  ;;  %v2703_v26 = vrot.slane %v2701_v19, 5  ;;  %v6343_v62 = vld [vmem:[%s8120_s18 + $0x50] sm:$0x1]  ;;  %v7920_v8 = vld [vmem:[%s9226_s1 + $0x160] sm:$0xff]  }
  0x21   : > { %7206 = vmatpush3.bf16.msra.mxu0 %v7904_v24  ;;  %7015 = vmatprep.subr.bf16.mxu1 %v7905_v32  ;;  %v2691_v24 = vrot.slane %v2690_v16, 4  ;;  %v2709_v29 = vrot.slane %v2707_v21, 5  ;;  %v2713_v30 = vrot.slane %v2711_v22, 4  ;;  %v2719_v35 = vrot.slane %v2717_v23, 5  ;;  %v6344_v19 = vld [vmem:[%s8120_s18 + $0x54] sm:$0xf] }
  0x22   : > { %7207 = vmatprep.subr.bf16.mxu0 %v7906_v38  ;;  %v2700_v25 = vrot.slane %v2698_v18, 4  ;;  %v2686_v27 = vsel %vm8143_vm2, %v2681_v20, %v2685_v7  ;;  %v2722_v43 = vshrl.u32 %v6338_v39, 16  ;;  %v2725_v44 = vshll.u32 %v6338_v39, 16  ;;  %v7922_v18 = vld [vmem:[%s8120_s18 + $0x48] sm:$0xff]   ;;  %v6345_v20 = vld [vmem:[%s8120_s18 + $0x58] sm:$0xf] }
  0x23   : > { %v2731_v45 = vshll.u32 %v6339_v40, 16  ;;  %v2735_v48 = vshrl.u32 %v6339_v40, 16  ;;  %v2741_v49 = vshll.u32 %v6340_v41, 16  ;;  %v2746_v63 = vshrl.u32 %v6341_v58, 16  ;;  %v7921_v23 = vld [vmem:[%s9226_s1 + $0x168] sm:$0xff]   ;;  %v7923_v39 = vld [vmem:[%s8120_s18 + $0x54] sm:$0xff]  }
  0x24   : > { %7016 = vmatpush3.bf16.msra.mxu1 %v7905_v32  ;;  %v2696_v32 = vsel %vm8143_vm2, %v2691_v24, %v2695_v9  ;;  %v2704_v34 = vor.u32 %v2703_v26, %v2700_v25  ;;  %v2724_v51 = vrot.slane %v2722_v43, 4  ;;  %v2749_v0 = vshll.u32 %v6341_v58, 16  ;;  %v6346_v24 = vld [vmem:[%s8120_s18 + $0x5c] sm:$0x1]  ;;  %v6347_v43 = vld [vmem:[%s8120_s18 + $0x60] sm:$0xf] }
  0x25   : > { %7208 = vmatpush3.bf16.msra.mxu0 %v7906_v38  ;;  %7049 = vmatprep.subr.bf16.mxu1 %v7909_v47  ;;  %v6392_v37 = vcombine.low %v2686_v27, %v2696_v32  ;;  %v2714_v38 = vor.u32 %v2713_v30, %v2709_v29  ;;  %v2733_v53 = vrot.slane %v2731_v45, 5  ;;  %v2737_v56 = vrot.slane %v2735_v48, 4  ;;  %v7924_v40 = vld [vmem:[%s9226_s1 + $0x58] sm:$0xff]   ;;  %v6349_v45 = vld [vmem:[%s8120_s18 + $0x68] sm:$0x1] }
  0x26   : > { %7241 = vmatprep.subr.bf16.mxu0 %v7910_v52  ;;  %v2705_v42 = vrot.slane %v2704_v34, 4  ;;  %v2743_v57 = vrot.slane %v2741_v49, 5  ;;  %v2759_v3 = vshrl.u32 %v6342_v61, 16  ;;  %v2765_v4 = vshll.u32 %v6343_v62, 16 }
  0x27   : > { %7018 = vmatmul.mubr.bf16.vlgmr.msra.gmra.mrb[0].mxu1 %v7908_v55  ;;  %v2715_v46 = vrot.slane %v2714_v38, 4  ;;  %v2738_v1 = vor.u32 %v2737_v56, %v2733_v53  ;;  %v2751_v7 = vrot.slane %v2749_v0, 5  ;;  %v2770_v25 = vshrl.u32 %v6344_v19, 16  ;;  %v6414_v0 = vld [vmem:[%s8120_s18 + $0xc] sm:$0xe] }
  0x28   : > { %7210 = vmatmul.mubr.bf16.vlgmr.msra.gmra.mrb[0].mxu0 %v6391_v15  ;;  %7050 = vmatpush3.bf16.msra.mxu1 %v7909_v47  ;;  %v7916_v47 = vld [vmem:[%s9226_s1 + $0x158] sm:$0xff]   ;;  %v2710_v50 = vsel %vm8143_vm2, %v2705_v42, %v2709_v29  ;;  %v2761_v12 = vrot.slane %v2759_v3, 4  ;;  %v2767_v17 = vrot.slane %v2765_v4, 5  ;;  %v2773_v26 = vshll.u32 %v6344_v19, 16 }
  0x29   : > { %7242 = vmatpush3.bf16.msra.mxu0 %v7910_v52  ;;  %7021 = vmatprep.mubr.bf16.mxu1 %v7912_v2  ;;  %v2727_v52 = vrot.slane %v2725_v44, 5  ;;  %v2720_v55 = vsel %vm8143_vm2, %v2715_v46, %v2719_v35  ;;  %v2755_v2 = vshll.u32 %v6342_v61, 16  ;;  %v2739_v9 = vrot.slane %v2738_v1, 4  ;;  %v6348_v44 = vld [vmem:[%s8120_s18 + $0x64] sm:$0xf] }
  0x2a   : > { %7243 = vmatprep.subr.bf16.mxu0 %v7911_v6  ;;  %7051 = vmatprep.subr.bf16.mxu1 %v7914_v10  ;;  %v6393_v59 = vcombine.low %v2710_v50, %v2720_v55  ;;  %v2783_v29 = vshrl.u32 %v6345_v20, 16  ;;  %v2789_v30 = vshll.u32 %v6346_v24, 16  ;;  %v2772_v32 = vrot.slane %v2770_v25, 4  ;;  %v7925_v50 = vld [vmem:[%s9226_s1 + $0x170] sm:$0xff]  }
  0x2b   : > { %7213 = vmatprep.mubr.bf16.mxu0 %v6392_v37  ;;  %v2728_v60 = vor.u32 %v2727_v52, %v2724_v51  ;;  %v2757_v11 = vrot.slane %v2755_v2, 5  ;;  %v2744_v15 = vsel %vm8143_vm2, %v2739_v9, %v2743_v57  ;;  %v2775_v34 = vrot.slane %v2773_v26, 5 }
  0x2c   : > { %7052 = vmatpush3.bf16.msra.mxu1 %v7914_v10  ;;  %v7918_v10 = vld [vmem:[%s8120_s18 + $0x3c] sm:$0xff]   ;;  %v2785_v37 = vrot.slane %v2783_v29, 4  ;;  %v2791_v38 = vrot.slane %v2789_v30, 5  ;;  %v2797_v48 = vshll.u32 %v6347_v43, 16  ;;  %v2803_v49 = vshll.u32 %v6348_v44, 16 }
  0x2d   : > { %7244 = vmatpush3.bf16.msra.mxu0 %v7911_v6  ;;  %7053 = vmatprep.subr.bf16.mxu1 %v7919_v54  ;;  %v2729_v5 = vrot.slane %v2728_v60, 4  ;;  %v2748_v6 = vrot.slane %v2746_v63, 4  ;;  %v2762_v16 = vor.u32 %v2761_v12, %v2757_v11  ;;  %v2776_v42 = vor.u32 %v2775_v34, %v2772_v32  ;;  %v7926_v60 = vld [vmem:[%s9226_s1 + $0x178] sm:$0xff]   ;;  %v7927_v63 = vld [vmem:[%s8120_s18 + $0x60] sm:$0xff]   ;;  %v6421_v30 = vld [vmem:[%s8120_s18 + $0x28] sm:$0xf] }
  0x2e   : > { %7245 = vmatprep.subr.bf16.mxu0 %v7915_v31  ;;  %v2807_v52 = vshrl.u32 %v6348_v44, 16  ;;  %v2799_v56 = vrot.slane %v2797_v48, 5  ;;  %v2805_v57 = vrot.slane %v2803_v49, 5  ;;  %v6420_v29 = vld [vmem:[%s8120_s18 + $0x24] sm:$0xe] }
  0x2f   : > { %7022 = vmatmul.mubr.bf16.gmra.mrb[4].mxu1 %v7913_v28  ;;  %v2734_v13 = vsel %vm8143_vm2, %v2729_v5, %v2733_v53  ;;  %v2752_v14 = vor.u32 %v2751_v7, %v2748_v6  ;;  %v2763_v27 = vrot.slane %v2762_v16, 4  ;;  %v2779_v28 = vshll.u32 %v6345_v20, 16  ;;  %v6415_v5 = vld [vmem:[%s8120_s18 + $0x10] sm:$0xf]  ;;  %v6416_v6 = vld [vmem:[%s8120_s18 + $0x14] sm:$0x1] }
  0x30   : > { %7025 = vmatprep.mubr.bf16.mxu1 %v7917_v36  ;;  %7054 = vmatpush3.bf16.msra.mxu1 %v7919_v54  ;;  %v6394_v21 = vcombine.low %v2734_v13, %v2744_v15  ;;  %v2777_v51 = vrot.slane %v2776_v42, 4  ;;  %v2813_v53 = vshll.u32 %v6349_v45, 16  ;;  %v6462_v7 = vrot.slane %v6414_v0, 9  ;;  %v7928_v13 = vld [vmem:[%s8120_s18 + $0x6c] sm:$0xff]   ;;  %v6418_v20 = vld [vmem:[%s8120_s18 + $0x1c] sm:$0xf] }
  0x31   : > { %7246 = vmatpush3.bf16.msra.mxu0 %v7915_v31  ;;  %v2753_v22 = vrot.slane %v2752_v14, 4  ;;  %v2768_v35 = vsel %vm8143_vm2, %v2763_v27, %v2767_v17  ;;  %v2781_v36 = vrot.slane %v2779_v28, 5  ;;  %7055 = vmatprep.subr.bf16.mxu1 %v7924_v40  ;;  %v3493_v9 = vrot.slane %v6415_v5, 5  ;;  %v6417_v17 = vld [vmem:[%s8120_s18 + $0x18] sm:$0xe]  ;;  %v7931_v42 = vld [vmem:[%s8120_s18 + $0x84] sm:$0xff]  }
  0x32   : > { %7214 = vmatmul.mubr.bf16.gmra.mrb[4].mxu0 %v6393_v59  ;;  %7247 = vmatprep.subr.bf16.mxu0 %v7916_v47  ;;  %v2809_v59 = vrot.slane %v2807_v52, 4  ;;  %v2815_v3 = vrot.slane %v2813_v53, 5  ;;  %v3500_v26 = vrot.slane %v6418_v20, 5  ;;  %v6464_v34 = vrot.slane %v6420_v29, 9  ;;  %v6424_v44 = vld [vmem:[%s8120_s18 + $0x34] sm:$0xf] }
  0x33   : > { %7217 = vmatprep.mubr.bf16.mxu0 %v6394_v21  ;;  %v2758_v31 = vsel %vm8143_vm2, %v2753_v22, %v2757_v11  ;;  %v2786_v46 = vor.u32 %v2785_v37, %v2781_v36  ;;  %v2782_v58 = vsel %vm8143_vm2, %v2777_v51, %v2781_v36  ;;  %v7929_v11 = vld [vmem:[%s9226_s1 + $0x60] sm:$0xff]   ;;  %v3494_v15 = vsel %vm8243_vm5, %v6462_v7, %v3493_v9  ;;  %v6425_v45 = vld [vmem:[%s8120_s18 + $0x38] sm:$0x1]  ;;  %v7934_v52 = vld [vmem:[%s8120_s18 + $0x90] sm:$0xff]  }
  0x34   : > { %v6395_v41 = vcombine.low %v2758_v31, %v2768_v35  ;;  %7056 = vmatpush3.bf16.msra.mxu1 %v7924_v40  ;;  %v2810_v2 = vor.u32 %v2809_v59, %v2805_v57  ;;  %v3495_v16 = vrot.slane %v3493_v9, 4  ;;  %v6419_v21 = vld [vmem:[%s8120_s18 + $0x20] sm:$0x1]  ;;  %v6463_v22 = vrot.slane %v6417_v17, 9  ;;  %v6422_v31 = vld [vmem:[%s8120_s18 + $0x2c] sm:$0x1] }
  0x35   : > { %7248 = vmatpush3.bf16.msra.mxu0 %v7916_v47  ;;  %v2794_v47 = vshrl.u32 %v6347_v43, 16  ;;  %v2787_v54 = vrot.slane %v2786_v46, 4  ;;  %7057 = vmatprep.subr.bf16.mxu1 %v7929_v11  ;;  %v3503_v27 = vrot.slane %v6419_v21, 5  ;;  %v3502_v32 = vrot.slane %v3500_v26, 4  ;;  %v7933_v36 = vld [vmem:[%s9226_s1 + $0x180] sm:$0xff]  }
  0x36   : > { %7249 = vmatprep.subr.bf16.mxu0 %v7920_v8  ;;  %v2811_v12 = vrot.slane %v2810_v2, 4  ;;  %v3507_v35 = vrot.slane %v6421_v30, 5  ;;  %v3501_v37 = vsel %vm8243_vm5, %v6463_v22, %v3500_v26  ;;  %v6423_v43 = vld [vmem:[%s8120_s18 + $0x30] sm:$0xe]  ;;  %v3517_v51 = vrot.slane %v6425_v45, 5  ;;  %v7935_v5 = vld [vmem:[%s8120_s18 + $0x9c] sm:$0xff]  }
  0x37   : > { %7026 = vmatmul.mubr.bf16.gmra.mrb[8].mxu1 %v7918_v10  ;;  %v2796_v55 = vrot.slane %v2794_v47, 4  ;;  %v2792_v61 = vsel %vm8143_vm2, %v2787_v54, %v2791_v38  ;;  %v3496_v10 = vrot.slane %v6416_v6, 5  ;;  %v3510_v38 = vrot.slane %v6422_v31, 5  ;;  %v7936_v47 = vld [vmem:[%s9226_s1 + $0x70] sm:$0xff]   ;;  %v6426_v54 = vld [vmem:[%s8120_s18 + $0x3c] sm:$0xe] }
  0x38   : > { %7029 = vmatprep.mubr.bf16.mxu1 %v7922_v18  ;;  %v6396_v1 = vcombine.low %v2782_v58, %v2792_v61  ;;  %v7930_v18 = vld [vmem:[%s8120_s18 + $0x78] sm:$0xff]   ;;  %v2816_v19 = vsel %vm8143_vm2, %v2811_v12, %v2815_v3  ;;  %7058 = vmatpush3.bf16.msra.mxu1 %v7929_v11  ;;  %v3508_v40 = vsel %vm8243_vm5, %v6464_v34, %v3507_v35  ;;  %v6465_v46 = vrot.slane %v6423_v43, 9  ;;  %v6429_v61 = vld [vmem:[%s8120_s18 + $0x48] sm:$0xe]  ;;  %v6431_v2 = vld [vmem:[%s8120_s18 + $0x50] sm:$0x1] }
  0x39   : > { %7250 = vmatpush3.bf16.msra.mxu0 %v7920_v8  ;;  %v2800_v62 = vor.u32 %v2799_v56, %v2796_v55  ;;  %v3497_v25 = vsel %vm8243_vm5, %v3495_v16, %v3496_v10  ;;  %v6427_v56 = vld [vmem:[%s8120_s18 + $0x40] sm:$0xf]  ;;  %v6466_v58 = vrot.slane %v6426_v54, 9  ;;  %v6467_v6 = vrot.slane %v6429_v61, 9  ;;  %v7937_v10 = vld [vmem:[%s9226_s1 + $0x188] sm:$0xff]   ;;  %v7941_v30 = vld [vmem:[%s9226_s1 + $0x190] sm:$0xff]  }
  0x3a   : > { %7251 = vmatprep.subr.bf16.mxu0 %v7921_v23  ;;  %7218 = vmatmul.mubr.bf16.gmra.mrb[8].mxu0 %v6395_v41  ;;  %v6494_v28 = vcombine.low %v3494_v15, %v3497_v25  ;;  %v3509_v41 = vrot.slane %v3507_v35, 4  ;;  %v3521_v59 = vrot.slane %v6427_v56, 5  ;;  %v3531_v9 = vrot.slane %v6431_v2, 5  ;;  %v6433_v15 = vld [vmem:[%s8120_s18 + $0x58] sm:$0xf] }
  0x3b   : > { %v2801_v8 = vrot.slane %v2800_v62, 4  ;;  %7221 = vmatprep.mubr.bf16.mxu0 %v6396_v1  ;;  %v6430_v1 = vld [vmem:[%s8120_s18 + $0x4c] sm:$0xf]  ;;  %v6434_v17 = vld [vmem:[%s8120_s18 + $0x5c] sm:$0x1] }
  0x3c   : > { %v3511_v49 = vsel %vm8243_vm5, %v3509_v41, %v3510_v38  ;;  %v3523_v0 = vrot.slane %v3521_v59, 4  ;;  %v3522_v3 = vsel %vm8243_vm5, %v6466_v58, %v3521_v59  ;;  %v3528_v7 = vrot.slane %v6430_v1, 5  ;;  %v7940_v25 = vld [vmem:[%s9226_s1 + $0x78] sm:$0xff]   ;;  %v6435_v26 = vld [vmem:[%s8120_s18 + $0x60] sm:$0xe] }
  0x3d   : > { %7252 = vmatpush3.bf16.msra.mxu0 %v7921_v23  ;;  %v2806_v14 = vsel %vm8143_vm2, %v2801_v8, %v2805_v57  ;;  %v7932_v23 = vld [vmem:[%s9226_s1 + $0x68] sm:$0xff]   ;;  %v6496_v53 = vcombine.low %v3508_v40, %v3511_v49  ;;  %v6428_v57 = vld [vmem:[%s8120_s18 + $0x44] sm:$0x1]  ;;  %v3538_v20 = vrot.slane %v6434_v17, 5  ;;  %v6469_v29 = vrot.slane %v6435_v26, 9 }
  0x3e   : > { %7253 = vmatprep.subr.bf16.mxu0 %v7925_v50  ;;  %v6397_v24 = vcombine.low %v2806_v14, %v2816_v19  ;;  %7059 = vmatprep.subr.bf16.mxu1 %v7932_v23  ;;  %v3530_v12 = vrot.slane %v3528_v7, 4  ;;  %v6432_v14 = vld [vmem:[%s8120_s18 + $0x54] sm:$0xe]  ;;  %v3535_v19 = vrot.slane %v6433_v15, 5  ;;  %v3529_v21 = vsel %vm8243_vm5, %v6467_v6, %v3528_v7  ;;  %v708_v38 = vld [vmem:[%s8120_s18] sm:$0xf] }
  0x3f   : > { %7030 = vmatmul.mubr.bf16.gmra.mrb[12].mxu1 %v7923_v39  ;;  %v3504_v39 = vsel %vm8243_vm5, %v3502_v32, %v3503_v27  ;;  %v6436_v27 = vld [vmem:[%s8120_s18 + $0x64] sm:$0xf]  ;;  %v710_v40 = vld [vmem:[%s8120_s18 + $0x8] sm:$0x1]  ;;  %v760_v43 = vshrl.u32 %v708_v38, 16 }
  0x40   : > { %7033 = vmatprep.mubr.bf16.mxu1 %v7927_v63  ;;  %7060 = vmatpush3.bf16.msra.mxu1 %v7932_v23  ;;  %v6495_v48 = vcombine.low %v3501_v37, %v3504_v39  ;;  %v3532_v22 = vsel %vm8243_vm5, %v3530_v12, %v3531_v9  ;;  %v3542_v32 = vrot.slane %v6436_v27, 5  ;;  %v7939_v37 = vld [vmem:[%s8120_s18 + $0xb4] sm:$0xff]   ;;  %v709_v39 = vld [vmem:[%s8120_s18 + $0x4] sm:$0xf]  ;;  %v6438_v45 = vld [vmem:[%s8120_s18 + $0x6c] sm:$0xe] }
  0x41   : > { %7254 = vmatpush3.bf16.msra.mxu0 %v7925_v50  ;;  %v3514_v50 = vrot.slane %v6424_v44, 5  ;;  %7061 = vmatprep.subr.bf16.mxu1 %v7936_v47  ;;  %v6499_v35 = vcombine.low %v3529_v21, %v3532_v22  ;;  %v763_v44 = vshll.u32 %v708_v38, 16  ;;  %v779_v49 = vshll.u32 %v710_v40, 16  ;;  %v711_v61 = vld [vmem:[%s8120_s18 + $0xc] sm:$0xf]  ;;  %v7945_v9 = vld [vmem:[%s9226_s1 + $0x1a0] sm:$0xff]  }
  0x42   : > { %7255 = vmatprep.subr.bf16.mxu0 %v7926_v60  ;;  %7222 = vmatmul.mubr.bf16.gmra.mrb[12].mxu0 %v6397_v24  ;;  %v3537_v24 = vrot.slane %v3535_v19, 4  ;;  %v8335_v41 = vsel %vm8243_vm5, %v6469_v29, %v3542_v32  ;;  %v712_v2 = vld [vmem:[%s8120_s18 + $0x10] sm:$0xf]  ;;  %v784_v6 = vshrl.u32 %v711_v61, 16  ;;  %v787_v7 = vshll.u32 %v711_v61, 16 }
  0x43   : > { %7257 = vmatprep.mubr.bf16.mxu0 %v6494_v28  ;;  %v3516_v55 = vrot.slane %v3514_v50, 4  ;;  %v3515_v62 = vsel %vm8243_vm5, %v6465_v46, %v3514_v50  ;;  %v6437_v28 = vld [vmem:[%s8120_s18 + $0x68] sm:$0x1]  ;;  %v8341_v46 = vld [vmem:[%s9226_s1 + $0x80] sm:$0xff]   ;;  %v6439_v50 = vld [vmem:[%s8120_s18 + $0x70] sm:$0xf] }
  0x44   : > { %7062 = vmatpush3.bf16.msra.mxu1 %v7936_v47  ;;  %v3539_v31 = vsel %vm8243_vm5, %v3537_v24, %v3538_v20  ;;  %v3545_v34 = vrot.slane %v6437_v28, 5  ;;  %v769_v47 = vshll.u32 %v709_v39, 16  ;;  %v765_v54 = vrot.slane %v763_v44, 5  ;;  %v6442_v24 = vld [vmem:[%s8120_s18 + $0x7c] sm:$0xf] }
  0x45   : > { %7256 = vmatpush3.bf16.msra.mxu0 %v7926_v60  ;;  %v3524_v60 = vrot.slane %v6428_v57, 5  ;;  %v3518_v63 = vsel %vm8243_vm5, %v3516_v55, %v3517_v51  ;;  %7063 = vmatprep.subr.bf16.mxu1 %v7940_v25  ;;  %v6470_v51 = vrot.slane %v6438_v45, 9  ;;  %v6440_v55 = vld [vmem:[%s8120_s18 + $0x74] sm:$0x1]  ;;  %v3549_v56 = vrot.slane %v6439_v50, 5  ;;  %v7943_v57 = vld [vmem:[%s9226_s1 + $0x198] sm:$0xff]  }
  0x46   : > { %7289 = vmatprep.subr.bf16.mxu0 %v7933_v36  ;;  %v6497_v11 = vcombine.low %v3515_v62, %v3518_v63  ;;  %v771_v58 = vrot.slane %v769_v47, 5  ;;  %v3552_v1 = vrot.slane %v6440_v55, 5  ;;  %v797_v12 = vshrl.u32 %v712_v2, 16  ;;  %v6443_v27 = vld [vmem:[%s8120_s18 + $0x80] sm:$0x1] }
  0x47   : > { %7034 = vmatmul.mubr.bf16.gmra.mrb[16].mxu1 %v7928_v13  ;;  %v3525_v8 = vsel %vm8243_vm5, %v3523_v0, %v3524_v60  ;;  %v7938_v13 = vld [vmem:[%s8120_s18 + $0xa8] sm:$0xff]   ;;  %v781_v60 = vrot.slane %v779_v49, 5  ;;  %v3551_v0 = vrot.slane %v3549_v56, 4  ;;  %v789_v17 = vrot.slane %v787_v7, 5  ;;  %v715_v40 = vld [vmem:[%s8120_s18 + $0x1c] sm:$0xf] }
  0x48   : > { %7037 = vmatprep.mubr.bf16.mxu1 %v7930_v18  ;;  %v6498_v16 = vcombine.low %v3522_v3, %v3525_v8  ;;  %v6468_v18 = vrot.slane %v6432_v14, 9  ;;  %7064 = vmatpush3.bf16.msra.mxu1 %v7940_v25  ;;  %v713_v3 = vld [vmem:[%s8120_s18 + $0x14] sm:$0x1]  ;;  %v793_v8 = vshll.u32 %v712_v2, 16  ;;  %v799_v22 = vrot.slane %v797_v12, 4  ;;  %v7950_v2 = vld [vmem:[%s9226_s1 + $0x1b8] sm:$0xff]  }
  0x49   : > { %7097 = vmatprep.subr.bf16.mxu1 %v8341_v46  ;;  %v3553_v15 = vsel %vm8243_vm5, %v3551_v0, %v3552_v1  ;;  %v3556_v29 = vrot.slane %v6442_v24, 5  ;;  %v817_v45 = vshll.u32 %v715_v40, 16  ;;  %v6444_v47 = vld [vmem:[%s8120_s18 + $0x84] sm:$0xe]  ;;  %v821_v50 = vshrl.u32 %v715_v40, 16 }
  0x4a   : > { %7258 = vmatmul.mubr.bf16.vlgmr.msra.gmra.mrb[0].mxu0 %v6495_v48  ;;  %v3536_v23 = vsel %vm8243_vm5, %v6468_v18, %v3535_v19  ;;  %v773_v48 = vshrl.u32 %v709_v39, 16  ;;  %v6441_v18 = vld [vmem:[%s8120_s18 + $0x78] sm:$0xe]  ;;  %v7947_v19 = vld [vmem:[%s9226_s1 + $0x1a8] sm:$0xff]   ;;  %v795_v21 = vrot.slane %v793_v8, 5 }
  0x4b   : > { %7261 = vmatprep.mubr.bf16.mxu0 %v6496_v53  ;;  %7290 = vmatpush3.bf16.msra.mxu0 %v7933_v36  ;;  %v6500_v36 = vcombine.low %v3536_v23, %v3539_v31  ;;  %v762_v53 = vrot.slane %v760_v43, 4  ;;  %v6471_v28 = vrot.slane %v6441_v18, 9  ;;  %v3558_v39 = vrot.slane %v3556_v29, 4  ;;  %v719_v1 = vld [vmem:[%s8120_s18 + $0x2c] sm:$0x1] }
  0x4c   : > { %7291 = vmatprep.subr.bf16.mxu0 %v7937_v10  ;;  %v775_v59 = vrot.slane %v773_v48, 4 }
  0x4d   : > { %v766_v63 = vor.u32 %v765_v54, %v762_v53  ;;  %v8381_v38 = vsel %vm8243_vm5, %v6471_v28, %v3556_v29  ;;  %v6446_v53 = vld [vmem:[%s8120_s18 + $0x8c] sm:$0x1] }
  0x4e   : > { %v7944_v54 = vld [vmem:[%s9226_s1 + $0x88] sm:$0xff]   ;;  %v3566_v7 = vrot.slane %v6446_v53, 5 }
  0x4f   : > { %7038 = vmatmul.mubr.bf16.gmra.mrb[20].mxu1 %v7931_v42  ;;  %7292 = vmatpush3.bf16.msra.mxu0 %v7937_v10  ;;  %v3544_v42 = vrot.slane %v3542_v32, 4  ;;  %v767_v10 = vrot.slane %v766_v63, 4  ;;  %v800_v32 = vor.u32 %v799_v22, %v795_v21  ;;  %v823_v63 = vrot.slane %v821_v50, 4  ;;  %v6451_v50 = vld [vmem:[%s8120_s18 + $0xa0] sm:$0xf] }
  0x50   : > { %7041 = vmatprep.mubr.bf16.mxu1 %v7934_v52  ;;  %7293 = vmatprep.subr.bf16.mxu0 %v7941_v30 }
  0x51   : > { %v8346_v52 = vsel %vm8243_vm5, %v3544_v42, %v3545_v34  ;;  %v772_v20 = vsel %vm8143_vm2, %v767_v10, %v771_v58  ;;  %v3559_v34 = vrot.slane %v6443_v27, 5  ;;  %v801_v42 = vrot.slane %v800_v32, 4  ;;  %v7948_v32 = vld [vmem:[%s9226_s1 + $0x98] sm:$0xff]  }
  0x52   : > { %7262 = vmatmul.mubr.bf16.gmra.mrb[4].mxu0 %v6497_v11  ;;  %v6501_v62 = vcombine.low %v8335_v41, %v8346_v52  ;;  %v3550_v11 = vsel %vm8243_vm5, %v6470_v51, %v3549_v56  ;;  %v716_v41 = vld [vmem:[%s8120_s18 + $0x20] sm:$0x1]  ;;  %v6445_v52 = vld [vmem:[%s8120_s18 + $0x88] sm:$0xf] }
  0x53   : > { %7265 = vmatprep.mubr.bf16.mxu0 %v6498_v16  ;;  %7294 = vmatpush3.bf16.msra.mxu0 %v7941_v30  ;;  %v786_v16 = vrot.slane %v784_v6, 4  ;;  %v6502_v31 = vcombine.low %v3550_v11, %v3553_v15  ;;  %v3560_v49 = vsel %vm8243_vm5, %v3558_v39, %v3559_v34  ;;  %v827_v51 = vshll.u32 %v716_v41, 16  ;;  %v722_v39 = vld [vmem:[%s8120_s18 + $0x38] sm:$0x1] }
  0x54   : > { %7295 = vmatprep.subr.bf16.mxu0 %v7943_v57  ;;  %v6503_v56 = vcombine.low %v8381_v38, %v3560_v49  ;;  %v3563_v6 = vrot.slane %v6445_v52, 5  ;;  %v721_v38 = vld [vmem:[%s8120_s18 + $0x34] sm:$0xf] }
  0x55   : > { %v790_v26 = vor.u32 %v789_v17, %v786_v16  ;;  %v829_v0 = vrot.slane %v827_v51, 5  ;;  %v6447_v16 = vld [vmem:[%s8120_s18 + $0x90] sm:$0xe]  ;;  %v865_v49 = vshll.u32 %v721_v38, 16 }
  0x56   : > { %v7946_v17 = vld [vmem:[%s9226_s1 + $0x90] sm:$0xff]  }
  0x57   : > { %7042 = vmatmul.mubr.bf16.gmra.mrb[24].mxu1 %v7935_v5  ;;  %v776_v5 = vor.u32 %v775_v59, %v771_v58  ;;  %7296 = vmatpush3.bf16.msra.mxu0 %v7943_v57  ;;  %v717_v59 = vld [vmem:[%s8120_s18 + $0x24] sm:$0xf] }
  0x58   : > { %7045 = vmatprep.mubr.bf16.mxu1 %v7938_v13  ;;  %v803_v13 = vshll.u32 %v713_v3, 16  ;;  %7297 = vmatprep.subr.bf16.mxu0 %v7945_v9  ;;  %v835_v10 = vshll.u32 %v717_v59, 16 }
  0x59   : > { %v777_v14 = vrot.slane %v776_v5, 4  ;;  %v6472_v5 = vrot.slane %v6444_v47, 9 }
  0x5a   : > { %7266 = vmatmul.mubr.bf16.gmra.mrb[8].mxu0 %v6499_v35  ;;  %v805_v23 = vrot.slane %v803_v13, 5  ;;  %v714_v35 = vld [vmem:[%s8120_s18 + $0x18] sm:$0xf] }
  0x5b   : > { %7269 = vmatprep.mubr.bf16.mxu0 %v6500_v36  ;;  %v782_v25 = vsel %vm8143_vm2, %v777_v14, %v781_v60  ;;  %7298 = vmatpush3.bf16.msra.mxu0 %v7945_v9  ;;  %v7949_v36 = vld [vmem:[%s9226_s1 + $0x1b0] sm:$0xff]   ;;  %v808_v43 = vshrl.u32 %v714_v35, 16  ;;  %v811_v44 = vshll.u32 %v714_v35, 16  ;;  %v718_v60 = vld [vmem:[%s8120_s18 + $0x28] sm:$0xf]  ;;  %v832_v9 = vshrl.u32 %v717_v59, 16 }
  0x5c   : > { %v6174_v30 = vcombine.low %v772_v20, %v782_v25  ;;  %7299 = vmatprep.subr.bf16.mxu0 %v7947_v19  ;;  %v806_v55 = vsel %vm8143_vm2, %v801_v42, %v805_v23  ;;  %v841_v11 = vshll.u32 %v718_v60, 16  ;;  %v3564_v13 = vsel %vm8243_vm5, %v6472_v5, %v3563_v6  ;;  %v8445_v5 = vld [vmem:[%s9226_s1 + $0x1c0] sm:$0xff]  }
  0x5d   : > { %v810_v57 = vrot.slane %v808_v43, 4  ;;  %v813_v58 = vrot.slane %v811_v44, 5  ;;  %v3565_v14 = vrot.slane %v3563_v6, 4  ;;  %v845_v15 = vshrl.u32 %v718_v60, 16  ;;  %v6450_v44 = vld [vmem:[%s8120_s18 + $0x9c] sm:$0xe] }
  0x5e   : > { %v837_v20 = vrot.slane %v835_v10, 5  ;;  %v851_v25 = vshll.u32 %v719_v1, 16  ;;  %v867_v59 = vrot.slane %v865_v49, 5  ;;  %v875_v60 = vshll.u32 %v722_v39, 16 }
  0x5f   : > { %7046 = vmatmul.mubr.bf16.gmra.mrb[28].mxu1 %v7939_v37  ;;  %v791_v37 = vrot.slane %v790_v26, 4  ;;  %7300 = vmatpush3.bf16.msra.mxu0 %v7947_v19  ;;  %v814_v3 = vor.u32 %v813_v58, %v810_v57  ;;  %v834_v19 = vrot.slane %v832_v9, 4  ;;  %v3567_v23 = vsel %vm8243_vm5, %v3565_v14, %v3566_v7  ;;  %v6449_v26 = vld [vmem:[%s8120_s18 + $0x98] sm:$0x1]  ;;  %v6453_v14 = vld [vmem:[%s8120_s18 + $0xa8] sm:$0xe] }
  0x60   : > { %7065 = vmatprep.mubr.bf16.mxu1 %v6174_v30  ;;  %7301 = vmatprep.subr.bf16.mxu0 %v7949_v36  ;;  %v847_v24 = vrot.slane %v845_v15, 4  ;;  %v6504_v28 = vcombine.low %v3564_v13, %v3567_v23  ;;  %v6473_v30 = vrot.slane %v6447_v16, 9  ;;  %v3573_v41 = vrot.slane %v6449_v26, 5  ;;  %v6455_v23 = vld [vmem:[%s8120_s18 + $0xb0] sm:$0x1] }
  0x61   : > { %v796_v48 = vsel %vm8143_vm2, %v791_v37, %v795_v21  ;;  %v815_v12 = vrot.slane %v814_v3, 4  ;;  %v843_v21 = vrot.slane %v841_v11, 5  ;;  %v838_v29 = vor.u32 %v837_v20, %v834_v19  ;;  %v725_v3 = vld [vmem:[%s8120_s18 + $0x44] sm:$0x1]  ;;  %v6454_v19 = vld [vmem:[%s8120_s18 + $0xac] sm:$0xf] }
  0x62   : > { %7270 = vmatmul.mubr.bf16.gmra.mrb[12].mxu0 %v6501_v62  ;;  %v6175_v61 = vcombine.low %v796_v48, %v806_v55  ;;  %v819_v62 = vrot.slane %v817_v45, 5  ;;  %v6452_v55 = vld [vmem:[%s8120_s18 + $0xa4] sm:$0x1]  ;;  %v877_v6 = vrot.slane %v875_v60, 5  ;;  %v6474_v7 = vrot.slane %v6450_v44, 9 }
  0x63   : > { %7273 = vmatprep.mubr.bf16.mxu0 %v6502_v31  ;;  %7302 = vmatpush3.bf16.msra.mxu0 %v7949_v36  ;;  %v720_v31 = vld [vmem:[%s8120_s18 + $0x30] sm:$0xf]  ;;  %v848_v35 = vor.u32 %v847_v24, %v843_v21  ;;  %v853_v36 = vrot.slane %v851_v25, 5  ;;  %v839_v40 = vrot.slane %v838_v29, 4  ;;  %v3580_v9 = vrot.slane %v6452_v55, 5  ;;  %v7955_v24 = vld [vmem:[%s9226_s1 + $0xa8] sm:$0xff]  }
  0x64   : > { %v824_v8 = vor.u32 %v823_v63, %v819_v62  ;;  %7303 = vmatprep.subr.bf16.mxu0 %v7950_v2  ;;  %v820_v22 = vsel %vm8143_vm2, %v815_v12, %v819_v62  ;;  %v856_v42 = vshrl.u32 %v720_v31, 16  ;;  %v859_v43 = vshll.u32 %v720_v31, 16  ;;  %v724_v62 = vld [vmem:[%s8120_s18 + $0x40] sm:$0xf] }
  0x65   : > { %v849_v45 = vrot.slane %v848_v35, 4  ;;  %v844_v51 = vsel %vm8143_vm2, %v839_v40, %v843_v21  ;;  %v7959_v35 = vld [vmem:[%s9226_s1 + $0xb0] sm:$0xff]   ;;  %v3584_v39 = vrot.slane %v6454_v19, 5  ;;  %v727_v40 = vld [vmem:[%s8120_s18 + $0x4c] sm:$0xf] }
  0x66   : > { %v825_v18 = vrot.slane %v824_v8, 4  ;;  %v858_v52 = vrot.slane %v856_v42, 4  ;;  %v861_v53 = vrot.slane %v859_v43, 5  ;;  %v3577_v8 = vrot.slane %v6451_v50, 5 }
  0x67   : > { %7066 = vmatmul.mubr.bf16.vlgmr.msra.gmra.mrb[0].mxu1 %v6175_v61  ;;  %7304 = vmatpush3.bf16.msra.mxu0 %v7950_v2  ;;  %v854_v57 = vsel %vm8143_vm2, %v849_v45, %v853_v36  ;;  %v723_v61 = vld [vmem:[%s8120_s18 + $0x3c] sm:$0xf]  ;;  %v3587_v43 = vrot.slane %v6455_v23, 5  ;;  %v3586_v50 = vrot.slane %v3584_v39, 4 }
  0x68   : > { %7098 = vmatpush3.bf16.msra.mxu1 %v8341_v46  ;;  %v6448_v46 = vld [vmem:[%s8120_s18 + $0x94] sm:$0xf]  ;;  %v830_v27 = vsel %vm8143_vm2, %v825_v18, %v829_v0  ;;  %v6177_v63 = vcombine.low %v844_v51, %v854_v57  ;;  %v862_v1 = vor.u32 %v861_v53, %v858_v52  ;;  %v880_v12 = vshrl.u32 %v723_v61, 16  ;;  %7337 = vmatprep.subr.bf16.mxu0 %v8445_v5  ;;  %v6457_v52 = vld [vmem:[%s8120_s18 + $0xb8] sm:$0xf] }
  0x69   : > { %7099 = vmatprep.subr.bf16.mxu1 %v7944_v54  ;;  %v6176_v34 = vcombine.low %v820_v22, %v830_v27  ;;  %v3570_v37 = vrot.slane %v6448_v46, 5  ;;  %v883_v13 = vshll.u32 %v723_v61, 16  ;;  %v3578_v15 = vsel %vm8243_vm5, %v6474_v7, %v3577_v8  ;;  %v6458_v57 = vld [vmem:[%s8120_s18 + $0xbc] sm:$0x1] }
  0x6a   : > { %7274 = vmatmul.mubr.bf16.gmra.mrb[16].mxu0 %v6503_v56  ;;  %v7952_v56 = vld [vmem:[%s9226_s1 + $0xa0] sm:$0xff]   ;;  %v863_v10 = vrot.slane %v862_v1, 4  ;;  %v3579_v16 = vrot.slane %v3577_v8, 4  ;;  %v893_v18 = vshrl.u32 %v724_v62, 16  ;;  %v882_v46 = vrot.slane %v880_v12, 4  ;;  %v7963_v7 = vld [vmem:[%s9226_s1 + $0xb8] sm:$0xff]  }
  0x6b   : > { %7277 = vmatprep.mubr.bf16.mxu0 %v6504_v28  ;;  %7069 = vmatprep.mubr.bf16.mxu1 %v6176_v34  ;;  %v3571_v47 = vsel %vm8243_vm5, %v6473_v30, %v3570_v37  ;;  %v3572_v48 = vrot.slane %v3570_v37, 4  ;;  %v885_v22 = vrot.slane %v883_v13, 5  ;;  %v899_v28 = vshll.u32 %v725_v3, 16  ;;  %v726_v34 = vld [vmem:[%s8120_s18 + $0x48] sm:$0xf] }
  0x6c   : > { %7100 = vmatpush3.bf16.msra.mxu1 %v7944_v54  ;;  %v869_v54 = vshrl.u32 %v721_v38, 16  ;;  %v868_v20 = vsel %vm8143_vm2, %v863_v10, %v867_v59  ;;  %v3581_v25 = vsel %vm8243_vm5, %v3579_v16, %v3580_v9  ;;  %v895_v27 = vrot.slane %v893_v18, 4  ;;  %v6459_v16 = vld [vmem:[%s8120_s18 + $0xc0] sm:$0xe] }
  0x6d   : > { %7101 = vmatprep.subr.bf16.mxu1 %v7946_v17  ;;  %v3574_v58 = vsel %vm8243_vm5, %v3572_v48, %v3573_v41  ;;  %v6506_v30 = vcombine.low %v3578_v15, %v3581_v25  ;;  %v886_v31 = vor.u32 %v885_v22, %v882_v46  ;;  %v901_v38 = vrot.slane %v899_v28, 5  ;;  %v728_v41 = vld [vmem:[%s8120_s18 + $0x50] sm:$0x1]  ;;  %v6461_v25 = vld [vmem:[%s8120_s18 + $0xc8] sm:$0x1] }
  0x6e   : > { %v6505_v0 = vcombine.low %v3571_v47, %v3574_v58  ;;  %v871_v2 = vrot.slane %v869_v54, 4  ;;  %v904_v44 = vshrl.u32 %v726_v34, 16  ;;  %v907_v45 = vshll.u32 %v726_v34, 16  ;;  %v6456_v47 = vld [vmem:[%s8120_s18 + $0xb4] sm:$0xe] }
  0x6f   : > { %7070 = vmatmul.mubr.bf16.gmra.mrb[4].mxu1 %v6177_v63  ;;  %v887_v42 = vrot.slane %v886_v31, 4  ;;  %v913_v51 = vshll.u32 %v727_v40, 16  ;;  %v923_v61 = vshll.u32 %v728_v41, 16  ;;  %v730_v63 = vld [vmem:[%s8120_s18 + $0x58] sm:$0xf]  ;;  %v6476_v9 = vrot.slane %v6456_v47, 9 }
  0x70   : > { %7102 = vmatpush3.bf16.msra.mxu1 %v7946_v17  ;;  %v872_v11 = vor.u32 %v871_v2, %v867_v59  ;;  %v889_v17 = vshll.u32 %v724_v62, 16  ;;  %v906_v54 = vrot.slane %v904_v44, 4  ;;  %v909_v55 = vrot.slane %v907_v45, 5  ;;  %v729_v62 = vld [vmem:[%s8120_s18 + $0x54] sm:$0xf] }
  0x71   : > { %7103 = vmatprep.subr.bf16.mxu1 %v7948_v32  ;;  %v3588_v59 = vsel %vm8243_vm5, %v3586_v50, %v3587_v43  ;;  %v915_v60 = vrot.slane %v913_v51, 5  ;;  %v925_v8 = vrot.slane %v923_v61, 5  ;;  %v3591_v10 = vrot.slane %v6457_v52, 5  ;;  %v733_v43 = vld [vmem:[%s8120_s18 + $0x64] sm:$0xf] }
  0x72   : > { %7278 = vmatmul.mubr.bf16.gmra.mrb[20].mxu0 %v6505_v0  ;;  %v873_v21 = vrot.slane %v872_v11, 4  ;;  %v891_v26 = vrot.slane %v889_v17, 5  ;;  %v910_v2 = vor.u32 %v909_v55, %v906_v54  ;;  %v3594_v11 = vrot.slane %v6458_v57, 5  ;;  %v734_v44 = vld [vmem:[%s8120_s18 + $0x68] sm:$0x1]  ;;  %v7951_v54 = vld [vmem:[%s8120_s18 + $0x18] sm:$0xff]  }
  0x73   : > { %7281 = vmatprep.mubr.bf16.mxu0 %v6506_v30  ;;  %v931_v15 = vshll.u32 %v729_v62, 16  ;;  %v3592_v17 = vsel %vm8243_vm5, %v6476_v9, %v3591_v10  ;;  %v3593_v18 = vrot.slane %v3591_v10, 4  ;;  %v937_v19 = vshll.u32 %v730_v63, 16 }
  0x74   : > { %7104 = vmatpush3.bf16.msra.mxu1 %v7948_v32  ;;  %v878_v29 = vsel %vm8143_vm2, %v873_v21, %v877_v6  ;;  %v6475_v32 = vrot.slane %v6453_v14, 9  ;;  %v896_v37 = vor.u32 %v895_v27, %v891_v26  ;;  %v892_v53 = vsel %vm8143_vm2, %v887_v42, %v891_v26  ;;  %v731_v6 = vld [vmem:[%s8120_s18 + $0x5c] sm:$0x1]  ;;  %v6460_v21 = vld [vmem:[%s8120_s18 + $0xc4] sm:$0xf] }
  0x75   : > { %7105 = vmatprep.subr.bf16.mxu1 %v7952_v56  ;;  %v6178_v36 = vcombine.low %v868_v20, %v878_v29  ;;  %v911_v12 = vrot.slane %v910_v2, 4  ;;  %v928_v14 = vshrl.u32 %v729_v62, 16  ;;  %v941_v20 = vshrl.u32 %v730_v63, 16  ;;  %v8495_v26 = vld [vmem:[%s9226_s1 + $0xc0] sm:$0xff]  }
  0x76   : > { %v897_v48 = vrot.slane %v896_v37, 4  ;;  %v3585_v49 = vsel %vm8243_vm5, %v6475_v32, %v3584_v39  ;;  %v3595_v27 = vsel %vm8243_vm5, %v3593_v18, %v3594_v11  ;;  %v939_v28 = vrot.slane %v937_v19, 5 }
  0x77   : > { %7073 = vmatprep.mubr.bf16.mxu1 %v6178_v36  ;;  %v6507_v1 = vcombine.low %v3585_v49, %v3588_v59  ;;  %v916_v46 = vsel %vm8143_vm2, %v911_v12, %v915_v60  ;;  %v930_v23 = vrot.slane %v928_v14, 4  ;;  %v943_v29 = vrot.slane %v941_v20, 4  ;;  %v735_v59 = vld [vmem:[%s8120_s18 + $0x6c] sm:$0xf]  ;;  %v739_v20 = vld [vmem:[%s8120_s18 + $0x7c] sm:$0xf] }
  0x78   : > { %7106 = vmatpush3.bf16.msra.mxu1 %v7952_v56  ;;  %v917_v56 = vshrl.u32 %v727_v40, 16  ;;  %v902_v58 = vsel %vm8143_vm2, %v897_v48, %v901_v38  ;;  %v947_v30 = vshll.u32 %v731_v6, 16  ;;  %v6508_v32 = vcombine.low %v3592_v17, %v3595_v27  ;;  %v732_v40 = vld [vmem:[%s8120_s18 + $0x60] sm:$0xf] }
  0x79   : > { %7107 = vmatprep.subr.bf16.mxu1 %v7955_v24  ;;  %v6179_v0 = vcombine.low %v892_v53, %v902_v58  ;;  %v944_v37 = vor.u32 %v943_v29, %v939_v28  ;;  %v3598_v39 = vrot.slane %v6460_v21, 5  ;;  %v3601_v42 = vrot.slane %v6461_v25, 5 }
  0x7a   : > { %v919_v3 = vrot.slane %v917_v56, 4  ;;  %7282 = vmatmul.mubr.bf16.gmra.mrb[24].mxu0 %v6507_v1  ;;  %v949_v38 = vrot.slane %v947_v30, 5  ;;  %v952_v49 = vshrl.u32 %v732_v40, 16  ;;  %v955_v51 = vshll.u32 %v732_v40, 16  ;;  %v737_v1 = vld [vmem:[%s8120_s18 + $0x74] sm:$0x1] }
  0x7b   : > { %7074 = vmatmul.mubr.bf16.gmra.mrb[8].mxu1 %v6179_v0  ;;  %7285 = vmatprep.mubr.bf16.mxu0 %v6508_v32  ;;  %v945_v45 = vrot.slane %v944_v37, 4  ;;  %v3600_v48 = vrot.slane %v3598_v39, 4  ;;  %v961_v52 = vshll.u32 %v733_v43, 16  ;;  %v965_v53 = vshrl.u32 %v733_v43, 16  ;;  %v741_v37 = vld [vmem:[%s8120_s18 + $0x84] sm:$0xf] }
  0x7c   : > { %7108 = vmatpush3.bf16.msra.mxu1 %v7955_v24  ;;  %v920_v13 = vor.u32 %v919_v3, %v915_v60  ;;  %v933_v24 = vrot.slane %v931_v15, 5  ;;  %v954_v57 = vrot.slane %v952_v49, 4  ;;  %v971_v58 = vshll.u32 %v734_v44, 16  ;;  %v736_v60 = vld [vmem:[%s8120_s18 + $0x70] sm:$0xf]  ;;  %v7961_v43 = vld [vmem:[%s9226_s1 + $0x1c8] sm:$0xff]  }
  0x7d   : > { %7109 = vmatprep.subr.bf16.mxu1 %v7959_v35  ;;  %v950_v55 = vsel %vm8143_vm2, %v945_v45, %v949_v38  ;;  %v3602_v56 = vsel %vm8243_vm5, %v3600_v48, %v3601_v42  ;;  %v957_v63 = vrot.slane %v955_v51, 5  ;;  %v963_v0 = vrot.slane %v961_v52, 5  ;;  %v738_v15 = vld [vmem:[%s8120_s18 + $0x78] sm:$0xf]  ;;  %v742_v42 = vld [vmem:[%s8120_s18 + $0x88] sm:$0xf] }
  0x7e   : > { %v921_v22 = vrot.slane %v920_v13, 4  ;;  %v934_v34 = vor.u32 %v933_v24, %v930_v23  ;;  %v967_v2 = vrot.slane %v965_v53, 4  ;;  %v973_v3 = vrot.slane %v971_v58, 5  ;;  %v740_v23 = vld [vmem:[%s8120_s18 + $0x80] sm:$0x1]  ;;  %v7965_v58 = vld [vmem:[%s9226_s1 + $0x1d0] sm:$0xff]  }
  0x7f   : > { %v976_v6 = vshrl.u32 %v735_v59, 16  ;;  %v985_v9 = vshll.u32 %v736_v60, 16  ;;  %v989_v10 = vshrl.u32 %v736_v60, 16  ;;  %v995_v11 = vshll.u32 %v737_v1, 16  ;;  %v743_v48 = vld [vmem:[%s8120_s18 + $0x8c] sm:$0x1] }
  0x80   : > { %7110 = vmatpush3.bf16.msra.mxu1 %v7959_v35  ;;  %v926_v31 = vsel %vm8143_vm2, %v921_v22, %v925_v8  ;;  %v6477_v35 = vrot.slane %v6459_v16, 9  ;;  %v935_v41 = vrot.slane %v934_v34, 4  ;;  %v958_v8 = vor.u32 %v957_v63, %v954_v57  ;;  %v7953_v22 = vld [vmem:[%s8120_s18 + $0x24] sm:$0xff]   ;;  %v7956_v1 = vld [vmem:[%s8120_s18 + $0x3c] sm:$0xff]  }
  0x81   : > { %7111 = vmatprep.subr.bf16.mxu1 %v7963_v7  ;;  %v6180_v36 = vcombine.low %v916_v46, %v926_v31  ;;  %v968_v12 = vor.u32 %v967_v2, %v963_v0  ;;  %v978_v13 = vrot.slane %v976_v6, 4  ;;  %v987_v17 = vrot.slane %v985_v9, 5  ;;  %v744_v2 = vld [vmem:[%s8120_s18 + $0x90] sm:$0xf] }
  0x82   : > { %v3599_v47 = vsel %vm8243_vm5, %v6477_v35, %v3598_v39  ;;  %v940_v50 = vsel %vm8143_vm2, %v935_v41, %v939_v28  ;;  %v959_v16 = vrot.slane %v958_v8, 4  ;;  %v991_v18 = vrot.slane %v989_v10, 4  ;;  %v746_v8 = vld [vmem:[%s8120_s18 + $0x98] sm:$0x1] }
  0x83   : > { %7077 = vmatprep.mubr.bf16.mxu1 %v6180_v36  ;;  %v6181_v61 = vcombine.low %v940_v50, %v950_v55  ;;  %v6509_v62 = vcombine.low %v3599_v47, %v3602_v56  ;;  %v997_v19 = vrot.slane %v995_v11, 5  ;;  %v969_v21 = vrot.slane %v968_v12, 4  ;;  %v7954_v36 = vld [vmem:[%s8120_s18 + $0x30] sm:$0xff]  }
  0x84   : > { %7112 = vmatpush3.bf16.msra.mxu1 %v7963_v7  ;;  %v979_v7 = vshll.u32 %v735_v59, 16  ;;  %v1000_v24 = vshrl.u32 %v738_v15, 16  ;;  %v1003_v25 = vshll.u32 %v738_v15, 16  ;;  %v964_v27 = vsel %vm8143_vm2, %v959_v16, %v963_v0 }
  0x85   : > { %7145 = vmatprep.subr.bf16.mxu1 %v8495_v26  ;;  %7078 = vmatmul.mubr.bf16.gmra.mrb[12].mxu1 %v6181_v61  ;;  %v992_v28 = vor.u32 %v991_v18, %v987_v17  ;;  %v1009_v29 = vshll.u32 %v739_v20, 16  ;;  %v1013_v30 = vshrl.u32 %v739_v20, 16  ;;  %v974_v31 = vsel %vm8143_vm2, %v969_v21, %v973_v3 }
  0x86   : > { %7286 = vmatmul.mubr.bf16.gmra.mrb[28].mxu0 %v6509_v62  ;;  %v981_v14 = vrot.slane %v979_v7, 5  ;;  %v1002_v34 = vrot.slane %v1000_v24, 4  ;;  %v1005_v35 = vrot.slane %v1003_v25, 5  ;;  %v6182_v38 = vcombine.low %v964_v27, %v974_v31  ;;  %v745_v7 = vld [vmem:[%s8120_s18 + $0x94] sm:$0xf] }
  0x87   : > { %7305 = vmatprep.mubr.bf16.mxu0 %v7951_v54  ;;  %v993_v39 = vrot.slane %v992_v28, 4  ;;  %v1011_v40 = vrot.slane %v1009_v29, 5  ;;  %v1015_v41 = vrot.slane %v1013_v30, 4  ;;  %v1019_v47 = vshll.u32 %v740_v23, 16  ;;  %v748_v27 = vld [vmem:[%s8120_s18 + $0xa0] sm:$0xf] }
  0x88   : > { %v982_v46 = vor.u32 %v981_v14, %v978_v13  ;;  %v1006_v45 = vor.u32 %v1005_v35, %v1002_v34  ;;  %v1024_v49 = vshrl.u32 %v741_v37, 16  ;;  %7081 = vmatprep.mubr.bf16.mxu1 %v6182_v38  ;;  %v1027_v52 = vshll.u32 %v741_v37, 16  ;;  %v7958_v14 = vld [vmem:[%s8120_s18 + $0x48] sm:$0xff]   ;;  %v749_v28 = vld [vmem:[%s8120_s18 + $0xa4] sm:$0x1] }
  0x89   : > { %v998_v50 = vsel %vm8143_vm2, %v993_v39, %v997_v19  ;;  %v1016_v51 = vor.u32 %v1015_v41, %v1011_v40  ;;  %v1033_v53 = vshll.u32 %v742_v42, 16  ;;  %v1021_v56 = vrot.slane %v1019_v47, 5  ;;  %v7969_v19 = vld [vmem:[%s9226_s1 + $0x1d8] sm:$0xff]   ;;  %v7973_v34 = vld [vmem:[%s9226_s1 + $0x1e0] sm:$0xff]  }
  0x8a   : > { %v983_v32 = vrot.slane %v982_v46, 4  ;;  %v1007_v55 = vrot.slane %v1006_v45, 4  ;;  %v1026_v57 = vrot.slane %v1024_v49, 4  ;;  %v1029_v60 = vrot.slane %v1027_v52, 5  ;;  %v7960_v39 = vld [vmem:[%s8120_s18 + $0x54] sm:$0xff]  }
  0x8b   : > { %v1017_v59 = vrot.slane %v1016_v51, 4  ;;  %v1035_v61 = vrot.slane %v1033_v53, 5  ;;  %v1037_v62 = vshrl.u32 %v742_v42, 16  ;;  %v1043_v0 = vshll.u32 %v743_v48, 16  ;;  %v750_v52 = vld [vmem:[%s8120_s18 + $0xa8] sm:$0xf] }
  0x8c   : > { %v988_v44 = vsel %vm8143_vm2, %v983_v32, %v987_v17  ;;  %v1012_v63 = vsel %vm8143_vm2, %v1007_v55, %v1011_v40  ;;  %v1030_v3 = vor.u32 %v1029_v60, %v1026_v57  ;;  %v1048_v9 = vshrl.u32 %v744_v2, 16  ;;  %v751_v53 = vld [vmem:[%s8120_s18 + $0xac] sm:$0xf]  ;;  %v752_v57 = vld [vmem:[%s8120_s18 + $0xb0] sm:$0x1] }
  0x8d   : > { %v6183_v54 = vcombine.low %v988_v44, %v998_v50  ;;  %v1039_v6 = vrot.slane %v1037_v62, 4  ;;  %v1045_v11 = vrot.slane %v1043_v0, 5  ;;  %v1051_v12 = vshll.u32 %v744_v2, 16  ;;  %v7962_v44 = vld [vmem:[%s8120_s18 + $0x60] sm:$0xff]  }
  0x8e   : > { %7306 = vmatmul.mubr.bf16.vlgmr.msra.gmra.mrb[0].mxu0 %v7953_v22  ;;  %v1057_v13 = vshll.u32 %v745_v7, 16  ;;  %v1031_v15 = vrot.slane %v1030_v3, 4  ;;  %v1050_v17 = vrot.slane %v1048_v9, 4  ;;  %v1061_v18 = vshrl.u32 %v745_v7, 16  ;;  %v747_v22 = vld [vmem:[%s8120_s18 + $0x9c] sm:$0xf] }
  0x8f   : > { %7309 = vmatprep.mubr.bf16.mxu0 %v7954_v36  ;;  %7338 = vmatpush3.bf16.msra.mxu0 %v8445_v5  ;;  %v1022_v5 = vsel %vm8143_vm2, %v1017_v59, %v1021_v56  ;;  %v1040_v16 = vor.u32 %v1039_v6, %v1035_v61  ;;  %v1053_v20 = vrot.slane %v1051_v12, 5  ;;  %v1067_v46 = vshll.u32 %v746_v8, 16  ;;  %v753_v3 = vld [vmem:[%s8120_s18 + $0xb4] sm:$0xf]  ;;  %v754_v9 = vld [vmem:[%s8120_s18 + $0xb8] sm:$0xf] }
  0x90   : > { %7339 = vmatprep.subr.bf16.mxu0 %v7961_v43  ;;  %7082 = vmatmul.mubr.bf16.gmra.mrb[16].mxu1 %v6183_v54  ;;  %v6184_v10 = vcombine.low %v1012_v63, %v1022_v5  ;;  %v1059_v21 = vrot.slane %v1057_v13, 5  ;;  %v1036_v23 = vsel %vm8143_vm2, %v1031_v15, %v1035_v61  ;;  %v1063_v25 = vrot.slane %v1061_v18, 4  ;;  %v7977_v63 = vld [vmem:[%s9226_s1 + $0x1e8] sm:$0xff]   ;;  %v7981_v15 = vld [vmem:[%s9226_s1 + $0x1f0] sm:$0xff]  }
  0x91   : > { %v1041_v24 = vrot.slane %v1040_v16, 4  ;;  %v1054_v29 = vor.u32 %v1053_v20, %v1050_v17  ;;  %v1069_v30 = vrot.slane %v1067_v46, 5  ;;  %v1072_v31 = vshrl.u32 %v747_v22, 16 }
  0x92   : > { %7085 = vmatprep.mubr.bf16.mxu1 %v6184_v10  ;;  %v1075_v32 = vshll.u32 %v747_v22, 16  ;;  %v1064_v36 = vor.u32 %v1063_v25, %v1059_v21  ;;  %v1081_v37 = vshll.u32 %v748_v27, 16  ;;  %v1085_v38 = vshrl.u32 %v748_v27, 16  ;;  %v755_v10 = vld [vmem:[%s8120_s18 + $0xbc] sm:$0x1] }
  0x93   : > { %7340 = vmatpush3.bf16.msra.mxu0 %v7961_v43  ;;  %v1046_v35 = vsel %vm8143_vm2, %v1041_v24, %v1045_v11  ;;  %v1055_v41 = vrot.slane %v1054_v29, 4  ;;  %v1074_v42 = vrot.slane %v1072_v31, 4  ;;  %v1091_v49 = vshll.u32 %v749_v28, 16  ;;  %v7966_v28 = vld [vmem:[%s8120_s18 + $0x78] sm:$0xff]  }
  0x94   : > { %7341 = vmatprep.subr.bf16.mxu0 %v7965_v58  ;;  %v6185_v40 = vcombine.low %v1036_v23, %v1046_v35  ;;  %v1077_v43 = vrot.slane %v1075_v32, 5  ;;  %v1065_v45 = vrot.slane %v1064_v36, 4  ;;  %v1083_v47 = vrot.slane %v1081_v37, 5  ;;  %v7964_v23 = vld [vmem:[%s8120_s18 + $0x6c] sm:$0xff]   ;;  %v7982_v32 = vld [vmem:[%s9226_s1 + $0x1f8] sm:$0xff]  }
  0x95   : > { %v1087_v48 = vrot.slane %v1085_v38, 4  ;;  %v1060_v50 = vsel %vm8143_vm2, %v1055_v41, %v1059_v21  ;;  %v1093_v56 = vrot.slane %v1091_v49, 5  ;;  %v1099_v61 = vshll.u32 %v750_v52, 16  ;;  %v1529_v36 = vld [vmem:[%s8120_s18] sm:$0xe] }
  0x96   : > { %7310 = vmatmul.mubr.bf16.gmra.mrb[4].mxu0 %v7956_v1  ;;  %v1078_v51 = vor.u32 %v1077_v43, %v1074_v42  ;;  %v1070_v54 = vsel %vm8143_vm2, %v1065_v45, %v1069_v30  ;;  %v1105_v62 = vshll.u32 %v751_v53, 16  ;;  %v1109_v2 = vshrl.u32 %v751_v53, 16  ;;  %v1530_v37 = vld [vmem:[%s8120_s18 + $0x4] sm:$0xf]  ;;  %v1531_v38 = vld [vmem:[%s8120_s18 + $0x8] sm:$0x1] }
  0x97   : > { %7313 = vmatprep.mubr.bf16.mxu0 %v7958_v14  ;;  %7342 = vmatpush3.bf16.msra.mxu0 %v7965_v58  ;;  %v1088_v55 = vor.u32 %v1087_v48, %v1083_v47  ;;  %v1096_v58 = vshrl.u32 %v750_v52, 16  ;;  %v6186_v59 = vcombine.low %v1060_v50, %v1070_v54  ;;  %v1115_v5 = vshll.u32 %v752_v57, 16  ;;  %v1533_v48 = vld [vmem:[%s8120_s18 + $0x10] sm:$0xf]  ;;  %v1534_v52 = vld [vmem:[%s8120_s18 + $0x14] sm:$0x1] }
  0x98   : > { %7343 = vmatprep.subr.bf16.mxu0 %v7969_v19  ;;  %7086 = vmatmul.mubr.bf16.gmra.mrb[20].mxu1 %v6185_v40  ;;  %v1079_v60 = vrot.slane %v1078_v51, 4  ;;  %v1101_v7 = vrot.slane %v1099_v61, 5  ;;  %v1107_v8 = vrot.slane %v1105_v62, 5  ;;  %v1111_v12 = vrot.slane %v1109_v2, 4  ;;  %v7968_v54 = vld [vmem:[%s8120_s18 + $0x84] sm:$0xff]  }
  0x99   : > { %v1089_v0 = vrot.slane %v1088_v55, 4  ;;  %v1098_v1 = vrot.slane %v1096_v58, 4  ;;  %7089 = vmatprep.mubr.bf16.mxu1 %v6186_v59  ;;  %v1117_v13 = vrot.slane %v1115_v5, 5  ;;  %v1120_v14 = vshrl.u32 %v753_v3, 16  ;;  %v8605_v55 = vld [vmem:[%s9226_s1 + $0x200] sm:$0xff]  }
  0x9a   : > { %v1084_v6 = vsel %vm8143_vm2, %v1079_v60, %v1083_v47  ;;  %v1123_v18 = vshll.u32 %v753_v3, 16  ;;  %v1112_v20 = vor.u32 %v1111_v12, %v1107_v8  ;;  %v1133_v46 = vshrl.u32 %v754_v9, 16  ;;  %v1532_v47 = vld [vmem:[%s8120_s18 + $0xc] sm:$0xe]  ;;  %v1536_v2 = vld [vmem:[%s8120_s18 + $0x1c] sm:$0xf] }
  0x9b   : > { %7344 = vmatpush3.bf16.msra.mxu0 %v7969_v19  ;;  %v1094_v11 = vsel %vm8143_vm2, %v1089_v0, %v1093_v56  ;;  %v1102_v17 = vor.u32 %v1101_v7, %v1098_v1  ;;  %v1129_v19 = vshll.u32 %v754_v9, 16  ;;  %v1122_v21 = vrot.slane %v1120_v14, 4  ;;  %v1535_v0 = vld [vmem:[%s8120_s18 + $0x18] sm:$0xe]  ;;  %v7970_v1 = vld [vmem:[%s8120_s18 + $0x90] sm:$0xff]  }
  0x9c   : > { %7345 = vmatprep.subr.bf16.mxu0 %v7973_v34  ;;  %v6187_v16 = vcombine.low %v1084_v6, %v1094_v11  ;;  %v1139_v22 = vshll.u32 %v755_v10, 16  ;;  %v1125_v25 = vrot.slane %v1123_v18, 5  ;;  %v1113_v29 = vrot.slane %v1112_v20, 4  ;;  %v1537_v5 = vld [vmem:[%s8120_s18 + $0x20] sm:$0x1] }
  0x9d   : > { %v1103_v24 = vrot.slane %v1102_v17, 4  ;;  %v1131_v27 = vrot.slane %v1129_v19, 5  ;;  %v1135_v30 = vrot.slane %v1133_v46, 4  ;;  %v6198_v41 = vrot.slane %v1529_v36, 9  ;;  %v1538_v10 = vld [vmem:[%s8120_s18 + $0x24] sm:$0xe] }
  0x9e   : > { %7314 = vmatmul.mubr.bf16.gmra.mrb[8].mxu0 %v7960_v39  ;;  %v1141_v31 = vrot.slane %v1139_v22, 5  ;;  %v1126_v35 = vor.u32 %v1125_v25, %v1122_v21  ;;  %v1118_v39 = vsel %vm8143_vm2, %v1113_v29, %v1117_v13  ;;  %v1630_v42 = vrot.slane %v1530_v37, 5  ;;  %v1539_v11 = vld [vmem:[%s8120_s18 + $0x28] sm:$0xf]  ;;  %v1540_v12 = vld [vmem:[%s8120_s18 + $0x2c] sm:$0x1] }
  0x9f   : > { %7317 = vmatprep.mubr.bf16.mxu0 %v7962_v44  ;;  %7346 = vmatpush3.bf16.msra.mxu0 %v7973_v34  ;;  %v1108_v34 = vsel %vm8143_vm2, %v1103_v24, %v1107_v8  ;;  %v1136_v40 = vor.u32 %v1135_v30, %v1131_v27  ;;  %v1633_v45 = vrot.slane %v1531_v38, 5  ;;  %v6199_v53 = vrot.slane %v1532_v47, 9  ;;  %v7971_v21 = vld [vmem:[%s9226_s1 + $0xc8] sm:$0xff]   ;;  %v7972_v46 = vld [vmem:[%s8120_s18 + $0x9c] sm:$0xff]   ;;  %v1542_v24 = vld [vmem:[%s8120_s18 + $0x34] sm:$0xf] }
  0xa0   : > { %7347 = vmatprep.subr.bf16.mxu0 %v7977_v63  ;;  %7090 = vmatmul.mubr.bf16.gmra.mrb[24].mxu1 %v6187_v16  ;;  %v6188_v43 = vcombine.low %v1108_v34, %v1118_v39  ;;  %v1127_v44 = vrot.slane %v1126_v35, 4  ;;  %v1631_v50 = vsel %vm8243_vm5, %v6198_v41, %v1630_v42  ;;  %v1632_v51 = vrot.slane %v1630_v42, 4  ;;  %v1543_v25 = vld [vmem:[%s8120_s18 + $0x38] sm:$0x1]  ;;  %v7974_v30 = vld [vmem:[%s8120_s18 + $0xa8] sm:$0xff]   ;;  %v7975_v39 = vld [vmem:[%s9226_s1 + $0xd0] sm:$0xff]  }
  0xa1   : > { %v1137_v49 = vrot.slane %v1136_v40, 4  ;;  %v1637_v57 = vrot.slane %v1533_v48, 5  ;;  %v1640_v58 = vrot.slane %v1534_v52, 5  ;;  %v6200_v3 = vrot.slane %v1535_v0, 9  ;;  %v1545_v34 = vld [vmem:[%s8120_s18 + $0x40] sm:$0xf] }
  0xa2   : > { %7093 = vmatprep.mubr.bf16.mxu1 %v6188_v43  ;;  %v1132_v56 = vsel %vm8143_vm2, %v1127_v44, %v1131_v27  ;;  %v1634_v60 = vsel %vm8243_vm5, %v1632_v51, %v1633_v45  ;;  %v1644_v6 = vrot.slane %v1536_v2, 5  ;;  %v1647_v7 = vrot.slane %v1537_v5, 5  ;;  %v1546_v35 = vld [vmem:[%s8120_s18 + $0x44] sm:$0x1]  ;;  %v1547_v43 = vld [vmem:[%s8120_s18 + $0x48] sm:$0xe] }
  0xa3   : > { %7348 = vmatpush3.bf16.msra.mxu0 %v7977_v63  ;;  %v1142_v59 = vsel %vm8143_vm2, %v1137_v49, %v1141_v31  ;;  %v6230_v62 = vcombine.low %v1631_v50, %v1634_v60  ;;  %v1639_v63 = vrot.slane %v1637_v57, 4  ;;  %v1638_v8 = vsel %vm8243_vm5, %v6199_v53, %v1637_v57  ;;  %v1544_v31 = vld [vmem:[%s8120_s18 + $0x3c] sm:$0xe]  ;;  %v7976_v47 = vld [vmem:[%s8120_s18 + $0xb4] sm:$0xff]   ;;  %v1548_v48 = vld [vmem:[%s8120_s18 + $0x4c] sm:$0xf] }
  0xa4   : > { %7349 = vmatprep.subr.bf16.mxu0 %v7981_v15  ;;  %v6189_v61 = vcombine.low %v1132_v56, %v1142_v59  ;;  %v1645_v13 = vsel %vm8243_vm5, %v6200_v3, %v1644_v6  ;;  %v1646_v14 = vrot.slane %v1644_v6, 4  ;;  %v6201_v16 = vrot.slane %v1538_v10, 9  ;;  %v1549_v49 = vld [vmem:[%s8120_s18 + $0x50] sm:$0x1]  ;;  %v7979_v51 = vld [vmem:[%s9226_s1 + $0xd8] sm:$0xff]   ;;  %v7978_v60 = vld [vmem:[%s8120_s18 + $0xc0] sm:$0xff]  }
  0xa5   : > { %v1641_v9 = vsel %vm8243_vm5, %v1639_v63, %v1640_v58  ;;  %v1654_v20 = vrot.slane %v1540_v12, 5  ;;  %v1661_v29 = vrot.slane %v1543_v25, 5  ;;  %v1665_v38 = vrot.slane %v1545_v34, 5  ;;  %v1550_v56 = vld [vmem:[%s8120_s18 + $0x54] sm:$0xe]  ;;  %v7980_v12 = vld [vmem:[%s8120_s18 + $0xcc] sm:$0xff]  }
  0xa6   : > { %7318 = vmatmul.mubr.bf16.gmra.mrb[12].mxu0 %v7964_v23  ;;  %v6231_v17 = vcombine.low %v1638_v8, %v1641_v9  ;;  %v1648_v18 = vsel %vm8243_vm5, %v1646_v14, %v1647_v7  ;;  %v1541_v23 = vld [vmem:[%s8120_s18 + $0x30] sm:$0xe]  ;;  %v6203_v41 = vrot.slane %v1544_v31, 9  ;;  %v1668_v42 = vrot.slane %v1546_v35, 5  ;;  %v1551_v57 = vld [vmem:[%s8120_s18 + $0x58] sm:$0xf] }
  0xa7   : > { %7321 = vmatprep.mubr.bf16.mxu0 %v7966_v28  ;;  %7350 = vmatpush3.bf16.msra.mxu0 %v7981_v15  ;;  %v1651_v15 = vrot.slane %v1539_v11, 5  ;;  %v6232_v22 = vcombine.low %v1645_v13, %v1648_v18  ;;  %v6202_v27 = vrot.slane %v1541_v23, 9  ;;  %v1658_v28 = vrot.slane %v1542_v24, 5  ;;  %v1552_v58 = vld [vmem:[%s8120_s18 + $0x5c] sm:$0x1] }
  0xa8   : > { %7351 = vmatprep.subr.bf16.mxu0 %v7982_v32  ;;  %7094 = vmatmul.mubr.bf16.gmra.mrb[28].mxu1 %v6189_v61  ;;  %v1667_v45 = vrot.slane %v1665_v38, 4  ;;  %v6204_v50 = vrot.slane %v1547_v43, 9  ;;  %v1672_v53 = vrot.slane %v1548_v48, 5  ;;  %v1679_v61 = vrot.slane %v1551_v57, 5  ;;  %v1553_v8 = vld [vmem:[%s8120_s18 + $0x60] sm:$0xe] }
  0xa9   : > { %7113 = vmatprep.mubr.bf16.mxu1 %v6230_v62  ;;  %v1653_v19 = vrot.slane %v1651_v15, 4  ;;  %v1652_v36 = vsel %vm8243_vm5, %v6201_v16, %v1651_v15  ;;  %v1666_v62 = vsel %vm8243_vm5, %v6203_v41, %v1665_v38  ;;  %v6205_v0 = vrot.slane %v1550_v56, 9  ;;  %v1554_v9 = vld [vmem:[%s8120_s18 + $0x64] sm:$0xf]  ;;  %v1555_v10 = vld [vmem:[%s8120_s18 + $0x68] sm:$0x1] }
  0xaa   : > { %v1674_v59 = vrot.slane %v1672_v53, 4  ;;  %v1669_v63 = vsel %vm8243_vm5, %v1667_v45, %v1668_v42  ;;  %v1681_v2 = vrot.slane %v1679_v61, 4  ;;  %v1682_v5 = vrot.slane %v1552_v58, 5  ;;  %v6590_v16 = vld [vmem:[%s8120_s18 + $0x18] sm:$0xf]  ;;  %v7986_v43 = vld [vmem:[%s9226_s1 + $0xf0] sm:$0xff]  }
  0xab   : > { %7352 = vmatpush3.bf16.msra.mxu0 %v7982_v32  ;;  %v1660_v32 = vrot.slane %v1658_v28, 4  ;;  %v1655_v37 = vsel %vm8243_vm5, %v1653_v19, %v1654_v20  ;;  %v1673_v3 = vsel %vm8243_vm5, %v6204_v50, %v1672_v53  ;;  %v6235_v7 = vcombine.low %v1666_v62, %v1669_v63  ;;  %v6591_v19 = vld [vmem:[%s8120_s18 + $0x1c] sm:$0xf]  ;;  %v6592_v20 = vld [vmem:[%s8120_s18 + $0x20] sm:$0x1] }
  0xac   : > { %7385 = vmatprep.subr.bf16.mxu0 %v8605_v55  ;;  %v6233_v44 = vcombine.low %v1652_v36, %v1655_v37  ;;  %v8679_v11 = vsel %vm8243_vm5, %v6205_v0, %v1679_v61  ;;  %v6206_v13 = vrot.slane %v1553_v8, 9  ;;  %v1686_v14 = vrot.slane %v1554_v9, 5  ;;  %v1558_v38 = vld [vmem:[%s8120_s18 + $0x74] sm:$0x1]  ;;  %v6594_v50 = vld [vmem:[%s8120_s18 + $0x28] sm:$0xf] }
  0xad   : > { %v1662_v40 = vsel %vm8243_vm5, %v1660_v32, %v1661_v29  ;;  %v1689_v15 = vrot.slane %v1555_v10, 5  ;;  %v8685_v18 = vsel %vm8243_vm5, %v1681_v2, %v1682_v5  ;;  %v4498_v24 = vshll.u32 %v6591_v19, 16  ;;  %v1557_v32 = vld [vmem:[%s8120_s18 + $0x70] sm:$0xf]  ;;  %v1559_v61 = vld [vmem:[%s8120_s18 + $0x78] sm:$0xe] }
  0xae   : > { %7322 = vmatmul.mubr.bf16.gmra.mrb[16].mxu0 %v7968_v54  ;;  %v1675_v54 = vrot.slane %v1549_v49, 5  ;;  %v1688_v23 = vrot.slane %v1686_v14, 4  ;;  %v4502_v25 = vshrl.u32 %v6591_v19, 16  ;;  %v4508_v31 = vshll.u32 %v6592_v20, 16  ;;  %v6593_v49 = vld [vmem:[%s8120_s18 + $0x24] sm:$0xf] }
  0xaf   : > { %7325 = vmatprep.mubr.bf16.mxu0 %v7970_v1  ;;  %v7983_v1 = vld [vmem:[%s9226_s1 + $0xe0] sm:$0xff]   ;;  %v4500_v36 = vrot.slane %v4498_v24, 5  ;;  %v1696_v42 = vrot.slane %v1558_v38, 5  ;;  %v4513_v53 = vshrl.u32 %v6593_v49, 16  ;;  %v4522_v56 = vshll.u32 %v6594_v50, 16  ;;  %v7988_v10 = vld [vmem:[%s9226_s1 + $0xf8] sm:$0xff]  }
  0xb0   : > { %7114 = vmatmul.mubr.bf16.vlgmr.msra.gmra.mrb[0].mxu1 %v6231_v17  ;;  %v1676_v6 = vsel %vm8243_vm5, %v1674_v59, %v1675_v54  ;;  %v1690_v35 = vsel %vm8243_vm5, %v1688_v23, %v1689_v15  ;;  %v4504_v37 = vrot.slane %v4502_v25, 4  ;;  %v4510_v45 = vrot.slane %v4508_v31, 5  ;;  %v1560_v2 = vld [vmem:[%s8120_s18 + $0x7c] sm:$0xf]  ;;  %v1561_v5 = vld [vmem:[%s8120_s18 + $0x80] sm:$0x1] }
  0xb1   : > { %7146 = vmatpush3.bf16.msra.mxu1 %v8495_v26  ;;  %7117 = vmatprep.mubr.bf16.mxu1 %v6232_v22  ;;  %v1659_v26 = vsel %vm8243_vm5, %v6202_v27, %v1658_v28  ;;  %v6236_v17 = vcombine.low %v1673_v3, %v1676_v6  ;;  %v8691_v22 = vsel %vm8243_vm5, %v6206_v13, %v1686_v14  ;;  %v1556_v27 = vld [vmem:[%s8120_s18 + $0x6c] sm:$0xe]  ;;  %v4516_v54 = vshll.u32 %v6593_v49, 16  ;;  %v6596_v9 = vld [vmem:[%s8120_s18 + $0x30] sm:$0xf] }
  0xb2   : > { %7147 = vmatprep.subr.bf16.mxu1 %v7971_v21  ;;  %v6234_v52 = vcombine.low %v1659_v26, %v1662_v40  ;;  %v7984_v28 = vld [vmem:[%s9226_s1 + $0xe8] sm:$0xff]   ;;  %v6207_v34 = vrot.slane %v1556_v27, 9  ;;  %v6237_v26 = vcombine.low %v8679_v11, %v8685_v18  ;;  %v6238_v40 = vcombine.low %v8691_v22, %v1690_v35  ;;  %v6597_v15 = vld [vmem:[%s8120_s18 + $0x34] sm:$0xf] }
  0xb3   : > { %v4526_v59 = vshrl.u32 %v6594_v50, 16  ;;  %v4515_v0 = vrot.slane %v4513_v53, 4  ;;  %v4524_v6 = vrot.slane %v4522_v56, 5  ;;  %v6208_v13 = vrot.slane %v1559_v61, 9  ;;  %v1563_v25 = vld [vmem:[%s8120_s18 + $0x88] sm:$0xf] }
  0xb4   : > { %v1700_v14 = vrot.slane %v1560_v2, 5  ;;  %v1703_v18 = vrot.slane %v1561_v5, 5  ;;  %v4537_v19 = vshrl.u32 %v6596_v9, 16  ;;  %v4540_v20 = vshll.u32 %v6596_v9, 16  ;;  %v1564_v31 = vld [vmem:[%s8120_s18 + $0x8c] sm:$0x1] }
  0xb5   : > { %7148 = vmatpush3.bf16.msra.mxu1 %v7971_v21  ;;  %v4489_v21 = vshrl.u32 %v6590_v16, 16  ;;  %v4546_v24 = vshll.u32 %v6597_v15, 16  ;;  %v7987_v49 = vld [vmem:[%s9226_s1 + $0x208] sm:$0xff]   ;;  %v1565_v2 = vld [vmem:[%s8120_s18 + $0x90] sm:$0xe] }
  0xb6   : > { %7326 = vmatmul.mubr.bf16.gmra.mrb[20].mxu0 %v7972_v46  ;;  %7149 = vmatprep.subr.bf16.mxu1 %v7975_v39  ;;  %v4492_v46 = vshll.u32 %v6590_v16, 16  ;;  %v6598_v16 = vld [vmem:[%s8120_s18 + $0x38] sm:$0x1]  ;;  %v1701_v22 = vsel %vm8243_vm5, %v6208_v13, %v1700_v14  ;;  %v1702_v23 = vrot.slane %v1700_v14, 4 }
  0xb7   : > { %7329 = vmatprep.mubr.bf16.mxu0 %v7974_v30  ;;  %v4491_v29 = vrot.slane %v4489_v21, 4  ;;  %v1562_v21 = vld [vmem:[%s8120_s18 + $0x84] sm:$0xe]  ;;  %v4548_v35 = vrot.slane %v4546_v24, 5  ;;  %v1567_v9 = vld [vmem:[%s8120_s18 + $0x98] sm:$0x1] }
  0xb8   : > { %7118 = vmatmul.mubr.bf16.gmra.mrb[4].mxu1 %v6233_v44  ;;  %v4494_v30 = vrot.slane %v4492_v46, 5  ;;  %v4505_v44 = vor.u32 %v4504_v37, %v4500_v36 }
  0xb9   : > { %7121 = vmatprep.mubr.bf16.mxu1 %v6234_v52  ;;  %7150 = vmatpush3.bf16.msra.mxu1 %v7975_v39  ;;  %v1693_v39 = vrot.slane %v1557_v32, 5  ;;  %v6595_v52 = vld [vmem:[%s8120_s18 + $0x2c] sm:$0x1] }
  0xba   : > { %7151 = vmatprep.subr.bf16.mxu1 %v7979_v51  ;;  %v4495_v41 = vor.u32 %v4494_v30, %v4491_v29  ;;  %v4506_v57 = vrot.slane %v4505_v44, 4  ;;  %v4542_v29 = vrot.slane %v4540_v20, 5  ;;  %v4550_v30 = vshrl.u32 %v6597_v15, 16 }
  0xbb   : > { %v1695_v48 = vrot.slane %v1693_v39, 4  ;;  %v6209_v44 = vrot.slane %v1562_v21, 9 }
  0xbc   : > { %v4511_v3 = vsel %vm8143_vm2, %v4506_v57, %v4510_v45  ;;  %v1707_v45 = vrot.slane %v1563_v25, 5 }
  0xbd   : > { %7152 = vmatpush3.bf16.msra.mxu1 %v7979_v51  ;;  %v4496_v51 = vrot.slane %v4495_v41, 4  ;;  %v8716_v58 = vsel %vm8243_vm5, %v1695_v48, %v1696_v42  ;;  %v6600_v41 = vld [vmem:[%s8120_s18 + $0x40] sm:$0xf]  ;;  %v6601_v48 = vld [vmem:[%s8120_s18 + $0x44] sm:$0x1] }
  0xbe   : > { %7330 = vmatmul.mubr.bf16.gmra.mrb[24].mxu0 %v7976_v47  ;;  %7153 = vmatprep.subr.bf16.mxu1 %v7983_v1  ;;  %v8709_v47 = vsel %vm8243_vm5, %v6207_v34, %v1693_v39  ;;  %v1704_v34 = vsel %vm8243_vm5, %v1702_v23, %v1703_v18  ;;  %v1709_v56 = vrot.slane %v1707_v45, 4 }
  0xbf   : > { %7333 = vmatprep.mubr.bf16.mxu0 %v7978_v60  ;;  %v4532_v60 = vshll.u32 %v6595_v52, 16  ;;  %v4501_v62 = vsel %vm8143_vm2, %v4496_v51, %v4500_v36  ;;  %v6239_v63 = vcombine.low %v8709_v47, %v8716_v58  ;;  %v4556_v36 = vshll.u32 %v6598_v16, 16  ;;  %v1566_v58 = vld [vmem:[%s8120_s18 + $0x94] sm:$0xf]  ;;  %v6603_v16 = vld [vmem:[%s8120_s18 + $0x4c] sm:$0xf] }
  0xc0   : > { %7122 = vmatmul.mubr.bf16.gmra.mrb[8].mxu1 %v6235_v7  ;;  %v4528_v7 = vrot.slane %v4526_v59, 4  ;;  %v6654_v11 = vcombine.low %v4501_v62, %v4511_v3  ;;  %v6240_v38 = vcombine.low %v1701_v22, %v1704_v34  ;;  %v1710_v52 = vrot.slane %v1564_v31, 5  ;;  %v1570_v34 = vld [vmem:[%s8120_s18 + $0xa4] sm:$0x1] }
  0xc1   : > { %7125 = vmatprep.mubr.bf16.mxu1 %v6236_v17  ;;  %7154 = vmatpush3.bf16.msra.mxu1 %v7983_v1  ;;  %v4518_v1 = vrot.slane %v4516_v54, 5  ;;  %v4534_v8 = vrot.slane %v4532_v60, 5  ;;  %v1708_v54 = vsel %vm8243_vm5, %v6209_v44, %v1707_v45  ;;  %v4570_v59 = vshll.u32 %v6600_v41, 16  ;;  %v8755_v60 = vld [vmem:[%s9226_s1 + $0x100] sm:$0xff]  }
  0xc2   : > { %7155 = vmatprep.subr.bf16.mxu1 %v7984_v28  ;;  %v4529_v17 = vor.u32 %v4528_v7, %v4524_v6  ;;  %v1711_v5 = vsel %vm8243_vm5, %v1709_v56, %v1710_v52  ;;  %v4580_v47 = vshll.u32 %v6601_v48, 16  ;;  %v1714_v15 = vrot.slane %v1566_v58, 5 }
  0xc3   : > { %v4594_v25 = vshll.u32 %v6603_v16, 16 }
  0xc4   : > { %v4530_v27 = vrot.slane %v4529_v17, 4  ;;  %v4582_v14 = vrot.slane %v4580_v47, 5  ;;  %v6604_v17 = vld [vmem:[%s8120_s18 + $0x50] sm:$0x1]  ;;  %v1716_v24 = vrot.slane %v1714_v15, 4 }
  0xc5   : > { %7156 = vmatpush3.bf16.msra.mxu1 %v7984_v28  ;;  %v4539_v28 = vrot.slane %v4537_v19, 4  ;;  %v1717_v19 = vrot.slane %v1567_v9, 5 }
  0xc6   : > { %7334 = vmatmul.mubr.bf16.gmra.mrb[28].mxu0 %v7980_v12  ;;  %7157 = vmatprep.subr.bf16.mxu1 %v7986_v43  ;;  %v4519_v12 = vor.u32 %v4518_v1, %v4515_v0  ;;  %v4535_v37 = vsel %vm8143_vm2, %v4530_v27, %v4534_v8  ;;  %v4574_v1 = vshrl.u32 %v6600_v41, 16  ;;  %v1569_v27 = vld [vmem:[%s8120_s18 + $0xa0] sm:$0xf] }
  0xc7   : > { %7353 = vmatprep.mubr.bf16.mxu0 %v6654_v11  ;;  %v4543_v39 = vor.u32 %v4542_v29, %v4539_v28  ;;  %v6602_v11 = vld [vmem:[%s8120_s18 + $0x48] sm:$0xf]  ;;  %v7992_v28 = vld [vmem:[%s9226_s1 + $0x218] sm:$0xff]  }
  0xc8   : > { %7126 = vmatmul.mubr.bf16.gmra.mrb[12].mxu1 %v6237_v26  ;;  %v4520_v46 = vrot.slane %v4519_v12, 4  ;;  %v4552_v26 = vrot.slane %v4550_v30, 4  ;;  %v4576_v8 = vrot.slane %v4574_v1, 4  ;;  %v4585_v20 = vshrl.u32 %v6602_v11, 16 }
  0xc9   : > { %7129 = vmatprep.mubr.bf16.mxu1 %v6238_v40  ;;  %7158 = vmatpush3.bf16.msra.mxu1 %v7986_v43  ;;  %v6599_v40 = vld [vmem:[%s8120_s18 + $0x3c] sm:$0xf]  ;;  %v4558_v43 = vrot.slane %v4556_v36, 5  ;;  %v4544_v50 = vrot.slane %v4543_v39, 4  ;;  %v4588_v21 = vshll.u32 %v6602_v11, 16  ;;  %v1718_v36 = vsel %vm8243_vm5, %v1716_v24, %v1717_v19 }
  0xca   : > { %v4525_v32 = vsel %vm8143_vm2, %v4520_v46, %v4524_v6  ;;  %7159 = vmatprep.subr.bf16.mxu1 %v7988_v10  ;;  %v4553_v51 = vor.u32 %v4552_v26, %v4548_v35  ;;  %v4561_v53 = vshrl.u32 %v6599_v40, 16  ;;  %v4564_v57 = vshll.u32 %v6599_v40, 16  ;;  %v1568_v46 = vld [vmem:[%s8120_s18 + $0x9c] sm:$0xe]  ;;  %v1573_v11 = vld [vmem:[%s8120_s18 + $0xb0] sm:$0x1] }
  0xcb   : > { %v6655_v42 = vcombine.low %v4525_v32, %v4535_v37  ;;  %v4549_v61 = vsel %vm8143_vm2, %v4544_v50, %v4548_v35  ;;  %v4572_v6 = vrot.slane %v4570_v59, 5  ;;  %v4587_v30 = vrot.slane %v4585_v20, 4  ;;  %v6607_v50 = vld [vmem:[%s8120_s18 + $0x5c] sm:$0x1]  ;;  %v6610_v19 = vld [vmem:[%s8120_s18 + $0x68] sm:$0x1] }
  0xcc   : > { %v4554_v62 = vrot.slane %v4553_v51, 4  ;;  %v4563_v0 = vrot.slane %v4561_v53, 4  ;;  %v4566_v3 = vrot.slane %v4564_v57, 5  ;;  %v4590_v31 = vrot.slane %v4588_v21, 5  ;;  %v7995_v51 = vld [vmem:[%s9226_s1 + $0x220] sm:$0xff]  }
  0xcd   : > { %7160 = vmatpush3.bf16.msra.mxu1 %v7988_v10  ;;  %v6210_v10 = vrot.slane %v1565_v2, 9  ;;  %v4577_v18 = vor.u32 %v4576_v8, %v4572_v6  ;;  %v4598_v32 = vshrl.u32 %v6603_v16, 16  ;;  %v4596_v37 = vrot.slane %v4594_v25, 5 }
  0xce   : > { %7354 = vmatmul.mubr.bf16.vlgmr.msra.gmra.mrb[0].mxu0 %v6655_v42  ;;  %7433 = vmatprep.subr.bf16.mxu1 %v8755_v60  ;;  %v4559_v7 = vsel %vm8143_vm2, %v4554_v62, %v4558_v43  ;;  %v4567_v13 = vor.u32 %v4566_v3, %v4563_v0  ;;  %v4591_v40 = vor.u32 %v4590_v31, %v4587_v30  ;;  %v6605_v42 = vld [vmem:[%s8120_s18 + $0x54] sm:$0xf]  ;;  %v6606_v43 = vld [vmem:[%s8120_s18 + $0x58] sm:$0xf]  ;;  %v6211_v48 = vrot.slane %v1568_v46, 9 }
  0xcf   : > { %7386 = vmatpush3.bf16.msra.mxu0 %v8605_v55  ;;  %v6241_v55 = vcombine.low %v1708_v54, %v1711_v5  ;;  %v6656_v12 = vcombine.low %v4549_v61, %v4559_v7  ;;  %v1715_v23 = vsel %vm8243_vm5, %v6210_v10, %v1714_v15  ;;  %v4578_v29 = vrot.slane %v4577_v18, 4  ;;  %v1571_v3 = vld [vmem:[%s8120_s18 + $0xa8] sm:$0xe]  ;;  %v1572_v7 = vld [vmem:[%s8120_s18 + $0xac] sm:$0xf]  ;;  %v8001_v30 = vld [vmem:[%s9226_s1 + $0x230] sm:$0xff]  }
  0xd0   : > { %7130 = vmatmul.mubr.bf16.gmra.mrb[16].mxu1 %v6239_v63  ;;  %7387 = vmatprep.subr.bf16.mxu0 %v7987_v49  ;;  %v7989_v63 = vld [vmem:[%s9226_s1 + $0x210] sm:$0xff]   ;;  %v4568_v22 = vrot.slane %v4567_v13, 4  ;;  %v6242_v26 = vcombine.low %v1715_v23, %v1718_v36  ;;  %v4600_v41 = vrot.slane %v4598_v32, 4  ;;  %v4592_v52 = vrot.slane %v4591_v40, 4  ;;  %v6608_v13 = vld [vmem:[%s8120_s18 + $0x60] sm:$0xf] }
  0xd1   : > { %7133 = vmatprep.mubr.bf16.mxu1 %v6240_v38  ;;  %7357 = vmatprep.mubr.bf16.mxu0 %v6656_v12  ;;  %v4604_v38 = vshll.u32 %v6604_v17, 16  ;;  %v4583_v39 = vsel %vm8143_vm2, %v4578_v29, %v4582_v14  ;;  %v1724_v54 = vrot.slane %v1570_v34, 5  ;;  %v4609_v56 = vshrl.u32 %v6605_v42, 16  ;;  %v6609_v18 = vld [vmem:[%s8120_s18 + $0x64] sm:$0xf] }
  0xd2   : > { %v4573_v35 = vsel %vm8143_vm2, %v4568_v22, %v4572_v6  ;;  %v4601_v53 = vor.u32 %v4600_v41, %v4596_v37  ;;  %v4612_v61 = vshll.u32 %v6605_v42, 16  ;;  %v4618_v62 = vshll.u32 %v6606_v43, 16  ;;  %v1574_v23 = vld [vmem:[%s8120_s18 + $0xb4] sm:$0xe]  ;;  %v1575_v29 = vld [vmem:[%s8120_s18 + $0xb8] sm:$0xf] }
  0xd3   : > { %7388 = vmatpush3.bf16.msra.mxu0 %v7987_v49  ;;  %v6657_v44 = vcombine.low %v4573_v35, %v4583_v39  ;;  %v4606_v45 = vrot.slane %v4604_v38, 5  ;;  %v1721_v49 = vrot.slane %v1569_v27, 5  ;;  %v4597_v0 = vsel %vm8143_vm2, %v4592_v52, %v4596_v37  ;;  %v1576_v36 = vld [vmem:[%s8120_s18 + $0xbc] sm:$0x1]  ;;  %v6613_v52 = vld [vmem:[%s8120_s18 + $0x74] sm:$0x1] }
  0xd4   : > { %7389 = vmatprep.subr.bf16.mxu0 %v7989_v63  ;;  %v4602_v1 = vrot.slane %v4601_v53, 4  ;;  %v4611_v2 = vrot.slane %v4609_v56, 4  ;;  %v4622_v5 = vshrl.u32 %v6606_v43, 16  ;;  %v4614_v47 = vrot.slane %v4612_v61, 5  ;;  %v8002_v53 = vld [vmem:[%s9226_s1 + $0x238] sm:$0xff]  }
  0xd5   : > { %v1722_v57 = vsel %vm8243_vm5, %v6211_v48, %v1721_v49  ;;  %v1723_v59 = vrot.slane %v1721_v49, 4  ;;  %v4620_v58 = vrot.slane %v4618_v62, 5  ;;  %v6212_v12 = vrot.slane %v1571_v3, 9 }
  0xd6   : > { %7358 = vmatmul.mubr.bf16.gmra.mrb[4].mxu0 %v6657_v44  ;;  %v4607_v8 = vsel %vm8143_vm2, %v4602_v1, %v4606_v45  ;;  %v4624_v10 = vrot.slane %v4622_v5, 4  ;;  %v4615_v15 = vor.u32 %v4614_v47, %v4611_v2  ;;  %v1728_v17 = vrot.slane %v1572_v7, 5  ;;  %v6611_v44 = vld [vmem:[%s8120_s18 + $0x6c] sm:$0xf]  ;;  %v6612_v45 = vld [vmem:[%s8120_s18 + $0x70] sm:$0xf] }
  0xd7   : > { %7390 = vmatpush3.bf16.msra.mxu0 %v7989_v63  ;;  %v1725_v6 = vsel %vm8243_vm5, %v1723_v59, %v1724_v54  ;;  %v4628_v63 = vshll.u32 %v6607_v50, 16  ;;  %v6658_v14 = vcombine.low %v4597_v0, %v4607_v8  ;;  %v1731_v21 = vrot.slane %v1573_v11, 5  ;;  %v6614_v11 = vld [vmem:[%s8120_s18 + $0x78] sm:$0xf] }
  0xd8   : > { %7134 = vmatmul.mubr.bf16.gmra.mrb[20].mxu1 %v6241_v55  ;;  %7391 = vmatprep.subr.bf16.mxu0 %v7992_v28  ;;  %v7998_v55 = vld [vmem:[%s9226_s1 + $0x228] sm:$0xff]   ;;  %v6243_v9 = vcombine.low %v1722_v57, %v1725_v6  ;;  %v4625_v20 = vor.u32 %v4624_v10, %v4620_v58  ;;  %v4633_v46 = vshrl.u32 %v6608_v13, 16  ;;  %v4636_v22 = vshll.u32 %v6608_v13, 16 }
  0xd9   : > { %7137 = vmatprep.mubr.bf16.mxu1 %v6242_v26  ;;  %v4630_v16 = vrot.slane %v4628_v63, 5  ;;  %7361 = vmatprep.mubr.bf16.mxu0 %v6658_v14  ;;  %v4616_v24 = vrot.slane %v4615_v15, 4  ;;  %v1729_v25 = vsel %vm8243_vm5, %v6212_v12, %v1728_v17  ;;  %v1730_v27 = vrot.slane %v1728_v17, 4  ;;  %v6615_v12 = vld [vmem:[%s8120_s18 + $0x7c] sm:$0xf] }
  0xda   : > { %v4626_v31 = vrot.slane %v4625_v20, 4  ;;  %v4635_v32 = vrot.slane %v4633_v46, 4  ;;  %v4638_v34 = vrot.slane %v4636_v22, 5  ;;  %v4646_v35 = vshrl.u32 %v6609_v18, 16 }
  0xdb   : > { %7392 = vmatpush3.bf16.msra.mxu0 %v7992_v28  ;;  %v4642_v28 = vshll.u32 %v6609_v18, 16  ;;  %v4621_v37 = vsel %vm8143_vm2, %v4616_v24, %v4620_v58  ;;  %v1732_v38 = vsel %vm8243_vm5, %v1730_v27, %v1731_v21  ;;  %v4652_v26 = vshll.u32 %v6610_v19, 16  ;;  %v6617_v24 = vld [vmem:[%s8120_s18 + $0x84] sm:$0xf] }
  0xdc   : > { %7393 = vmatprep.subr.bf16.mxu0 %v7995_v51  ;;  %v4631_v40 = vsel %vm8143_vm2, %v4626_v31, %v4630_v16  ;;  %v6244_v41 = vcombine.low %v1729_v25, %v1732_v38  ;;  %v4639_v42 = vor.u32 %v4638_v34, %v4635_v32  ;;  %v4648_v43 = vrot.slane %v4646_v35, 4  ;;  %v6616_v16 = vld [vmem:[%s8120_s18 + $0x80] sm:$0x1]  ;;  %v6619_v34 = vld [vmem:[%s8120_s18 + $0x8c] sm:$0x1] }
  0xdd   : > { %v4644_v39 = vrot.slane %v4642_v28, 5  ;;  %v6659_v48 = vcombine.low %v4621_v37, %v4631_v40  ;;  %v4654_v49 = vrot.slane %v4652_v26, 5  ;;  %v6213_v50 = vrot.slane %v1574_v23, 9  ;;  %v7991_v26 = vld [vmem:[%s8120_s18 + $0x18] sm:$0xff]  }
  0xde   : > { %v4640_v54 = vrot.slane %v4639_v42, 4  ;;  %v1738_v57 = vrot.slane %v1576_v36, 5  ;;  %v4657_v59 = vshrl.u32 %v6611_v44, 16  ;;  %v4660_v0 = vshll.u32 %v6611_v44, 16 }
  0xdf   : > { %7394 = vmatpush3.bf16.msra.mxu0 %v7995_v51  ;;  %v1735_v51 = vrot.slane %v1575_v29, 5  ;;  %v4649_v56 = vor.u32 %v4648_v43, %v4644_v39  ;;  %v4666_v1 = vshll.u32 %v6612_v45, 16  ;;  %v4670_v6 = vshrl.u32 %v6612_v45, 16  ;;  %v7993_v45 = vld [vmem:[%s8120_s18 + $0x24] sm:$0xff]  }
  0xe0   : > { %7138 = vmatmul.mubr.bf16.gmra.mrb[24].mxu1 %v6243_v9  ;;  %7395 = vmatprep.subr.bf16.mxu0 %v7998_v55  ;;  %v4645_v2 = vsel %vm8143_vm2, %v4640_v54, %v4644_v39  ;;  %v4659_v3 = vrot.slane %v4657_v59, 4  ;;  %v4662_v58 = vrot.slane %v4660_v0, 5  ;;  %v4676_v7 = vshll.u32 %v6613_v52, 16  ;;  %v6620_v54 = vld [vmem:[%s8120_s18 + $0x90] sm:$0xf] }
  0xe1   : > { %7141 = vmatprep.mubr.bf16.mxu1 %v6244_v41  ;;  %7362 = vmatmul.mubr.bf16.gmra.mrb[8].mxu0 %v6659_v48  ;;  %v1736_v61 = vsel %vm8243_vm5, %v6213_v50, %v1735_v51  ;;  %v1737_v62 = vrot.slane %v1735_v51, 4  ;;  %v4650_v5 = vrot.slane %v4649_v56, 4  ;;  %v4668_v63 = vrot.slane %v4666_v1, 5  ;;  %v6621_v56 = vld [vmem:[%s8120_s18 + $0x94] sm:$0xf] }
  0xe2   : > { %v4672_v10 = vrot.slane %v4670_v6, 4  ;;  %v4663_v14 = vor.u32 %v4662_v58, %v4659_v3  ;;  %v4678_v15 = vrot.slane %v4676_v7, 5  ;;  %v4681_v17 = vshrl.u32 %v6614_v11, 16  ;;  %v6623_v6 = vld [vmem:[%s8120_s18 + $0x9c] sm:$0xf] }
  0xe3   : > { %7396 = vmatpush3.bf16.msra.mxu0 %v7998_v55  ;;  %v1739_v47 = vsel %vm8243_vm5, %v1737_v62, %v1738_v57  ;;  %v7990_v55 = vld [vmem:[%s8120_s18 + $0xc] sm:$0xff]   ;;  %v4655_v8 = vsel %vm8143_vm2, %v4650_v5, %v4654_v49  ;;  %v4684_v19 = vshll.u32 %v6614_v11, 16  ;;  %v4690_v20 = vshll.u32 %v6615_v12, 16  ;;  %v6622_v62 = vld [vmem:[%s8120_s18 + $0x98] sm:$0x1] }
  0xe4   : > { %7397 = vmatprep.subr.bf16.mxu0 %v8001_v30  ;;  %v6245_v9 = vcombine.low %v1736_v61, %v1739_v47  ;;  %v6660_v13 = vcombine.low %v4645_v2, %v4655_v8  ;;  %v4673_v18 = vor.u32 %v4672_v10, %v4668_v63  ;;  %v4694_v21 = vshrl.u32 %v6615_v12, 16  ;;  %v8012_v8 = vld [vmem:[%s9226_s1 + $0x108] sm:$0xff]   ;;  %v6625_v12 = vld [vmem:[%s8120_s18 + $0xa4] sm:$0x1] }
  0xe5   : > { %v4664_v46 = vrot.slane %v4663_v14, 4  ;;  %v4683_v22 = vrot.slane %v4681_v17, 4  ;;  %v4700_v23 = vshll.u32 %v6616_v16, 16  ;;  %v4686_v27 = vrot.slane %v4684_v19, 5  ;;  %v7996_v14 = vld [vmem:[%s8120_s18 + $0x3c] sm:$0xff]  }
  0xe6   : > { %7365 = vmatprep.mubr.bf16.mxu0 %v6660_v13  ;;  %v4674_v25 = vrot.slane %v4673_v18, 4  ;;  %v4692_v28 = vrot.slane %v4690_v20, 5  ;;  %v4696_v29 = vrot.slane %v4694_v21, 4  ;;  %v4705_v35 = vshrl.u32 %v6617_v24, 16 }
  0xe7   : > { %7398 = vmatpush3.bf16.msra.mxu0 %v8001_v30  ;;  %v6618_v30 = vld [vmem:[%s8120_s18 + $0x88] sm:$0xf]  ;;  %v4669_v31 = vsel %vm8143_vm2, %v4664_v46, %v4668_v63  ;;  %v4702_v32 = vrot.slane %v4700_v23, 5  ;;  %v4708_v36 = vshll.u32 %v6617_v24, 16  ;;  %v4687_v38 = vor.u32 %v4686_v27, %v4683_v22 }
  0xe8   : > { %7399 = vmatprep.subr.bf16.mxu0 %v8002_v53  ;;  %7142 = vmatmul.mubr.bf16.gmra.mrb[28].mxu1 %v6245_v9  ;;  %v4679_v37 = vsel %vm8143_vm2, %v4674_v25, %v4678_v15  ;;  %v4697_v39 = vor.u32 %v4696_v29, %v4692_v28  ;;  %v4714_v40 = vshll.u32 %v6618_v30, 16  ;;  %v4707_v42 = vrot.slane %v4705_v35, 4  ;;  %v6624_v9 = vld [vmem:[%s8120_s18 + $0xa0] sm:$0xf]  ;;  %v6626_v27 = vld [vmem:[%s8120_s18 + $0xa8] sm:$0xf] }
  0xe9   : > { %7161 = vmatprep.mubr.bf16.mxu1 %v7990_v55  ;;  %v6661_v41 = vcombine.low %v4669_v31, %v4679_v37  ;;  %v4710_v43 = vrot.slane %v4708_v36, 5  ;;  %v4718_v44 = vshrl.u32 %v6618_v30, 16  ;;  %v4688_v48 = vrot.slane %v4687_v38, 4  ;;  %v7994_v55 = vld [vmem:[%s8120_s18 + $0x30] sm:$0xff]  }
  0xea   : > { %v4698_v49 = vrot.slane %v4697_v39, 4  ;;  %v4716_v50 = vrot.slane %v4714_v40, 5  ;;  %v4724_v51 = vshll.u32 %v6619_v34, 16  ;;  %v4729_v0 = vshrl.u32 %v6620_v54, 16  ;;  %v6628_v38 = vld [vmem:[%s8120_s18 + $0xb0] sm:$0x1] }
  0xeb   : > { %7400 = vmatpush3.bf16.msra.mxu0 %v8002_v53  ;;  %v4711_v52 = vor.u32 %v4710_v43, %v4707_v42  ;;  %v4720_v53 = vrot.slane %v4718_v44, 4  ;;  %v4693_v57 = vsel %vm8143_vm2, %v4688_v48, %v4692_v28  ;;  %v4732_v3 = vshll.u32 %v6620_v54, 16  ;;  %v8013_v28 = vld [vmem:[%s9226_s1 + $0x110] sm:$0xff]  }
  0xec   : > { %7366 = vmatmul.mubr.bf16.gmra.mrb[12].mxu0 %v6661_v41  ;;  %v4703_v59 = vsel %vm8143_vm2, %v4698_v49, %v4702_v32  ;;  %v4726_v61 = vrot.slane %v4724_v51, 5  ;;  %v4731_v47 = vrot.slane %v4729_v0, 4  ;;  %v4738_v58 = vshll.u32 %v6621_v56, 16  ;;  %v6627_v32 = vld [vmem:[%s8120_s18 + $0xac] sm:$0xf]  ;;  %v8014_v51 = vld [vmem:[%s9226_s1 + $0x118] sm:$0xff]  }
  0xed   : > { %v6662_v1 = vcombine.low %v4693_v57, %v4703_v59  ;;  %v4712_v2 = vrot.slane %v4711_v52, 4  ;;  %v4721_v5 = vor.u32 %v4720_v53, %v4716_v50  ;;  %v4742_v63 = vshrl.u32 %v6621_v56, 16  ;;  %v7997_v49 = vld [vmem:[%s8120_s18 + $0x48] sm:$0xff]   ;;  %v6630_v57 = vld [vmem:[%s8120_s18 + $0xb8] sm:$0xf] }
  0xee   : > { %v4748_v7 = vshll.u32 %v6622_v62, 16  ;;  %v4734_v11 = vrot.slane %v4732_v3, 5  ;;  %v4753_v13 = vshrl.u32 %v6623_v6, 16  ;;  %v4740_v15 = vrot.slane %v4738_v58, 5  ;;  %v7999_v59 = vld [vmem:[%s8120_s18 + $0x54] sm:$0xff]  }
  0xef   : > { %7369 = vmatprep.mubr.bf16.mxu0 %v6662_v1  ;;  %v4722_v10 = vrot.slane %v4721_v5, 4  ;;  %v4744_v16 = vrot.slane %v4742_v63, 4  ;;  %v4756_v18 = vshll.u32 %v6623_v6, 16  ;;  %v4762_v46 = vshll.u32 %v6624_v9, 16  ;;  %v6631_v1 = vld [vmem:[%s8120_s18 + $0xbc] sm:$0x1] }
  0xf0   : > { %7162 = vmatmul.mubr.bf16.vlgmr.msra.gmra.mrb[0].mxu1 %v7991_v26  ;;  %v4750_v17 = vrot.slane %v4748_v7, 5  ;;  %v4735_v20 = vor.u32 %v4734_v11, %v4731_v47  ;;  %v4755_v21 = vrot.slane %v4753_v13, 4  ;;  %v4766_v25 = vshrl.u32 %v6624_v9, 16 }
  0xf1   : > { %7441 = vmatpush3.bf16.msra.mxu1 %v8755_v60  ;;  %7165 = vmatprep.mubr.bf16.mxu1 %v7993_v45  ;;  %v4717_v60 = vsel %vm8143_vm2, %v4712_v2, %v4716_v50  ;;  %v4727_v19 = vsel %vm8143_vm2, %v4722_v10, %v4726_v61  ;;  %v4745_v23 = vor.u32 %v4744_v16, %v4740_v15  ;;  %v4758_v24 = vrot.slane %v4756_v18, 5  ;;  %v6629_v50 = vld [vmem:[%s8120_s18 + $0xb4] sm:$0xf]  ;;  %v6633_v16 = vld [vmem:[%s8120_s18 + $0xc4] sm:$0xf] }
  0xf2   : > { %7434 = vmatprep.subr.bf16.mxu1 %v8012_v8  ;;  %v6663_v22 = vcombine.low %v4717_v60, %v4727_v19  ;;  %v4736_v29 = vrot.slane %v4735_v20, 4  ;;  %v4764_v30 = vrot.slane %v4762_v46, 5  ;;  %v4772_v31 = vshll.u32 %v6625_v12, 16  ;;  %v6632_v12 = vld [vmem:[%s8120_s18 + $0xc0] sm:$0xf] }
  0xf3   : > { %v4777_v34 = vshrl.u32 %v6626_v27, 16  ;;  %v4746_v35 = vrot.slane %v4745_v23, 4  ;;  %v4759_v36 = vor.u32 %v4758_v24, %v4755_v21  ;;  %v4768_v37 = vrot.slane %v4766_v25, 4 }
  0xf4   : > { %7370 = vmatmul.mubr.bf16.gmra.mrb[16].mxu0 %v6663_v22  ;;  %v4780_v39 = vshll.u32 %v6626_v27, 16  ;;  %v4741_v26 = vsel %vm8143_vm2, %v4736_v29, %v4740_v15  ;;  %v4774_v40 = vrot.slane %v4772_v31, 5  ;;  %v4786_v42 = vshll.u32 %v6627_v32, 16  ;;  %v6635_v31 = vld [vmem:[%s8120_s18 + $0xcc] sm:$0xf] }
  0xf5   : > { %7442 = vmatpush3.bf16.msra.mxu1 %v8012_v8  ;;  %v4779_v41 = vrot.slane %v4777_v34, 4  ;;  %v4751_v43 = vsel %vm8143_vm2, %v4746_v35, %v4750_v17  ;;  %v4760_v44 = vrot.slane %v4759_v36, 4  ;;  %v4769_v45 = vor.u32 %v4768_v37, %v4764_v30  ;;  %v8015_v8 = vld [vmem:[%s9226_s1 + $0x120] sm:$0xff]   ;;  %v6634_v17 = vld [vmem:[%s8120_s18 + $0xc8] sm:$0x1] }
  0xf6   : > { %7435 = vmatprep.subr.bf16.mxu1 %v8013_v28  ;;  %v4782_v48 = vrot.slane %v4780_v39, 5  ;;  %v6664_v52 = vcombine.low %v4741_v26, %v4751_v43  ;;  %v4788_v53 = vrot.slane %v4786_v42, 5  ;;  %v4790_v54 = vshrl.u32 %v6627_v32, 16  ;;  %v8016_v32 = vld [vmem:[%s9226_s1 + $0x128] sm:$0xff]   ;;  %v6637_v42 = vld [vmem:[%s8120_s18 + $0xd4] sm:$0x1] }
  0xf7   : > { %v4796_v56 = vshll.u32 %v6628_v38, 16  ;;  %v4765_v61 = vsel %vm8143_vm2, %v4760_v44, %v4764_v30  ;;  %v4770_v62 = vrot.slane %v4769_v45, 4  ;;  %v4801_v2 = vshrl.u32 %v6629_v50, 16  ;;  %v8000_v30 = vld [vmem:[%s8120_s18 + $0x60] sm:$0xff]   ;;  %v6636_v38 = vld [vmem:[%s8120_s18 + $0xd0] sm:$0xf] }
  0xf8   : > { %7166 = vmatmul.mubr.bf16.gmra.mrb[4].mxu1 %v7994_v55  ;;  %v4783_v0 = vor.u32 %v4782_v48, %v4779_v41  ;;  %7373 = vmatprep.mubr.bf16.mxu0 %v6664_v52  ;;  %v4792_v5 = vrot.slane %v4790_v54, 4  ;;  %v4804_v6 = vshll.u32 %v6629_v50, 16  ;;  %v4810_v47 = vshll.u32 %v6630_v57, 16  ;;  %v8003_v39 = vld [vmem:[%s8120_s18 + $0x6c] sm:$0xff]  }
  0xf9   : > { %7169 = vmatprep.mubr.bf16.mxu1 %v7996_v14  ;;  %7443 = vmatpush3.bf16.msra.mxu1 %v8013_v28  ;;  %v4798_v3 = vrot.slane %v4796_v56, 5  ;;  %v4775_v58 = vsel %vm8143_vm2, %v4770_v62, %v4774_v40  ;;  %v4803_v7 = vrot.slane %v4801_v2, 4  ;;  %v4814_v55 = vshrl.u32 %v6630_v57, 16  ;;  %v8017_v54 = vld [vmem:[%s9226_s1 + $0x130] sm:$0xff]  }
  0xfa   : > { %7436 = vmatprep.subr.bf16.mxu1 %v8014_v51  ;;  %v4784_v63 = vrot.slane %v4783_v0, 4  ;;  %v6665_v9 = vcombine.low %v4765_v61, %v4775_v58  ;;  %v4793_v60 = vor.u32 %v4792_v5, %v4788_v53  ;;  %v4806_v10 = vrot.slane %v4804_v6, 5  ;;  %v6679_v6 = vld [vmem:[%s8120_s18 + $0x1c] sm:$0xf] }
  0xfb   : > { %v4812_v11 = vrot.slane %v4810_v47, 5  ;;  %v4816_v14 = vrot.slane %v4814_v55, 4  ;;  %v4820_v15 = vshll.u32 %v6631_v1, 16  ;;  %v4825_v20 = vshrl.u32 %v6632_v12, 16  ;;  %v6678_v1 = vld [vmem:[%s8120_s18 + $0x18] sm:$0xe] }
  0xfc   : > { %v4789_v13 = vsel %vm8143_vm2, %v4784_v63, %v4788_v53  ;;  %7374 = vmatmul.mubr.bf16.gmra.mrb[20].mxu0 %v6665_v9  ;;  %v4794_v18 = vrot.slane %v4793_v60, 4  ;;  %v4807_v19 = vor.u32 %v4806_v10, %v4803_v7  ;;  %v4828_v21 = vshll.u32 %v6632_v12, 16  ;;  %v6680_v47 = vld [vmem:[%s8120_s18 + $0x20] sm:$0x1]  ;;  %v8018_v9 = vld [vmem:[%s9226_s1 + $0x138] sm:$0xff]  }
  0xfd   : > { %7444 = vmatpush3.bf16.msra.mxu1 %v8014_v51  ;;  %v4817_v46 = vor.u32 %v4816_v14, %v4812_v11  ;;  %v4822_v22 = vrot.slane %v4820_v15, 5  ;;  %v4834_v23 = vshll.u32 %v6633_v16, 16  ;;  %v4838_v24 = vshrl.u32 %v6633_v16, 16  ;;  %v6681_v12 = vld [vmem:[%s8120_s18 + $0x24] sm:$0xe] }
  0xfe   : > { %7437 = vmatprep.subr.bf16.mxu1 %v8015_v8  ;;  %v4799_v25 = vsel %vm8143_vm2, %v4794_v18, %v4798_v3  ;;  %v4808_v27 = vrot.slane %v4807_v19, 4  ;;  %v4827_v28 = vrot.slane %v4825_v20, 4  ;;  %v4830_v29 = vrot.slane %v4828_v21, 5  ;;  %v6682_v15 = vld [vmem:[%s8120_s18 + $0x28] sm:$0xf] }
  0xff   : > { %v6666_v34 = vcombine.low %v4789_v13, %v4799_v25  ;;  %v4818_v35 = vrot.slane %v4817_v46, 4  ;;  %v4836_v36 = vrot.slane %v4834_v23, 5  ;;  %v4840_v37 = vrot.slane %v4838_v24, 4  ;;  %v6683_v16 = vld [vmem:[%s8120_s18 + $0x2c] sm:$0x1] }
 0x100   : > { %7170 = vmatmul.mubr.bf16.gmra.mrb[8].mxu1 %v7997_v49  ;;  %v4813_v26 = vsel %vm8143_vm2, %v4808_v27, %v4812_v11  ;;  %v4831_v40 = vor.u32 %v4830_v29, %v4827_v28  ;;  %v4844_v41 = vshll.u32 %v6634_v17, 16  ;;  %v4849_v43 = vshrl.u32 %v6635_v31, 16  ;;  %v8005_v17 = vld [vmem:[%s8120_s18 + $0x84] sm:$0xff]   ;;  %v6685_v23 = vld [vmem:[%s8120_s18 + $0x34] sm:$0xf] }
 0x101   : > { %7173 = vmatprep.mubr.bf16.mxu1 %v7999_v59  ;;  %7445 = vmatpush3.bf16.msra.mxu1 %v8015_v8  ;;  %v4823_v44 = vsel %vm8143_vm2, %v4818_v35, %v4822_v22  ;;  %v4841_v45 = vor.u32 %v4840_v37, %v4836_v36  ;;  %v4852_v48 = vshll.u32 %v6635_v31, 16  ;;  %v4858_v49 = vshll.u32 %v6636_v38, 16  ;;  %v8004_v8 = vld [vmem:[%s8120_s18 + $0x78] sm:$0xff]   ;;  %v6684_v22 = vld [vmem:[%s8120_s18 + $0x30] sm:$0xe] }
 0x102   : > { %7438 = vmatprep.subr.bf16.mxu1 %v8016_v32  ;;  %7377 = vmatprep.mubr.bf16.mxu0 %v6666_v34  ;;  %v6667_v50 = vcombine.low %v4813_v26, %v4823_v44  ;;  %v4832_v51 = vrot.slane %v4831_v40, 4  ;;  %v4846_v52 = vrot.slane %v4844_v41, 5  ;;  %v4851_v53 = vrot.slane %v4849_v43, 4  ;;  %v6686_v29 = vld [vmem:[%s8120_s18 + $0x38] sm:$0x1]  ;;  %v8006_v35 = vld [vmem:[%s8120_s18 + $0x90] sm:$0xff]  }
 0x103   : > { %v4842_v56 = vrot.slane %v4841_v45, 4  ;;  %v4854_v57 = vrot.slane %v4852_v48, 5  ;;  %v4860_v59 = vrot.slane %v4858_v49, 5  ;;  %v4862_v61 = vshrl.u32 %v6636_v38, 16  ;;  %v6688_v37 = vld [vmem:[%s8120_s18 + $0x40] sm:$0xf] }
 0x104   : > { %7378 = vmatmul.mubr.bf16.gmra.mrb[24].mxu0 %v6667_v50  ;;  %v4837_v62 = vsel %vm8143_vm2, %v4832_v51, %v4836_v36  ;;  %v4868_v0 = vshll.u32 %v6637_v42, 16  ;;  %v6726_v58 = vrot.slane %v6678_v1, 9  ;;  %v5356_v7 = vrot.slane %v6679_v6, 5  ;;  %v6687_v36 = vld [vmem:[%s8120_s18 + $0x3c] sm:$0xe] }
 0x105   : > { %7446 = vmatpush3.bf16.msra.mxu1 %v8016_v32  ;;  %v4847_v2 = vsel %vm8143_vm2, %v4842_v56, %v4846_v52  ;;  %v4855_v5 = vor.u32 %v4854_v57, %v4851_v53  ;;  %v4864_v3 = vrot.slane %v4862_v61, 4  ;;  %v5359_v55 = vrot.slane %v6680_v47, 5  ;;  %v6689_v38 = vld [vmem:[%s8120_s18 + $0x44] sm:$0x1]  ;;  %v8007_v41 = vld [vmem:[%s8120_s18 + $0x9c] sm:$0xff]  }
 0x106   : > { %7439 = vmatprep.subr.bf16.mxu1 %v8017_v54  ;;  %v6668_v63 = vcombine.low %v4837_v62, %v4847_v2  ;;  %v4870_v11 = vrot.slane %v4868_v0, 5  ;;  %v5357_v13 = vsel %vm8243_vm5, %v6726_v58, %v5356_v7  ;;  %v5358_v14 = vrot.slane %v5356_v7, 4  ;;  %v6690_v48 = vld [vmem:[%s8120_s18 + $0x48] sm:$0xe]  ;;  %v6691_v49 = vld [vmem:[%s8120_s18 + $0x4c] sm:$0xf] }
 0x107   : > { %v4856_v60 = vrot.slane %v4855_v5, 4  ;;  %v4865_v10 = vor.u32 %v4864_v3, %v4860_v59  ;;  %v6727_v20 = vrot.slane %v6681_v12, 9  ;;  %v5363_v21 = vrot.slane %v6682_v15, 5  ;;  %v6692_v51 = vld [vmem:[%s8120_s18 + $0x50] sm:$0x1] }
 0x108   : > { %7174 = vmatmul.mubr.bf16.gmra.mrb[12].mxu1 %v8000_v30  ;;  %7381 = vmatprep.mubr.bf16.mxu0 %v6668_v63  ;;  %v5360_v46 = vsel %vm8243_vm5, %v5358_v14, %v5359_v55  ;;  %v5366_v28 = vrot.slane %v6683_v16, 5  ;;  %v6728_v31 = vrot.slane %v6684_v22, 9  ;;  %v5370_v32 = vrot.slane %v6685_v23, 5  ;;  %v6693_v57 = vld [vmem:[%s8120_s18 + $0x54] sm:$0xe] }
 0x109   : > { %7177 = vmatprep.mubr.bf16.mxu1 %v8003_v39  ;;  %7447 = vmatpush3.bf16.msra.mxu1 %v8017_v54  ;;  %v4861_v18 = vsel %vm8143_vm2, %v4856_v60, %v4860_v59  ;;  %v4866_v19 = vrot.slane %v4865_v10, 4  ;;  %v6758_v25 = vcombine.low %v5357_v13, %v5360_v46  ;;  %v5365_v27 = vrot.slane %v5363_v21, 4  ;;  %v6694_v0 = vld [vmem:[%s8120_s18 + $0x58] sm:$0xf]  ;;  %v6695_v1 = vld [vmem:[%s8120_s18 + $0x5c] sm:$0x1] }
 0x10a   : > { %7440 = vmatprep.subr.bf16.mxu1 %v8018_v9  ;;  %v5373_v34 = vrot.slane %v6686_v29, 5  ;;  %v5364_v39 = vsel %vm8243_vm5, %v6727_v20, %v5363_v21  ;;  %v5372_v26 = vrot.slane %v5370_v32, 4  ;;  %v6729_v40 = vrot.slane %v6687_v36, 9  ;;  %v6696_v7 = vld [vmem:[%s8120_s18 + $0x60] sm:$0xe]  ;;  %v8009_v13 = vld [vmem:[%s8120_s18 + $0xb4] sm:$0xff]  }
 0x10b   : > { %v4871_v24 = vsel %vm8143_vm2, %v4866_v19, %v4870_v11  ;;  %v5367_v42 = vsel %vm8243_vm5, %v5365_v27, %v5366_v28  ;;  %v5371_v43 = vsel %vm8243_vm5, %v6728_v31, %v5370_v32  ;;  %v5377_v44 = vrot.slane %v6688_v37, 5  ;;  %v6697_v55 = vld [vmem:[%s8120_s18 + $0x64] sm:$0xf]  ;;  %v6699_v16 = vld [vmem:[%s8120_s18 + $0x6c] sm:$0xe] }
 0x10c   : > { %v6669_v30 = vcombine.low %v4861_v18, %v4871_v24  ;;  %v5380_v45 = vrot.slane %v6689_v38, 5  ;;  %v5374_v50 = vsel %vm8243_vm5, %v5372_v26, %v5373_v34  ;;  %v6730_v52 = vrot.slane %v6690_v48, 9  ;;  %v6701_v20 = vld [vmem:[%s8120_s18 + $0x74] sm:$0x1]  ;;  %v6350_v22 = vld [vmem:[%s8120_s18 + $0x6c] sm:$0xf] }
 0x10d   : > { %7448 = vmatpush3.bf16.msra.mxu1 %v8018_v9  ;;  %v5384_v53 = vrot.slane %v6691_v49, 5  ;;  %v5379_v54 = vrot.slane %v5377_v44, 4  ;;  %v5387_v56 = vrot.slane %v6692_v51, 5  ;;  %v6759_v59 = vcombine.low %v5364_v39, %v5367_v42  ;;  %v8008_v9 = vld [vmem:[%s8120_s18 + $0xa8] sm:$0xff]   ;;  %v6351_v28 = vld [vmem:[%s8120_s18 + $0x70] sm:$0xf] }
 0x10e   : > { %7382 = vmatmul.mubr.bf16.gmra.mrb[28].mxu0 %v6669_v30  ;;  %v6760_v61 = vcombine.low %v5371_v43, %v5374_v50  ;;  %v6731_v2 = vrot.slane %v6693_v57, 9  ;;  %v5378_v5 = vsel %vm8243_vm5, %v6729_v40, %v5377_v44  ;;  %v5391_v6 = vrot.slane %v6694_v0, 5  ;;  %v6352_v29 = vld [vmem:[%s8120_s18 + $0x74] sm:$0x1]  ;;  %v6703_v26 = vld [vmem:[%s8120_s18 + $0x7c] sm:$0xf] }
 0x10f   : > { %7401 = vmatprep.mubr.bf16.mxu0 %v6758_v25  ;;  %v5386_v62 = vrot.slane %v5384_v53, 4  ;;  %v5381_v3 = vsel %vm8243_vm5, %v5379_v54, %v5380_v45  ;;  %v5394_v47 = vrot.slane %v6695_v1, 5  ;;  %v5385_v58 = vsel %vm8243_vm5, %v6730_v52, %v5384_v53  ;;  %v6704_v44 = vld [vmem:[%s8120_s18 + $0x80] sm:$0x1]  ;;  %v6353_v45 = vld [vmem:[%s8120_s18 + $0x78] sm:$0xf] }
 0x110   : > { %7178 = vmatmul.mubr.bf16.gmra.mrb[16].mxu1 %v8004_v8  ;;  %v6698_v8 = vld [vmem:[%s8120_s18 + $0x68] sm:$0x1]  ;;  %v8981_v60 = vsel %vm8243_vm5, %v6731_v2, %v5391_v6  ;;  %v5393_v10 = vrot.slane %v5391_v6, 4  ;;  %v6732_v11 = vrot.slane %v6696_v7, 9  ;;  %v6761_v12 = vcombine.low %v5378_v5, %v5381_v3  ;;  %v6354_v52 = vld [vmem:[%s8120_s18 + $0x7c] sm:$0xf] }
 0x111   : > { %7181 = vmatprep.mubr.bf16.mxu1 %v8005_v17  ;;  %v5388_v63 = vsel %vm8243_vm5, %v5386_v62, %v5387_v56  ;;  %v5398_v14 = vrot.slane %v6697_v55, 5  ;;  %v5401_v15 = vrot.slane %v6698_v8, 5  ;;  %v6700_v17 = vld [vmem:[%s8120_s18 + $0x70] sm:$0xf]  ;;  %v6733_v21 = vrot.slane %v6699_v16, 9  ;;  %v8010_v2 = vld [vmem:[%s8120_s18 + $0xc0] sm:$0xff]  }
 0x112   : > { %v6762_v18 = vcombine.low %v5385_v58, %v5388_v63  ;;  %v8988_v19 = vsel %vm8243_vm5, %v5393_v10, %v5394_v47  ;;  %v5405_v46 = vrot.slane %v6700_v17, 5  ;;  %v5408_v27 = vrot.slane %v6701_v20, 5  ;;  %v6705_v58 = vld [vmem:[%s8120_s18 + $0x84] sm:$0xe] }
 0x113   : > { %v6763_v23 = vcombine.low %v8981_v60, %v8988_v19  ;;  %v8996_v24 = vsel %vm8243_vm5, %v6732_v11, %v5398_v14  ;;  %v5400_v25 = vrot.slane %v5398_v14, 4  ;;  %v2818_v32 = vshrl.u32 %v6350_v22, 16  ;;  %v6707_v14 = vld [vmem:[%s8120_s18 + $0x8c] sm:$0x1] }
 0x114   : > { %v9002_v30 = vsel %vm8243_vm5, %v6733_v21, %v5405_v46  ;;  %v5407_v31 = vrot.slane %v5405_v46, 4  ;;  %v2821_v34 = vshll.u32 %v6350_v22, 16  ;;  %v2827_v37 = vshll.u32 %v6351_v28, 16  ;;  %v6357_v21 = vld [vmem:[%s8120_s18 + $0x88] sm:$0xf] }
 0x115   : > { %v9007_v36 = vsel %vm8243_vm5, %v5400_v25, %v5401_v15  ;;  %v2831_v38 = vshrl.u32 %v6351_v28, 16  ;;  %v2837_v39 = vshll.u32 %v6352_v29, 16  ;;  %v2820_v42 = vrot.slane %v2818_v32, 4  ;;  %v6356_v15 = vld [vmem:[%s8120_s18 + $0x84] sm:$0xf] }
 0x116   : > { %7402 = vmatmul.mubr.bf16.vlgmr.msra.gmra.mrb[0].mxu0 %v6759_v59  ;;  %v6764_v40 = vcombine.low %v8996_v24, %v9007_v36  ;;  %v2823_v43 = vrot.slane %v2821_v34, 5  ;;  %v2829_v49 = vrot.slane %v2827_v37, 5  ;;  %v5412_v56 = vrot.slane %v6703_v26, 5  ;;  %v6358_v28 = vld [vmem:[%s8120_s18 + $0x8c] sm:$0x1] }
 0x117   : > { %7405 = vmatprep.mubr.bf16.mxu0 %v6760_v61  ;;  %v2833_v50 = vrot.slane %v2831_v38, 4  ;;  %v2839_v51 = vrot.slane %v2837_v39, 5  ;;  %v5415_v57 = vrot.slane %v6704_v44, 5  ;;  %v6355_v61 = vld [vmem:[%s8120_s18 + $0x80] sm:$0x1]  ;;  %v2842_v62 = vshrl.u32 %v6353_v45, 16 }
 0x118   : > { %7182 = vmatmul.mubr.bf16.gmra.mrb[20].mxu1 %v8006_v35  ;;  %v6702_v35 = vld [vmem:[%s8120_s18 + $0x78] sm:$0xe]  ;;  %v2824_v53 = vor.u32 %v2823_v43, %v2820_v42  ;;  %v2845_v0 = vshll.u32 %v6353_v45, 16  ;;  %v2851_v1 = vshll.u32 %v6354_v52, 16  ;;  %v5414_v6 = vrot.slane %v5412_v56, 4 }
 0x119   : > { %7185 = vmatprep.mubr.bf16.mxu1 %v8007_v41  ;;  %v9014_v41 = vsel %vm8243_vm5, %v5407_v31, %v5408_v27  ;;  %v6734_v54 = vrot.slane %v6702_v35, 9  ;;  %v2834_v59 = vor.u32 %v2833_v50, %v2829_v49  ;;  %v2855_v47 = vshrl.u32 %v6354_v52, 16  ;;  %v6708_v35 = vld [vmem:[%s8120_s18 + $0x90] sm:$0xe]  ;;  %v6709_v42 = vld [vmem:[%s8120_s18 + $0x94] sm:$0xf] }
 0x11a   : > { %v6765_v48 = vcombine.low %v9002_v30, %v9014_v41  ;;  %v2825_v5 = vrot.slane %v2824_v53, 4  ;;  %v2844_v7 = vrot.slane %v2842_v62, 4  ;;  %v2847_v55 = vrot.slane %v2845_v0, 5  ;;  %v6710_v50 = vld [vmem:[%s8120_s18 + $0x98] sm:$0x1] }
 0x11b   : > { %v9025_v3 = vsel %vm8243_vm5, %v6734_v54, %v5412_v56  ;;  %v2835_v63 = vrot.slane %v2834_v59, 4  ;;  %v2853_v8 = vrot.slane %v2851_v1, 5  ;;  %v9033_v11 = vsel %vm8243_vm5, %v5414_v6, %v5415_v57  ;;  %v6359_v52 = vld [vmem:[%s8120_s18 + $0x90] sm:$0xf]  ;;  %v6360_v24 = vld [vmem:[%s8120_s18 + $0x94] sm:$0xf] }
 0x11c   : > { %v2830_v10 = vsel %vm8143_vm2, %v2825_v5, %v2829_v49  ;;  %v6766_v17 = vcombine.low %v9025_v3, %v9033_v11  ;;  %v6735_v20 = vrot.slane %v6705_v58, 9  ;;  %v5422_v31 = vrot.slane %v6707_v14, 5  ;;  %v6361_v62 = vld [vmem:[%s8120_s18 + $0x98] sm:$0x1]  ;;  %v6711_v6 = vld [vmem:[%s8120_s18 + $0x9c] sm:$0xe] }
 0x11d   : > { %v2840_v16 = vsel %vm8143_vm2, %v2835_v63, %v2839_v51  ;;  %v2866_v32 = vshrl.u32 %v6356_v15, 16  ;;  %v2869_v34 = vshll.u32 %v6356_v15, 16  ;;  %v2875_v26 = vshll.u32 %v6357_v21, 16  ;;  %v6364_v30 = vld [vmem:[%s8120_s18 + $0xa4] sm:$0x1] }
 0x11e   : > { %7406 = vmatmul.mubr.bf16.gmra.mrb[4].mxu0 %v6761_v12  ;;  %v2857_v12 = vrot.slane %v2855_v47, 4  ;;  %v6398_v46 = vcombine.low %v2830_v10, %v2840_v16  ;;  %v2879_v49 = vshrl.u32 %v6357_v21, 16  ;;  %v5426_v59 = vrot.slane %v6709_v42, 5 }
 0x11f   : > { %7409 = vmatprep.mubr.bf16.mxu0 %v6762_v18  ;;  %v2848_v18 = vor.u32 %v2847_v55, %v2844_v7  ;;  %v2868_v44 = vrot.slane %v2866_v32, 4  ;;  %v2871_v45 = vrot.slane %v2869_v34, 5  ;;  %v2877_v19 = vrot.slane %v2875_v26, 5  ;;  %v6712_v55 = vld [vmem:[%s8120_s18 + $0xa0] sm:$0xf] }
 0x120   : > { %7186 = vmatmul.mubr.bf16.gmra.mrb[24].mxu1 %v8008_v9  ;;  %v6706_v9 = vld [vmem:[%s8120_s18 + $0x88] sm:$0xf]  ;;  %v2858_v22 = vor.u32 %v2857_v12, %v2853_v8  ;;  %v2881_v57 = vrot.slane %v2879_v49, 4  ;;  %v2893_v5 = vshll.u32 %v6359_v52, 16  ;;  %v5428_v58 = vrot.slane %v5426_v59, 4 }
 0x121   : > { %7189 = vmatprep.mubr.bf16.mxu1 %v8009_v13  ;;  %v2861_v13 = vshll.u32 %v6355_v61, 16  ;;  %v5419_v27 = vrot.slane %v6706_v9, 5  ;;  %v2849_v29 = vrot.slane %v2848_v18, 4  ;;  %v2872_v56 = vor.u32 %v2871_v45, %v2868_v44  ;;  %v6716_v49 = vld [vmem:[%s8120_s18 + $0xb0] sm:$0x1] }
 0x122   : > { %v2859_v37 = vrot.slane %v2858_v22, 4  ;;  %v5429_v61 = vrot.slane %v6710_v50, 5  ;;  %v2882_v1 = vor.u32 %v2881_v57, %v2877_v19  ;;  %v2899_v63 = vshll.u32 %v6360_v24, 16 }
 0x123   : > { %v2863_v25 = vrot.slane %v2861_v13, 5  ;;  %v9046_v38 = vsel %vm8243_vm5, %v6735_v20, %v5419_v27  ;;  %v5421_v39 = vrot.slane %v5419_v27, 4  ;;  %v2854_v43 = vsel %vm8143_vm2, %v2849_v29, %v2853_v8  ;;  %v6713_v13 = vld [vmem:[%s8120_s18 + $0xa4] sm:$0x1]  ;;  %v6362_v20 = vld [vmem:[%s8120_s18 + $0x9c] sm:$0xf] }
 0x124   : > { %v2873_v0 = vrot.slane %v2872_v56, 4  ;;  %v2903_v7 = vshrl.u32 %v6360_v24, 16  ;;  %v2883_v9 = vrot.slane %v2882_v1, 4  ;;  %v2895_v12 = vrot.slane %v2893_v5, 5  ;;  %v6363_v27 = vld [vmem:[%s8120_s18 + $0xa0] sm:$0xf] }
 0x125   : > { %v2864_v51 = vsel %vm8143_vm2, %v2859_v37, %v2863_v25  ;;  %v9062_v60 = vsel %vm8243_vm5, %v5421_v39, %v5422_v31  ;;  %v5430_v14 = vsel %vm8243_vm5, %v5428_v58, %v5429_v61  ;;  %v2901_v15 = vrot.slane %v2899_v63, 5  ;;  %v6714_v37 = vld [vmem:[%s8120_s18 + $0xa8] sm:$0xe] }
 0x126   : > { %7410 = vmatmul.mubr.bf16.gmra.mrb[8].mxu0 %v6763_v23  ;;  %v2885_v23 = vshll.u32 %v6358_v28, 16  ;;  %v6399_v53 = vcombine.low %v2854_v43, %v2864_v51  ;;  %v6767_v54 = vcombine.low %v9046_v38, %v9062_v60  ;;  %v2878_v8 = vsel %vm8143_vm2, %v2873_v0, %v2877_v19  ;;  %v6367_v0 = vld [vmem:[%s8120_s18 + $0xb0] sm:$0x1] }
 0x127   : > { %7413 = vmatprep.mubr.bf16.mxu0 %v6764_v40  ;;  %v6736_v40 = vrot.slane %v6708_v35, 9  ;;  %v2905_v16 = vrot.slane %v2903_v7, 4  ;;  %v2909_v18 = vshll.u32 %v6361_v62, 16  ;;  %v6737_v25 = vrot.slane %v6711_v6, 9 }
 0x128   : > { %7190 = vmatmul.mubr.bf16.gmra.mrb[28].mxu1 %v8010_v2  ;;  %v2887_v36 = vrot.slane %v2885_v23, 5  ;;  %v2890_v2 = vshrl.u32 %v6359_v52, 16  ;;  %v5433_v32 = vrot.slane %v6712_v55, 5  ;;  %v2914_v34 = vshrl.u32 %v6362_v20, 16  ;;  %v6365_v52 = vld [vmem:[%s8120_s18 + $0xa8] sm:$0xf] }
 0x129   : > { %7225 = vmatprep.mubr.bf16.mxu1 %v6398_v46  ;;  %v9072_v47 = vsel %vm8243_vm5, %v6736_v40, %v5426_v59  ;;  %v2906_v29 = vor.u32 %v2905_v16, %v2901_v15  ;;  %v2911_v31 = vrot.slane %v2909_v18, 5  ;;  %v2917_v35 = vshll.u32 %v6362_v20, 16  ;;  %v6368_v16 = vld [vmem:[%s8120_s18 + $0xb4] sm:$0xf] }
 0x12a   : > { %v2892_v10 = vrot.slane %v2890_v2, 4  ;;  %v2888_v21 = vsel %vm8143_vm2, %v2883_v9, %v2887_v36  ;;  %v6768_v46 = vcombine.low %v9072_v47, %v5430_v14  ;;  %v9095_v26 = vsel %vm8243_vm5, %v6737_v25, %v5433_v32  ;;  %v6366_v36 = vld [vmem:[%s8120_s18 + $0xac] sm:$0xf]  ;;  %v6717_v47 = vld [vmem:[%s8120_s18 + $0xb4] sm:$0xe] }
 0x12b   : > { %v6400_v28 = vcombine.low %v2878_v8, %v2888_v21  ;;  %v2907_v39 = vrot.slane %v2906_v29, 4  ;;  %v5435_v3 = vrot.slane %v5433_v32, 4  ;;  %v2923_v11 = vshll.u32 %v6363_v27, 16  ;;  %v6718_v8 = vld [vmem:[%s8120_s18 + $0xb8] sm:$0xf] }
 0x12c   : > { %v2896_v22 = vor.u32 %v2895_v12, %v2892_v10  ;;  %v2916_v43 = vrot.slane %v2914_v34, 4  ;;  %v2919_v44 = vrot.slane %v2917_v35, 5  ;;  %v2927_v45 = vshrl.u32 %v6363_v27, 16  ;;  %v6719_v10 = vld [vmem:[%s8120_s18 + $0xbc] sm:$0x1] }
 0x12d   : > { %v2912_v50 = vsel %vm8143_vm2, %v2907_v39, %v2911_v31  ;;  %v2925_v19 = vrot.slane %v2923_v11, 5  ;;  %v2933_v23 = vshll.u32 %v6364_v30, 16  ;;  %v6738_v59 = vrot.slane %v6714_v37, 9  ;;  %v6370_v31 = vld [vmem:[%s8120_s18 + $0xbc] sm:$0x1] }
 0x12e   : > { %7414 = vmatmul.mubr.bf16.gmra.mrb[12].mxu0 %v6765_v48  ;;  %v2897_v41 = vrot.slane %v2896_v22, 4  ;;  %v5436_v48 = vrot.slane %v6713_v13, 5  ;;  %v2920_v57 = vor.u32 %v2919_v44, %v2916_v43  ;;  %v2929_v24 = vrot.slane %v2927_v45, 4  ;;  %v6369_v22 = vld [vmem:[%s8120_s18 + $0xb8] sm:$0xf] }
 0x12f   : > { %7417 = vmatprep.mubr.bf16.mxu0 %v6766_v17  ;;  %v6715_v17 = vld [vmem:[%s8120_s18 + $0xac] sm:$0xf]  ;;  %v2935_v40 = vrot.slane %v2933_v23, 5  ;;  %v5443_v62 = vrot.slane %v6716_v49, 5  ;;  %v2938_v5 = vshrl.u32 %v6365_v52, 16  ;;  %v2941_v6 = vshll.u32 %v6365_v52, 16 }
 0x130   : > { %7226 = vmatmul.mubr.bf16.vlgmr.msra.gmra.mrb[16].mxu1 %v6399_v53  ;;  %v2902_v42 = vsel %vm8143_vm2, %v2897_v41, %v2901_v15  ;;  %v5437_v51 = vsel %vm8243_vm5, %v5435_v3, %v5436_v48  ;;  %v5440_v61 = vrot.slane %v6715_v17, 5  ;;  %v2921_v1 = vrot.slane %v2920_v57, 4  ;;  %v6720_v34 = vld [vmem:[%s8120_s18 + $0xc0] sm:$0xe]  ;;  %v6721_v3 = vld [vmem:[%s8120_s18 + $0xc4] sm:$0xf] }
 0x131   : > { %7229 = vmatprep.mubr.bf16.mxu1 %v6400_v28  ;;  %v6401_v53 = vcombine.low %v2902_v42, %v2912_v50  ;;  %v6769_v56 = vcombine.low %v9095_v26, %v5437_v51  ;;  %v2930_v2 = vor.u32 %v2929_v24, %v2925_v19  ;;  %v2947_v7 = vshll.u32 %v6366_v36, 16  ;;  %v6722_v44 = vld [vmem:[%s8120_s18 + $0xc8] sm:$0x1]  ;;  %v6372_v57 = vld [vmem:[%s8120_s18 + $0xc4] sm:$0xf] }
 0x132   : > { %v5441_v58 = vsel %vm8243_vm5, %v6738_v59, %v5440_v61  ;;  %v5442_v63 = vrot.slane %v5440_v61, 4  ;;  %v2951_v55 = vshrl.u32 %v6366_v36, 16  ;;  %v2926_v38 = vsel %vm8143_vm2, %v2921_v1, %v2925_v19  ;;  %v6371_v19 = vld [vmem:[%s8120_s18 + $0xc0] sm:$0xf] }
 0x133   : > { %v2931_v60 = vrot.slane %v2930_v2, 4  ;;  %v2943_v9 = vrot.slane %v2941_v6, 5  ;;  %v2949_v13 = vrot.slane %v2947_v7, 5  ;;  %v2957_v15 = vshll.u32 %v6367_v0, 16  ;;  %v6373_v0 = vld [vmem:[%s8120_s18 + $0xc8] sm:$0x1] }
 0x134   : > { %v5444_v12 = vsel %vm8243_vm5, %v5442_v63, %v5443_v62  ;;  %v2953_v14 = vrot.slane %v2951_v55, 4  ;;  %v5447_v29 = vrot.slane %v6718_v8, 5  ;;  %v5450_v30 = vrot.slane %v6719_v10, 5  ;;  %v6723_v63 = vld [vmem:[%s8120_s18 + $0xcc] sm:$0xe] }
 0x135   : > { %v2936_v18 = vsel %vm8143_vm2, %v2931_v60, %v2935_v40  ;;  %v6770_v20 = vcombine.low %v5441_v58, %v5444_v12  ;;  %v2959_v28 = vrot.slane %v2957_v15, 5  ;;  %v2962_v41 = vshrl.u32 %v6368_v16, 16  ;;  %v6724_v60 = vld [vmem:[%s8120_s18 + $0xd0] sm:$0xf] }
 0x136   : > { %7418 = vmatmul.mubr.bf16.gmra.mrb[16].mxu0 %v6767_v54  ;;  %v2940_v54 = vrot.slane %v2938_v5, 4  ;;  %v6402_v25 = vcombine.low %v2926_v38, %v2936_v18  ;;  %v2954_v27 = vor.u32 %v2953_v14, %v2949_v13  ;;  %v2965_v48 = vshll.u32 %v6368_v16, 16 }
 0x137   : > { %7421 = vmatprep.mubr.bf16.mxu0 %v6768_v46  ;;  %v6739_v46 = vrot.slane %v6717_v47, 9  ;;  %v5449_v39 = vrot.slane %v5447_v29, 4  ;;  %v2971_v26 = vshll.u32 %v6369_v22, 16  ;;  %v2964_v17 = vrot.slane %v2962_v41, 4 }
 0x138   : > { %7230 = vmatmul.mubr.bf16.gmra.mrb[20].mxu1 %v6401_v53  ;;  %v2944_v21 = vor.u32 %v2943_v9, %v2940_v54  ;;  %v2955_v35 = vrot.slane %v2954_v27, 4  ;;  %v2967_v42 = vrot.slane %v2965_v48, 5  ;;  %v2975_v43 = vshrl.u32 %v6369_v22, 16 }
 0x139   : > { %7233 = vmatprep.mubr.bf16.mxu1 %v6402_v25  ;;  %v5448_v37 = vsel %vm8243_vm5, %v6739_v46, %v5447_v29  ;;  %v5451_v49 = vsel %vm8243_vm5, %v5449_v39, %v5450_v30  ;;  %v2973_v50 = vrot.slane %v2971_v26, 5  ;;  %v2981_v51 = vshll.u32 %v6370_v31, 16 }
 0x13a   : > { %v2945_v32 = vrot.slane %v2944_v21, 4  ;;  %v2960_v45 = vsel %vm8143_vm2, %v2955_v35, %v2959_v28  ;;  %v6771_v52 = vcombine.low %v5448_v37, %v5451_v49  ;;  %v2968_v53 = vor.u32 %v2967_v42, %v2964_v17 }
 0x13b   : > { %v2983_v24 = vrot.slane %v2981_v51, 5  ;;  %v6740_v36 = vrot.slane %v6720_v34, 9  ;;  %v5454_v40 = vrot.slane %v6721_v3, 5  ;;  %v5457_v59 = vrot.slane %v6722_v44, 5 }
 0x13c   : > { %v2950_v11 = vsel %vm8143_vm2, %v2945_v32, %v2949_v13  ;;  %v2969_v61 = vrot.slane %v2968_v53, 4  ;;  %v2986_v1 = vshrl.u32 %v6371_v19, 16  ;;  %v2989_v2 = vshll.u32 %v6371_v19, 16  ;;  %v6725_v13 = vld [vmem:[%s8120_s18 + $0xd4] sm:$0x1]  ;;  %s6784_s18 = sshll.u32 %s9238_s12, 8 }
 0x13d   : > { %v6403_v23 = vcombine.low %v2950_v11, %v2960_v45  ;;  %v5455_v5 = vsel %vm8243_vm5, %v6740_v36, %v5454_v40  ;;  %v5456_v6 = vrot.slane %v5454_v40, 4  ;;  %v2995_v47 = vshll.u32 %v6372_v57, 16  ;;  %s9173_s27 = scalar_lea.vmem %s9227_s2, %s6784_s18 }
 0x13e   : > { %7422 = vmatmul.mubr.bf16.gmra.mrb[20].mxu0 %v6769_v56  ;;  %v2977_v56 = vrot.slane %v2975_v43, 4  ;;  %v2999_v58 = vshrl.u32 %v6372_v57, 16  ;;  %v2974_v7 = vsel %vm8143_vm2, %v2969_v61, %v2973_v50  ;;  %v2988_v8 = vrot.slane %v2986_v1, 4 }
 0x13f   : > { %7425 = vmatprep.mubr.bf16.mxu0 %v6770_v20  ;;  %v2991_v38 = vrot.slane %v2989_v2, 5  ;;  %v5458_v54 = vsel %vm8243_vm5, %v5456_v6, %v5457_v59  ;;  %v2997_v9 = vrot.slane %v2995_v47, 5  ;;  %v3005_v12 = vshll.u32 %v6373_v0, 16 }
 0x140   : > { %7234 = vmatmul.mubr.bf16.gmra.mrb[24].mxu1 %v6403_v23  ;;  %v2978_v62 = vor.u32 %v2977_v56, %v2973_v50  ;;  %v3001_v10 = vrot.slane %v2999_v58, 4  ;;  %v6772_v15 = vcombine.low %v5455_v5, %v5458_v54  ;;  %v6741_v18 = vrot.slane %v6723_v63, 9 }
 0x141   : > { %v2992_v16 = vor.u32 %v2991_v38, %v2988_v8  ;;  %v3007_v46 = vrot.slane %v3005_v12, 5  ;;  %v5461_v22 = vrot.slane %v6724_v60, 5  ;;  %v5464_v27 = vrot.slane %v6725_v13, 5 }
 0x142   : > { %v2979_v55 = vrot.slane %v2978_v62, 4  ;;  %v3002_v21 = vor.u32 %v3001_v10, %v2997_v9 }
 0x143   : > { %v2993_v25 = vrot.slane %v2992_v16, 4  ;;  %v5462_v29 = vsel %vm8243_vm5, %v6741_v18, %v5461_v22  ;;  %v5463_v31 = vrot.slane %v5461_v22, 4 }
 0x144   : > { %v2984_v14 = vsel %vm8143_vm2, %v2979_v55, %v2983_v24  ;;  %v3003_v28 = vrot.slane %v3002_v21, 4 }
 0x145   : > { %v6404_v20 = vcombine.low %v2974_v7, %v2984_v14  ;;  %v2998_v32 = vsel %vm8143_vm2, %v2993_v25, %v2997_v9  ;;  %v5465_v41 = vsel %vm8243_vm5, %v5463_v31, %v5464_v27 }
 0x146   : > { %7426 = vmatmul.mubr.bf16.gmra.mrb[24].mxu0 %v6771_v52  ;;  %v3008_v30 = vsel %vm8143_vm2, %v3003_v28, %v3007_v46  ;;  %v6773_v34 = vcombine.low %v5462_v29, %v5465_v41 }
 0x147   : > { %7429 = vmatprep.mubr.bf16.mxu0 %v6772_v15  ;;  %7237 = vmatprep.mubr.bf16.mxu1 %v6404_v20  ;;  %v6405_v48 = vcombine.low %v2998_v32, %v3008_v30 }
 0x149   : > { %7238 = vmatmul.mubr.bf16.gmra.mrb[28].mxu1 %v6405_v48 }
 0x14e   : > { %7430 = vmatmul.mubr.bf16.gmra.mrb[28].mxu0 %v6773_v34 }
 0x1c3   : > { %v7163_v35 = vpop.f32.mrb[0].mxu1 }
 0x1c4   : > { %v2386_v37 = vpop.f32.mrb[1].mxu1 }
 0x1c5   : > { %v7164_v39 = vpop.f32.mrb[2].mxu1 }
 0x1c6   : > { %v2389_v26 = vpop.f32.mrb[3].mxu1 }
 0x1cb   : > { %v7167_v3 = vpop.f32.mrb[4].mxu1 }
 0x1cc   : > { %v2402_v11 = vpop.f32.mrb[5].mxu1 }
 0x1cd   : > { %v7168_v17 = vpop.f32.mrb[6].mxu1 }
 0x1ce   : > { %v2405_v42 = vpop.f32.mrb[7].mxu1 }
 0x1d3   : > { %v7171_v43 = vpop.f32.mrb[8].mxu1 }
 0x1d4   : > { %v2418_v44 = vpop.f32.mrb[9].mxu1 }
 0x1d5   : > { %v7172_v33 = vpop.f32.mrb[10].mxu1 }
 0x1d6   : > { %v9159_v45 = vpop.f32.mrb[11].mxu1 }
 0x1db   : > { %v9161_v4 = vpop.f32.mrb[12].mxu1 }
 0x1dc   : > { %v9163_v49 = vpop.f32.mrb[13].mxu1 }
 0x1dd   : > { %v9165_v50 = vpop.f32.mrb[14].mxu1 }
 0x1de   : > { %v9167_v51 = vpop.f32.mrb[15].mxu1 }
 0x1e9   : > { %v7403_v19 = vpop.f32.mrb[0].mxu0 }
 0x1ea   : > { %v7454_v23 = vadd.f32 %v7403_v19, %v7163_v35  ;;  %v5661_v52 = vpop.f32.mrb[1].mxu0 }
 0x1eb   : > { %v7460_v53 = vadd.f32 %v5661_v52, %v2386_v37  ;;  %v7404_v56 = vpop.f32.mrb[2].mxu0 }
 0x1ec   : > { %5822 = vst [vmem:[%s9173_s27 + $0x10] sm:$0xff] %v7454_v23  ;;  %v7466_v57 = vadd.f32 %v7404_v56, %v7164_v39  ;;  %v5664_v24 = vpop.f32.mrb[3].mxu0  ;;  %v5924_v62 = vmul.f32 %v7454_v23, %v7454_v23 }
 0x1ed   : > { %5820 = vst [vmem:[%s9173_s27] sm:$0xff] %v7460_v53  ;;  %v7472_v36 = vadd.f32 %v5664_v24, %v2389_v26  ;;  %v5922_v40 = vmul.f32 %v7460_v53, %v7460_v53 }
 0x1ee   : > { %5823 = vst [vmem:[%s9173_s27 + $0x18] sm:$0xff] %v7466_v57  ;;  %v5925_v47 = vmul.f32 %v7466_v57, %v7466_v57 }
 0x1ef   : > { %5821 = vst [vmem:[%s9173_s27 + $0x8] sm:$0xff] %v7472_v36  ;;  %v5884_v59 = vadd.f32 %v7472_v36, %v7460_v53  ;;  %v5923_v61 = vmul.f32 %v7472_v36, %v7472_v36 }
 0x1f1   : > { %v5885_v0 = vadd.f32 %v7454_v23, %v5884_v59  ;;  %v5954_v1 = vadd.f32 %v5923_v61, %v5922_v40  ;;  %v7407_v2 = vpop.f32.mrb[4].mxu0 }
 0x1f2   : > { %v7478_v5 = vadd.f32 %v7407_v2, %v7167_v3  ;;  %v5677_v6 = vpop.f32.mrb[5].mxu0 }
 0x1f3   : > { %v5955_v58 = vadd.f32 %v5954_v1, %v5924_v62  ;;  %v7484_v63 = vadd.f32 %v5677_v6, %v2402_v11  ;;  %v5886_v7 = vadd.f32 %v7466_v57, %v5885_v0  ;;  %v7408_v55 = vpop.f32.mrb[6].mxu0 }
 0x1f4   : > { %5826 = vst [vmem:[%s9173_s27 + $0x30] sm:$0xff] %v7478_v5  ;;  %v7490_v8 = vadd.f32 %v7408_v55, %v7168_v17  ;;  %v5680_v38 = vpop.f32.mrb[7].mxu0  ;;  %v5928_v15 = vmul.f32 %v7478_v5, %v7478_v5 }
 0x1f5   : > { %5824 = vst [vmem:[%s9173_s27 + $0x20] sm:$0xff] %v7484_v63  ;;  %v5887_v60 = vadd.f32 %v7484_v63, %v5886_v7  ;;  %v5926_v54 = vmul.f32 %v7484_v63, %v7484_v63  ;;  %v5956_v9 = vadd.f32 %v5955_v58, %v5925_v47  ;;  %v7496_v10 = vadd.f32 %v5680_v38, %v2405_v42 }
 0x1f6   : > { %5827 = vst [vmem:[%s9173_s27 + $0x38] sm:$0xff] %v7490_v8  ;;  %v5929_v22 = vmul.f32 %v7490_v8, %v7490_v8 }
 0x1f7   : > { %v5957_v12 = vadd.f32 %v5956_v9, %v5926_v54  ;;  %5825 = vst [vmem:[%s9173_s27 + $0x28] sm:$0xff] %v7496_v10  ;;  %v5888_v13 = vadd.f32 %v7496_v10, %v5887_v60  ;;  %v5927_v14 = vmul.f32 %v7496_v10, %v7496_v10 }
 0x1f9   : > { %v5889_v16 = vadd.f32 %v7478_v5, %v5888_v13  ;;  %v5958_v18 = vadd.f32 %v5957_v12, %v5927_v14  ;;  %v7411_v20 = vpop.f32.mrb[8].mxu0 }
 0x1fa   : > { %v7502_v21 = vadd.f32 %v7411_v20, %v7171_v43  ;;  %v5693_v46 = vpop.f32.mrb[9].mxu0 }
 0x1fb   : > { %v5959_v25 = vadd.f32 %v5958_v18, %v5928_v15  ;;  %v7508_v27 = vadd.f32 %v5693_v46, %v2418_v44  ;;  %v5890_v28 = vadd.f32 %v7490_v8, %v5889_v16  ;;  %v7412_v29 = vpop.f32.mrb[10].mxu0 }
 0x1fc   : > { %5830 = vst [vmem:[%s9173_s27 + $0x50] sm:$0xff] %v7502_v21  ;;  %v7514_v31 = vadd.f32 %v7412_v29, %v7172_v33  ;;  %v5696_v32 = vpop.f32.mrb[11].mxu0  ;;  %v5932_v17 = vmul.f32 %v7502_v21, %v7502_v21 }
 0x1fd   : > { %5828 = vst [vmem:[%s9173_s27 + $0x40] sm:$0xff] %v7508_v27  ;;  %v5891_v30 = vadd.f32 %v7508_v27, %v5890_v28  ;;  %v5930_v41 = vmul.f32 %v7508_v27, %v7508_v27  ;;  %v5960_v48 = vadd.f32 %v5959_v25, %v5929_v22  ;;  %v7520_v34 = vadd.f32 %v5696_v32, %v9159_v45 }
 0x1fe   : > { %5831 = vst [vmem:[%s9173_s27 + $0x58] sm:$0xff] %v7514_v31  ;;  %v5933_v45 = vmul.f32 %v7514_v31, %v7514_v31 }
 0x1ff   : > { %v5961_v37 = vadd.f32 %v5960_v48, %v5930_v41  ;;  %5829 = vst [vmem:[%s9173_s27 + $0x48] sm:$0xff] %v7520_v34  ;;  %v5892_v39 = vadd.f32 %v7520_v34, %v5891_v30  ;;  %v5931_v26 = vmul.f32 %v7520_v34, %v7520_v34 }
 0x201   : > { %v5893_v42 = vadd.f32 %v7502_v21, %v5892_v39  ;;  %v5962_v43 = vadd.f32 %v5961_v37, %v5931_v26  ;;  %v7415_v44 = vpop.f32.mrb[12].mxu0 }
 0x202   : > { %v7526_v19 = vadd.f32 %v7415_v44, %v9161_v4  ;;  %v5709_v23 = vpop.f32.mrb[13].mxu0 }
 0x203   : > { %v7227_v35 = vpop.f32.mrb[16].mxu1  ;;  %v5963_v52 = vadd.f32 %v5962_v43, %v5932_v17  ;;  %v7532_v53 = vadd.f32 %v5709_v23, %v9163_v49  ;;  %v5894_v56 = vadd.f32 %v7514_v31, %v5893_v42  ;;  %v7416_v57 = vpop.f32.mrb[14].mxu0 }
 0x204   : > { %v3268_v3 = vpop.f32.mrb[17].mxu1  ;;  %5834 = vst [vmem:[%s9173_s27 + $0x70] sm:$0xff] %v7526_v19  ;;  %v7538_v24 = vadd.f32 %v7416_v57, %v9165_v50  ;;  %v5712_v36 = vpop.f32.mrb[15].mxu0  ;;  %v5936_v2 = vmul.f32 %v7526_v19, %v7526_v19 }
 0x205   : > { %v7228_v11 = vpop.f32.mrb[18].mxu1  ;;  %5832 = vst [vmem:[%s9173_s27 + $0x60] sm:$0xff] %v7532_v53  ;;  %v5895_v40 = vadd.f32 %v7532_v53, %v5894_v56  ;;  %v5934_v59 = vmul.f32 %v7532_v53, %v7532_v53  ;;  %v5964_v61 = vadd.f32 %v5963_v52, %v5933_v45  ;;  %v7544_v62 = vadd.f32 %v5712_v36, %v9167_v51 }
 0x206   : > { %v3271_v33 = vpop.f32.mrb[19].mxu1  ;;  %5835 = vst [vmem:[%s9173_s27 + $0x78] sm:$0xff] %v7538_v24  ;;  %v5937_v7 = vmul.f32 %v7538_v24, %v7538_v24 }
 0x207   : > { %v5965_v4 = vadd.f32 %v5964_v61, %v5934_v59  ;;  %5833 = vst [vmem:[%s9173_s27 + $0x68] sm:$0xff] %v7544_v62  ;;  %v5896_v0 = vadd.f32 %v7544_v62, %v5895_v40  ;;  %v5935_v1 = vmul.f32 %v7544_v62, %v7544_v62 }
 0x209   : > { %v5897_v49 = vadd.f32 %v7526_v19, %v5896_v0  ;;  %v5966_v5 = vadd.f32 %v5965_v4, %v5935_v1  ;;  %v7419_v6 = vpop.f32.mrb[16].mxu0 }
 0x20a   : > { %v7550_v50 = vadd.f32 %v7419_v6, %v7227_v35  ;;  %v5725_v58 = vpop.f32.mrb[17].mxu0 }
 0x20b   : > { %v7231_v47 = vpop.f32.mrb[20].mxu1  ;;  %v5967_v55 = vadd.f32 %v5966_v5, %v5936_v2  ;;  %v7556_v51 = vadd.f32 %v5725_v58, %v3268_v3  ;;  %v5898_v8 = vadd.f32 %v7538_v24, %v5897_v49  ;;  %v7420_v38 = vpop.f32.mrb[18].mxu0 }
 0x20c   : > { %v3284_v63 = vpop.f32.mrb[21].mxu1  ;;  %5838 = vst [vmem:[%s9173_s27 + $0x90] sm:$0xff] %v7550_v50  ;;  %v7562_v54 = vadd.f32 %v7420_v38, %v7228_v11  ;;  %v5728_v9 = vpop.f32.mrb[19].mxu0  ;;  %v5940_v21 = vmul.f32 %v7550_v50, %v7550_v50 }
 0x20d   : > { %v7232_v60 = vpop.f32.mrb[22].mxu1  ;;  %5836 = vst [vmem:[%s9173_s27 + $0x80] sm:$0xff] %v7556_v51  ;;  %v5899_v12 = vadd.f32 %v7556_v51, %v5898_v8  ;;  %v5938_v13 = vmul.f32 %v7556_v51, %v7556_v51  ;;  %v5968_v14 = vadd.f32 %v5967_v55, %v5937_v7  ;;  %v7568_v15 = vadd.f32 %v5728_v9, %v3271_v33 }
 0x20e   : > { %v3287_v10 = vpop.f32.mrb[23].mxu1  ;;  %5839 = vst [vmem:[%s9173_s27 + $0x98] sm:$0xff] %v7562_v54  ;;  %v5941_v29 = vmul.f32 %v7562_v54, %v7562_v54 }
 0x20f   : > { %v5969_v16 = vadd.f32 %v5968_v14, %v5938_v13  ;;  %5837 = vst [vmem:[%s9173_s27 + $0x88] sm:$0xff] %v7568_v15  ;;  %v5900_v18 = vadd.f32 %v7568_v15, %v5899_v12  ;;  %v5939_v20 = vmul.f32 %v7568_v15, %v7568_v15 }
 0x211   : > { %v5901_v46 = vadd.f32 %v7550_v50, %v5900_v18  ;;  %v5970_v22 = vadd.f32 %v5969_v16, %v5939_v20  ;;  %v7423_v25 = vpop.f32.mrb[20].mxu0 }
 0x212   : > { %v7574_v27 = vadd.f32 %v7423_v25, %v7231_v47  ;;  %v5741_v28 = vpop.f32.mrb[21].mxu0 }
 0x213   : > { %v5971_v31 = vadd.f32 %v5970_v22, %v5940_v21  ;;  %v7580_v32 = vadd.f32 %v5741_v28, %v3284_v63  ;;  %v5902_v30 = vadd.f32 %v7562_v54, %v5901_v46  ;;  %v7424_v41 = vpop.f32.mrb[22].mxu0  ;;  %v7235_v3 = vpop.f32.mrb[24].mxu1 }
 0x214   : > { %5842 = vst [vmem:[%s9173_s27 + $0xb0] sm:$0xff] %v7574_v27  ;;  %v7586_v48 = vadd.f32 %v7424_v41, %v7232_v60  ;;  %v5744_v34 = vpop.f32.mrb[23].mxu0  ;;  %v3300_v11 = vpop.f32.mrb[25].mxu1  ;;  %v5944_v19 = vmul.f32 %v7574_v27, %v7574_v27 }
 0x215   : > { %5840 = vst [vmem:[%s9173_s27 + $0xa0] sm:$0xff] %v7580_v32  ;;  %v5903_v35 = vadd.f32 %v7580_v32, %v5902_v30  ;;  %v5942_v37 = vmul.f32 %v7580_v32, %v7580_v32  ;;  %v5972_v39 = vadd.f32 %v5971_v31, %v5941_v29  ;;  %v7592_v26 = vadd.f32 %v5744_v34, %v3287_v10  ;;  %v7236_v44 = vpop.f32.mrb[26].mxu1 }
 0x216   : > { %5843 = vst [vmem:[%s9173_s27 + $0xb8] sm:$0xff] %v7586_v48  ;;  %v3303_v33 = vpop.f32.mrb[27].mxu1  ;;  %v5945_v57 = vmul.f32 %v7586_v48, %v7586_v48 }
 0x217   : > { %v5973_v17 = vadd.f32 %v5972_v39, %v5942_v37  ;;  %5841 = vst [vmem:[%s9173_s27 + $0xa8] sm:$0xff] %v7592_v26  ;;  %v5904_v42 = vadd.f32 %v7592_v26, %v5903_v35  ;;  %v5943_v43 = vmul.f32 %v7592_v26, %v7592_v26 }
 0x219   : > { %v5905_v23 = vadd.f32 %v7574_v27, %v5904_v42  ;;  %v5974_v45 = vadd.f32 %v5973_v17, %v5943_v43  ;;  %v7427_v52 = vpop.f32.mrb[24].mxu0 }
 0x21a   : > { %v7598_v53 = vadd.f32 %v7427_v52, %v7235_v3  ;;  %v5757_v56 = vpop.f32.mrb[25].mxu0 }
 0x21b   : > { %v5975_v24 = vadd.f32 %v5974_v45, %v5944_v19  ;;  %v7604_v36 = vadd.f32 %v5757_v56, %v3300_v11  ;;  %v5906_v40 = vadd.f32 %v7586_v48, %v5905_v23  ;;  %v7428_v59 = vpop.f32.mrb[26].mxu0 }
 0x21c   : > { %5846 = vst [vmem:[%s9173_s27 + $0xd0] sm:$0xff] %v7598_v53  ;;  %v7610_v61 = vadd.f32 %v7428_v59, %v7236_v44  ;;  %v5760_v62 = vpop.f32.mrb[27].mxu0  ;;  %v5948_v47 = vmul.f32 %v7598_v53, %v7598_v53  ;;  %v7239_v63 = vpop.f32.mrb[28].mxu1 }
 0x21d   : > { %5844 = vst [vmem:[%s9173_s27 + $0xc0] sm:$0xff] %v7604_v36  ;;  %v5907_v4 = vadd.f32 %v7604_v36, %v5906_v40  ;;  %v5946_v0 = vmul.f32 %v7604_v36, %v7604_v36  ;;  %v5976_v1 = vadd.f32 %v5975_v24, %v5945_v57  ;;  %v7616_v2 = vadd.f32 %v5760_v62, %v3303_v33  ;;  %v3316_v55 = vpop.f32.mrb[29].mxu1 }
 0x21e   : > { %5847 = vst [vmem:[%s9173_s27 + $0xd8] sm:$0xff] %v7610_v61  ;;  %v5949_v8 = vmul.f32 %v7610_v61, %v7610_v61  ;;  %v7240_v54 = vpop.f32.mrb[30].mxu1 }
 0x21f   : > { %v5977_v49 = vadd.f32 %v5976_v1, %v5946_v0  ;;  %5845 = vst [vmem:[%s9173_s27 + $0xc8] sm:$0xff] %v7616_v2  ;;  %v5908_v5 = vadd.f32 %v7616_v2, %v5907_v4  ;;  %v5947_v6 = vmul.f32 %v7616_v2, %v7616_v2  ;;  %v3319_v12 = vpop.f32.mrb[31].mxu1 }
 0x221   : > { %v5909_v50 = vadd.f32 %v7598_v53, %v5908_v5  ;;  %v5978_v58 = vadd.f32 %v5977_v49, %v5947_v6  ;;  %v7431_v7 = vpop.f32.mrb[28].mxu0 }
 0x222   : > { %v5773_v51 = vpop.f32.mrb[29].mxu0  ;;  %v7622_v10 = vadd.f32 %v7431_v7, %v7239_v63 }
 0x223   : > { %v5979_v38 = vadd.f32 %v5978_v58, %v5948_v47  ;;  %v5910_v60 = vadd.f32 %v7610_v61, %v5909_v50  ;;  %v7432_v9 = vpop.f32.mrb[30].mxu0  ;;  %v7628_v14 = vadd.f32 %v5773_v51, %v3316_v55 }
 0x224   : > { %v5776_v13 = vpop.f32.mrb[31].mxu0  ;;  %5850 = vst [vmem:[%s9173_s27 + $0xf0] sm:$0xff] %v7622_v10  ;;  %v7634_v16 = vadd.f32 %v7432_v9, %v7240_v54  ;;  %v5952_v27 = vmul.f32 %v7622_v10, %v7622_v10 }
 0x225   : > { %v5980_v15 = vadd.f32 %v5979_v38, %v5949_v8  ;;  %5848 = vst [vmem:[%s9173_s27 + $0xe0] sm:$0xff] %v7628_v14  ;;  %v5911_v18 = vadd.f32 %v7628_v14, %v5910_v60  ;;  %v5950_v20 = vmul.f32 %v7628_v14, %v7628_v14  ;;  %v7640_v21 = vadd.f32 %v5776_v13, %v3319_v12 }
 0x226   : > { %5851 = vst [vmem:[%s9173_s27 + $0xf8] sm:$0xff] %v7634_v16  ;;  %v5953_v31 = vmul.f32 %v7634_v16, %v7634_v16 }
 0x227   : > { %v5981_v46 = vadd.f32 %v5980_v15, %v5950_v20  ;;  %5849 = vst [vmem:[%s9173_s27 + $0xe8] sm:$0xff] %v7640_v21  ;;  %v5912_v22 = vadd.f32 %v7640_v21, %v5911_v18  ;;  %v5951_v25 = vmul.f32 %v7640_v21, %v7640_v21 }
 0x229   : > { %v5913_v28 = vadd.f32 %v7622_v10, %v5912_v22  ;;  %v5982_v29 = vadd.f32 %v5981_v46, %v5951_v25 }
 0x22b   : > { %v5914_v32 = vadd.f32 %v7634_v16, %v5913_v28  ;;  %v5983_v30 = vadd.f32 %v5982_v29, %v5952_v27 }
 0x22d   : > { %v5915_v41 = vrot.slane %v5914_v32, 4  ;;  %v5984_v48 = vadd.f32 %v5983_v30, %v5953_v31 }
 0x22f   : > { %v5916_v34 = vadd.f32 %v5915_v41, %v5914_v32  ;;  %v5985_v35 = vrot.slane %v5984_v48, 4 }
 0x231   : > { %v5917_v37 = vrot.slane %v5916_v34, 2  ;;  %v5986_v39 = vadd.f32 %v5985_v35, %v5984_v48 }
 0x233   : > { %v5918_v26 = vadd.f32 %v5917_v37, %v5916_v34  ;;  %v5987_v3 = vrot.slane %v5986_v39, 2 }
 0x235   : > { %v5919_v11 = vrot.slane %v5918_v26, 1  ;;  %v5988_v17 = vadd.f32 %v5987_v3, %v5986_v39 }
 0x237   : > { %v5920_v42 = vadd.f32 %v5919_v11, %v5918_v26  ;;  %v5989_v43 = vrot.slane %v5988_v17, 1 }
 0x239   : > { %5921 = vst [vmem:[%s225_s4] sm:$0x1] %v5920_v42  ;;  %v5990_v44 = vadd.f32 %v5989_v43, %v5988_v17 }
 0x23b   : > { %5991 = vst [vmem:[%s225_s4 + $0x1] sm:$0x1] %v5990_v44 }
 0x23c PF: > { %s14_s14 = sadd.s32 1, %s8041_s14   ;;  %s9233_s12 = smov %s8037_s13 }
 0x23d   : > { %p11_p5 = scmp.ge.s32.totalorder %s14_s14, 4   ;;  %s9234_s13 = smov %s9236_s15 }
 0x23f   :  { %13 = sbr.rel (!%p11_p5) target bundleno = 2 (0x2), region = 80 }

</bundles_post_ra>
